<compile_context>
chip_gen: v6e
topology: v6e:2x2x1
jax: 0.10.0
libtpu: 0.0.40
codegen_flags: <defaults>
</compile_context>

<pallas_src>
import functools

import jax
import jax.numpy as jnp
from jax.experimental import pallas as pl
from jax.experimental.pallas import tpu as pltpu

LANES = 128           # channel padding (lane-dense layout)
CIN_PAD = 8           # padded input channels for conv1
KH1 = KW1 = 7         # conv1 kernel
K56 = KW1 * CIN_PAD   # 56: per-row unfold width for one kh tap
NP1 = (KH1 + 1) // 2  # 4: conv1 kh-pair matmuls
K1PAD = LANES         # conv1 K padded to 128 (2*56 = 112 real)


def _ru8(n):
    return (n + 7) // 8 * 8


def _pick_chunk(s, cap=256):
    """Largest multiple-of-8 divisor of s that is <= cap (falls back to s)."""
    c0 = min(s, cap) - (min(s, cap) % 8)
    for c in range(c0, 0, -8):
        if s % c == 0:
            return c
    return s


def build_fused_forward(H, W):
    """Build the fused forward pallas_call for an (N, H, W, 3) input."""
    assert H % 4 == 0 and W % 8 == 0 and H >= 16 and W >= 16
    Hv1 = H - 6                      # valid height after conv1
    Hv2 = Hv1 - 2                    # ... after conv2
    W2, W4 = W // 2, W // 4          # pool1 / pool2 storage grid widths
    Hp1, Wp1 = Hv2 // 2, (W - 8) // 2
    Hv3, Wv3 = Hp1 - 2, Wp1 - 2
    Hp2, Wp2 = Hv3 // 2, Wv3 // 2

    S1 = Hv1 * W                     # conv1 rows computed
    S2 = Hv2 * W                     # conv2 rows computed
    S3 = Hv3 * W2                    # conv3 rows computed
    POOL1_ROWS = Hp1 * W2            # pool1 rows stored
    P2_ROWS = Hp2 * W4               # pool2 rows (FC matmul M)

    A1_ROWS = _ru8(S1 + 2)           # conv1 out (f32); kw-repack reads rows < S1+2
    A1P_ROWS = _ru8(S1)              # conv1 out, kw-packed (bf16)
    A2_ROWS = _ru8(S2)               # conv2 out (f32)
    VB1_ROWS = Hp1 * W               # pool1 vertical-max intermediate (f32)
    P1B_ROWS = 2 * W2 + S3           # rows of the dj-{1,2} repack read by conv3
    P1_ROWS = _ru8(max(POOL1_ROWS, P1B_ROWS + 2))   # pool1 out (bf16)
    P1B_ALLOC = _ru8(P1B_ROWS)
    A3_ROWS = _ru8(S3)               # conv3 out (f32)
    VB2_ROWS = Hp2 * W2              # pool2 vertical-max intermediate (f32)

    C1 = _pick_chunk(S1)             # conv1 M-chunk (208 for 32x32)
    C2 = _pick_chunk(S2)             # conv2 M-chunk (256 for 32x32)

    def kernel(x_ref, w1_ref, b1_ref, w2_ref, b2_ref, w3_ref, b3_ref,
               wf_ref, bf_ref, out_ref,
               a1, a1p, a2, vb1, p1, p1b, a3, vb2):
        f32, bf16 = jnp.float32, jnp.bfloat16

        # Zero only the tail rows that later stages may read; everything else is
        # fully overwritten.  (Tail rows / out-of-window columns only ever feed
        # invalid positions that the final mask & row truncation discard.)
        a1[pl.ds(S1, A1_ROWS - S1), :] = jnp.zeros((A1_ROWS - S1, LANES), f32)
        if P1_ROWS > POOL1_ROWS:
            p1[pl.ds(POOL1_ROWS, P1_ROWS - POOL1_ROWS), :] = jnp.zeros(
                (P1_ROWS - POOL1_ROWS, LANES), bf16)

        # ---- conv1: NP1 bf16 matmuls (kh pairs folded into K=128), fused bias+ReLU
        b1v = b1_ref[...]
        for m0 in range(0, S1, C1):
            acc = jnp.dot(x_ref[0, pl.ds(m0, C1), :], w1_ref[pl.ds(0, LANES), :],
                          preferred_element_type=f32)
            for p in range(1, NP1):
                acc = acc + jnp.dot(x_ref[0, pl.ds(m0 + 2 * p * W, C1), :],
                                    w1_ref[pl.ds(p * LANES, LANES), :],
                                    preferred_element_type=f32)
            a1[pl.ds(m0, C1), :] = jnp.maximum(acc + b1v, 0.0)

        # ---- repack: fold conv2's 3 kw taps into lanes [0:32)[32:64)[64:96)
        # (a1 lanes 32:128 are zero, so c0[:, 96:] supplies the zero tail lanes)
        c0 = a1[pl.ds(0, S1), :]
        c1 = a1[pl.ds(1, S1), :]
        c2 = a1[pl.ds(2, S1), :]
        a1p[pl.ds(0, S1), :] = jnp.concatenate(
            [c0[:, :32], c1[:, :32], c2[:, :32], c0[:, 96:]], axis=1).astype(bf16)

        # ---- conv2: 3 bf16 matmuls (row shifts are multiples of W), fused epilogue
        b2v = b2_ref[...]
        for m0 in range(0, S2, C2):
            acc = jnp.dot(a1p[pl.ds(m0, C2), :], w2_ref[pl.ds(0, LANES), :],
                          preferred_element_type=f32)
            for di in range(1, 3):
                acc = acc + jnp.dot(a1p[pl.ds(m0 + di * W, C2), :],
                                    w2_ref[pl.ds(di * LANES, LANES), :],
                                    preferred_element_type=f32)
            a2[pl.ds(m0, C2), :] = jnp.maximum(acc + b2v, 0.0)

        # ---- maxpool 2x2 (stride 2): HxW grid -> (H/2)x(W/2) grid
        for yp in range(Hp1):
            r0 = a2[pl.ds((2 * yp) * W, W), :]
            r1 = a2[pl.ds((2 * yp + 1) * W, W), :]
            vb1[pl.ds(yp * W, W), :] = jnp.maximum(r0, r1)
        even = vb1[pl.ds(0, POOL1_ROWS, 2), :]
        odd = vb1[pl.ds(1, POOL1_ROWS, 2), :]
        p1[pl.ds(0, POOL1_ROWS), :] = jnp.maximum(even, odd).astype(bf16)

        # ---- repack: fold conv3's dj in {1,2} taps into lanes [0:64)[64:128)
        sh1 = p1[pl.ds(1, P1B_ROWS), :].astype(f32)
        sh2 = p1[pl.ds(2, P1B_ROWS), :].astype(f32)
        p1b[pl.ds(0, P1B_ROWS), :] = jnp.concatenate(
            [sh1[:, :64], sh2[:, :64]], axis=1).astype(bf16)

        # ---- conv3: 6 bf16 matmuls (dj=0 tap + packed dj={1,2} tap per di)
        acc = jnp.dot(p1[pl.ds(0, S3), :], w3_ref[pl.ds(0, LANES), :],
                      preferred_element_type=f32)
        acc = acc + jnp.dot(p1b[pl.ds(0, S3), :], w3_ref[pl.ds(LANES, LANES), :],
                            preferred_element_type=f32)
        for di in range(1, 3):
            acc = acc + jnp.dot(p1[pl.ds(di * W2, S3), :],
                                w3_ref[pl.ds(2 * di * LANES, LANES), :],
                                preferred_element_type=f32)
            acc = acc + jnp.dot(p1b[pl.ds(di * W2, S3), :],
                                w3_ref[pl.ds((2 * di + 1) * LANES, LANES), :],
                                preferred_element_type=f32)
        a3[pl.ds(0, S3), :] = jnp.maximum(acc + b3_ref[...], 0.0)

        # ---- maxpool 2x2: (H/2)x(W/2) grid -> (H/4)x(W/4) grid
        for yp in range(Hp2):
            r0 = a3[pl.ds((2 * yp) * W2, W2), :]
            r1 = a3[pl.ds((2 * yp + 1) * W2, W2), :]
            vb2[pl.ds(yp * W2, W2), :] = jnp.maximum(r0, r1)
        p2 = jnp.maximum(vb2[pl.ds(0, P2_ROWS, 2), :],
                         vb2[pl.ds(1, P2_ROWS, 2), :])          # (P2_ROWS, 128) f32

        # ---- global average (1/area folded into wf by the wrapper) + FC head
        rows_i = jax.lax.broadcasted_iota(jnp.int32, (P2_ROWS, LANES), 0)
        pm = jnp.where((rows_i % W4) < Wp2, p2, 0.0).astype(bf16)
        y = jnp.dot(pm, wf_ref[...], preferred_element_type=f32)  # (P2_ROWS, 128)
        out = jnp.sum(y, axis=0, keepdims=True) + bf_ref[...]     # (1, 128)
        out_ref[0] = out.astype(out_ref.dtype)

    def forward(x_unf, w1, b1, w2, b2, w3, b3, wf, bf):
        N = x_unf.shape[0]
        return pl.pallas_call(
            kernel,
            out_shape=jax.ShapeDtypeStruct((N, 1, LANES), jnp.float32),
            grid=(N,),
            in_specs=[
                pl.BlockSpec((1, H * W, K1PAD), lambda i: (i, 0, 0)),    # x (bf16)
                pl.BlockSpec((NP1 * LANES, LANES), lambda i: (0, 0)),    # w1 (bf16)
                pl.BlockSpec((1, LANES), lambda i: (0, 0)),              # b1 (f32)
                pl.BlockSpec((3 * LANES, LANES), lambda i: (0, 0)),      # w2 (bf16)
                pl.BlockSpec((1, LANES), lambda i: (0, 0)),              # b2
                pl.BlockSpec((6 * LANES, LANES), lambda i: (0, 0)),      # w3 (bf16)
                pl.BlockSpec((1, LANES), lambda i: (0, 0)),              # b3
                pl.BlockSpec((LANES, LANES), lambda i: (0, 0)),          # wf (bf16)
                pl.BlockSpec((1, LANES), lambda i: (0, 0)),              # bf
            ],
            out_specs=pl.BlockSpec((1, 1, LANES), lambda i: (i, 0, 0)),
            scratch_shapes=[
                pltpu.VMEM((A1_ROWS, LANES), jnp.float32),     # conv1 out
                pltpu.VMEM((A1P_ROWS, LANES), jnp.bfloat16),   # conv1 out, kw-packed
                pltpu.VMEM((A2_ROWS, LANES), jnp.float32),     # conv2 out
                pltpu.VMEM((VB1_ROWS, LANES), jnp.float32),    # pool1 vertical max
                pltpu.VMEM((P1_ROWS, LANES), jnp.bfloat16),    # pool1 out
                pltpu.VMEM((P1B_ALLOC, LANES), jnp.bfloat16),  # pool1 out, dj-packed
                pltpu.VMEM((A3_ROWS, LANES), jnp.float32),     # conv3 out
                pltpu.VMEM((VB2_ROWS, LANES), jnp.float32),    # pool2 vertical max
            ],
            compiler_params=pltpu.CompilerParams(
                dimension_semantics=("parallel",)),
        )(x_unf, w1, b1, w2, b2, w3, b3, wf, bf)

    return forward


# ----------------------------------------------------------------------------
# Parameters (PyTorch shapes) and conversion to the kernel layout
# ----------------------------------------------------------------------------
def init_torch_params(key, num_classes):
    ks = jax.random.split(key, 8)

    def init(k, shape, fan_in):
        return jax.random.normal(k, shape, jnp.float32) / jnp.sqrt(fan_in)

    return dict(
        w1=init(ks[0], (32, 3, 7, 7), 3 * 49),   b1=init(ks[1], (32,), 3 * 49),
        w2=init(ks[2], (64, 32, 3, 3), 32 * 9),  b2=init(ks[3], (64,), 32 * 9),
        w3=init(ks[4], (128, 64, 3, 3), 64 * 9), b3=init(ks[5], (128,), 64 * 9),
        wf=init(ks[6], (num_classes, 128), 128), bf=init(ks[7], (num_classes,), 128),
    )


def _pack_w1(w):
    """(32,3,7,7) -> (NP1*128,128); block p, row t*56 + dj*8 + ci = w[o,ci,2p+t,dj]."""
    w_t = jnp.transpose(w, (2, 3, 1, 0))             # (kh, kw, ci, o)
    o, i = w.shape[0], w.shape[1]
    blocks = []
    for p in range(NP1):
        blk = jnp.zeros((2, KW1, CIN_PAD, LANES), jnp.float32)
        for t in range(2):
            kh = 2 * p + t
            if kh < KH1:
                blk = blk.at[t, :, :i, :o].set(w_t[kh])
        blk = blk.reshape(2 * K56, LANES)
        blk = jnp.pad(blk, ((0, K1PAD - 2 * K56), (0, 0)))
        blocks.append(blk)
    return jnp.concatenate(blocks, axis=0)


def _pack_w2(w):
    """(64,32,3,3) -> (3*128,128); block di, row dj*32 + ci = w[o,ci,di,dj]."""
    w_t = jnp.transpose(w, (2, 3, 1, 0))             # (3, 3, 32, 64)
    blk = jnp.zeros((3, 3, 32, LANES), jnp.float32).at[:, :, :, :64].set(w_t)
    blk = blk.reshape(3, 96, LANES)
    blk = jnp.pad(blk, ((0, 0), (0, LANES - 96), (0, 0)))
    return blk.reshape(3 * LANES, LANES)


def _pack_w3(w):
    """(128,64,3,3) -> (6*128,128); block 2*di: rows ci = w[o,ci,di,0];
    block 2*di+1: rows ci = w[o,ci,di,1], rows 64+ci = w[o,ci,di,2]."""
    w_t = jnp.transpose(w, (2, 3, 1, 0))             # (3, 3, 64, 128)
    blocks = []
    for di in range(3):
        a = jnp.zeros((LANES, LANES), jnp.float32).at[:64, :].set(w_t[di, 0])
        b = jnp.zeros((LANES, LANES), jnp.float32).at[:64, :].set(w_t[di, 1])
        b = b.at[64:, :].set(w_t[di, 2])
        blocks += [a, b]
    return jnp.concatenate(blocks, axis=0)


def _pad_bias(b, n_pad):
    return jnp.zeros((1, n_pad), jnp.float32).at[0, : b.shape[0]].set(b)


def pack_params(tp, num_classes, pool_area):
    wf = jnp.zeros((LANES, LANES), jnp.float32)
    wf = wf.at[:, :num_classes].set(jnp.transpose(tp["wf"]) / pool_area)
    bf16 = jnp.bfloat16
    return dict(
        w1=_pack_w1(tp["w1"]).astype(bf16), b1=_pad_bias(tp["b1"], LANES),
        w2=_pack_w2(tp["w2"]).astype(bf16), b2=_pad_bias(tp["b2"], LANES),
        w3=_pack_w3(tp["w3"]).astype(bf16), b3=_pad_bias(tp["b3"], LANES),
        wf=wf.astype(bf16), bf=_pad_bias(tp["bf"], LANES),
    )


# ----------------------------------------------------------------------------
# Forward pass (matches BaseModel.forward, inference mode)
# ----------------------------------------------------------------------------
@functools.partial(jax.jit, static_argnames=("num_classes",))
def base_model_forward(x_nchw, params, num_classes):
    N, C, H, W = x_nchw.shape
    x = jnp.transpose(x_nchw, (0, 2, 3, 1)).astype(jnp.float32)      # NHWC
    # Tiny wrapper-side prep: pad channels to 8, width by kw-1, height by 1,
    # unfold the 7 kw taps and 2 consecutive kh taps into the K axis, pad K to
    # 128, and ship as bf16 (~256 KB/image DMA).
    x = jnp.pad(x, ((0, 0), (0, 1), (0, KW1 - 1), (0, CIN_PAD - C)))
    cols = jnp.stack([x[:, :, j:j + W, :] for j in range(KW1)], axis=3)
    xu = cols.reshape(N, (H + 1) * W, K56)
    x2 = jnp.concatenate([xu[:, :H * W, :], xu[:, W:(H + 1) * W, :]], axis=-1)
    x2 = jnp.pad(x2, ((0, 0), (0, 0), (0, K1PAD - 2 * K56))).astype(jnp.bfloat16)

    fwd = build_fused_forward(H, W)
    out = fwd(x2, params["w1"], params["b1"], params["w2"], params["b2"],
              params["w3"], params["b3"], params["wf"], params["bf"])
    return out.reshape(N, LANES)[:, :num_classes]


# ----------------------------------------------------------------------------
# Pure-JAX reference (correctness sanity check)
# ----------------------------------------------------------------------------
@jax.jit
def reference_forward(x_nchw, tp):
    x = jnp.transpose(x_nchw, (0, 2, 3, 1))

    def conv(x, w, b):
        y = jax.lax.conv_general_dilated(
            x, jnp.transpose(w, (2, 3, 1, 0)), (1, 1), "VALID",
            dimension_numbers=("NHWC", "HWIO", "NHWC"),
            precision=jax.lax.Precision.HIGHEST)
        return y + b

    x = jax.nn.relu(conv(x, tp["w1"], tp["b1"]))
    x = jax.nn.relu(conv(x, tp["w2"], tp["b2"]))
    x = jax.lax.reduce_window(x, -jnp.inf, jax.lax.max,
                              (1, 2, 2, 1), (1, 2, 2, 1), "VALID")
    x = jax.nn.relu(conv(x, tp["w3"], tp["b3"]))
    x = jax.lax.reduce_window(x, -jnp.inf, jax.lax.max,
                              (1, 2, 2, 1), (1, 2, 2, 1), "VALID")
    pooled = jnp.mean(x, axis=(1, 2))
    return pooled @ tp["wf"].T + tp["bf"]


# ----------------------------------------------------------------------------
if __name__ == "__main__":
    num_classes = 10
    key = jax.random.PRNGKey(0)
    k_x, k_p = jax.random.split(key)

    N, H, W = 2, 32, 32
    x = jax.random.normal(k_x, (N, 3, H, W), jnp.float32)
    tp = init_torch_params(k_p, num_classes)

    Hp2 = ((H - 8) // 2 - 2) // 2
    Wp2 = ((W - 8) // 2 - 2) // 2
    params = pack_params(tp, num_classes, Hp2 * Wp2)

    out = jax.block_until_ready(base_model_forward(x, params, num_classes))
    assert out.shape == (N, num_classes), out.shape
    assert bool(jnp.all(jnp.isfinite(out)))

    ref = jax.block_until_ready(reference_forward(x, tp))
    max_err = float(jnp.max(jnp.abs(out - ref)))
    # bf16 matmul operands vs an f32 HIGHEST-precision reference.
    assert max_err < 5e-2, f"max abs error vs reference: {max_err}"

    print("KERNEL_OK")
</pallas_src>

<mosaic_0001>
module attributes {stable_mosaic.version = 11 : i64} {
  func.func @kernel(%arg0: i32, %arg1: memref<1x1024x128xbf16, #tpu.memory_space<vmem>>, %arg2: memref<512x128xbf16, #tpu.memory_space<vmem>>, %arg3: memref<1x128xf32, #tpu.memory_space<vmem>>, %arg4: memref<384x128xbf16, #tpu.memory_space<vmem>>, %arg5: memref<1x128xf32, #tpu.memory_space<vmem>>, %arg6: memref<768x128xbf16, #tpu.memory_space<vmem>>, %arg7: memref<1x128xf32, #tpu.memory_space<vmem>>, %arg8: memref<128x128xbf16, #tpu.memory_space<vmem>>, %arg9: memref<1x128xf32, #tpu.memory_space<vmem>>, %arg10: memref<1x1x128xf32, #tpu.memory_space<vmem>>, %arg11: memref<840x128xf32, #tpu.memory_space<vmem>>, %arg12: memref<832x128xbf16, #tpu.memory_space<vmem>>, %arg13: memref<768x128xf32, #tpu.memory_space<vmem>>, %arg14: memref<384x128xf32, #tpu.memory_space<vmem>>, %arg15: memref<200x128xbf16, #tpu.memory_space<vmem>>, %arg16: memref<192x128xbf16, #tpu.memory_space<vmem>>, %arg17: memref<160x128xf32, #tpu.memory_space<vmem>>, %arg18: memref<80x128xf32, #tpu.memory_space<vmem>>) attributes {dimension_semantics = [#tpu.dimension_semantics<parallel>], iteration_bounds = array<i64: 2>, scalar_prefetch = 0 : i64, scratch_operands = 8 : i64, tpu.core_type = #tpu.core_type<tc>, window_params = [{transform_indices = @transform_0, window_bounds = array<i64: 1, 1024, 128>}, {pipeline_mode = #tpu.pipeline_mode<synchronous>, transform_indices = @transform_1, window_bounds = array<i64: 512, 128>}, {pipeline_mode = #tpu.pipeline_mode<synchronous>, transform_indices = @transform_2, window_bounds = array<i64: 1, 128>}, {pipeline_mode = #tpu.pipeline_mode<synchronous>, transform_indices = @transform_3, window_bounds = array<i64: 384, 128>}, {pipeline_mode = #tpu.pipeline_mode<synchronous>, transform_indices = @transform_4, window_bounds = array<i64: 1, 128>}, {pipeline_mode = #tpu.pipeline_mode<synchronous>, transform_indices = @transform_5, window_bounds = array<i64: 768, 128>}, {pipeline_mode = #tpu.pipeline_mode<synchronous>, transform_indices = @transform_6, window_bounds = array<i64: 1, 128>}, {pipeline_mode = #tpu.pipeline_mode<synchronous>, transform_indices = @transform_7, window_bounds = array<i64: 128, 128>}, {pipeline_mode = #tpu.pipeline_mode<synchronous>, transform_indices = @transform_8, window_bounds = array<i64: 1, 128>}, {transform_indices = @transform_9, window_bounds = array<i64: 1, 1, 128>}]} {
    %cst = arith.constant 0.000000e+00 : f32
    %0 = vector.broadcast %cst : f32 to vector<8x128xf32>
    %c832 = arith.constant 832 : index
    %c0 = arith.constant 0 : index
    %1 = vector.load %arg11[%c832, %c0] : memref<840x128xf32, #tpu.memory_space<vmem>>, vector<8x128xf32>
    tpu.vector_store %arg11[%c832, %c0], %0 {strides = array<i32>} : memref<840x128xf32, #tpu.memory_space<vmem>>, vector<8x128xf32>,
    %cst_0 = arith.constant 0.000000e+00 : bf16
    %2 = vector.broadcast %cst_0 : bf16 to vector<8x128xbf16>
    %c192 = arith.constant 192 : index
    %c0_1 = arith.constant 0 : index
    %3 = vector.load %arg15[%c192, %c0_1] : memref<200x128xbf16, #tpu.memory_space<vmem>>, vector<8x128xbf16>
    tpu.vector_store %arg15[%c192, %c0_1], %2 {strides = array<i32>} : memref<200x128xbf16, #tpu.memory_space<vmem>>, vector<8x128xbf16>,
    %c0_2 = arith.constant 0 : index
    %c0_3 = arith.constant 0 : index
    %4 = vector.load %arg3[%c0_2, %c0_3] : memref<1x128xf32, #tpu.memory_space<vmem>>, vector<1x128xf32>
    %c0_4 = arith.constant 0 : index
    %c0_5 = arith.constant 0 : index
    %c0_6 = arith.constant 0 : index
    %5 = vector.load %arg1[%c0_4, %c0_5, %c0_6] : memref<1x1024x128xbf16, #tpu.memory_space<vmem>>, vector<1x208x128xbf16>
    %6 = vector.shape_cast %5 : vector<1x208x128xbf16> to vector<208x128xbf16>
    %c0_7 = arith.constant 0 : index
    %c0_8 = arith.constant 0 : index
    %7 = vector.load %arg2[%c0_7, %c0_8] : memref<512x128xbf16, #tpu.memory_space<vmem>>, vector<128x128xbf16>
    %cst_9 = arith.constant dense<0.000000e+00> : vector<208x128xf32>
    %8 = tpu.matmul %6, %7, %cst_9 {dimension_numbers = #tpu.dot_dimension_numbers<[1], [0], [0], [1], [0, 0, 1, 1], [], []>} : vector<208x128xbf16>, vector<128x128xbf16>, vector<208x128xf32> -> vector<208x128xf32>
    %c0_10 = arith.constant 0 : index
    %c64 = arith.constant 64 : index
    %c0_11 = arith.constant 0 : index
    %9 = vector.load %arg1[%c0_10, %c64, %c0_11] : memref<1x1024x128xbf16, #tpu.memory_space<vmem>>, vector<1x208x128xbf16>
    %10 = vector.shape_cast %9 : vector<1x208x128xbf16> to vector<208x128xbf16>
    %c128 = arith.constant 128 : index
    %c0_12 = arith.constant 0 : index
    %11 = vector.load %arg2[%c128, %c0_12] : memref<512x128xbf16, #tpu.memory_space<vmem>>, vector<128x128xbf16>
    %cst_13 = arith.constant dense<0.000000e+00> : vector<208x128xf32>
    %12 = tpu.matmul %10, %11, %cst_13 {dimension_numbers = #tpu.dot_dimension_numbers<[1], [0], [0], [1], [0, 0, 1, 1], [], []>} : vector<208x128xbf16>, vector<128x128xbf16>, vector<208x128xf32> -> vector<208x128xf32>
    %13 = arith.addf %8, %12 : vector<208x128xf32>
    %c0_14 = arith.constant 0 : index
    %c128_15 = arith.constant 128 : index
    %c0_16 = arith.constant 0 : index
    %14 = vector.load %arg1[%c0_14, %c128_15, %c0_16] : memref<1x1024x128xbf16, #tpu.memory_space<vmem>>, vector<1x208x128xbf16>
    %15 = vector.shape_cast %14 : vector<1x208x128xbf16> to vector<208x128xbf16>
    %c256 = arith.constant 256 : index
    %c0_17 = arith.constant 0 : index
    %16 = vector.load %arg2[%c256, %c0_17] : memref<512x128xbf16, #tpu.memory_space<vmem>>, vector<128x128xbf16>
    %cst_18 = arith.constant dense<0.000000e+00> : vector<208x128xf32>
    %17 = tpu.matmul %15, %16, %cst_18 {dimension_numbers = #tpu.dot_dimension_numbers<[1], [0], [0], [1], [0, 0, 1, 1], [], []>} : vector<208x128xbf16>, vector<128x128xbf16>, vector<208x128xf32> -> vector<208x128xf32>
    %18 = arith.addf %13, %17 : vector<208x128xf32>
    %c0_19 = arith.constant 0 : index
    %c192_20 = arith.constant 192 : index
    %c0_21 = arith.constant 0 : index
    %19 = vector.load %arg1[%c0_19, %c192_20, %c0_21] : memref<1x1024x128xbf16, #tpu.memory_space<vmem>>, vector<1x208x128xbf16>
    %20 = vector.shape_cast %19 : vector<1x208x128xbf16> to vector<208x128xbf16>
    %c384 = arith.constant 384 : index
    %c0_22 = arith.constant 0 : index
    %21 = vector.load %arg2[%c384, %c0_22] : memref<512x128xbf16, #tpu.memory_space<vmem>>, vector<128x128xbf16>
    %cst_23 = arith.constant dense<0.000000e+00> : vector<208x128xf32>
    %22 = tpu.matmul %20, %21, %cst_23 {dimension_numbers = #tpu.dot_dimension_numbers<[1], [0], [0], [1], [0, 0, 1, 1], [], []>} : vector<208x128xbf16>, vector<128x128xbf16>, vector<208x128xf32> -> vector<208x128xf32>
    %23 = arith.addf %18, %22 : vector<208x128xf32>
    %24 = vector.broadcast %4 : vector<1x128xf32> to vector<208x128xf32>
    %25 = arith.addf %23, %24 : vector<208x128xf32>
    %cst_24 = arith.constant 0.000000e+00 : f32
    %26 = vector.broadcast %cst_24 : f32 to vector<208x128xf32>
    %27 = arith.maximumf %25, %26 : vector<208x128xf32>
    %c0_25 = arith.constant 0 : index
    %c0_26 = arith.constant 0 : index
    %28 = vector.load %arg11[%c0_25, %c0_26] : memref<840x128xf32, #tpu.memory_space<vmem>>, vector<208x128xf32>
    tpu.vector_store %arg11[%c0_25, %c0_26], %27 {strides = array<i32>} : memref<840x128xf32, #tpu.memory_space<vmem>>, vector<208x128xf32>,
    %c0_27 = arith.constant 0 : index
    %c208 = arith.constant 208 : index
    %c0_28 = arith.constant 0 : index
    %29 = vector.load %arg1[%c0_27, %c208, %c0_28] : memref<1x1024x128xbf16, #tpu.memory_space<vmem>>, vector<1x208x128xbf16>
    %30 = vector.shape_cast %29 : vector<1x208x128xbf16> to vector<208x128xbf16>
    %c0_29 = arith.constant 0 : index
    %c0_30 = arith.constant 0 : index
    %31 = vector.load %arg2[%c0_29, %c0_30] : memref<512x128xbf16, #tpu.memory_space<vmem>>, vector<128x128xbf16>
    %cst_31 = arith.constant dense<0.000000e+00> : vector<208x128xf32>
    %32 = tpu.matmul %30, %31, %cst_31 {dimension_numbers = #tpu.dot_dimension_numbers<[1], [0], [0], [1], [0, 0, 1, 1], [], []>} : vector<208x128xbf16>, vector<128x128xbf16>, vector<208x128xf32> -> vector<208x128xf32>
    %c0_32 = arith.constant 0 : index
    %c272 = arith.constant 272 : index
    %c0_33 = arith.constant 0 : index
    %33 = vector.load %arg1[%c0_32, %c272, %c0_33] : memref<1x1024x128xbf16, #tpu.memory_space<vmem>>, vector<1x208x128xbf16>
    %34 = vector.shape_cast %33 : vector<1x208x128xbf16> to vector<208x128xbf16>
    %c128_34 = arith.constant 128 : index
    %c0_35 = arith.constant 0 : index
    %35 = vector.load %arg2[%c128_34, %c0_35] : memref<512x128xbf16, #tpu.memory_space<vmem>>, vector<128x128xbf16>
    %cst_36 = arith.constant dense<0.000000e+00> : vector<208x128xf32>
    %36 = tpu.matmul %34, %35, %cst_36 {dimension_numbers = #tpu.dot_dimension_numbers<[1], [0], [0], [1], [0, 0, 1, 1], [], []>} : vector<208x128xbf16>, vector<128x128xbf16>, vector<208x128xf32> -> vector<208x128xf32>
    %37 = arith.addf %32, %36 : vector<208x128xf32>
    %c0_37 = arith.constant 0 : index
    %c336 = arith.constant 336 : index
    %c0_38 = arith.constant 0 : index
    %38 = vector.load %arg1[%c0_37, %c336, %c0_38] : memref<1x1024x128xbf16, #tpu.memory_space<vmem>>, vector<1x208x128xbf16>
    %39 = vector.shape_cast %38 : vector<1x208x128xbf16> to vector<208x128xbf16>
    %c256_39 = arith.constant 256 : index
    %c0_40 = arith.constant 0 : index
    %40 = vector.load %arg2[%c256_39, %c0_40] : memref<512x128xbf16, #tpu.memory_space<vmem>>, vector<128x128xbf16>
    %cst_41 = arith.constant dense<0.000000e+00> : vector<208x128xf32>
    %41 = tpu.matmul %39, %40, %cst_41 {dimension_numbers = #tpu.dot_dimension_numbers<[1], [0], [0], [1], [0, 0, 1, 1], [], []>} : vector<208x128xbf16>, vector<128x128xbf16>, vector<208x128xf32> -> vector<208x128xf32>
    %42 = arith.addf %37, %41 : vector<208x128xf32>
    %c0_42 = arith.constant 0 : index
    %c400 = arith.constant 400 : index
    %c0_43 = arith.constant 0 : index
    %43 = vector.load %arg1[%c0_42, %c400, %c0_43] : memref<1x1024x128xbf16, #tpu.memory_space<vmem>>, vector<1x208x128xbf16>
    %44 = vector.shape_cast %43 : vector<1x208x128xbf16> to vector<208x128xbf16>
    %c384_44 = arith.constant 384 : index
    %c0_45 = arith.constant 0 : index
    %45 = vector.load %arg2[%c384_44, %c0_45] : memref<512x128xbf16, #tpu.memory_space<vmem>>, vector<128x128xbf16>
    %cst_46 = arith.constant dense<0.000000e+00> : vector<208x128xf32>
    %46 = tpu.matmul %44, %45, %cst_46 {dimension_numbers = #tpu.dot_dimension_numbers<[1], [0], [0], [1], [0, 0, 1, 1], [], []>} : vector<208x128xbf16>, vector<128x128xbf16>, vector<208x128xf32> -> vector<208x128xf32>
    %47 = arith.addf %42, %46 : vector<208x128xf32>
    %48 = vector.broadcast %4 : vector<1x128xf32> to vector<208x128xf32>
    %49 = arith.addf %47, %48 : vector<208x128xf32>
    %cst_47 = arith.constant 0.000000e+00 : f32
    %50 = vector.broadcast %cst_47 : f32 to vector<208x128xf32>
    %51 = arith.maximumf %49, %50 : vector<208x128xf32>
    %c208_48 = arith.constant 208 : index
    %c0_49 = arith.constant 0 : index
    %52 = vector.load %arg11[%c208_48, %c0_49] : memref<840x128xf32, #tpu.memory_space<vmem>>, vector<208x128xf32>
    tpu.vector_store %arg11[%c208_48, %c0_49], %51 {strides = array<i32>} : memref<840x128xf32, #tpu.memory_space<vmem>>, vector<208x128xf32>,
    %c0_50 = arith.constant 0 : index
    %c416 = arith.constant 416 : index
    %c0_51 = arith.constant 0 : index
    %53 = vector.load %arg1[%c0_50, %c416, %c0_51] : memref<1x1024x128xbf16, #tpu.memory_space<vmem>>, vector<1x208x128xbf16>
    %54 = vector.shape_cast %53 : vector<1x208x128xbf16> to vector<208x128xbf16>
    %c0_52 = arith.constant 0 : index
    %c0_53 = arith.constant 0 : index
    %55 = vector.load %arg2[%c0_52, %c0_53] : memref<512x128xbf16, #tpu.memory_space<vmem>>, vector<128x128xbf16>
    %cst_54 = arith.constant dense<0.000000e+00> : vector<208x128xf32>
    %56 = tpu.matmul %54, %55, %cst_54 {dimension_numbers = #tpu.dot_dimension_numbers<[1], [0], [0], [1], [0, 0, 1, 1], [], []>} : vector<208x128xbf16>, vector<128x128xbf16>, vector<208x128xf32> -> vector<208x128xf32>
    %c0_55 = arith.constant 0 : index
    %c480 = arith.constant 480 : index
    %c0_56 = arith.constant 0 : index
    %57 = vector.load %arg1[%c0_55, %c480, %c0_56] : memref<1x1024x128xbf16, #tpu.memory_space<vmem>>, vector<1x208x128xbf16>
    %58 = vector.shape_cast %57 : vector<1x208x128xbf16> to vector<208x128xbf16>
    %c128_57 = arith.constant 128 : index
    %c0_58 = arith.constant 0 : index
    %59 = vector.load %arg2[%c128_57, %c0_58] : memref<512x128xbf16, #tpu.memory_space<vmem>>, vector<128x128xbf16>
    %cst_59 = arith.constant dense<0.000000e+00> : vector<208x128xf32>
    %60 = tpu.matmul %58, %59, %cst_59 {dimension_numbers = #tpu.dot_dimension_numbers<[1], [0], [0], [1], [0, 0, 1, 1], [], []>} : vector<208x128xbf16>, vector<128x128xbf16>, vector<208x128xf32> -> vector<208x128xf32>
    %61 = arith.addf %56, %60 : vector<208x128xf32>
    %c0_60 = arith.constant 0 : index
    %c544 = arith.constant 544 : index
    %c0_61 = arith.constant 0 : index
    %62 = vector.load %arg1[%c0_60, %c544, %c0_61] : memref<1x1024x128xbf16, #tpu.memory_space<vmem>>, vector<1x208x128xbf16>
    %63 = vector.shape_cast %62 : vector<1x208x128xbf16> to vector<208x128xbf16>
    %c256_62 = arith.constant 256 : index
    %c0_63 = arith.constant 0 : index
    %64 = vector.load %arg2[%c256_62, %c0_63] : memref<512x128xbf16, #tpu.memory_space<vmem>>, vector<128x128xbf16>
    %cst_64 = arith.constant dense<0.000000e+00> : vector<208x128xf32>
    %65 = tpu.matmul %63, %64, %cst_64 {dimension_numbers = #tpu.dot_dimension_numbers<[1], [0], [0], [1], [0, 0, 1, 1], [], []>} : vector<208x128xbf16>, vector<128x128xbf16>, vector<208x128xf32> -> vector<208x128xf32>
    %66 = arith.addf %61, %65 : vector<208x128xf32>
    %c0_65 = arith.constant 0 : index
    %c608 = arith.constant 608 : index
    %c0_66 = arith.constant 0 : index
    %67 = vector.load %arg1[%c0_65, %c608, %c0_66] : memref<1x1024x128xbf16, #tpu.memory_space<vmem>>, vector<1x208x128xbf16>
    %68 = vector.shape_cast %67 : vector<1x208x128xbf16> to vector<208x128xbf16>
    %c384_67 = arith.constant 384 : index
    %c0_68 = arith.constant 0 : index
    %69 = vector.load %arg2[%c384_67, %c0_68] : memref<512x128xbf16, #tpu.memory_space<vmem>>, vector<128x128xbf16>
    %cst_69 = arith.constant dense<0.000000e+00> : vector<208x128xf32>
    %70 = tpu.matmul %68, %69, %cst_69 {dimension_numbers = #tpu.dot_dimension_numbers<[1], [0], [0], [1], [0, 0, 1, 1], [], []>} : vector<208x128xbf16>, vector<128x128xbf16>, vector<208x128xf32> -> vector<208x128xf32>
    %71 = arith.addf %66, %70 : vector<208x128xf32>
    %72 = vector.broadcast %4 : vector<1x128xf32> to vector<208x128xf32>
    %73 = arith.addf %71, %72 : vector<208x128xf32>
    %cst_70 = arith.constant 0.000000e+00 : f32
    %74 = vector.broadcast %cst_70 : f32 to vector<208x128xf32>
    %75 = arith.maximumf %73, %74 : vector<208x128xf32>
    %c416_71 = arith.constant 416 : index
    %c0_72 = arith.constant 0 : index
    %76 = vector.load %arg11[%c416_71, %c0_72] : memref<840x128xf32, #tpu.memory_space<vmem>>, vector<208x128xf32>
    tpu.vector_store %arg11[%c416_71, %c0_72], %75 {strides = array<i32>} : memref<840x128xf32, #tpu.memory_space<vmem>>, vector<208x128xf32>,
    %c0_73 = arith.constant 0 : index
    %c624 = arith.constant 624 : index
    %c0_74 = arith.constant 0 : index
    %77 = vector.load %arg1[%c0_73, %c624, %c0_74] : memref<1x1024x128xbf16, #tpu.memory_space<vmem>>, vector<1x208x128xbf16>
    %78 = vector.shape_cast %77 : vector<1x208x128xbf16> to vector<208x128xbf16>
    %c0_75 = arith.constant 0 : index
    %c0_76 = arith.constant 0 : index
    %79 = vector.load %arg2[%c0_75, %c0_76] : memref<512x128xbf16, #tpu.memory_space<vmem>>, vector<128x128xbf16>
    %cst_77 = arith.constant dense<0.000000e+00> : vector<208x128xf32>
    %80 = tpu.matmul %78, %79, %cst_77 {dimension_numbers = #tpu.dot_dimension_numbers<[1], [0], [0], [1], [0, 0, 1, 1], [], []>} : vector<208x128xbf16>, vector<128x128xbf16>, vector<208x128xf32> -> vector<208x128xf32>
    %c0_78 = arith.constant 0 : index
    %c688 = arith.constant 688 : index
    %c0_79 = arith.constant 0 : index
    %81 = vector.load %arg1[%c0_78, %c688, %c0_79] : memref<1x1024x128xbf16, #tpu.memory_space<vmem>>, vector<1x208x128xbf16>
    %82 = vector.shape_cast %81 : vector<1x208x128xbf16> to vector<208x128xbf16>
    %c128_80 = arith.constant 128 : index
    %c0_81 = arith.constant 0 : index
    %83 = vector.load %arg2[%c128_80, %c0_81] : memref<512x128xbf16, #tpu.memory_space<vmem>>, vector<128x128xbf16>
    %cst_82 = arith.constant dense<0.000000e+00> : vector<208x128xf32>
    %84 = tpu.matmul %82, %83, %cst_82 {dimension_numbers = #tpu.dot_dimension_numbers<[1], [0], [0], [1], [0, 0, 1, 1], [], []>} : vector<208x128xbf16>, vector<128x128xbf16>, vector<208x128xf32> -> vector<208x128xf32>
    %85 = arith.addf %80, %84 : vector<208x128xf32>
    %c0_83 = arith.constant 0 : index
    %c752 = arith.constant 752 : index
    %c0_84 = arith.constant 0 : index
    %86 = vector.load %arg1[%c0_83, %c752, %c0_84] : memref<1x1024x128xbf16, #tpu.memory_space<vmem>>, vector<1x208x128xbf16>
    %87 = vector.shape_cast %86 : vector<1x208x128xbf16> to vector<208x128xbf16>
    %c256_85 = arith.constant 256 : index
    %c0_86 = arith.constant 0 : index
    %88 = vector.load %arg2[%c256_85, %c0_86] : memref<512x128xbf16, #tpu.memory_space<vmem>>, vector<128x128xbf16>
    %cst_87 = arith.constant dense<0.000000e+00> : vector<208x128xf32>
    %89 = tpu.matmul %87, %88, %cst_87 {dimension_numbers = #tpu.dot_dimension_numbers<[1], [0], [0], [1], [0, 0, 1, 1], [], []>} : vector<208x128xbf16>, vector<128x128xbf16>, vector<208x128xf32> -> vector<208x128xf32>
    %90 = arith.addf %85, %89 : vector<208x128xf32>
    %c0_88 = arith.constant 0 : index
    %c816 = arith.constant 816 : index
    %c0_89 = arith.constant 0 : index
    %91 = vector.load %arg1[%c0_88, %c816, %c0_89] : memref<1x1024x128xbf16, #tpu.memory_space<vmem>>, vector<1x208x128xbf16>
    %92 = vector.shape_cast %91 : vector<1x208x128xbf16> to vector<208x128xbf16>
    %c384_90 = arith.constant 384 : index
    %c0_91 = arith.constant 0 : index
    %93 = vector.load %arg2[%c384_90, %c0_91] : memref<512x128xbf16, #tpu.memory_space<vmem>>, vector<128x128xbf16>
    %cst_92 = arith.constant dense<0.000000e+00> : vector<208x128xf32>
    %94 = tpu.matmul %92, %93, %cst_92 {dimension_numbers = #tpu.dot_dimension_numbers<[1], [0], [0], [1], [0, 0, 1, 1], [], []>} : vector<208x128xbf16>, vector<128x128xbf16>, vector<208x128xf32> -> vector<208x128xf32>
    %95 = arith.addf %90, %94 : vector<208x128xf32>
    %96 = vector.broadcast %4 : vector<1x128xf32> to vector<208x128xf32>
    %97 = arith.addf %95, %96 : vector<208x128xf32>
    %cst_93 = arith.constant 0.000000e+00 : f32
    %98 = vector.broadcast %cst_93 : f32 to vector<208x128xf32>
    %99 = arith.maximumf %97, %98 : vector<208x128xf32>
    %c624_94 = arith.constant 624 : index
    %c0_95 = arith.constant 0 : index
    %100 = vector.load %arg11[%c624_94, %c0_95] : memref<840x128xf32, #tpu.memory_space<vmem>>, vector<208x128xf32>
    tpu.vector_store %arg11[%c624_94, %c0_95], %99 {strides = array<i32>} : memref<840x128xf32, #tpu.memory_space<vmem>>, vector<208x128xf32>,
    %c0_96 = arith.constant 0 : index
    %c0_97 = arith.constant 0 : index
    %101 = vector.load %arg11[%c0_96, %c0_97] : memref<840x128xf32, #tpu.memory_space<vmem>>, vector<832x128xf32>
    %c1 = arith.constant 1 : index
    %c0_98 = arith.constant 0 : index
    %102 = vector.load %arg11[%c1, %c0_98] : memref<840x128xf32, #tpu.memory_space<vmem>>, vector<832x128xf32>
    %c2 = arith.constant 2 : index
    %c0_99 = arith.constant 0 : index
    %103 = vector.load %arg11[%c2, %c0_99] : memref<840x128xf32, #tpu.memory_space<vmem>>, vector<832x128xf32>
    %104 = vector.extract_strided_slice %101 {offsets = [0, 0], sizes = [832, 32], strides = [1, 1]} : vector<832x128xf32> to vector<832x32xf32>
    %105 = vector.extract_strided_slice %102 {offsets = [0, 0], sizes = [832, 32], strides = [1, 1]} : vector<832x128xf32> to vector<832x32xf32>
    %106 = vector.extract_strided_slice %103 {offsets = [0, 0], sizes = [832, 32], strides = [1, 1]} : vector<832x128xf32> to vector<832x32xf32>
    %107 = vector.extract_strided_slice %101 {offsets = [0, 96], sizes = [832, 32], strides = [1, 1]} : vector<832x128xf32> to vector<832x32xf32>
    %108 = tpu.concatenate %104, %105, %106, %107 in 1 : vector<832x32xf32>, vector<832x32xf32>, vector<832x32xf32>, vector<832x32xf32> -> vector<832x128xf32>
    %109 = arith.truncf %108 : vector<832x128xf32> to vector<832x128xbf16>
    %c0_100 = arith.constant 0 : index
    %c0_101 = arith.constant 0 : index
    %110 = vector.load %arg12[%c0_100, %c0_101] : memref<832x128xbf16, #tpu.memory_space<vmem>>, vector<832x128xbf16>
    tpu.vector_store %arg12[%c0_100, %c0_101], %109 {strides = array<i32>} : memref<832x128xbf16, #tpu.memory_space<vmem>>, vector<832x128xbf16>,
    %c0_102 = arith.constant 0 : index
    %c0_103 = arith.constant 0 : index
    %111 = vector.load %arg5[%c0_102, %c0_103] : memref<1x128xf32, #tpu.memory_space<vmem>>, vector<1x128xf32>
    %c0_104 = arith.constant 0 : index
    %c0_105 = arith.constant 0 : index
    %112 = vector.load %arg12[%c0_104, %c0_105] : memref<832x128xbf16, #tpu.memory_space<vmem>>, vector<256x128xbf16>
    %c0_106 = arith.constant 0 : index
    %c0_107 = arith.constant 0 : index
    %113 = vector.load %arg4[%c0_106, %c0_107] : memref<384x128xbf16, #tpu.memory_space<vmem>>, vector<128x128xbf16>
    %cst_108 = arith.constant dense<0.000000e+00> : vector<256x128xf32>
    %114 = tpu.matmul %112, %113, %cst_108 {dimension_numbers = #tpu.dot_dimension_numbers<[1], [0], [0], [1], [0, 0, 1, 1], [], []>} : vector<256x128xbf16>, vector<128x128xbf16>, vector<256x128xf32> -> vector<256x128xf32>
    %c32 = arith.constant 32 : index
    %c0_109 = arith.constant 0 : index
    %115 = vector.load %arg12[%c32, %c0_109] : memref<832x128xbf16, #tpu.memory_space<vmem>>, vector<256x128xbf16>
    %c128_110 = arith.constant 128 : index
    %c0_111 = arith.constant 0 : index
    %116 = vector.load %arg4[%c128_110, %c0_111] : memref<384x128xbf16, #tpu.memory_space<vmem>>, vector<128x128xbf16>
    %cst_112 = arith.constant dense<0.000000e+00> : vector<256x128xf32>
    %117 = tpu.matmul %115, %116, %cst_112 {dimension_numbers = #tpu.dot_dimension_numbers<[1], [0], [0], [1], [0, 0, 1, 1], [], []>} : vector<256x128xbf16>, vector<128x128xbf16>, vector<256x128xf32> -> vector<256x128xf32>
    %118 = arith.addf %114, %117 : vector<256x128xf32>
    %c64_113 = arith.constant 64 : index
    %c0_114 = arith.constant 0 : index
    %119 = vector.load %arg12[%c64_113, %c0_114] : memref<832x128xbf16, #tpu.memory_space<vmem>>, vector<256x128xbf16>
    %c256_115 = arith.constant 256 : index
    %c0_116 = arith.constant 0 : index
    %120 = vector.load %arg4[%c256_115, %c0_116] : memref<384x128xbf16, #tpu.memory_space<vmem>>, vector<128x128xbf16>
    %cst_117 = arith.constant dense<0.000000e+00> : vector<256x128xf32>
    %121 = tpu.matmul %119, %120, %cst_117 {dimension_numbers = #tpu.dot_dimension_numbers<[1], [0], [0], [1], [0, 0, 1, 1], [], []>} : vector<256x128xbf16>, vector<128x128xbf16>, vector<256x128xf32> -> vector<256x128xf32>
    %122 = arith.addf %118, %121 : vector<256x128xf32>
    %123 = vector.broadcast %111 : vector<1x128xf32> to vector<256x128xf32>
    %124 = arith.addf %122, %123 : vector<256x128xf32>
    %cst_118 = arith.constant 0.000000e+00 : f32
    %125 = vector.broadcast %cst_118 : f32 to vector<256x128xf32>
    %126 = arith.maximumf %124, %125 : vector<256x128xf32>
    %c0_119 = arith.constant 0 : index
    %c0_120 = arith.constant 0 : index
    %127 = vector.load %arg13[%c0_119, %c0_120] : memref<768x128xf32, #tpu.memory_space<vmem>>, vector<256x128xf32>
    tpu.vector_store %arg13[%c0_119, %c0_120], %126 {strides = array<i32>} : memref<768x128xf32, #tpu.memory_space<vmem>>, vector<256x128xf32>,
    %c256_121 = arith.constant 256 : index
    %c0_122 = arith.constant 0 : index
    %128 = vector.load %arg12[%c256_121, %c0_122] : memref<832x128xbf16, #tpu.memory_space<vmem>>, vector<256x128xbf16>
    %c0_123 = arith.constant 0 : index
    %c0_124 = arith.constant 0 : index
    %129 = vector.load %arg4[%c0_123, %c0_124] : memref<384x128xbf16, #tpu.memory_space<vmem>>, vector<128x128xbf16>
    %cst_125 = arith.constant dense<0.000000e+00> : vector<256x128xf32>
    %130 = tpu.matmul %128, %129, %cst_125 {dimension_numbers = #tpu.dot_dimension_numbers<[1], [0], [0], [1], [0, 0, 1, 1], [], []>} : vector<256x128xbf16>, vector<128x128xbf16>, vector<256x128xf32> -> vector<256x128xf32>
    %c288 = arith.constant 288 : index
    %c0_126 = arith.constant 0 : index
    %131 = vector.load %arg12[%c288, %c0_126] : memref<832x128xbf16, #tpu.memory_space<vmem>>, vector<256x128xbf16>
    %c128_127 = arith.constant 128 : index
    %c0_128 = arith.constant 0 : index
    %132 = vector.load %arg4[%c128_127, %c0_128] : memref<384x128xbf16, #tpu.memory_space<vmem>>, vector<128x128xbf16>
    %cst_129 = arith.constant dense<0.000000e+00> : vector<256x128xf32>
    %133 = tpu.matmul %131, %132, %cst_129 {dimension_numbers = #tpu.dot_dimension_numbers<[1], [0], [0], [1], [0, 0, 1, 1], [], []>} : vector<256x128xbf16>, vector<128x128xbf16>, vector<256x128xf32> -> vector<256x128xf32>
    %134 = arith.addf %130, %133 : vector<256x128xf32>
    %c320 = arith.constant 320 : index
    %c0_130 = arith.constant 0 : index
    %135 = vector.load %arg12[%c320, %c0_130] : memref<832x128xbf16, #tpu.memory_space<vmem>>, vector<256x128xbf16>
    %c256_131 = arith.constant 256 : index
    %c0_132 = arith.constant 0 : index
    %136 = vector.load %arg4[%c256_131, %c0_132] : memref<384x128xbf16, #tpu.memory_space<vmem>>, vector<128x128xbf16>
    %cst_133 = arith.constant dense<0.000000e+00> : vector<256x128xf32>
    %137 = tpu.matmul %135, %136, %cst_133 {dimension_numbers = #tpu.dot_dimension_numbers<[1], [0], [0], [1], [0, 0, 1, 1], [], []>} : vector<256x128xbf16>, vector<128x128xbf16>, vector<256x128xf32> -> vector<256x128xf32>
    %138 = arith.addf %134, %137 : vector<256x128xf32>
    %139 = vector.broadcast %111 : vector<1x128xf32> to vector<256x128xf32>
    %140 = arith.addf %138, %139 : vector<256x128xf32>
    %cst_134 = arith.constant 0.000000e+00 : f32
    %141 = vector.broadcast %cst_134 : f32 to vector<256x128xf32>
    %142 = arith.maximumf %140, %141 : vector<256x128xf32>
    %c256_135 = arith.constant 256 : index
    %c0_136 = arith.constant 0 : index
    %143 = vector.load %arg13[%c256_135, %c0_136] : memref<768x128xf32, #tpu.memory_space<vmem>>, vector<256x128xf32>
    tpu.vector_store %arg13[%c256_135, %c0_136], %142 {strides = array<i32>} : memref<768x128xf32, #tpu.memory_space<vmem>>, vector<256x128xf32>,
    %c512 = arith.constant 512 : index
    %c0_137 = arith.constant 0 : index
    %144 = vector.load %arg12[%c512, %c0_137] : memref<832x128xbf16, #tpu.memory_space<vmem>>, vector<256x128xbf16>
    %c0_138 = arith.constant 0 : index
    %c0_139 = arith.constant 0 : index
    %145 = vector.load %arg4[%c0_138, %c0_139] : memref<384x128xbf16, #tpu.memory_space<vmem>>, vector<128x128xbf16>
    %cst_140 = arith.constant dense<0.000000e+00> : vector<256x128xf32>
    %146 = tpu.matmul %144, %145, %cst_140 {dimension_numbers = #tpu.dot_dimension_numbers<[1], [0], [0], [1], [0, 0, 1, 1], [], []>} : vector<256x128xbf16>, vector<128x128xbf16>, vector<256x128xf32> -> vector<256x128xf32>
    %c544_141 = arith.constant 544 : index
    %c0_142 = arith.constant 0 : index
    %147 = vector.load %arg12[%c544_141, %c0_142] : memref<832x128xbf16, #tpu.memory_space<vmem>>, vector<256x128xbf16>
    %c128_143 = arith.constant 128 : index
    %c0_144 = arith.constant 0 : index
    %148 = vector.load %arg4[%c128_143, %c0_144] : memref<384x128xbf16, #tpu.memory_space<vmem>>, vector<128x128xbf16>
    %cst_145 = arith.constant dense<0.000000e+00> : vector<256x128xf32>
    %149 = tpu.matmul %147, %148, %cst_145 {dimension_numbers = #tpu.dot_dimension_numbers<[1], [0], [0], [1], [0, 0, 1, 1], [], []>} : vector<256x128xbf16>, vector<128x128xbf16>, vector<256x128xf32> -> vector<256x128xf32>
    %150 = arith.addf %146, %149 : vector<256x128xf32>
    %c576 = arith.constant 576 : index
    %c0_146 = arith.constant 0 : index
    %151 = vector.load %arg12[%c576, %c0_146] : memref<832x128xbf16, #tpu.memory_space<vmem>>, vector<256x128xbf16>
    %c256_147 = arith.constant 256 : index
    %c0_148 = arith.constant 0 : index
    %152 = vector.load %arg4[%c256_147, %c0_148] : memref<384x128xbf16, #tpu.memory_space<vmem>>, vector<128x128xbf16>
    %cst_149 = arith.constant dense<0.000000e+00> : vector<256x128xf32>
    %153 = tpu.matmul %151, %152, %cst_149 {dimension_numbers = #tpu.dot_dimension_numbers<[1], [0], [0], [1], [0, 0, 1, 1], [], []>} : vector<256x128xbf16>, vector<128x128xbf16>, vector<256x128xf32> -> vector<256x128xf32>
    %154 = arith.addf %150, %153 : vector<256x128xf32>
    %155 = vector.broadcast %111 : vector<1x128xf32> to vector<256x128xf32>
    %156 = arith.addf %154, %155 : vector<256x128xf32>
    %cst_150 = arith.constant 0.000000e+00 : f32
    %157 = vector.broadcast %cst_150 : f32 to vector<256x128xf32>
    %158 = arith.maximumf %156, %157 : vector<256x128xf32>
    %c512_151 = arith.constant 512 : index
    %c0_152 = arith.constant 0 : index
    %159 = vector.load %arg13[%c512_151, %c0_152] : memref<768x128xf32, #tpu.memory_space<vmem>>, vector<256x128xf32>
    tpu.vector_store %arg13[%c512_151, %c0_152], %158 {strides = array<i32>} : memref<768x128xf32, #tpu.memory_space<vmem>>, vector<256x128xf32>,
    %c0_153 = arith.constant 0 : index
    %c0_154 = arith.constant 0 : index
    %160 = vector.load %arg13[%c0_153, %c0_154] : memref<768x128xf32, #tpu.memory_space<vmem>>, vector<32x128xf32>
    %c32_155 = arith.constant 32 : index
    %c0_156 = arith.constant 0 : index
    %161 = vector.load %arg13[%c32_155, %c0_156] : memref<768x128xf32, #tpu.memory_space<vmem>>, vector<32x128xf32>
    %162 = arith.maximumf %160, %161 : vector<32x128xf32>
    %c0_157 = arith.constant 0 : index
    %c0_158 = arith.constant 0 : index
    %163 = vector.load %arg14[%c0_157, %c0_158] : memref<384x128xf32, #tpu.memory_space<vmem>>, vector<32x128xf32>
    tpu.vector_store %arg14[%c0_157, %c0_158], %162 {strides = array<i32>} : memref<384x128xf32, #tpu.memory_space<vmem>>, vector<32x128xf32>,
    %c64_159 = arith.constant 64 : index
    %c0_160 = arith.constant 0 : index
    %164 = vector.load %arg13[%c64_159, %c0_160] : memref<768x128xf32, #tpu.memory_space<vmem>>, vector<32x128xf32>
    %c96 = arith.constant 96 : index
    %c0_161 = arith.constant 0 : index
    %165 = vector.load %arg13[%c96, %c0_161] : memref<768x128xf32, #tpu.memory_space<vmem>>, vector<32x128xf32>
    %166 = arith.maximumf %164, %165 : vector<32x128xf32>
    %c32_162 = arith.constant 32 : index
    %c0_163 = arith.constant 0 : index
    %167 = vector.load %arg14[%c32_162, %c0_163] : memref<384x128xf32, #tpu.memory_space<vmem>>, vector<32x128xf32>
    tpu.vector_store %arg14[%c32_162, %c0_163], %166 {strides = array<i32>} : memref<384x128xf32, #tpu.memory_space<vmem>>, vector<32x128xf32>,
    %c128_164 = arith.constant 128 : index
    %c0_165 = arith.constant 0 : index
    %168 = vector.load %arg13[%c128_164, %c0_165] : memref<768x128xf32, #tpu.memory_space<vmem>>, vector<32x128xf32>
    %c160 = arith.constant 160 : index
    %c0_166 = arith.constant 0 : index
    %169 = vector.load %arg13[%c160, %c0_166] : memref<768x128xf32, #tpu.memory_space<vmem>>, vector<32x128xf32>
    %170 = arith.maximumf %168, %169 : vector<32x128xf32>
    %c64_167 = arith.constant 64 : index
    %c0_168 = arith.constant 0 : index
    %171 = vector.load %arg14[%c64_167, %c0_168] : memref<384x128xf32, #tpu.memory_space<vmem>>, vector<32x128xf32>
    tpu.vector_store %arg14[%c64_167, %c0_168], %170 {strides = array<i32>} : memref<384x128xf32, #tpu.memory_space<vmem>>, vector<32x128xf32>,
    %c192_169 = arith.constant 192 : index
    %c0_170 = arith.constant 0 : index
    %172 = vector.load %arg13[%c192_169, %c0_170] : memref<768x128xf32, #tpu.memory_space<vmem>>, vector<32x128xf32>
    %c224 = arith.constant 224 : index
    %c0_171 = arith.constant 0 : index
    %173 = vector.load %arg13[%c224, %c0_171] : memref<768x128xf32, #tpu.memory_space<vmem>>, vector<32x128xf32>
    %174 = arith.maximumf %172, %173 : vector<32x128xf32>
    %c96_172 = arith.constant 96 : index
    %c0_173 = arith.constant 0 : index
    %175 = vector.load %arg14[%c96_172, %c0_173] : memref<384x128xf32, #tpu.memory_space<vmem>>, vector<32x128xf32>
    tpu.vector_store %arg14[%c96_172, %c0_173], %174 {strides = array<i32>} : memref<384x128xf32, #tpu.memory_space<vmem>>, vector<32x128xf32>,
    %c256_174 = arith.constant 256 : index
    %c0_175 = arith.constant 0 : index
    %176 = vector.load %arg13[%c256_174, %c0_175] : memref<768x128xf32, #tpu.memory_space<vmem>>, vector<32x128xf32>
    %c288_176 = arith.constant 288 : index
    %c0_177 = arith.constant 0 : index
    %177 = vector.load %arg13[%c288_176, %c0_177] : memref<768x128xf32, #tpu.memory_space<vmem>>, vector<32x128xf32>
    %178 = arith.maximumf %176, %177 : vector<32x128xf32>
    %c128_178 = arith.constant 128 : index
    %c0_179 = arith.constant 0 : index
    %179 = vector.load %arg14[%c128_178, %c0_179] : memref<384x128xf32, #tpu.memory_space<vmem>>, vector<32x128xf32>
    tpu.vector_store %arg14[%c128_178, %c0_179], %178 {strides = array<i32>} : memref<384x128xf32, #tpu.memory_space<vmem>>, vector<32x128xf32>,
    %c320_180 = arith.constant 320 : index
    %c0_181 = arith.constant 0 : index
    %180 = vector.load %arg13[%c320_180, %c0_181] : memref<768x128xf32, #tpu.memory_space<vmem>>, vector<32x128xf32>
    %c352 = arith.constant 352 : index
    %c0_182 = arith.constant 0 : index
    %181 = vector.load %arg13[%c352, %c0_182] : memref<768x128xf32, #tpu.memory_space<vmem>>, vector<32x128xf32>
    %182 = arith.maximumf %180, %181 : vector<32x128xf32>
    %c160_183 = arith.constant 160 : index
    %c0_184 = arith.constant 0 : index
    %183 = vector.load %arg14[%c160_183, %c0_184] : memref<384x128xf32, #tpu.memory_space<vmem>>, vector<32x128xf32>
    tpu.vector_store %arg14[%c160_183, %c0_184], %182 {strides = array<i32>} : memref<384x128xf32, #tpu.memory_space<vmem>>, vector<32x128xf32>,
    %c384_185 = arith.constant 384 : index
    %c0_186 = arith.constant 0 : index
    %184 = vector.load %arg13[%c384_185, %c0_186] : memref<768x128xf32, #tpu.memory_space<vmem>>, vector<32x128xf32>
    %c416_187 = arith.constant 416 : index
    %c0_188 = arith.constant 0 : index
    %185 = vector.load %arg13[%c416_187, %c0_188] : memref<768x128xf32, #tpu.memory_space<vmem>>, vector<32x128xf32>
    %186 = arith.maximumf %184, %185 : vector<32x128xf32>
    %c192_189 = arith.constant 192 : index
    %c0_190 = arith.constant 0 : index
    %187 = vector.load %arg14[%c192_189, %c0_190] : memref<384x128xf32, #tpu.memory_space<vmem>>, vector<32x128xf32>
    tpu.vector_store %arg14[%c192_189, %c0_190], %186 {strides = array<i32>} : memref<384x128xf32, #tpu.memory_space<vmem>>, vector<32x128xf32>,
    %c448 = arith.constant 448 : index
    %c0_191 = arith.constant 0 : index
    %188 = vector.load %arg13[%c448, %c0_191] : memref<768x128xf32, #tpu.memory_space<vmem>>, vector<32x128xf32>
    %c480_192 = arith.constant 480 : index
    %c0_193 = arith.constant 0 : index
    %189 = vector.load %arg13[%c480_192, %c0_193] : memref<768x128xf32, #tpu.memory_space<vmem>>, vector<32x128xf32>
    %190 = arith.maximumf %188, %189 : vector<32x128xf32>
    %c224_194 = arith.constant 224 : index
    %c0_195 = arith.constant 0 : index
    %191 = vector.load %arg14[%c224_194, %c0_195] : memref<384x128xf32, #tpu.memory_space<vmem>>, vector<32x128xf32>
    tpu.vector_store %arg14[%c224_194, %c0_195], %190 {strides = array<i32>} : memref<384x128xf32, #tpu.memory_space<vmem>>, vector<32x128xf32>,
    %c512_196 = arith.constant 512 : index
    %c0_197 = arith.constant 0 : index
    %192 = vector.load %arg13[%c512_196, %c0_197] : memref<768x128xf32, #tpu.memory_space<vmem>>, vector<32x128xf32>
    %c544_198 = arith.constant 544 : index
    %c0_199 = arith.constant 0 : index
    %193 = vector.load %arg13[%c544_198, %c0_199] : memref<768x128xf32, #tpu.memory_space<vmem>>, vector<32x128xf32>
    %194 = arith.maximumf %192, %193 : vector<32x128xf32>
    %c256_200 = arith.constant 256 : index
    %c0_201 = arith.constant 0 : index
    %195 = vector.load %arg14[%c256_200, %c0_201] : memref<384x128xf32, #tpu.memory_space<vmem>>, vector<32x128xf32>
    tpu.vector_store %arg14[%c256_200, %c0_201], %194 {strides = array<i32>} : memref<384x128xf32, #tpu.memory_space<vmem>>, vector<32x128xf32>,
    %c576_202 = arith.constant 576 : index
    %c0_203 = arith.constant 0 : index
    %196 = vector.load %arg13[%c576_202, %c0_203] : memref<768x128xf32, #tpu.memory_space<vmem>>, vector<32x128xf32>
    %c608_204 = arith.constant 608 : index
    %c0_205 = arith.constant 0 : index
    %197 = vector.load %arg13[%c608_204, %c0_205] : memref<768x128xf32, #tpu.memory_space<vmem>>, vector<32x128xf32>
    %198 = arith.maximumf %196, %197 : vector<32x128xf32>
    %c288_206 = arith.constant 288 : index
    %c0_207 = arith.constant 0 : index
    %199 = vector.load %arg14[%c288_206, %c0_207] : memref<384x128xf32, #tpu.memory_space<vmem>>, vector<32x128xf32>
    tpu.vector_store %arg14[%c288_206, %c0_207], %198 {strides = array<i32>} : memref<384x128xf32, #tpu.memory_space<vmem>>, vector<32x128xf32>,
    %c640 = arith.constant 640 : index
    %c0_208 = arith.constant 0 : index
    %200 = vector.load %arg13[%c640, %c0_208] : memref<768x128xf32, #tpu.memory_space<vmem>>, vector<32x128xf32>
    %c672 = arith.constant 672 : index
    %c0_209 = arith.constant 0 : index
    %201 = vector.load %arg13[%c672, %c0_209] : memref<768x128xf32, #tpu.memory_space<vmem>>, vector<32x128xf32>
    %202 = arith.maximumf %200, %201 : vector<32x128xf32>
    %c320_210 = arith.constant 320 : index
    %c0_211 = arith.constant 0 : index
    %203 = vector.load %arg14[%c320_210, %c0_211] : memref<384x128xf32, #tpu.memory_space<vmem>>, vector<32x128xf32>
    tpu.vector_store %arg14[%c320_210, %c0_211], %202 {strides = array<i32>} : memref<384x128xf32, #tpu.memory_space<vmem>>, vector<32x128xf32>,
    %c704 = arith.constant 704 : index
    %c0_212 = arith.constant 0 : index
    %204 = vector.load %arg13[%c704, %c0_212] : memref<768x128xf32, #tpu.memory_space<vmem>>, vector<32x128xf32>
    %c736 = arith.constant 736 : index
    %c0_213 = arith.constant 0 : index
    %205 = vector.load %arg13[%c736, %c0_213] : memref<768x128xf32, #tpu.memory_space<vmem>>, vector<32x128xf32>
    %206 = arith.maximumf %204, %205 : vector<32x128xf32>
    %c352_214 = arith.constant 352 : index
    %c0_215 = arith.constant 0 : index
    %207 = vector.load %arg14[%c352_214, %c0_215] : memref<384x128xf32, #tpu.memory_space<vmem>>, vector<32x128xf32>
    tpu.vector_store %arg14[%c352_214, %c0_215], %206 {strides = array<i32>} : memref<384x128xf32, #tpu.memory_space<vmem>>, vector<32x128xf32>,
    %c0_216 = arith.constant 0 : index
    %c0_217 = arith.constant 0 : index
    %208 = tpu.strided_load %arg14[%c0_216, %c0_217] {strides = array<i32: 2, 1>} : memref<384x128xf32, #tpu.memory_space<vmem>>, vector<192x128xf32>
    %c1_218 = arith.constant 1 : index
    %c0_219 = arith.constant 0 : index
    %209 = tpu.strided_load %arg14[%c1_218, %c0_219] {strides = array<i32: 2, 1>} : memref<384x128xf32, #tpu.memory_space<vmem>>, vector<192x128xf32>
    %210 = arith.maximumf %208, %209 : vector<192x128xf32>
    %211 = arith.truncf %210 : vector<192x128xf32> to vector<192x128xbf16>
    %c0_220 = arith.constant 0 : index
    %c0_221 = arith.constant 0 : index
    %212 = vector.load %arg15[%c0_220, %c0_221] : memref<200x128xbf16, #tpu.memory_space<vmem>>, vector<192x128xbf16>
    tpu.vector_store %arg15[%c0_220, %c0_221], %211 {strides = array<i32>} : memref<200x128xbf16, #tpu.memory_space<vmem>>, vector<192x128xbf16>,
    %c1_222 = arith.constant 1 : index
    %c0_223 = arith.constant 0 : index
    %213 = vector.load %arg15[%c1_222, %c0_223] : memref<200x128xbf16, #tpu.memory_space<vmem>>, vector<192x128xbf16>
    %214 = arith.extf %213 : vector<192x128xbf16> to vector<192x128xf32>
    %c2_224 = arith.constant 2 : index
    %c0_225 = arith.constant 0 : index
    %215 = vector.load %arg15[%c2_224, %c0_225] : memref<200x128xbf16, #tpu.memory_space<vmem>>, vector<192x128xbf16>
    %216 = arith.extf %215 : vector<192x128xbf16> to vector<192x128xf32>
    %217 = vector.extract_strided_slice %214 {offsets = [0, 0], sizes = [192, 64], strides = [1, 1]} : vector<192x128xf32> to vector<192x64xf32>
    %218 = vector.extract_strided_slice %216 {offsets = [0, 0], sizes = [192, 64], strides = [1, 1]} : vector<192x128xf32> to vector<192x64xf32>
    %219 = tpu.concatenate %217, %218 in 1 : vector<192x64xf32>, vector<192x64xf32> -> vector<192x128xf32>
    %220 = arith.truncf %219 : vector<192x128xf32> to vector<192x128xbf16>
    %c0_226 = arith.constant 0 : index
    %c0_227 = arith.constant 0 : index
    %221 = vector.load %arg16[%c0_226, %c0_227] : memref<192x128xbf16, #tpu.memory_space<vmem>>, vector<192x128xbf16>
    tpu.vector_store %arg16[%c0_226, %c0_227], %220 {strides = array<i32>} : memref<192x128xbf16, #tpu.memory_space<vmem>>, vector<192x128xbf16>,
    %c0_228 = arith.constant 0 : index
    %c0_229 = arith.constant 0 : index
    %222 = vector.load %arg15[%c0_228, %c0_229] : memref<200x128xbf16, #tpu.memory_space<vmem>>, vector<160x128xbf16>
    %c0_230 = arith.constant 0 : index
    %c0_231 = arith.constant 0 : index
    %223 = vector.load %arg6[%c0_230, %c0_231] : memref<768x128xbf16, #tpu.memory_space<vmem>>, vector<128x128xbf16>
    %cst_232 = arith.constant dense<0.000000e+00> : vector<160x128xf32>
    %224 = tpu.matmul %222, %223, %cst_232 {dimension_numbers = #tpu.dot_dimension_numbers<[1], [0], [0], [1], [0, 0, 1, 1], [], []>} : vector<160x128xbf16>, vector<128x128xbf16>, vector<160x128xf32> -> vector<160x128xf32>
    %c0_233 = arith.constant 0 : index
    %c0_234 = arith.constant 0 : index
    %225 = vector.load %arg16[%c0_233, %c0_234] : memref<192x128xbf16, #tpu.memory_space<vmem>>, vector<160x128xbf16>
    %c128_235 = arith.constant 128 : index
    %c0_236 = arith.constant 0 : index
    %226 = vector.load %arg6[%c128_235, %c0_236] : memref<768x128xbf16, #tpu.memory_space<vmem>>, vector<128x128xbf16>
    %cst_237 = arith.constant dense<0.000000e+00> : vector<160x128xf32>
    %227 = tpu.matmul %225, %226, %cst_237 {dimension_numbers = #tpu.dot_dimension_numbers<[1], [0], [0], [1], [0, 0, 1, 1], [], []>} : vector<160x128xbf16>, vector<128x128xbf16>, vector<160x128xf32> -> vector<160x128xf32>
    %228 = arith.addf %224, %227 : vector<160x128xf32>
    %c16 = arith.constant 16 : index
    %c0_238 = arith.constant 0 : index
    %229 = vector.load %arg15[%c16, %c0_238] : memref<200x128xbf16, #tpu.memory_space<vmem>>, vector<160x128xbf16>
    %c256_239 = arith.constant 256 : index
    %c0_240 = arith.constant 0 : index
    %230 = vector.load %arg6[%c256_239, %c0_240] : memref<768x128xbf16, #tpu.memory_space<vmem>>, vector<128x128xbf16>
    %cst_241 = arith.constant dense<0.000000e+00> : vector<160x128xf32>
    %231 = tpu.matmul %229, %230, %cst_241 {dimension_numbers = #tpu.dot_dimension_numbers<[1], [0], [0], [1], [0, 0, 1, 1], [], []>} : vector<160x128xbf16>, vector<128x128xbf16>, vector<160x128xf32> -> vector<160x128xf32>
    %232 = arith.addf %228, %231 : vector<160x128xf32>
    %c16_242 = arith.constant 16 : index
    %c0_243 = arith.constant 0 : index
    %233 = vector.load %arg16[%c16_242, %c0_243] : memref<192x128xbf16, #tpu.memory_space<vmem>>, vector<160x128xbf16>
    %c384_244 = arith.constant 384 : index
    %c0_245 = arith.constant 0 : index
    %234 = vector.load %arg6[%c384_244, %c0_245] : memref<768x128xbf16, #tpu.memory_space<vmem>>, vector<128x128xbf16>
    %cst_246 = arith.constant dense<0.000000e+00> : vector<160x128xf32>
    %235 = tpu.matmul %233, %234, %cst_246 {dimension_numbers = #tpu.dot_dimension_numbers<[1], [0], [0], [1], [0, 0, 1, 1], [], []>} : vector<160x128xbf16>, vector<128x128xbf16>, vector<160x128xf32> -> vector<160x128xf32>
    %236 = arith.addf %232, %235 : vector<160x128xf32>
    %c32_247 = arith.constant 32 : index
    %c0_248 = arith.constant 0 : index
    %237 = vector.load %arg15[%c32_247, %c0_248] : memref<200x128xbf16, #tpu.memory_space<vmem>>, vector<160x128xbf16>
    %c512_249 = arith.constant 512 : index
    %c0_250 = arith.constant 0 : index
    %238 = vector.load %arg6[%c512_249, %c0_250] : memref<768x128xbf16, #tpu.memory_space<vmem>>, vector<128x128xbf16>
    %cst_251 = arith.constant dense<0.000000e+00> : vector<160x128xf32>
    %239 = tpu.matmul %237, %238, %cst_251 {dimension_numbers = #tpu.dot_dimension_numbers<[1], [0], [0], [1], [0, 0, 1, 1], [], []>} : vector<160x128xbf16>, vector<128x128xbf16>, vector<160x128xf32> -> vector<160x128xf32>
    %240 = arith.addf %236, %239 : vector<160x128xf32>
    %c32_252 = arith.constant 32 : index
    %c0_253 = arith.constant 0 : index
    %241 = vector.load %arg16[%c32_252, %c0_253] : memref<192x128xbf16, #tpu.memory_space<vmem>>, vector<160x128xbf16>
    %c640_254 = arith.constant 640 : index
    %c0_255 = arith.constant 0 : index
    %242 = vector.load %arg6[%c640_254, %c0_255] : memref<768x128xbf16, #tpu.memory_space<vmem>>, vector<128x128xbf16>
    %cst_256 = arith.constant dense<0.000000e+00> : vector<160x128xf32>
    %243 = tpu.matmul %241, %242, %cst_256 {dimension_numbers = #tpu.dot_dimension_numbers<[1], [0], [0], [1], [0, 0, 1, 1], [], []>} : vector<160x128xbf16>, vector<128x128xbf16>, vector<160x128xf32> -> vector<160x128xf32>
    %244 = arith.addf %240, %243 : vector<160x128xf32>
    %c0_257 = arith.constant 0 : index
    %c0_258 = arith.constant 0 : index
    %245 = vector.load %arg7[%c0_257, %c0_258] : memref<1x128xf32, #tpu.memory_space<vmem>>, vector<1x128xf32>
    %246 = vector.broadcast %245 : vector<1x128xf32> to vector<160x128xf32>
    %247 = arith.addf %244, %246 : vector<160x128xf32>
    %cst_259 = arith.constant 0.000000e+00 : f32
    %248 = vector.broadcast %cst_259 : f32 to vector<160x128xf32>
    %249 = arith.maximumf %247, %248 : vector<160x128xf32>
    %c0_260 = arith.constant 0 : index
    %c0_261 = arith.constant 0 : index
    %250 = vector.load %arg17[%c0_260, %c0_261] : memref<160x128xf32, #tpu.memory_space<vmem>>, vector<160x128xf32>
    tpu.vector_store %arg17[%c0_260, %c0_261], %249 {strides = array<i32>} : memref<160x128xf32, #tpu.memory_space<vmem>>, vector<160x128xf32>,
    %c0_262 = arith.constant 0 : index
    %c0_263 = arith.constant 0 : index
    %251 = vector.load %arg17[%c0_262, %c0_263] : memref<160x128xf32, #tpu.memory_space<vmem>>, vector<16x128xf32>
    %c16_264 = arith.constant 16 : index
    %c0_265 = arith.constant 0 : index
    %252 = vector.load %arg17[%c16_264, %c0_265] : memref<160x128xf32, #tpu.memory_space<vmem>>, vector<16x128xf32>
    %253 = arith.maximumf %251, %252 : vector<16x128xf32>
    %c0_266 = arith.constant 0 : index
    %c0_267 = arith.constant 0 : index
    %254 = vector.load %arg18[%c0_266, %c0_267] : memref<80x128xf32, #tpu.memory_space<vmem>>, vector<16x128xf32>
    tpu.vector_store %arg18[%c0_266, %c0_267], %253 {strides = array<i32>} : memref<80x128xf32, #tpu.memory_space<vmem>>, vector<16x128xf32>,
    %c32_268 = arith.constant 32 : index
    %c0_269 = arith.constant 0 : index
    %255 = vector.load %arg17[%c32_268, %c0_269] : memref<160x128xf32, #tpu.memory_space<vmem>>, vector<16x128xf32>
    %c48 = arith.constant 48 : index
    %c0_270 = arith.constant 0 : index
    %256 = vector.load %arg17[%c48, %c0_270] : memref<160x128xf32, #tpu.memory_space<vmem>>, vector<16x128xf32>
    %257 = arith.maximumf %255, %256 : vector<16x128xf32>
    %c16_271 = arith.constant 16 : index
    %c0_272 = arith.constant 0 : index
    %258 = vector.load %arg18[%c16_271, %c0_272] : memref<80x128xf32, #tpu.memory_space<vmem>>, vector<16x128xf32>
    tpu.vector_store %arg18[%c16_271, %c0_272], %257 {strides = array<i32>} : memref<80x128xf32, #tpu.memory_space<vmem>>, vector<16x128xf32>,
    %c64_273 = arith.constant 64 : index
    %c0_274 = arith.constant 0 : index
    %259 = vector.load %arg17[%c64_273, %c0_274] : memref<160x128xf32, #tpu.memory_space<vmem>>, vector<16x128xf32>
    %c80 = arith.constant 80 : index
    %c0_275 = arith.constant 0 : index
    %260 = vector.load %arg17[%c80, %c0_275] : memref<160x128xf32, #tpu.memory_space<vmem>>, vector<16x128xf32>
    %261 = arith.maximumf %259, %260 : vector<16x128xf32>
    %c32_276 = arith.constant 32 : index
    %c0_277 = arith.constant 0 : index
    %262 = vector.load %arg18[%c32_276, %c0_277] : memref<80x128xf32, #tpu.memory_space<vmem>>, vector<16x128xf32>
    tpu.vector_store %arg18[%c32_276, %c0_277], %261 {strides = array<i32>} : memref<80x128xf32, #tpu.memory_space<vmem>>, vector<16x128xf32>,
    %c96_278 = arith.constant 96 : index
    %c0_279 = arith.constant 0 : index
    %263 = vector.load %arg17[%c96_278, %c0_279] : memref<160x128xf32, #tpu.memory_space<vmem>>, vector<16x128xf32>
    %c112 = arith.constant 112 : index
    %c0_280 = arith.constant 0 : index
    %264 = vector.load %arg17[%c112, %c0_280] : memref<160x128xf32, #tpu.memory_space<vmem>>, vector<16x128xf32>
    %265 = arith.maximumf %263, %264 : vector<16x128xf32>
    %c48_281 = arith.constant 48 : index
    %c0_282 = arith.constant 0 : index
    %266 = vector.load %arg18[%c48_281, %c0_282] : memref<80x128xf32, #tpu.memory_space<vmem>>, vector<16x128xf32>
    tpu.vector_store %arg18[%c48_281, %c0_282], %265 {strides = array<i32>} : memref<80x128xf32, #tpu.memory_space<vmem>>, vector<16x128xf32>,
    %c128_283 = arith.constant 128 : index
    %c0_284 = arith.constant 0 : index
    %267 = vector.load %arg17[%c128_283, %c0_284] : memref<160x128xf32, #tpu.memory_space<vmem>>, vector<16x128xf32>
    %c144 = arith.constant 144 : index
    %c0_285 = arith.constant 0 : index
    %268 = vector.load %arg17[%c144, %c0_285] : memref<160x128xf32, #tpu.memory_space<vmem>>, vector<16x128xf32>
    %269 = arith.maximumf %267, %268 : vector<16x128xf32>
    %c64_286 = arith.constant 64 : index
    %c0_287 = arith.constant 0 : index
    %270 = vector.load %arg18[%c64_286, %c0_287] : memref<80x128xf32, #tpu.memory_space<vmem>>, vector<16x128xf32>
    tpu.vector_store %arg18[%c64_286, %c0_287], %269 {strides = array<i32>} : memref<80x128xf32, #tpu.memory_space<vmem>>, vector<16x128xf32>,
    %c0_288 = arith.constant 0 : index
    %c0_289 = arith.constant 0 : index
    %271 = tpu.strided_load %arg18[%c0_288, %c0_289] {strides = array<i32: 2, 1>} : memref<80x128xf32, #tpu.memory_space<vmem>>, vector<40x128xf32>
    %c1_290 = arith.constant 1 : index
    %c0_291 = arith.constant 0 : index
    %272 = tpu.strided_load %arg18[%c1_290, %c0_291] {strides = array<i32: 2, 1>} : memref<80x128xf32, #tpu.memory_space<vmem>>, vector<40x128xf32>
    %273 = arith.maximumf %271, %272 : vector<40x128xf32>
    %274 = tpu.iota {dimensions = array<i32: 0>} : vector<40x128xi32>
    %c8_i32 = arith.constant 8 : i32
    %c0_i32 = arith.constant 0 : i32
    %275 = arith.cmpi eq, %c8_i32, %c0_i32 : i32
    %c1_i32 = arith.constant 1 : i32
    %276 = arith.select %275, %c1_i32, %c8_i32 : i32
    %277 = vector.broadcast %276 : i32 to vector<40x128xi32>
    %278 = arith.remsi %274, %277 : vector<40x128xi32>
    %c0_i32_292 = arith.constant 0 : i32
    %279 = vector.broadcast %c0_i32_292 : i32 to vector<40x128xi32>
    %280 = arith.cmpi ne, %278, %279 : vector<40x128xi32>
    %c0_i32_293 = arith.constant 0 : i32
    %281 = vector.broadcast %c0_i32_293 : i32 to vector<40x128xi32>
    %282 = arith.cmpi slt, %278, %281 : vector<40x128xi32>
    %c0_i32_294 = arith.constant 0 : i32
    %283 = arith.cmpi slt, %276, %c0_i32_294 : i32
    %284 = vector.broadcast %283 : i1 to vector<40x128xi1>
    %285 = vector.broadcast %284 : vector<40x128xi1> to vector<40x128xi1>
    %286 = arith.xori %282, %285 : vector<40x128xi1>
    %287 = arith.andi %286, %280 : vector<40x128xi1>
    %288 = vector.broadcast %276 : i32 to vector<40x128xi32>
    %289 = arith.addi %278, %288 : vector<40x128xi32>
    %290 = arith.select %287, %289, %278 : vector<40x128xi1>, vector<40x128xi32>
    %c5_i32 = arith.constant 5 : i32
    %291 = vector.broadcast %c5_i32 : i32 to vector<40x128xi32>
    %292 = arith.cmpi slt, %290, %291 : vector<40x128xi32>
    %cst_295 = arith.constant 0.000000e+00 : f32
    %293 = vector.broadcast %cst_295 : f32 to vector<40x128xf32>
    %294 = arith.select %292, %273, %293 : vector<40x128xi1>, vector<40x128xf32>
    %295 = arith.truncf %294 : vector<40x128xf32> to vector<40x128xbf16>
    %c0_296 = arith.constant 0 : index
    %c0_297 = arith.constant 0 : index
    %296 = vector.load %arg8[%c0_296, %c0_297] : memref<128x128xbf16, #tpu.memory_space<vmem>>, vector<128x128xbf16>
    %cst_298 = arith.constant dense<0.000000e+00> : vector<40x128xf32>
    %297 = tpu.matmul %295, %296, %cst_298 {dimension_numbers = #tpu.dot_dimension_numbers<[1], [0], [0], [1], [0, 0, 1, 1], [], []>} : vector<40x128xbf16>, vector<128x128xbf16>, vector<40x128xf32> -> vector<40x128xf32>
    %cst_299 = arith.constant dense<0.000000e+00> : vector<128xf32>
    %298 = vector.multi_reduction <add>, %297, %cst_299 [0] : vector<40x128xf32> to vector<128xf32>
    %299 = vector.shape_cast %298 : vector<128xf32> to vector<1x128xf32>
    %c0_300 = arith.constant 0 : index
    %c0_301 = arith.constant 0 : index
    %300 = vector.load %arg9[%c0_300, %c0_301] : memref<1x128xf32, #tpu.memory_space<vmem>>, vector<1x128xf32>
    %301 = arith.addf %299, %300 : vector<1x128xf32>
    %c0_302 = arith.constant 0 : index
    %c0_303 = arith.constant 0 : index
    %c0_304 = arith.constant 0 : index
    %302 = vector.load %arg10[%c0_302, %c0_303, %c0_304] : memref<1x1x128xf32, #tpu.memory_space<vmem>>, vector<1x1x128xf32>
    %303 = vector.shape_cast %302 : vector<1x1x128xf32> to vector<1x128xf32>
    %304 = vector.shape_cast %301 : vector<1x128xf32> to vector<1x1x128xf32>
    tpu.vector_store %arg10[%c0_302, %c0_303, %c0_304], %304 {strides = array<i32>} : memref<1x1x128xf32, #tpu.memory_space<vmem>>, vector<1x1x128xf32>,
    return
  }
  func.func @transform_0(%arg0: i32) -> (i32, i32, i32) {
    %c0_i32 = arith.constant 0 : i32
    %c0_i32_0 = arith.constant 0 : i32
    %c0_i32_1 = arith.constant 0 : i32
    return %arg0, %c0_i32, %c0_i32_0 : i32, i32, i32
  }
  func.func @transform_1(%arg0: i32) -> (i32, i32) {
    %c0_i32 = arith.constant 0 : i32
    %c0_i32_0 = arith.constant 0 : i32
    %c0_i32_1 = arith.constant 0 : i32
    return %c0_i32, %c0_i32_0 : i32, i32
  }
  func.func @transform_2(%arg0: i32) -> (i32, i32) {
    %c0_i32 = arith.constant 0 : i32
    %c0_i32_0 = arith.constant 0 : i32
    %c0_i32_1 = arith.constant 0 : i32
    return %c0_i32, %c0_i32_0 : i32, i32
  }
  func.func @transform_3(%arg0: i32) -> (i32, i32) {
    %c0_i32 = arith.constant 0 : i32
    %c0_i32_0 = arith.constant 0 : i32
    %c0_i32_1 = arith.constant 0 : i32
    return %c0_i32, %c0_i32_0 : i32, i32
  }
  func.func @transform_4(%arg0: i32) -> (i32, i32) {
    %c0_i32 = arith.constant 0 : i32
    %c0_i32_0 = arith.constant 0 : i32
    %c0_i32_1 = arith.constant 0 : i32
    return %c0_i32, %c0_i32_0 : i32, i32
  }
  func.func @transform_5(%arg0: i32) -> (i32, i32) {
    %c0_i32 = arith.constant 0 : i32
    %c0_i32_0 = arith.constant 0 : i32
    %c0_i32_1 = arith.constant 0 : i32
    return %c0_i32, %c0_i32_0 : i32, i32
  }
  func.func @transform_6(%arg0: i32) -> (i32, i32) {
    %c0_i32 = arith.constant 0 : i32
    %c0_i32_0 = arith.constant 0 : i32
    %c0_i32_1 = arith.constant 0 : i32
    return %c0_i32, %c0_i32_0 : i32, i32
  }
  func.func @transform_7(%arg0: i32) -> (i32, i32) {
    %c0_i32 = arith.constant 0 : i32
    %c0_i32_0 = arith.constant 0 : i32
    %c0_i32_1 = arith.constant 0 : i32
    return %c0_i32, %c0_i32_0 : i32, i32
  }
  func.func @transform_8(%arg0: i32) -> (i32, i32) {
    %c0_i32 = arith.constant 0 : i32
    %c0_i32_0 = arith.constant 0 : i32
    %c0_i32_1 = arith.constant 0 : i32
    return %c0_i32, %c0_i32_0 : i32, i32
  }
  func.func @transform_9(%arg0: i32) -> (i32, i32, i32) {
    %c0_i32 = arith.constant 0 : i32
    %c0_i32_0 = arith.constant 0 : i32
    %c0_i32_1 = arith.constant 0 : i32
    return %arg0, %c0_i32, %c0_i32_0 : i32, i32, i32
  }
}

</mosaic_0001>

<bundles_post_ra>
// kernel: base_model_forward.1
= control target key start
LH: loop header
LB: loop body
LE: loop exit
PB: predicated region body
PF: predicated region fallthrough
CT: control target
= control target key end

     0   :  { %14 = vsyncpa [#allocation11], 0  ;;  %s22653_s0 = inlined_call_operand.vmem [shape: bf16[2,1024,128], index: 0, kind: input, shape index: {}]   ;;  %s22654_s1 = inlined_call_operand.vmem [shape: bf16[512,128], index: 1, kind: input, shape index: {}]   ;;  %s22655_s2 = inlined_call_operand.vmem [shape: f32[1,128], index: 2, kind: input, shape index: {}]   ;;  %s22656_s3 = inlined_call_operand.vmem [shape: bf16[384,128], index: 3, kind: input, shape index: {}]   ;;  %s22657_s4 = inlined_call_operand.vmem [shape: f32[1,128], index: 4, kind: input, shape index: {}]   ;;  %s22658_s5 = inlined_call_operand.vmem [shape: bf16[768,128], index: 5, kind: input, shape index: {}]   ;;  %s22659_s6 = inlined_call_operand.vmem [shape: f32[1,128], index: 6, kind: input, shape index: {}]   ;;  %s22660_s7 = inlined_call_operand.vmem [shape: bf16[128,128], index: 7, kind: input, shape index: {}]   ;;  %s22661_s8 = inlined_call_operand.vmem [shape: f32[1,128], index: 8, kind: input, shape index: {}]   ;;  %s22662_s9 = inlined_call_operand.hbm [shape: f32[2,1,128], index: 9, kind: output, shape index: {}]  }
   0x1   :  { %16 = vsyncpa [#allocation11 + $0x1], 0  ;;  %s18859_s30 = smov 0   ;;  %s18861_s10 = smov 0  }
   0x2   :  { %s18863_s11 = smov 0   ;;  %s18865_s12 = smov 0  }
   0x3 LB: > { %s18880_s13 = sadd.s32 4294967295, %s18801_s12   ;;  %s13725_s14 = sadd.s32 4294967294, %s18801_s12   ;;  %s18801_s12 = sphi %s18865_s12, %s22764_s12   ;;  %s18797_s11 = sphi %s18863_s11, %s22763_s11   ;;  %s18793_s10 = sphi %s18861_s10, %s22762_s10   ;;  %s18789_s30 = sphi %s18859_s30, %s22761_s30  }
   0x4   : > { %s18884_s15 = sadd.s32 1, %s18801_s12   ;;  %s223_s16 = sadd.s32 1, %s18797_s11 }
   0x5   : > { %s220_s17 = ssub.s32 %s18801_s12, %s18884_s15  ;;  %p233_p0 = scmp.ne.s32.totalorder %s18797_s11, %s18793_s10 }
   0x6   : > { %p221_p1 = scmp.eq.s32.totalorder %s220_s17, 0  ;;  %p234_p2 = scmp.eq.s32.totalorder %s18880_s13, 1 }
   0x7   : > { %p239_p3 = scmp.ne.s32.totalorder %s18793_s10, %s18789_s30  ;;  %p240_p4 = scmp.eq.s32.totalorder %s13725_s14, 1 }
   0x8   : > { %s18895_s18 = scalar_select %p221_p1, %s18797_s11, %s223_s16  }
   0x9   : > { %p18897_p5 = por %p234_p2, %p233_p0  ;;  %p18901_p6 = por %p240_p4, %p239_p3 }
   0xa   : > { %p13728_p7 = scmp.ge.s32.totalorder %s18801_s12, 1  ;;  %p290_p8 = scmp.lt.s32.totalorder %s18801_s12, 3 }
   0xc   : > { %p291_p9 = pnand %p13728_p7, %p290_p8 }
   0xe   : > { %294 = sbr.rel (%p291_p9) target bundleno = 2185 (0x889), region = 56 }
  0x13   : > { %v18133_v0 = vld [vmem:[%s22654_s1 + $0x78] sm:$0xff]   ;;  %v18803_v1 = vmov 0.0   ;;  %v18135_v3 = vld [vmem:[%s22654_s1 + $0x70] sm:$0xff]   ;;  %vm18804_vm0 = vmmov 0   ;;  %p325_p10 = scmp.lt.s32.totalorder %s18880_s13, 1  ;;  %v18137_v5 = vld [vmem:[%s22654_s1 + $0x68] sm:$0xff]  }
  0x14   : > { %15755 = vmatprep.subr.bf16.mxu0 %v18803_v1  ;;  %331 = vst [vmem:[#allocation2 + $0x340] sm:$0xff] %v18803_v1  ;;  %15823 = vmatprep.subr.bf16.mxu1 %v18803_v1  ;;  %v18134_v2 = vld [vmem:[%s22654_s1 + $0x38] sm:$0xff]   ;;  %v18136_v4 = vld [vmem:[%s22654_s1 + $0x30] sm:$0xff]   ;;  %v18138_v6 = vld [vmem:[%s22654_s1 + $0x28] sm:$0xff]   ;;  %s18805_s28 = smov 64   ;;  %s18806_s29 = smov 32  }
  0x15   : > { %15756 = vmatpush3.bf16.msra.mxu0 %v18133_v0  ;;  %15771 = vmatprep.mubr.msk.bf16.mxu0 %vm18804_vm0, %v18803_v1  ;;  %s326_s21 = scalar_select %p325_p10, %s18880_s13, 1  ;;  %v18139_v7 = vld [vmem:[%s22654_s1 + $0x60] sm:$0xff]   ;;  %v18141_v9 = vld [vmem:[%s22654_s1 + $0x58] sm:$0xff]   ;;  %v18143_v11 = vld [vmem:[%s22654_s1 + $0x50] sm:$0xff]   ;;  %vm6596_vm1 = vcmask 261120   ;;  %vm6701_vm2 = vcmask 523264  }
  0x16   : > { %15824 = vmatpush3.bf16.msra.mxu1 %v18134_v2  ;;  %15757 = vmatprep.subr.bf16.mxu0 %v18803_v1  ;;  %v18140_v8 = vld [vmem:[%s22654_s1 + $0x20] sm:$0xff]   ;;  %v18142_v10 = vld [vmem:[%s22654_s1 + $0x18] sm:$0xff]   ;;  %v18144_v12 = vld [vmem:[%s22654_s1 + $0x10] sm:$0xff]   ;;  %vm6806_vm3 = vcmask 785408   ;;  %vm11171_vm4 = vcmask 1046528   ;;  %s18808_s24 = smov [#allocation10]  }
  0x17   : > { %15825 = vmatprep.subr.bf16.mxu1 %v18803_v1  ;;  %15839 = vmatprep.mubr.msk.bf16.mxu1 %vm18804_vm0, %v18803_v1  ;;  %s14489_s26 = sshll.u32 %s326_s21, 9  ;;  %v18145_v13 = vld [vmem:[%s22654_s1 + $0x48] sm:$0xff]   ;;  %v18147_v15 = vld [vmem:[%s22654_s1 + $0x40] sm:$0xff]   ;;  %v18151_v19 = vld [vmem:[%s22654_s1 + $0xb8] sm:$0xff]   ;;  %vm11397_vm5 = vsmask.f32 3328 }
  0x18   : > { %s18956_s22 = scalar_lea.vmem %s22653_s0, %s14489_s26  ;;  %v18146_v14 = vld [vmem:[%s22654_s1 + $0x8] sm:$0xff]   ;;  %v18148_v16 = vld [vmem:[%s22654_s1] sm:$0xff]   ;;  %v18152_v20 = vld [vmem:[%s22654_s1 + $0xf8] sm:$0xff]   ;;  %vm11398_vm6 = vsmask.f32 7440  ;;  %s18745_s25 = sshll.u32 %s18808_s24, 4  ;;  %s18746_s25 = int_to_ptr.vmem [resolvable:$false] %s18745_s25 }
  0x19   : > { %15758 = vmatpush3.bf16.msra.mxu0 %v18135_v3  ;;  %v18984_v17 = vld [vmem:[%s18956_s22 + $0x20] sm:$0xff]   ;;  %v18155_v21 = vld [vmem:[%s22654_s1 + $0xb0] sm:$0xff]   ;;  %v19008_v23 = vld [vmem:[%s18956_s22 + $0x28] sm:$0xff]  }
  0x1a   : > { %15826 = vmatpush3.bf16.msra.mxu1 %v18136_v4  ;;  %15759 = vmatprep.subr.bf16.mxu0 %v18803_v1  ;;  %v18150_v18 = vld [vmem:[%s18956_s22] sm:$0xff]   ;;  %v18158_v22 = vld [vmem:[%s22654_s1 + $0xf0] sm:$0xff]   ;;  %v18154_v24 = vld [vmem:[%s18956_s22 + $0x8] sm:$0xff]  }
  0x1b   : > { %15827 = vmatprep.subr.bf16.mxu1 %v18803_v1  ;;  %v18161_v25 = vld [vmem:[%s22654_s1 + $0xa8] sm:$0xff]   ;;  %v18165_v27 = vld [vmem:[%s22654_s1 + $0xa0] sm:$0xff]   ;;  %v18156_v29 = vld [vmem:[%s18956_s22 + $0x30] sm:$0xff]  }
  0x1c   : > { %v18162_v26 = vld [vmem:[%s22654_s1 + $0xe8] sm:$0xff]   ;;  %v18166_v28 = vld [vmem:[%s22654_s1 + $0xe0] sm:$0xff]   ;;  %v18157_v30 = vld [vmem:[%s18956_s22 + $0x10] sm:$0xff]  }
  0x1d   : > { %15760 = vmatpush3.bf16.msra.mxu0 %v18137_v5  ;;  %v18168_v31 = vld [vmem:[%s22654_s1 + $0x98] sm:$0xff]   ;;  %v18172_v33 = vld [vmem:[%s22654_s1 + $0x90] sm:$0xff]   ;;  %v18175_v37 = vld [vmem:[%s22654_s1 + $0x88] sm:$0xff]  }
  0x1e   : > { %15828 = vmatpush3.bf16.msra.mxu1 %v18138_v6  ;;  %15761 = vmatprep.subr.bf16.mxu0 %v18803_v1  ;;  %v18169_v32 = vld [vmem:[%s22654_s1 + $0xd8] sm:$0xff]   ;;  %v18173_v34 = vld [vmem:[%s22654_s1 + $0xd0] sm:$0xff]   ;;  %v18177_v38 = vld [vmem:[%s22654_s1 + $0xc8] sm:$0xff]  }
  0x1f   : > { %15829 = vmatprep.subr.bf16.mxu1 %v18803_v1  ;;  %v18159_v35 = vld [vmem:[%s18956_s22 + $0x38] sm:$0xff]   ;;  %v18179_v39 = vld [vmem:[%s22654_s1 + $0x80] sm:$0xff]   ;;  %v18164_v42 = vld [vmem:[%s18956_s22 + $0x48] sm:$0xff]  }
  0x20   : > { %v18160_v36 = vld [vmem:[%s18956_s22 + $0x18] sm:$0xff]   ;;  %v18180_v40 = vld [vmem:[%s22654_s1 + $0xc0] sm:$0xff]   ;;  %v18167_v43 = vld [vmem:[%s18956_s22 + $0x50] sm:$0xff]  }
  0x21   : > { %15762 = vmatpush3.bf16.msra.mxu0 %v18139_v7  ;;  %v18163_v41 = vld [vmem:[%s18956_s22 + $0x40] sm:$0xff]   ;;  %v18170_v44 = vld [vmem:[%s18956_s22 + $0x58] sm:$0xff]   ;;  %v18174_v46 = vld [vmem:[%s18956_s22 + $0x68] sm:$0xff]  }
  0x22   : > { %15830 = vmatpush3.bf16.msra.mxu1 %v18140_v8  ;;  %15763 = vmatprep.subr.bf16.mxu0 %v18803_v1  ;;  %v18171_v45 = vld [vmem:[%s18956_s22 + $0x60] sm:$0xff]   ;;  %v18176_v47 = vld [vmem:[%s18956_s22 + $0x70] sm:$0xff]   ;;  %v18178_v48 = vld [vmem:[%s18956_s22 + $0x78] sm:$0xff]  }
  0x23   : > { %15831 = vmatprep.subr.bf16.mxu1 %v18803_v1  ;;  %v18181_v49 = vld [vmem:[%s18956_s22 + $0x80] sm:$0xff]   ;;  %v18184_v52 = vld [vmem:[%s22654_s1 + $0x78] sm:$0xff]   ;;  %v18188_v54 = vld [vmem:[%s22654_s1 + $0x70] sm:$0xff]  }
  0x24   : > { %v18182_v50 = vld [vmem:[%s18956_s22 + $0x40] sm:$0xff]   ;;  %v18185_v53 = vld [vmem:[%s22654_s1 + $0x38] sm:$0xff]   ;;  %v18191_v55 = vld [vmem:[%s22654_s1 + $0x30] sm:$0xff]  }
  0x25   : > { %15764 = vmatpush3.bf16.msra.mxu0 %v18141_v9  ;;  %v18183_v51 = vld [vmem:[%s18956_s22 + $0x60] sm:$0xff]   ;;  %v18186_v56 = vld [vmem:[%s18956_s22 + $0x48] sm:$0xff]   ;;  %v18189_v63 = vld [vmem:[%s18956_s22 + $0x50] sm:$0xff]  }
  0x26   : > { %15832 = vmatpush3.bf16.msra.mxu1 %v18142_v10  ;;  %15765 = vmatprep.subr.bf16.mxu0 %v18803_v1  ;;  %v18187_v57 = vld [vmem:[%s18956_s22 + $0x68] sm:$0xff]   ;;  %v19148_v58 = vld [vmem:[#allocation2 + $0x340] sm:$0xff]  ;;  %v18190_v0 = vld [vmem:[%s18956_s22 + $0x70] sm:$0xff]  }
  0x27   : > { %15833 = vmatprep.subr.bf16.mxu1 %v18803_v1  ;;  %v18194_v59 = vld [vmem:[%s22654_s1 + $0x68] sm:$0xff]   ;;  %v18200_v61 = vld [vmem:[%s22654_s1 + $0x60] sm:$0xff]   ;;  %v18205_v2 = vld [vmem:[%s22654_s1 + $0x18] sm:$0xff]  }
  0x28   : > { %v18195_v60 = vld [vmem:[%s22654_s1 + $0x28] sm:$0xff]   ;;  %v18201_v62 = vld [vmem:[%s22654_s1 + $0x20] sm:$0xff]   ;;  %v18192_v3 = vld [vmem:[%s18956_s22 + $0x58] sm:$0xff]  }
  0x29   : > { %15766 = vmatpush3.bf16.msra.mxu0 %v18143_v11  ;;  %v18210_v4 = vld [vmem:[%s22654_s1 + $0x50] sm:$0xff]   ;;  %v18193_v5 = vld [vmem:[%s18956_s22 + $0x78] sm:$0xff]   ;;  %v18214_v7 = vld [vmem:[%s22654_s1 + $0x48] sm:$0xff]  }
  0x2a   : > { %15834 = vmatpush3.bf16.msra.mxu1 %v18144_v12  ;;  %15767 = vmatprep.subr.bf16.mxu0 %v18803_v1  ;;  %v18211_v6 = vld [vmem:[%s22654_s1 + $0x10] sm:$0xff]   ;;  %v18217_v8 = vld [vmem:[%s22654_s1 + $0x8] sm:$0xff]   ;;  %v18220_v9 = vld [vmem:[%s22654_s1 + $0x40] sm:$0xff]  }
  0x2b   : > { %15835 = vmatprep.subr.bf16.mxu1 %v18803_v1  ;;  %v18221_v10 = vld [vmem:[%s22654_s1] sm:$0xff]   ;;  %vm21849_vm7 = vmor %vm11397_vm5, %vm11398_vm6 }
  0x2c   : > { %v18196_v11 = vld [vmem:[%s18956_s22 + $0x60] sm:$0xff]  }
  0x2d   : > { %15768 = vmatpush3.bf16.msra.mxu0 %v18145_v13  ;;  %v18197_v12 = vld [vmem:[%s18956_s22 + $0x80] sm:$0xff]   ;;  %v18198_v13 = vld [vmem:[%s18956_s22 + $0x68] sm:$0xff]  }
  0x2e   : > { %15836 = vmatpush3.bf16.msra.mxu1 %v18146_v14  ;;  %15769 = vmatprep.subr.bf16.mxu0 %v18803_v1  ;;  %v18199_v14 = vld [vmem:[%s18956_s22 + $0x88] sm:$0xff]  }
  0x2f   : > { %15837 = vmatprep.subr.bf16.mxu1 %v18803_v1 }
  0x31   : > { %15770 = vmatpush3.bf16.msra.mxu0 %v18147_v15  ;;  %v18202_v15 = vld [vmem:[%s18956_s22 + $0x70] sm:$0xff]  }
  0x32   : > { %15838 = vmatpush3.bf16.msra.mxu1 %v18148_v16  ;;  %15891 = vmatprep.subr.bf16.mxu0 %v18803_v1  ;;  %v18203_v16 = vld [vmem:[%s18956_s22 + $0x90] sm:$0xff]  }
  0x33   : > { %15959 = vmatprep.subr.bf16.mxu1 %v18803_v1 }
  0x34   : > { %15772 = vmatmul.mubr.bf16.vlgmr.msra.gmra.mxu0 %v18984_v17 }
  0x35   : > { %15840 = vmatmul.mubr.bf16.vlgmr.msra.gmra.mxu1 %v18150_v18  ;;  %15892 = vmatpush3.bf16.msra.mxu0 %v18151_v19  ;;  %v18207_v18 = vld [vmem:[%s18956_s22 + $0x98] sm:$0xff]   ;;  %v18208_v19 = vld [vmem:[%s18956_s22 + $0x80] sm:$0xff]  }
  0x36   : > { %15960 = vmatpush3.bf16.msra.mxu1 %v18152_v20  ;;  %15775 = vmatprep.mubr.msk.bf16.mxu0 %vm18804_vm0, %v18803_v1  ;;  %v18209_v20 = vld [vmem:[%s18956_s22 + $0xa0] sm:$0xff]  }
  0x37   : > { %15843 = vmatprep.mubr.msk.bf16.mxu1 %vm18804_vm0, %v18803_v1  ;;  %15893 = vmatprep.subr.bf16.mxu0 %v18803_v1 }
  0x38   : > { %15961 = vmatprep.subr.bf16.mxu1 %v18803_v1 }
  0x39   : > { %15894 = vmatpush3.bf16.msra.mxu0 %v18155_v21  ;;  %v18212_v21 = vld [vmem:[%s18956_s22 + $0x88] sm:$0xff]  }
  0x3a   : > { %15962 = vmatpush3.bf16.msra.mxu1 %v18158_v22  ;;  %15895 = vmatprep.subr.bf16.mxu0 %v18803_v1  ;;  %v18213_v22 = vld [vmem:[%s18956_s22 + $0xa8] sm:$0xff]  }
  0x3b   : > { %15963 = vmatprep.subr.bf16.mxu1 %v18803_v1 }
  0x3c   : > { %15776 = vmatmul.mubr.bf16.gmra.mxu0 %v19008_v23 }
  0x3d   : > { %15844 = vmatmul.mubr.bf16.gmra.mxu1 %v18154_v24  ;;  %15779 = vmatprep.mubr.msk.bf16.mxu0 %vm18804_vm0, %v18803_v1  ;;  %v18216_v24 = vld [vmem:[%s18956_s22 + $0xb0] sm:$0xff]  }
  0x3e   : > { %15847 = vmatprep.mubr.msk.bf16.mxu1 %vm18804_vm0, %v18803_v1  ;;  %15896 = vmatpush3.bf16.msra.mxu0 %v18161_v25  ;;  %v18218_v25 = vld [vmem:[%s18956_s22 + $0x98] sm:$0xff]  }
  0x3f   : > { %15964 = vmatpush3.bf16.msra.mxu1 %v18162_v26  ;;  %15897 = vmatprep.subr.bf16.mxu0 %v18803_v1  ;;  %v18219_v26 = vld [vmem:[%s18956_s22 + $0xb8] sm:$0xff]  }
  0x40   : > { %15965 = vmatprep.subr.bf16.mxu1 %v18803_v1 }
  0x42   : > { %15898 = vmatpush3.bf16.msra.mxu0 %v18165_v27 }
  0x43   : > { %15966 = vmatpush3.bf16.msra.mxu1 %v18166_v28  ;;  %15899 = vmatprep.subr.bf16.mxu0 %v18803_v1 }
  0x44   : > { %15780 = vmatmul.mubr.bf16.gmra.mxu0 %v18156_v29  ;;  %15967 = vmatprep.subr.bf16.mxu1 %v18803_v1 }
  0x45   : > { %15848 = vmatmul.mubr.bf16.gmra.mxu1 %v18157_v30  ;;  %15783 = vmatprep.mubr.msk.bf16.mxu0 %vm18804_vm0, %v18803_v1 }
  0x46   : > { %15851 = vmatprep.mubr.msk.bf16.mxu1 %vm18804_vm0, %v18803_v1  ;;  %15900 = vmatpush3.bf16.msra.mxu0 %v18168_v31  ;;  %v18222_v31 = vld [vmem:[%s18956_s22 + $0xa0] sm:$0xff]  }
  0x47   : > { %15968 = vmatpush3.bf16.msra.mxu1 %v18169_v32  ;;  %15901 = vmatprep.subr.bf16.mxu0 %v18803_v1 }
  0x48   : > { %15969 = vmatprep.subr.bf16.mxu1 %v18803_v1 }
  0x4a   : > { %15902 = vmatpush3.bf16.msra.mxu0 %v18172_v33  ;;  %v18223_v33 = vld [vmem:[%s18956_s22 + $0xc0] sm:$0xff]  }
  0x4b   : > { %15970 = vmatpush3.bf16.msra.mxu1 %v18173_v34  ;;  %15903 = vmatprep.subr.bf16.mxu0 %v18803_v1 }
  0x4c   : > { %15784 = vmatmul.mubr.bf16.gmra.mxu0 %v18159_v35  ;;  %15971 = vmatprep.subr.bf16.mxu1 %v18803_v1 }
  0x4d   : > { %15852 = vmatmul.mubr.bf16.gmra.mxu1 %v18160_v36  ;;  %15787 = vmatprep.mubr.msk.bf16.mxu0 %vm18804_vm0, %v18803_v1 }
  0x4e   : > { %15855 = vmatprep.mubr.msk.bf16.mxu1 %vm18804_vm0, %v18803_v1  ;;  %15904 = vmatpush3.bf16.msra.mxu0 %v18175_v37 }
  0x4f   : > { %15972 = vmatpush3.bf16.msra.mxu1 %v18177_v38  ;;  %15905 = vmatprep.subr.bf16.mxu0 %v18803_v1 }
  0x50   : > { %15973 = vmatprep.subr.bf16.mxu1 %v18803_v1 }
  0x52   : > { %15906 = vmatpush3.bf16.msra.mxu0 %v18179_v39 }
  0x53   : > { %15974 = vmatpush3.bf16.msra.mxu1 %v18180_v40  ;;  %16027 = vmatprep.subr.bf16.mxu0 %v18803_v1 }
  0x54   : > { %15788 = vmatmul.mubr.bf16.gmra.mxu0 %v18163_v41  ;;  %16095 = vmatprep.subr.bf16.mxu1 %v18803_v1 }
  0x55   : > { %15856 = vmatmul.mubr.bf16.gmra.mxu1 %v18984_v17  ;;  %15791 = vmatprep.mubr.msk.bf16.mxu0 %vm18804_vm0, %v18803_v1  ;;  %v18206_v17 = vld [vmem:[%s18956_s22 + $0x78] sm:$0xff]  }
  0x56   : > { %15859 = vmatprep.mubr.msk.bf16.mxu1 %vm18804_vm0, %v18803_v1 }
  0x5c   : > { %15792 = vmatmul.mubr.bf16.gmra.mxu0 %v18164_v42 }
  0x5d   : > { %15860 = vmatmul.mubr.bf16.gmra.mxu1 %v19008_v23  ;;  %15795 = vmatprep.mubr.msk.bf16.mxu0 %vm18804_vm0, %v18803_v1  ;;  %v18215_v23 = vld [vmem:[%s18956_s22 + $0x90] sm:$0xff]  }
  0x5e   : > { %15863 = vmatprep.mubr.msk.bf16.mxu1 %vm18804_vm0, %v18803_v1 }
  0x64   : > { %15796 = vmatmul.mubr.bf16.gmra.mxu0 %v18167_v43 }
  0x65   : > { %15864 = vmatmul.mubr.bf16.gmra.mxu1 %v18156_v29  ;;  %15799 = vmatprep.mubr.msk.bf16.mxu0 %vm18804_vm0, %v18803_v1 }
  0x66   : > { %15867 = vmatprep.mubr.msk.bf16.mxu1 %vm18804_vm0, %v18803_v1 }
  0x6c   : > { %15800 = vmatmul.mubr.bf16.gmra.mxu0 %v18170_v44 }
  0x6d   : > { %15868 = vmatmul.mubr.bf16.gmra.mxu1 %v18159_v35  ;;  %15803 = vmatprep.mubr.msk.bf16.mxu0 %vm18804_vm0, %v18803_v1 }
  0x6e   : > { %15871 = vmatprep.mubr.msk.bf16.mxu1 %vm18804_vm0, %v18803_v1 }
  0x74   : > { %15804 = vmatmul.mubr.bf16.gmra.mxu0 %v18171_v45 }
  0x75   : > { %15872 = vmatmul.mubr.bf16.gmra.mxu1 %v18163_v41  ;;  %15807 = vmatprep.mubr.msk.bf16.mxu0 %vm18804_vm0, %v18803_v1 }
  0x76   : > { %15875 = vmatprep.mubr.msk.bf16.mxu1 %vm18804_vm0, %v18803_v1 }
  0x7c   : > { %15808 = vmatmul.mubr.bf16.gmra.mxu0 %v18174_v46  ;;  %v18226_v46 = vld [vmem:[%s22654_s1 + $0xb8] sm:$0xff]  }
  0x7d   : > { %15876 = vmatmul.mubr.bf16.gmra.mxu1 %v18164_v42  ;;  %15811 = vmatprep.mubr.msk.bf16.mxu0 %vm18804_vm0, %v18803_v1 }
  0x7e   : > { %15879 = vmatprep.mubr.msk.bf16.mxu1 %vm18804_vm0, %v18803_v1 }
  0x84   : > { %15812 = vmatmul.mubr.bf16.gmra.mxu0 %v18176_v47 }
  0x85   : > { %15880 = vmatmul.mubr.bf16.gmra.mxu1 %v18167_v43  ;;  %15815 = vmatprep.mubr.msk.bf16.mxu0 %vm18804_vm0, %v18803_v1  ;;  %v19277_v43 = vld [vmem:[%s18956_s22 + $0x88] sm:$0xff]  }
  0x86   : > { %15883 = vmatprep.mubr.msk.bf16.mxu1 %vm18804_vm0, %v18803_v1 }
  0x8c   : > { %15816 = vmatmul.mubr.bf16.gmra.mxu0 %v18178_v48 }
  0x8d   : > { %15884 = vmatmul.mubr.bf16.gmra.mxu1 %v18170_v44  ;;  %15819 = vmatprep.mubr.msk.bf16.mxu0 %vm18804_vm0, %v18803_v1 }
  0x8e   : > { %15887 = vmatprep.mubr.msk.bf16.mxu1 %vm18804_vm0, %v18803_v1 }
  0x94   : > { %15820 = vmatmul.mubr.bf16.gmra.mxu0 %v18181_v49  ;;  %v18227_v49 = vld [vmem:[%s22654_s1 + $0xf8] sm:$0xff]  }
  0x95   : > { %15888 = vmatmul.mubr.bf16.gmra.mxu1 %v18171_v45  ;;  %15907 = vmatprep.mubr.msk.bf16.mxu0 %vm18804_vm0, %v18803_v1  ;;  %v18225_v45 = vld [vmem:[%s18956_s22 + $0x68] sm:$0xff]  }
  0x96   : > { %15975 = vmatprep.mubr.msk.bf16.mxu1 %vm18804_vm0, %v18803_v1 }
  0x9c   : > { %15908 = vmatmul.mubr.bf16.vlgmr.msra.gmra.mxu0 %v18182_v50 }
  0x9d   : > { %15976 = vmatmul.mubr.bf16.vlgmr.msra.gmra.mxu1 %v18183_v51  ;;  %16028 = vmatpush3.bf16.msra.mxu0 %v18184_v52 }
  0x9e   : > { %16096 = vmatpush3.bf16.msra.mxu1 %v18185_v53  ;;  %15911 = vmatprep.mubr.msk.bf16.mxu0 %vm18804_vm0, %v18803_v1  ;;  %v18230_v53 = vld [vmem:[%s22654_s1 + $0xb0] sm:$0xff]  }
  0x9f   : > { %15979 = vmatprep.mubr.msk.bf16.mxu1 %vm18804_vm0, %v18803_v1  ;;  %16029 = vmatprep.subr.bf16.mxu0 %v18803_v1 }
  0xa0   : > { %16097 = vmatprep.subr.bf16.mxu1 %v18803_v1  ;;  %v18204_v1 = vld [vmem:[%s22654_s1 + $0x58] sm:$0xff]  }
  0xa1   : > { %16030 = vmatpush3.bf16.msra.mxu0 %v18188_v54 }
  0xa2   : > { %16098 = vmatpush3.bf16.msra.mxu1 %v18191_v55  ;;  %16031 = vmatprep.subr.bf16.mxu0 %v19148_v58 }
  0xa3   : > { %16099 = vmatprep.subr.bf16.mxu1 %v19148_v58 }
  0xa4   : > { %15912 = vmatmul.mubr.bf16.gmra.mxu0 %v18186_v56  ;;  %v18233_v56 = vld [vmem:[%s22654_s1 + $0xf0] sm:$0xff]  }
  0xa5   : > { %15980 = vmatmul.mubr.bf16.gmra.mxu1 %v18187_v57  ;;  %15915 = vmatprep.mubr.msk.bf16.mxu0 %vm18804_vm0, %v19148_v58 }
  0xa6   : > { %15983 = vmatprep.mubr.msk.bf16.mxu1 %vm18804_vm0, %v19148_v58  ;;  %16032 = vmatpush3.bf16.msra.mxu0 %v18194_v59 }
  0xa7   : > { %16100 = vmatpush3.bf16.msra.mxu1 %v18195_v60  ;;  %16033 = vmatprep.subr.bf16.mxu0 %v19148_v58  ;;  %v19300_v60 = vld [vmem:[%s18956_s22 + $0x90] sm:$0xff]  }
  0xa8   : > { %16101 = vmatprep.subr.bf16.mxu1 %v19148_v58 }
  0xaa   : > { %16034 = vmatpush3.bf16.msra.mxu0 %v18200_v61 }
  0xab   : > { %16102 = vmatpush3.bf16.msra.mxu1 %v18201_v62  ;;  %16035 = vmatprep.subr.bf16.mxu0 %v19148_v58  ;;  %v18229_v62 = vld [vmem:[%s18956_s22 + $0x70] sm:$0xff]  }
  0xac   : > { %15916 = vmatmul.mubr.bf16.gmra.mxu0 %v18189_v63  ;;  %16103 = vmatprep.subr.bf16.mxu1 %v19148_v58 }
  0xad   : > { %15984 = vmatmul.mubr.bf16.gmra.mxu1 %v18190_v0  ;;  %15919 = vmatprep.mubr.msk.bf16.mxu0 %vm18804_vm0, %v19148_v58  ;;  %v18236_v0 = vld [vmem:[%s22654_s1 + $0xa8] sm:$0xff]  }
  0xae   : > { %15987 = vmatprep.mubr.msk.bf16.mxu1 %vm18804_vm0, %v19148_v58  ;;  %16036 = vmatpush3.bf16.msra.mxu0 %v18204_v1 }
  0xaf   : > { %16104 = vmatpush3.bf16.msra.mxu1 %v18205_v2  ;;  %16037 = vmatprep.subr.bf16.mxu0 %v19148_v58 }
  0xb0   : > { %16105 = vmatprep.subr.bf16.mxu1 %v19148_v58 }
  0xb2   : > { %16038 = vmatpush3.bf16.msra.mxu0 %v18210_v4 }
  0xb3   : > { %16106 = vmatpush3.bf16.msra.mxu1 %v18211_v6  ;;  %16039 = vmatprep.subr.bf16.mxu0 %v19148_v58 }
  0xb4   : > { %15920 = vmatmul.mubr.bf16.gmra.mxu0 %v18192_v3  ;;  %16107 = vmatprep.subr.bf16.mxu1 %v19148_v58 }
  0xb5   : > { %15988 = vmatmul.mubr.bf16.gmra.mxu1 %v18193_v5  ;;  %15923 = vmatprep.mubr.msk.bf16.mxu0 %vm18804_vm0, %v19148_v58  ;;  %v18237_v5 = vld [vmem:[%s22654_s1 + $0xe8] sm:$0xff]  }
  0xb6   : > { %15991 = vmatprep.mubr.msk.bf16.mxu1 %vm18804_vm0, %v19148_v58  ;;  %16040 = vmatpush3.bf16.msra.mxu0 %v18214_v7  ;;  %v18240_v7 = vld [vmem:[%s22654_s1 + $0xa0] sm:$0xff]  }
  0xb7   : > { %16108 = vmatpush3.bf16.msra.mxu1 %v18217_v8  ;;  %16041 = vmatprep.subr.bf16.mxu0 %v19148_v58 }
  0xb8   : > { %16109 = vmatprep.subr.bf16.mxu1 %v19148_v58 }
  0xba   : > { %16042 = vmatpush3.bf16.msra.mxu0 %v18220_v9  ;;  %v18241_v9 = vld [vmem:[%s22654_s1 + $0xe0] sm:$0xff]  }
  0xbb   : > { %16110 = vmatpush3.bf16.msra.mxu1 %v18221_v10  ;;  %16163 = vmatprep.subr.bf16.mxu0 %v19148_v58 }
  0xbc   : > { %15924 = vmatmul.mubr.bf16.gmra.mxu0 %v18196_v11  ;;  %16231 = vmatprep.subr.bf16.mxu1 %v19148_v58 }
  0xbd   : > { %15992 = vmatmul.mubr.bf16.gmra.mxu1 %v18197_v12  ;;  %15927 = vmatprep.mubr.msk.bf16.mxu0 %vm18804_vm0, %v19148_v58  ;;  %v19331_v12 = vld [vmem:[%s18956_s22 + $0x98] sm:$0xff]  }
  0xbe   : > { %15995 = vmatprep.mubr.msk.bf16.mxu1 %vm18804_vm0, %v19148_v58 }
  0xc4   : > { %15928 = vmatmul.mubr.bf16.gmra.mxu0 %v18198_v13 }
  0xc5   : > { %15996 = vmatmul.mubr.bf16.gmra.mxu1 %v18199_v14  ;;  %15931 = vmatprep.mubr.msk.bf16.mxu0 %vm18804_vm0, %v19148_v58  ;;  %v18232_v14 = vld [vmem:[%s18956_s22 + $0x78] sm:$0xff]  }
  0xc6   : > { %15999 = vmatprep.mubr.msk.bf16.mxu1 %vm18804_vm0, %v19148_v58 }
  0xcc   : > { %15932 = vmatmul.mubr.bf16.gmra.mxu0 %v18202_v15 }
  0xcd   : > { %16000 = vmatmul.mubr.bf16.gmra.mxu1 %v18203_v16  ;;  %15935 = vmatprep.mubr.msk.bf16.mxu0 %vm18804_vm0, %v19148_v58 }
  0xce   : > { %16003 = vmatprep.mubr.msk.bf16.mxu1 %vm18804_vm0, %v19148_v58 }
  0xd4   : > { %15936 = vmatmul.mubr.bf16.gmra.mxu0 %v18206_v17  ;;  %v18243_v17 = vld [vmem:[%s22654_s1 + $0x98] sm:$0xff]  }
  0xd5   : > { %16004 = vmatmul.mubr.bf16.gmra.mxu1 %v18207_v18  ;;  %15939 = vmatprep.mubr.msk.bf16.mxu0 %vm18804_vm0, %v19148_v58 }
  0xd6   : > { %16007 = vmatprep.mubr.msk.bf16.mxu1 %vm18804_vm0, %v19148_v58 }
  0xdc   : > { %15940 = vmatmul.mubr.bf16.gmra.mxu0 %v18208_v19 }
  0xdd   : > { %16008 = vmatmul.mubr.bf16.gmra.mxu1 %v18209_v20  ;;  %15943 = vmatprep.mubr.msk.bf16.mxu0 %vm18804_vm0, %v19148_v58 }
  0xde   : > { %16011 = vmatprep.mubr.msk.bf16.mxu1 %vm18804_vm0, %v19148_v58 }
  0xe4   : > { %15944 = vmatmul.mubr.bf16.gmra.mxu0 %v18212_v21  ;;  %v18244_v21 = vld [vmem:[%s22654_s1 + $0xd8] sm:$0xff]  }
  0xe5   : > { %16012 = vmatmul.mubr.bf16.gmra.mxu1 %v18213_v22  ;;  %15947 = vmatprep.mubr.msk.bf16.mxu0 %vm18804_vm0, %v19148_v58 }
  0xe6   : > { %16015 = vmatprep.mubr.msk.bf16.mxu1 %vm18804_vm0, %v19148_v58 }
  0xec   : > { %15948 = vmatmul.mubr.bf16.gmra.mxu0 %v18215_v23  ;;  %v18247_v23 = vld [vmem:[%s22654_s1 + $0x90] sm:$0xff]  }
  0xed   : > { %16016 = vmatmul.mubr.bf16.gmra.mxu1 %v18216_v24  ;;  %15951 = vmatprep.mubr.msk.bf16.mxu0 %vm18804_vm0, %v19148_v58 }
  0xee   : > { %16019 = vmatprep.mubr.msk.bf16.mxu1 %vm18804_vm0, %v19148_v58 }
  0xf4   : > { %v560_v27 = vpop.f32.mrf.mxu0  ;;  %15952 = vmatmul.mubr.bf16.gmra.mxu0 %v18218_v25  ;;  %v18248_v25 = vld [vmem:[%s22654_s1 + $0xd0] sm:$0xff]  }
  0xf5   : > { %v769_v28 = vpop.f32.mrf.mxu1  ;;  %16020 = vmatmul.mubr.bf16.gmra.mxu1 %v18219_v26  ;;  %15955 = vmatprep.mubr.msk.bf16.mxu0 %vm18804_vm0, %v19148_v58 }
  0xf6   : > { %v19262_v29 = vadd.f32 %v769_v28, %v560_v27  ;;  %v15773_v30 = vpop.f32.mrf.mxu0  ;;  %16023 = vmatprep.mubr.msk.bf16.mxu1 %vm18804_vm0, %v19148_v58  ;;  %v19360_v28 = vld [vmem:[%s18956_s22 + $0xa0] sm:$0xff]  }
  0xf7   : > { %v15841_v32 = vpop.f32.mrf.mxu1 }
  0xf8   : > { %v563_v34 = vpop.f32.mrf.mxu0  ;;  %v19363_v32 = vld [vmem:[#allocation2 + $0x340] sm:$0xff] }
  0xf9   : > { %v772_v35 = vpop.f32.mrf.mxu1 }
  0xfa   : > { %v19268_v36 = vadd.f32 %v772_v35, %v563_v34  ;;  %v15774_v37 = vpop.f32.mrf.mxu0  ;;  %v18250_v34 = vld [vmem:[%s22654_s1 + $0x88] sm:$0xff]  }
  0xfb   : > { %v15842_v38 = vpop.f32.mrf.mxu1 }
  0xfc   : > { %v568_v39 = vpop.f32.mrf.mxu0  ;;  %15956 = vmatmul.mubr.bf16.gmra.mxu0 %v18222_v31  ;;  %v18235_v31 = vld [vmem:[%s18956_s22 + $0x80] sm:$0xff]  }
  0xfd   : > { %v777_v40 = vpop.f32.mrf.mxu1  ;;  %16024 = vmatmul.mubr.bf16.gmra.mxu1 %v18223_v33  ;;  %16043 = vmatprep.mubr.msk.bf16.mxu0 %vm18804_vm0, %v19148_v58 }
  0xfe   : > { %v19272_v41 = vadd.f32 %v777_v40, %v568_v39  ;;  %v15777_v42 = vpop.f32.mrf.mxu0  ;;  %16111 = vmatprep.mubr.msk.bf16.mxu1 %vm18804_vm0, %v19148_v58  ;;  %v18252_v39 = vld [vmem:[%s22654_s1 + $0xc8] sm:$0xff]  }
  0xff   : > { %v15845_v44 = vpop.f32.mrf.mxu1 }
 0x100   : > { %v571_v47 = vpop.f32.mrf.mxu0  ;;  %v18254_v44 = vld [vmem:[%s22654_s1 + $0x80] sm:$0xff]  }
 0x101   : > { %v780_v48 = vpop.f32.mrf.mxu1 }
 0x102   : > { %v19286_v50 = vadd.f32 %v780_v48, %v571_v47  ;;  %v15778_v51 = vpop.f32.mrf.mxu0  ;;  %v19391_v48 = vld [vmem:[%s18956_s22 + $0xa8] sm:$0xff]  }
 0x103   : > { %v15846_v52 = vpop.f32.mrf.mxu1 }
 0x104   : > { %v576_v54 = vpop.f32.mrf.mxu0  ;;  %16044 = vmatmul.mubr.bf16.vlgmr.msra.gmra.mxu0 %v19277_v43 }
 0x105   : > { %v785_v55 = vpop.f32.mrf.mxu1  ;;  %16112 = vmatmul.mubr.bf16.vlgmr.msra.gmra.mxu1 %v18225_v45  ;;  %16164 = vmatpush3.bf16.msra.mxu0 %v18226_v46  ;;  %v18255_v45 = vld [vmem:[%s22654_s1 + $0xc0] sm:$0xff]  }
 0x106   : > { %v19295_v57 = vadd.f32 %v785_v55, %v576_v54  ;;  %v15781_v59 = vpop.f32.mrf.mxu0  ;;  %16232 = vmatpush3.bf16.msra.mxu1 %v18227_v49  ;;  %16047 = vmatprep.mubr.msk.bf16.mxu0 %vm18804_vm0, %v19148_v58 }
 0x107   : > { %v15849_v61 = vpop.f32.mrf.mxu1  ;;  %16115 = vmatprep.mubr.msk.bf16.mxu1 %vm18804_vm0, %v19148_v58  ;;  %16165 = vmatprep.subr.bf16.mxu0 %v19148_v58 }
 0x108   : > { %v579_v63 = vpop.f32.mrf.mxu0  ;;  %16233 = vmatprep.subr.bf16.mxu1 %v19148_v58 }
 0x109   : > { %v788_v1 = vpop.f32.mrf.mxu1  ;;  %16166 = vmatpush3.bf16.msra.mxu0 %v18230_v53 }
 0x10a   : > { %v19310_v2 = vadd.f32 %v788_v1, %v579_v63  ;;  %v15782_v3 = vpop.f32.mrf.mxu0  ;;  %16234 = vmatpush3.bf16.msra.mxu1 %v18233_v56  ;;  %16167 = vmatprep.subr.bf16.mxu0 %v19148_v58  ;;  %v19408_v63 = vld [vmem:[%s18956_s22 + $0xb0] sm:$0xff]  }
 0x10b   : > { %v15850_v4 = vpop.f32.mrf.mxu1  ;;  %16235 = vmatprep.subr.bf16.mxu1 %v19148_v58 }
 0x10c   : > { %v584_v6 = vpop.f32.mrf.mxu0  ;;  %16048 = vmatmul.mubr.bf16.gmra.mxu0 %v19300_v60 }
 0x10d   : > { %v793_v8 = vpop.f32.mrf.mxu1  ;;  %16116 = vmatmul.mubr.bf16.gmra.mxu1 %v18229_v62  ;;  %16051 = vmatprep.mubr.msk.bf16.mxu0 %vm18804_vm0, %v19148_v58 }
 0x10e   : > { %v19326_v10 = vadd.f32 %v793_v8, %v584_v6  ;;  %v15785_v11 = vpop.f32.mrf.mxu0  ;;  %16119 = vmatprep.mubr.msk.bf16.mxu1 %vm18804_vm0, %v19148_v58  ;;  %16168 = vmatpush3.bf16.msra.mxu0 %v18236_v0 }
 0x10f   : > { %v15853_v13 = vpop.f32.mrf.mxu1  ;;  %16236 = vmatpush3.bf16.msra.mxu1 %v18237_v5  ;;  %16169 = vmatprep.subr.bf16.mxu0 %v19148_v58  ;;  %v19421_v11 = vld [vmem:[%s18956_s22 + $0xb8] sm:$0xff]  }
 0x110   : > { %v587_v15 = vpop.f32.mrf.mxu0  ;;  %16237 = vmatprep.subr.bf16.mxu1 %v19148_v58 }
 0x111   : > { %v796_v16 = vpop.f32.mrf.mxu1 }
 0x112   : > { %v19339_v18 = vadd.f32 %v796_v16, %v587_v15  ;;  %v15786_v19 = vpop.f32.mrf.mxu0  ;;  %16170 = vmatpush3.bf16.msra.mxu0 %v18240_v7 }
 0x113   : > { %v15854_v20 = vpop.f32.mrf.mxu1  ;;  %16238 = vmatpush3.bf16.msra.mxu1 %v18241_v9  ;;  %16171 = vmatprep.subr.bf16.mxu0 %v19148_v58 }
 0x114   : > { %v592_v22 = vpop.f32.mrf.mxu0  ;;  %16052 = vmatmul.mubr.bf16.gmra.mxu0 %v19331_v12  ;;  %16239 = vmatprep.subr.bf16.mxu1 %v19148_v58 }
 0x115   : > { %v801_v24 = vpop.f32.mrf.mxu1  ;;  %16120 = vmatmul.mubr.bf16.gmra.mxu1 %v18232_v14  ;;  %16055 = vmatprep.mubr.msk.bf16.mxu0 %vm18804_vm0, %v19148_v58 }
 0x116   : > { %v19355_v26 = vadd.f32 %v801_v24, %v592_v22  ;;  %v15789_v27 = vpop.f32.mrf.mxu0  ;;  %16123 = vmatprep.mubr.msk.bf16.mxu1 %vm18804_vm0, %v19148_v58  ;;  %16172 = vmatpush3.bf16.msra.mxu0 %v18243_v17 }
 0x117   : > { %v15857_v30 = vpop.f32.mrf.mxu1  ;;  %16240 = vmatpush3.bf16.msra.mxu1 %v18244_v21  ;;  %16173 = vmatprep.subr.bf16.mxu0 %v19363_v32 }
 0x118   : > { %v595_v33 = vpop.f32.mrf.mxu0  ;;  %16241 = vmatprep.subr.bf16.mxu1 %v19363_v32 }
 0x119   : > { %v804_v35 = vpop.f32.mrf.mxu1 }
 0x11a   : > { %v19370_v37 = vadd.f32 %v804_v35, %v595_v33  ;;  %v15790_v58 = vpop.f32.mrf.mxu0  ;;  %16174 = vmatpush3.bf16.msra.mxu0 %v18247_v23  ;;  %v19434_v23 = vld [vmem:[%s18956_s22 + $0xc0] sm:$0xff]  }
 0x11b   : > { %v15858_v38 = vpop.f32.mrf.mxu1  ;;  %16242 = vmatpush3.bf16.msra.mxu1 %v18248_v25  ;;  %16175 = vmatprep.subr.bf16.mxu0 %v19363_v32 }
 0x11c   : > { %v600_v40 = vpop.f32.mrf.mxu0  ;;  %16056 = vmatmul.mubr.bf16.gmra.mxu0 %v19360_v28  ;;  %16243 = vmatprep.subr.bf16.mxu1 %v19363_v32  ;;  %v19447_v38 = vld [vmem:[%s18956_s22 + $0xc8] sm:$0xff]  }
 0x11d   : > { %v809_v42 = vpop.f32.mrf.mxu1  ;;  %16124 = vmatmul.mubr.bf16.gmra.mxu1 %v18235_v31  ;;  %16059 = vmatprep.mubr.msk.bf16.mxu0 %vm18804_vm0, %v19363_v32 }
 0x11e   : > { %v19386_v46 = vadd.f32 %v809_v42, %v600_v40  ;;  %v15793_v47 = vpop.f32.mrf.mxu0  ;;  %16127 = vmatprep.mubr.msk.bf16.mxu1 %vm18804_vm0, %v19363_v32  ;;  %16176 = vmatpush3.bf16.msra.mxu0 %v18250_v34 }
 0x11f   : > { %v15861_v49 = vpop.f32.mrf.mxu1  ;;  %16244 = vmatpush3.bf16.msra.mxu1 %v18252_v39  ;;  %16177 = vmatprep.subr.bf16.mxu0 %v19363_v32 }
 0x120   : > { %v603_v51 = vpop.f32.mrf.mxu0  ;;  %16245 = vmatprep.subr.bf16.mxu1 %v19363_v32 }
 0x121   : > { %v812_v52 = vpop.f32.mrf.mxu1 }
 0x122   : > { %v19395_v53 = vadd.f32 %v812_v52, %v603_v51  ;;  %v15794_v54 = vpop.f32.mrf.mxu0  ;;  %16178 = vmatpush3.bf16.msra.mxu0 %v18254_v44 }
 0x123   : > { %v15862_v55 = vpop.f32.mrf.mxu1  ;;  %16246 = vmatpush3.bf16.msra.mxu1 %v18255_v45  ;;  %16299 = vmatprep.subr.bf16.mxu0 %v19363_v32  ;;  %v18249_v54 = vld [vmem:[%s18956_s22 + $0xd0] sm:$0xff]  }
 0x124   : > { %v608_v56 = vpop.f32.mrf.mxu0  ;;  %16060 = vmatmul.mubr.bf16.gmra.mxu0 %v19391_v48  ;;  %16367 = vmatprep.subr.bf16.mxu1 %v19363_v32 }
 0x125   : > { %v817_v59 = vpop.f32.mrf.mxu1  ;;  %16128 = vmatmul.mubr.bf16.gmra.mxu1 %v19277_v43  ;;  %16063 = vmatprep.mubr.msk.bf16.mxu0 %vm18804_vm0, %v19363_v32 }
 0x126   : > { %v19403_v61 = vadd.f32 %v817_v59, %v608_v56  ;;  %v15797_v62 = vpop.f32.mrf.mxu0  ;;  %16131 = vmatprep.mubr.msk.bf16.mxu1 %vm18804_vm0, %v19363_v32 }
 0x127   : > { %v15865_v0 = vpop.f32.mrf.mxu1 }
 0x128   : > { %v611_v1 = vpop.f32.mrf.mxu0 }
 0x129   : > { %v820_v3 = vpop.f32.mrf.mxu1 }
 0x12a   : > { %v19410_v4 = vadd.f32 %v820_v3, %v611_v1  ;;  %v15798_v5 = vpop.f32.mrf.mxu0 }
 0x12b   : > { %v15866_v6 = vpop.f32.mrf.mxu1 }
 0x12c   : > { %v616_v43 = vpop.f32.mrf.mxu0  ;;  %16064 = vmatmul.mubr.bf16.gmra.mxu0 %v19408_v63 }
 0x12d   : > { %v825_v7 = vpop.f32.mrf.mxu1  ;;  %16132 = vmatmul.mubr.bf16.gmra.mxu1 %v19300_v60  ;;  %16067 = vmatprep.mubr.msk.bf16.mxu0 %vm18804_vm0, %v19363_v32 }
 0x12e   : > { %v19416_v8 = vadd.f32 %v825_v7, %v616_v43  ;;  %v15801_v9 = vpop.f32.mrf.mxu0  ;;  %16135 = vmatprep.mubr.msk.bf16.mxu1 %vm18804_vm0, %v19363_v32  ;;  %v18251_v43 = vld [vmem:[%s18956_s22 + $0xd8] sm:$0xff]  }
 0x12f   : > { %v15869_v13 = vpop.f32.mrf.mxu1 }
 0x130   : > { %v619_v14 = vpop.f32.mrf.mxu0 }
 0x131   : > { %v828_v15 = vpop.f32.mrf.mxu1 }
 0x132   : > { %v19423_v16 = vadd.f32 %v828_v15, %v619_v14  ;;  %v15802_v17 = vpop.f32.mrf.mxu0 }
 0x133   : > { %v15870_v19 = vpop.f32.mrf.mxu1 }
 0x134   : > { %v624_v60 = vpop.f32.mrf.mxu0  ;;  %16068 = vmatmul.mubr.bf16.gmra.mxu0 %v19421_v11 }
 0x135   : > { %v833_v20 = vpop.f32.mrf.mxu1  ;;  %16136 = vmatmul.mubr.bf16.gmra.mxu1 %v19331_v12  ;;  %16071 = vmatprep.mubr.msk.bf16.mxu0 %vm18804_vm0, %v19363_v32 }
 0x136   : > { %v19429_v21 = vadd.f32 %v833_v20, %v624_v60  ;;  %v15805_v22 = vpop.f32.mrf.mxu0  ;;  %16139 = vmatprep.mubr.msk.bf16.mxu1 %vm18804_vm0, %v19363_v32 }
 0x137   : > { %v15873_v24 = vpop.f32.mrf.mxu1 }
 0x138   : > { %v627_v25 = vpop.f32.mrf.mxu0  ;;  %v18253_v24 = vld [vmem:[%s18956_s22 + $0xe0] sm:$0xff]  }
 0x139   : > { %v836_v27 = vpop.f32.mrf.mxu1 }
 0x13a   : > { %v19436_v30 = vadd.f32 %v836_v27, %v627_v25  ;;  %v15806_v31 = vpop.f32.mrf.mxu0 }
 0x13b   : > { %v15874_v33 = vpop.f32.mrf.mxu1 }
 0x13c   : > { %v632_v12 = vpop.f32.mrf.mxu0  ;;  %16072 = vmatmul.mubr.bf16.gmra.mxu0 %v19434_v23 }
 0x13d   : > { %v841_v34 = vpop.f32.mrf.mxu1  ;;  %16140 = vmatmul.mubr.bf16.gmra.mxu1 %v19360_v28  ;;  %16075 = vmatprep.mubr.msk.bf16.mxu0 %vm18804_vm0, %v19363_v32 }
 0x13e   : > { %v19442_v35 = vadd.f32 %v841_v34, %v632_v12  ;;  %v15809_v58 = vpop.f32.mrf.mxu0  ;;  %16143 = vmatprep.mubr.msk.bf16.mxu1 %vm18804_vm0, %v19363_v32 }
 0x13f   : > { %v15877_v39 = vpop.f32.mrf.mxu1 }
 0x140   : > { %v635_v40 = vpop.f32.mrf.mxu0 }
 0x141   : > { %v844_v42 = vpop.f32.mrf.mxu1 }
 0x142   : > { %v19449_v44 = vadd.f32 %v844_v42, %v635_v40  ;;  %v15810_v45 = vpop.f32.mrf.mxu0  ;;  %v18256_v42 = vld [vmem:[%s18956_s22 + $0xe8] sm:$0xff]  }
 0x143   : > { %v15878_v47 = vpop.f32.mrf.mxu1 }
 0x144   : > { %v640_v28 = vpop.f32.mrf.mxu0  ;;  %16076 = vmatmul.mubr.bf16.gmra.mxu0 %v19447_v38 }
 0x145   : > { %v849_v49 = vpop.f32.mrf.mxu1  ;;  %16144 = vmatmul.mubr.bf16.gmra.mxu1 %v19391_v48  ;;  %16079 = vmatprep.mubr.msk.bf16.mxu0 %vm18804_vm0, %v19363_v32 }
 0x146   : > { %v19455_v51 = vadd.f32 %v849_v49, %v640_v28  ;;  %v15813_v52 = vpop.f32.mrf.mxu0  ;;  %16147 = vmatprep.mubr.msk.bf16.mxu1 %vm18804_vm0, %v19363_v32 }
 0x147   : > { %v15881_v55 = vpop.f32.mrf.mxu1 }
 0x148   : > { %v643_v56 = vpop.f32.mrf.mxu0 }
 0x149   : > { %v852_v59 = vpop.f32.mrf.mxu1 }
 0x14a   : > { %v19460_v62 = vadd.f32 %v852_v59, %v643_v56  ;;  %v15814_v0 = vpop.f32.mrf.mxu0 }
 0x14b   : > { %v15882_v1 = vpop.f32.mrf.mxu1 }
 0x14c   : > { %v648_v3 = vpop.f32.mrf.mxu0  ;;  %16080 = vmatmul.mubr.bf16.gmra.mxu0 %v18249_v54 }
 0x14d   : > { %v857_v48 = vpop.f32.mrf.mxu1  ;;  %16148 = vmatmul.mubr.bf16.gmra.mxu1 %v19408_v63  ;;  %16083 = vmatprep.mubr.msk.bf16.mxu0 %vm18804_vm0, %v19363_v32 }
 0x14e   : > { %v19465_v5 = vadd.f32 %v857_v48, %v648_v3  ;;  %v15817_v6 = vpop.f32.mrf.mxu0  ;;  %16151 = vmatprep.mubr.msk.bf16.mxu1 %vm18804_vm0, %v19363_v32  ;;  %v18257_v48 = vld [vmem:[%s18956_s22 + $0xa8] sm:$0xff]  }
 0x14f   : > { %v15885_v7 = vpop.f32.mrf.mxu1 }
 0x150   : > { %v651_v9 = vpop.f32.mrf.mxu0 }
 0x151   : > { %v860_v13 = vpop.f32.mrf.mxu1 }
 0x152   : > { %v19470_v14 = vadd.f32 %v860_v13, %v651_v9  ;;  %v15818_v15 = vpop.f32.mrf.mxu0  ;;  %v18258_v9 = vld [vmem:[%s18956_s22 + $0xc8] sm:$0xff]   ;;  %v18259_v13 = vld [vmem:[%s22654_s1 + $0x78] sm:$0xff]  }
 0x153   : > { %v15886_v17 = vpop.f32.mrf.mxu1 }
 0x154   : > { %v656_v19 = vpop.f32.mrf.mxu0  ;;  %16084 = vmatmul.mubr.bf16.gmra.mxu0 %v18251_v43 }
 0x155   : > { %v865_v63 = vpop.f32.mrf.mxu1  ;;  %16152 = vmatmul.mubr.bf16.gmra.mxu1 %v19421_v11  ;;  %16087 = vmatprep.mubr.msk.bf16.mxu0 %vm18804_vm0, %v19363_v32  ;;  %v19485_v11 = vld [vmem:[%s22655_s2] ss:$0 sm:$0xff] }
 0x156   : > { %v19475_v60 = vadd.f32 %v865_v63, %v656_v19  ;;  %v15821_v20 = vpop.f32.mrf.mxu0  ;;  %16155 = vmatprep.mubr.msk.bf16.mxu1 %vm18804_vm0, %v19363_v32 }
 0x157   : > { %v15889_v22 = vpop.f32.mrf.mxu1 }
 0x158   : > { %v659_v25 = vpop.f32.mrf.mxu0 }
 0x159   : > { %v868_v27 = vpop.f32.mrf.mxu1 }
 0x15a   : > { %v19480_v31 = vadd.f32 %v868_v27, %v659_v25  ;;  %v15822_v33 = vpop.f32.mrf.mxu0 }
 0x15b   : > { %v15890_v12 = vpop.f32.mrf.mxu1 }
 0x15c   : > { %v1074_v34 = vpop.f32.mrf.mxu0  ;;  %16088 = vmatmul.mubr.bf16.gmra.mxu0 %v18253_v24 }
 0x15d   : > { %v1177_v58 = vadd.f32 %v1074_v34, %v19262_v29  ;;  %v1405_v39 = vpop.f32.mrf.mxu1  ;;  %16156 = vmatmul.mubr.bf16.gmra.mxu1 %v19434_v23  ;;  %16091 = vmatprep.mubr.msk.bf16.mxu0 %vm18804_vm0, %v19363_v32 }
 0x15e   : > { %v15909_v40 = vpop.f32.mrf.mxu0  ;;  %16159 = vmatprep.mubr.msk.bf16.mxu1 %vm18804_vm0, %v19363_v32 }
 0x15f   : > { %v1508_v45 = vadd.f32 %v1405_v39, %v1177_v58  ;;  %v15977_v47 = vpop.f32.mrf.mxu1  ;;  %v18266_v58 = vld [vmem:[%s22654_s1 + $0x30] sm:$0xff]  }
 0x160   : > { %v1077_v28 = vpop.f32.mrf.mxu0 }
 0x161   : > { %v1540_v49 = vadd.f32 %v19485_v11, %v1508_v45  ;;  %v1178_v52 = vadd.f32 %v1077_v28, %v19268_v36  ;;  %v1408_v29 = vpop.f32.mrf.mxu1  ;;  %v18261_v45 = vld [vmem:[%s18956_s22 + $0xb0] sm:$0xff]  }
 0x162   : > { %v15910_v54 = vpop.f32.mrf.mxu0 }
 0x163   : > { %v1566_v55 = vmax.f32 %v1540_v49, 0.0  ;;  %v1509_v23 = vadd.f32 %v1408_v29, %v1178_v52  ;;  %v15978_v56 = vpop.f32.mrf.mxu1  ;;  %v18262_v52 = vld [vmem:[%s18956_s22 + $0xd0] sm:$0xff]   ;;  %v18269_v54 = vld [vmem:[%s22654_s1 + $0x68] sm:$0xff]  }
 0x164   : > { %v1082_v59 = vpop.f32.mrf.mxu0  ;;  %16092 = vmatmul.mubr.bf16.gmra.mxu0 %v18256_v42 }
 0x165   : > { %1592 = vst [vmem:[#allocation2] sm:$0xff] %v1566_v55  ;;  %v1541_v0 = vadd.f32 %v19485_v11, %v1509_v23  ;;  %v1179_v1 = vadd.f32 %v1082_v59, %v19272_v41  ;;  %v1413_v3 = vpop.f32.mrf.mxu1  ;;  %16160 = vmatmul.mubr.bf16.gmra.mxu1 %v19447_v38  ;;  %16179 = vmatprep.mubr.msk.bf16.mxu0 %vm18804_vm0, %v19363_v32  ;;  %v18260_v38 = vld [vmem:[%s22654_s1 + $0x38] sm:$0xff]  }
 0x166   : > { %v15913_v36 = vpop.f32.mrf.mxu0  ;;  %16247 = vmatprep.mubr.msk.bf16.mxu1 %vm18804_vm0, %v19363_v32 }
 0x167   : > { %v1567_v6 = vmax.f32 %v1541_v0, 0.0  ;;  %v1510_v43 = vadd.f32 %v1413_v3, %v1179_v1  ;;  %v15981_v7 = vpop.f32.mrf.mxu1 }
 0x168   : > { %v1085_v41 = vpop.f32.mrf.mxu0 }
 0x169   : > { %1593 = vst [vmem:[#allocation2 + $0x8] sm:$0xff] %v1567_v6  ;;  %v1542_v15 = vadd.f32 %v19485_v11, %v1510_v43  ;;  %v1180_v17 = vadd.f32 %v1085_v41, %v19286_v50  ;;  %v1416_v19 = vpop.f32.mrf.mxu1  ;;  %v18263_v50 = vld [vmem:[%s22654_s1 + $0x70] sm:$0xff]  }
 0x16a   : > { %v15914_v63 = vpop.f32.mrf.mxu0 }
 0x16b   : > { %v1568_v20 = vmax.f32 %v1542_v15, 0.0  ;;  %v1511_v22 = vadd.f32 %v1416_v19, %v1180_v17  ;;  %v15982_v24 = vpop.f32.mrf.mxu1  ;;  %v18265_v17 = vld [vmem:[%s18956_s22 + $0xd8] sm:$0xff]  }
 0x16c   : > { %v1090_v25 = vpop.f32.mrf.mxu0  ;;  %16180 = vmatmul.mubr.bf16.vlgmr.msra.gmra.mxu0 %v18257_v48  ;;  %v18275_v48 = vld [vmem:[%s22654_s1 + $0x60] sm:$0xff]   ;;  %v18279_v63 = vld [vmem:[%s22654_s1 + $0x58] sm:$0xff]  }
 0x16d   : > { %1594 = vst [vmem:[#allocation2 + $0x10] sm:$0xff] %v1568_v20  ;;  %v1543_v27 = vadd.f32 %v19485_v11, %v1511_v22  ;;  %v1181_v33 = vadd.f32 %v1090_v25, %v19295_v57  ;;  %v1421_v12 = vpop.f32.mrf.mxu1  ;;  %16248 = vmatmul.mubr.bf16.vlgmr.msra.gmra.mxu1 %v18258_v9  ;;  %16300 = vmatpush3.bf16.msra.mxu0 %v18259_v13  ;;  %v18264_v13 = vld [vmem:[%s18956_s22 + $0xb8] sm:$0xff]  }
 0x16e   : > { %v15917_v34 = vpop.f32.mrf.mxu0  ;;  %16368 = vmatpush3.bf16.msra.mxu1 %v18260_v38  ;;  %16183 = vmatprep.mubr.msk.bf16.mxu0 %vm18804_vm0, %v19363_v32  ;;  %v18280_v25 = vld [vmem:[%s22654_s1 + $0x18] sm:$0xff]  }
 0x16f   : > { %v1569_v39 = vmax.f32 %v1543_v27, 0.0  ;;  %v1512_v40 = vadd.f32 %v1421_v12, %v1181_v33  ;;  %v15985_v57 = vpop.f32.mrf.mxu1  ;;  %16251 = vmatprep.mubr.msk.bf16.mxu1 %vm18804_vm0, %v19363_v32  ;;  %16301 = vmatprep.subr.bf16.mxu0 %v19363_v32  ;;  %v18285_v34 = vld [vmem:[%s22654_s1 + $0x50] sm:$0xff]  }
 0x170   : > { %v1093_v42 = vpop.f32.mrf.mxu0  ;;  %16369 = vmatprep.subr.bf16.mxu1 %v19363_v32 }
 0x171   : > { %1595 = vst [vmem:[#allocation2 + $0x18] sm:$0xff] %v1569_v39  ;;  %v1544_v47 = vadd.f32 %v19485_v11, %v1512_v40  ;;  %v1182_v28 = vadd.f32 %v1093_v42, %v19310_v2  ;;  %v1424_v49 = vpop.f32.mrf.mxu1  ;;  %16302 = vmatpush3.bf16.msra.mxu0 %v18263_v50  ;;  %v18270_v2 = vld [vmem:[%s22654_s1 + $0x28] sm:$0xff]   ;;  %v18267_v42 = vld [vmem:[%s18956_s22 + $0xc0] sm:$0xff]  }
 0x172   : > { %v15918_v29 = vpop.f32.mrf.mxu0  ;;  %16370 = vmatpush3.bf16.msra.mxu1 %v18266_v58  ;;  %16303 = vmatprep.subr.bf16.mxu0 %v19363_v32 }
 0x173   : > { %v1570_v55 = vmax.f32 %v1544_v47, 0.0  ;;  %v1513_v23 = vadd.f32 %v1424_v49, %v1182_v28  ;;  %v15986_v56 = vpop.f32.mrf.mxu1  ;;  %16371 = vmatprep.subr.bf16.mxu1 %v19363_v32  ;;  %v18268_v49 = vld [vmem:[%s18956_s22 + $0xe0] sm:$0xff]  }
 0x174   : > { %v1098_v59 = vpop.f32.mrf.mxu0  ;;  %16184 = vmatmul.mubr.bf16.gmra.mxu0 %v18261_v45  ;;  %v19583_v56 = vld [vmem:[#allocation2 + $0x340] sm:$0xff] }
 0x175   : > { %1596 = vst [vmem:[#allocation2 + $0x20] sm:$0xff] %v1570_v55  ;;  %v1545_v0 = vadd.f32 %v19485_v11, %v1513_v23  ;;  %v1183_v1 = vadd.f32 %v1098_v59, %v19326_v10  ;;  %v1429_v3 = vpop.f32.mrf.mxu1  ;;  %16252 = vmatmul.mubr.bf16.gmra.mxu1 %v18262_v52  ;;  %16187 = vmatprep.mubr.msk.bf16.mxu0 %vm18804_vm0, %v19363_v32  ;;  %v18276_v10 = vld [vmem:[%s22654_s1 + $0x20] sm:$0xff]  }
 0x176   : > { %v15921_v36 = vpop.f32.mrf.mxu0  ;;  %16255 = vmatprep.mubr.msk.bf16.mxu1 %vm18804_vm0, %v19363_v32  ;;  %16304 = vmatpush3.bf16.msra.mxu0 %v18269_v54 }
 0x177   : > { %v1571_v6 = vmax.f32 %v1545_v0, 0.0  ;;  %v1514_v43 = vadd.f32 %v1429_v3, %v1183_v1  ;;  %v15989_v7 = vpop.f32.mrf.mxu1  ;;  %16372 = vmatpush3.bf16.msra.mxu1 %v18270_v2  ;;  %16305 = vmatprep.subr.bf16.mxu0 %v19363_v32 }
 0x178   : > { %v1101_v9 = vpop.f32.mrf.mxu0  ;;  %16373 = vmatprep.subr.bf16.mxu1 %v19363_v32 }
 0x179   : > { %1597 = vst [vmem:[#allocation2 + $0x28] sm:$0xff] %v1571_v6  ;;  %v1546_v41 = vadd.f32 %v19485_v11, %v1514_v43  ;;  %v1184_v38 = vadd.f32 %v1101_v9, %v19339_v18  ;;  %v1432_v15 = vpop.f32.mrf.mxu1 }
 0x17a   : > { %v15922_v19 = vpop.f32.mrf.mxu0  ;;  %16306 = vmatpush3.bf16.msra.mxu0 %v18275_v48 }
 0x17b   : > { %v1572_v20 = vmax.f32 %v1546_v41, 0.0  ;;  %v1515_v22 = vadd.f32 %v1432_v15, %v1184_v38  ;;  %v15990_v24 = vpop.f32.mrf.mxu1  ;;  %16374 = vmatpush3.bf16.msra.mxu1 %v18276_v10  ;;  %16307 = vmatprep.subr.bf16.mxu0 %v19363_v32  ;;  %v18271_v41 = vld [vmem:[%s18956_s22 + $0xc8] sm:$0xff]   ;;  %v18296_v38 = vld [vmem:[%s22654_s1] sm:$0xff]  }
 0x17c   : > { %v1106_v27 = vpop.f32.mrf.mxu0  ;;  %16188 = vmatmul.mubr.bf16.gmra.mxu0 %v18264_v13  ;;  %16375 = vmatprep.subr.bf16.mxu1 %v19363_v32 }
 0x17d   : > { %1598 = vst [vmem:[#allocation2 + $0x30] sm:$0xff] %v1572_v20  ;;  %v1547_v18 = vadd.f32 %v19485_v11, %v1515_v22  ;;  %v1185_v33 = vadd.f32 %v1106_v27, %v19355_v26  ;;  %v1437_v12 = vpop.f32.mrf.mxu1  ;;  %16256 = vmatmul.mubr.bf16.gmra.mxu1 %v18265_v17  ;;  %16191 = vmatprep.mubr.msk.bf16.mxu0 %vm18804_vm0, %v19363_v32  ;;  %v18286_v26 = vld [vmem:[%s22654_s1 + $0x10] sm:$0xff]  }
 0x17e   : > { %v15925_v50 = vpop.f32.mrf.mxu0  ;;  %16259 = vmatprep.mubr.msk.bf16.mxu1 %vm18804_vm0, %v19363_v32  ;;  %16308 = vmatpush3.bf16.msra.mxu0 %v18279_v63  ;;  %v18272_v63 = vld [vmem:[%s18956_s22 + $0xe8] sm:$0xff]  }
 0x17f   : > { %v1573_v58 = vmax.f32 %v1547_v18, 0.0  ;;  %v1516_v39 = vadd.f32 %v1437_v12, %v1185_v33  ;;  %v15993_v40 = vpop.f32.mrf.mxu1  ;;  %16376 = vmatpush3.bf16.msra.mxu1 %v18280_v25  ;;  %16309 = vmatprep.subr.bf16.mxu0 %v19363_v32  ;;  %v18295_v18 = vld [vmem:[%s22654_s1 + $0x40] sm:$0xff]  }
 0x180   : > { %v1109_v57 = vpop.f32.mrf.mxu0  ;;  %16377 = vmatprep.subr.bf16.mxu1 %v19363_v32  ;;  %v5664_v23 = vld [vmem:[#allocation2 + $0x22] sm:$0xff] }
 0x181   : > { %1599 = vst [vmem:[#allocation2 + $0x38] sm:$0xff] %v1573_v58  ;;  %v1548_v45 = vadd.f32 %v19485_v11, %v1516_v39  ;;  %v1186_v47 = vadd.f32 %v1109_v57, %v19370_v37  ;;  %v1440_v28 = vpop.f32.mrf.mxu1  ;;  %v18289_v32 = vld [vmem:[%s22654_s1 + $0x48] sm:$0xff]  }
 0x182   : > { %v15926_v52 = vpop.f32.mrf.mxu0  ;;  %16310 = vmatpush3.bf16.msra.mxu0 %v18285_v34  ;;  %v18292_v37 = vld [vmem:[%s22654_s1 + $0x8] sm:$0xff]  }
 0x183   : > { %v1574_v29 = vmax.f32 %v1548_v45, 0.0  ;;  %v1517_v54 = vadd.f32 %v1440_v28, %v1186_v47  ;;  %v15994_v55 = vpop.f32.mrf.mxu1  ;;  %16378 = vmatpush3.bf16.msra.mxu1 %v18286_v26  ;;  %16311 = vmatprep.subr.bf16.mxu0 %v19583_v56  ;;  %v5560_v0 = vld [vmem:[#allocation2 + $0x21] sm:$0xff]  ;;  %v18273_v28 = vld [vmem:[%s18956_s22 + $0xd0] sm:$0xff]  }
 0x184   : > { %v1114_v2 = vpop.f32.mrf.mxu0  ;;  %16192 = vmatmul.mubr.bf16.gmra.mxu0 %v18267_v42  ;;  %v5665_v59 = vld [vmem:[#allocation2 + $0x2a] sm:$0xff]  ;;  %16379 = vmatprep.subr.bf16.mxu1 %v19583_v56 }
 0x185   : > { %v5561_v1 = vld [vmem:[#allocation2 + $0x29] sm:$0xff]  ;;  %1600 = vst [vmem:[#allocation2 + $0x40] sm:$0xff] %v1574_v29  ;;  %v1549_v3 = vadd.f32 %v19485_v11, %v1517_v54  ;;  %v1187_v36 = vadd.f32 %v1114_v2, %v19386_v46  ;;  %v1445_v48 = vpop.f32.mrf.mxu1  ;;  %16260 = vmatmul.mubr.bf16.gmra.mxu1 %v18268_v49  ;;  %v17568_v6 = vpack.i.bf16 %v5665_v59, %v5664_v23 }
 0x186   : > { %v17563_v43 = vpack.i.bf16 %v5561_v1, %v5560_v0  ;;  %v15929_v7 = vpop.f32.mrf.mxu0  ;;  %16195 = vmatprep.mubr.msk.bf16.mxu0 %vm18804_vm0, %v19583_v56  ;;  %16263 = vmatprep.mubr.msk.bf16.mxu1 %vm18804_vm0, %v19583_v56  ;;  %v18274_v54 = vld [vmem:[%s18956_s22 + $0xf0] sm:$0xff]  }
 0x187   : > { %v1575_v10 = vmax.f32 %v1549_v3, 0.0  ;;  %v1518_v9 = vadd.f32 %v1445_v48, %v1187_v36  ;;  %v15997_v13 = vpop.f32.mrf.mxu1  ;;  %17569 = vrot.lane.b32.xlu1 %v17568_v6, %s18805_s28  ;;  %16312 = vmatpush3.bf16.msra.mxu0 %v18289_v32 }
 0x188   : > { %17564 = vrot.lane.b32.xlu0 %v17563_v43, %s18806_s29  ;;  %v1117_v46 = vpop.f32.mrf.mxu0  ;;  %16380 = vmatpush3.bf16.msra.mxu1 %v18292_v37  ;;  %v5666_v27 = vld [vmem:[#allocation2 + $0x32] sm:$0xff] }
 0x189   : > { %1601 = vst [vmem:[#allocation2 + $0x48] sm:$0xff] %v1575_v10  ;;  %v1550_v15 = vadd.f32 %v19485_v11, %v1518_v9  ;;  %v1188_v17 = vadd.f32 %v1117_v46, %v19395_v53  ;;  %v1448_v19 = vpop.f32.mrf.mxu1  ;;  %16313 = vmatprep.subr.bf16.mxu0 %v19583_v56  ;;  %16381 = vmatprep.subr.bf16.mxu1 %v19583_v56  ;;  %v5562_v50 = vld [vmem:[#allocation2 + $0x31] sm:$0xff] }
 0x18a   : > { %v15930_v20 = vpop.f32.mrf.mxu0 }
 0x18b   : > { %v1576_v22 = vmax.f32 %v1550_v15, 0.0  ;;  %v1519_v24 = vadd.f32 %v1448_v19, %v1188_v17  ;;  %v15998_v25 = vpop.f32.mrf.mxu1  ;;  %16314 = vmatpush3.bf16.msra.mxu0 %v18295_v18  ;;  %v18278_v17 = vld [vmem:[%s18956_s22 + $0xf8] sm:$0xff]  }
 0x18c   : > { %v1122_v33 = vpop.f32.mrf.mxu0  ;;  %16196 = vmatmul.mubr.bf16.gmra.mxu0 %v18271_v41  ;;  %v5667_v12 = vld [vmem:[#allocation2 + $0x3a] sm:$0xff]  ;;  %16382 = vmatpush3.bf16.msra.mxu1 %v18296_v38 }
 0x18d   : > { %v5563_v53 = vld [vmem:[#allocation2 + $0x39] sm:$0xff]  ;;  %1602 = vst [vmem:[#allocation2 + $0x50] sm:$0xff] %v1576_v22  ;;  %v1551_v34 = vadd.f32 %v19485_v11, %v1519_v24  ;;  %v1189_v58 = vadd.f32 %v1122_v33, %v19403_v61  ;;  %v1453_v39 = vpop.f32.mrf.mxu1  ;;  %16264 = vmatmul.mubr.bf16.gmra.mxu1 %v18272_v63  ;;  %v17578_v40 = vpack.i.bf16 %v5667_v12, %v5666_v27 }
 0x18e   : > { %v17573_v26 = vpack.i.bf16 %v5563_v53, %v5562_v50  ;;  %v15933_v57 = vpop.f32.mrf.mxu0  ;;  %16199 = vmatprep.mubr.msk.bf16.mxu0 %vm18804_vm0, %v19583_v56  ;;  %16267 = vmatprep.mubr.msk.bf16.mxu1 %vm18804_vm0, %v19583_v56 }
 0x18f   : > { %v1577_v42 = vmax.f32 %v1551_v34, 0.0  ;;  %v1520_v45 = vadd.f32 %v1453_v39, %v1189_v58  ;;  %v16001_v47 = vpop.f32.mrf.mxu1  ;;  %17579 = vrot.lane.b32.xlu1 %v17578_v40, %s18805_s28  ;;  %16503 = vmatprep.subr.bf16.mxu1 %v19583_v56 }
 0x190   : > { %17574 = vrot.lane.b32.xlu0 %v17573_v26, %s18806_s29  ;;  %v1125_v61 = vpop.f32.mrf.mxu0  ;;  %16435 = vmatprep.subr.bf16.mxu0 %v19583_v56  ;;  %v5564_v59 = vld [vmem:[#allocation2 + $0x41] sm:$0xff] }
 0x191   : > { %1603 = vst [vmem:[#allocation2 + $0x58] sm:$0xff] %v1577_v42  ;;  %v1552_v49 = vadd.f32 %v19485_v11, %v1520_v45  ;;  %v1190_v52 = vadd.f32 %v1125_v61, %v19410_v4  ;;  %v1456_v29 = vpop.f32.mrf.mxu1  ;;  %v5668_v13 = vld [vmem:[#allocation2 + $0x42] sm:$0xff] }
 0x192   : > { %v15934_v55 = vpop.f32.mrf.mxu0  ;;  %v18282_v61 = vld [vmem:[%s18956_s22 + $0x100] sm:$0xff]  }
 0x193   : > { %v1578_v23 = vmax.f32 %v1552_v49, 0.0  ;;  %v1521_v32 = vadd.f32 %v1456_v29, %v1190_v52  ;;  %v16002_v37 = vpop.f32.mrf.mxu1 }
 0x194   : > { %v1130_v2 = vpop.f32.mrf.mxu0  ;;  %16200 = vmatmul.mubr.bf16.gmra.mxu0 %v18273_v28  ;;  %v5565_v0 = vld [vmem:[#allocation2 + $0x49] sm:$0xff] }
 0x195   : > { %1604 = vst [vmem:[#allocation2 + $0x60] sm:$0xff] %v1578_v23  ;;  %v1553_v1 = vadd.f32 %v19485_v11, %v1521_v32  ;;  %v1191_v3 = vadd.f32 %v1130_v2, %v19416_v8  ;;  %v1461_v36 = vpop.f32.mrf.mxu1  ;;  %16268 = vmatmul.mubr.bf16.gmra.mxu1 %v18274_v54  ;;  %v17583_v4 = vpack.i.bf16 %v5565_v0, %v5564_v59  ;;  %v5669_v6 = vld [vmem:[#allocation2 + $0x4a] sm:$0xff]  ;;  %v18277_v8 = vld [vmem:[%s18956_s22 + $0xd8] sm:$0xff]  }
 0x196   : > { %16203 = vmatprep.mubr.msk.bf16.mxu0 %vm18804_vm0, %v19583_v56  ;;  %v15937_v48 = vpop.f32.mrf.mxu0  ;;  %16271 = vmatprep.mubr.msk.bf16.mxu1 %vm18804_vm0, %v19583_v56  ;;  %v17588_v15 = vpack.i.bf16 %v5669_v6, %v5668_v13 }
 0x197   : > { %v1579_v43 = vmax.f32 %v1553_v1, 0.0  ;;  %v1522_v7 = vadd.f32 %v1461_v36, %v1191_v3  ;;  %v16005_v10 = vpop.f32.mrf.mxu1  ;;  %17584 = vrot.lane.b32.xlu0 %v17583_v4, %s18806_s29 }
 0x198   : > { %v1133_v9 = vpop.f32.mrf.mxu0  ;;  %v5566_v25 = vld [vmem:[#allocation2 + $0x51] sm:$0xff] }
 0x199   : > { %1605 = vst [vmem:[#allocation2 + $0x68] sm:$0xff] %v1579_v43  ;;  %v1554_v46 = vadd.f32 %v19485_v11, %v1522_v7  ;;  %v1192_v41 = vadd.f32 %v1133_v9, %v19423_v16  ;;  %v1464_v38 = vpop.f32.mrf.mxu1  ;;  %v5670_v26 = vld [vmem:[#allocation2 + $0x52] sm:$0xff]  ;;  %v18284_v9 = vld [vmem:[%s18956_s22 + $0x108] sm:$0xff]  }
 0x19a   : > { %v15938_v19 = vpop.f32.mrf.mxu0 }
 0x19b   : > { %v1580_v63 = vmax.f32 %v1554_v46, 0.0  ;;  %v1523_v20 = vadd.f32 %v1464_v38, %v1192_v41  ;;  %v16006_v22 = vpop.f32.mrf.mxu1  ;;  %17589 = vrot.lane.b32.xlu0 %v17588_v15, %s18805_s28 }
 0x19c   : > { %v1138_v24 = vpop.f32.mrf.mxu0  ;;  %16204 = vmatmul.mubr.bf16.gmra.mxu0 %v18277_v8  ;;  %v5567_v27 = vld [vmem:[#allocation2 + $0x59] sm:$0xff] }
 0x19d   : > { %1606 = vst [vmem:[#allocation2 + $0x70] sm:$0xff] %v1580_v63  ;;  %v1555_v18 = vadd.f32 %v19485_v11, %v1523_v20  ;;  %v1193_v33 = vadd.f32 %v1138_v24, %v19429_v21  ;;  %v1469_v16 = vpop.f32.mrf.mxu1  ;;  %16272 = vmatmul.mubr.bf16.gmra.mxu1 %v18278_v17  ;;  %v17593_v12 = vpack.i.bf16 %v5567_v27, %v5566_v25  ;;  %v5671_v53 = vld [vmem:[#allocation2 + $0x5a] sm:$0xff] }
 0x19e   : > { %16207 = vmatprep.mubr.msk.bf16.mxu0 %vm18804_vm0, %v19583_v56  ;;  %v15941_v50 = vpop.f32.mrf.mxu0  ;;  %16275 = vmatprep.mubr.msk.bf16.mxu1 %vm18804_vm0, %v19583_v56  ;;  %v18281_v21 = vld [vmem:[%s18956_s22 + $0xe0] sm:$0xff]   ;;  %v17598_v47 = vpack.i.bf16 %v5671_v53, %v5670_v26 }
 0x19f   : > { %v1581_v34 = vmax.f32 %v1555_v18, 0.0  ;;  %v1524_v58 = vadd.f32 %v1469_v16, %v1193_v33  ;;  %v16009_v39 = vpop.f32.mrf.mxu1  ;;  %17594 = vrot.lane.b32.xlu1 %v17593_v12, %s18806_s29 }
 0x1a0   : > { %v1141_v40 = vpop.f32.mrf.mxu0  ;;  %v5568_v55 = vld [vmem:[#allocation2 + $0x61] sm:$0xff] }
 0x1a1   : > { %1607 = vst [vmem:[#allocation2 + $0x78] sm:$0xff] %v1581_v34  ;;  %v1556_v57 = vadd.f32 %v19485_v11, %v1524_v58  ;;  %v1194_v42 = vadd.f32 %v1141_v40, %v19436_v30  ;;  %v1472_v45 = vpop.f32.mrf.mxu1  ;;  %v5672_v48 = vld [vmem:[#allocation2 + $0x62] sm:$0xff]  ;;  %v18288_v58 = vld [vmem:[%s18956_s22 + $0x110] sm:$0xff]  }
 0x1a2   : > { %v15942_v28 = vpop.f32.mrf.mxu0 }
 0x1a3   : > { %v1582_v49 = vmax.f32 %v1556_v57, 0.0  ;;  %v1525_v52 = vadd.f32 %v1472_v45, %v1194_v42  ;;  %v16010_v29 = vpop.f32.mrf.mxu1  ;;  %17599 = vrot.lane.b32.xlu1 %v17598_v47, %s18805_s28 }
 0x1a4   : > { %v1146_v54 = vpop.f32.mrf.mxu0  ;;  %16208 = vmatmul.mubr.bf16.gmra.mxu0 %v18281_v21  ;;  %v5569_v23 = vld [vmem:[#allocation2 + $0x69] sm:$0xff] }
 0x1a5   : > { %1608 = vst [vmem:[#allocation2 + $0x80] sm:$0xff] %v1582_v49  ;;  %v1557_v32 = vadd.f32 %v19485_v11, %v1525_v52  ;;  %v1195_v37 = vadd.f32 %v1146_v54, %v19442_v35  ;;  %v1477_v30 = vpop.f32.mrf.mxu1  ;;  %16276 = vmatmul.mubr.bf16.gmra.mxu1 %v18282_v61  ;;  %v17603_v2 = vpack.i.bf16 %v5569_v23, %v5568_v55  ;;  %v5673_v0 = vld [vmem:[#allocation2 + $0x6a] sm:$0xff] }
 0x1a6   : > { %16211 = vmatprep.mubr.msk.bf16.mxu0 %vm18804_vm0, %v19583_v56  ;;  %v15945_v59 = vpop.f32.mrf.mxu0  ;;  %16279 = vmatprep.mubr.msk.bf16.mxu1 %vm18804_vm0, %v19583_v56  ;;  %v18283_v35 = vld [vmem:[%s18956_s22 + $0xe8] sm:$0xff]   ;;  %v17608_v10 = vpack.i.bf16 %v5673_v0, %v5672_v48  ;;  %v18291_v0 = vld [vmem:[%s18956_s22 + $0x118] sm:$0xff]  }
 0x1a7   : > { %v1583_v1 = vmax.f32 %v1557_v32, 0.0  ;;  %v1526_v3 = vadd.f32 %v1477_v30, %v1195_v37  ;;  %v16013_v36 = vpop.f32.mrf.mxu1  ;;  %17604 = vrot.lane.b32.xlu0 %v17603_v2, %s18806_s29 }
 0x1a8   : > { %v1149_v4 = vpop.f32.mrf.mxu0  ;;  %v5570_v15 = vld [vmem:[#allocation2 + $0x71] sm:$0xff] }
 0x1a9   : > { %1609 = vst [vmem:[#allocation2 + $0x88] sm:$0xff] %v1583_v1  ;;  %v1558_v6 = vadd.f32 %v19485_v11, %v1526_v3  ;;  %v1196_v43 = vadd.f32 %v1149_v4, %v19449_v44  ;;  %v1480_v7 = vpop.f32.mrf.mxu1  ;;  %v5674_v16 = vld [vmem:[#allocation2 + $0x72] sm:$0xff] }
 0x1aa   : > { %v15946_v13 = vpop.f32.mrf.mxu0 }
 0x1ab   : > { %v1584_v8 = vmax.f32 %v1558_v6, 0.0  ;;  %v1527_v46 = vadd.f32 %v1480_v7, %v1196_v43  ;;  %v16014_v41 = vpop.f32.mrf.mxu1  ;;  %17609 = vrot.lane.b32.xlu0 %v17608_v10, %s18805_s28 }
 0x1ac   : > { %v1154_v38 = vpop.f32.mrf.mxu0  ;;  %16212 = vmatmul.mubr.bf16.gmra.mxu0 %v18283_v35  ;;  %v5571_v17 = vld [vmem:[#allocation2 + $0x79] sm:$0xff] }
 0x1ad   : > { %1610 = vst [vmem:[#allocation2 + $0x90] sm:$0xff] %v1584_v8  ;;  %v1559_v19 = vadd.f32 %v19485_v11, %v1527_v46  ;;  %v1197_v63 = vadd.f32 %v1154_v38, %v19455_v51  ;;  %v1485_v44 = vpop.f32.mrf.mxu1  ;;  %16280 = vmatmul.mubr.bf16.gmra.mxu1 %v18284_v9  ;;  %v17613_v20 = vpack.i.bf16 %v5571_v17, %v5570_v15  ;;  %v5675_v24 = vld [vmem:[#allocation2 + $0x7a] sm:$0xff]  ;;  %v18287_v51 = vld [vmem:[%s18956_s22 + $0xf0] sm:$0xff]  }
 0x1ae   : > { %16215 = vmatprep.mubr.msk.bf16.mxu0 %vm18804_vm0, %v19583_v56  ;;  %v15949_v22 = vpop.f32.mrf.mxu0  ;;  %16283 = vmatprep.mubr.msk.bf16.mxu1 %vm18804_vm0, %v19583_v56  ;;  %v17618_v34 = vpack.i.bf16 %v5675_v24, %v5674_v16 }
 0x1af   : > { %v1585_v25 = vmax.f32 %v1559_v19, 0.0  ;;  %v1528_v27 = vadd.f32 %v1485_v44, %v1197_v63  ;;  %v16017_v18 = vpop.f32.mrf.mxu1  ;;  %17614 = vrot.lane.b32.xlu1 %v17613_v20, %s18806_s29  ;;  %v18294_v20 = vld [vmem:[%s18956_s22 + $0x120] sm:$0xff]  }
 0x1b0   : > { %v1157_v33 = vpop.f32.mrf.mxu0  ;;  %v5572_v42 = vld [vmem:[#allocation2 + $0x81] sm:$0xff] }
 0x1b1   : > { %1611 = vst [vmem:[#allocation2 + $0x98] sm:$0xff] %v1585_v25  ;;  %v1560_v12 = vadd.f32 %v19485_v11, %v1528_v27  ;;  %v1198_v50 = vadd.f32 %v1157_v33, %v19460_v62  ;;  %v1488_v53 = vpop.f32.mrf.mxu1  ;;  %v5676_v32 = vld [vmem:[#allocation2 + $0x82] sm:$0xff] }
 0x1b2   : > { %v15950_v39 = vpop.f32.mrf.mxu0 }
 0x1b3   : > { %v1586_v40 = vmax.f32 %v1560_v12, 0.0  ;;  %v1529_v26 = vadd.f32 %v1488_v53, %v1198_v50  ;;  %v16018_v21 = vpop.f32.mrf.mxu1  ;;  %17619 = vrot.lane.b32.xlu1 %v17618_v34, %s18805_s28 }
 0x1b4   : > { %v1162_v57 = vpop.f32.mrf.mxu0  ;;  %16216 = vmatmul.mubr.bf16.gmra.mxu0 %v18287_v51  ;;  %v5573_v45 = vld [vmem:[#allocation2 + $0x89] sm:$0xff] }
 0x1b5   : > { %1612 = vst [vmem:[#allocation2 + $0xa0] sm:$0xff] %v1586_v40  ;;  %v1561_v47 = vadd.f32 %v19485_v11, %v1529_v26  ;;  %v1199_v61 = vadd.f32 %v1162_v57, %v19465_v5  ;;  %v1493_v62 = vpop.f32.mrf.mxu1  ;;  %16284 = vmatmul.mubr.bf16.gmra.mxu1 %v18288_v58  ;;  %v17623_v28 = vpack.i.bf16 %v5573_v45, %v5572_v42  ;;  %v5677_v52 = vld [vmem:[#allocation2 + $0x8a] sm:$0xff]  ;;  %v18290_v5 = vld [vmem:[%s18956_s22 + $0xf8] sm:$0xff]  }
 0x1b6   : > { %16219 = vmatprep.mubr.msk.bf16.mxu0 %vm18804_vm0, %v19583_v56  ;;  %v15953_v49 = vpop.f32.mrf.mxu0  ;;  %16287 = vmatprep.mubr.msk.bf16.mxu1 %vm18804_vm0, %v19583_v56  ;;  %v17628_v59 = vpack.i.bf16 %v5677_v52, %v5676_v32  ;;  %v18297_v26 = vld [vmem:[%s18956_s22 + $0x108] sm:$0xff]  }
 0x1b7   : > { %v1587_v29 = vmax.f32 %v1561_v47, 0.0  ;;  %v1530_v54 = vadd.f32 %v1493_v62, %v1199_v61  ;;  %v16021_v55 = vpop.f32.mrf.mxu1  ;;  %17624 = vrot.lane.b32.xlu0 %v17623_v28, %s18806_s29  ;;  %v18298_v42 = vld [vmem:[%s18956_s22 + $0x128] sm:$0xff]  }
 0x1b8   : > { %v1165_v23 = vpop.f32.mrf.mxu0  ;;  %v5574_v35 = vld [vmem:[#allocation2 + $0x91] sm:$0xff] }
 0x1b9   : > { %1613 = vst [vmem:[#allocation2 + $0xa8] sm:$0xff] %v1587_v29  ;;  %v1562_v37 = vadd.f32 %v19485_v11, %v1530_v54  ;;  %v1200_v30 = vadd.f32 %v1165_v23, %v19470_v14  ;;  %v1496_v2 = vpop.f32.mrf.mxu1  ;;  %v5678_v15 = vld [vmem:[#allocation2 + $0x92] sm:$0xff] }
 0x1ba   : > { %v15954_v1 = vpop.f32.mrf.mxu0 }
 0x1bb   : > { %v1588_v3 = vmax.f32 %v1562_v37, 0.0  ;;  %v1531_v36 = vadd.f32 %v1496_v2, %v1200_v30  ;;  %v16022_v4 = vpop.f32.mrf.mxu1  ;;  %17629 = vrot.lane.b32.xlu0 %v17628_v59, %s18805_s28  ;;  %v19720_v30 = vld [vmem:[%s18956_s22 + $0xf0] sm:$0xff]   ;;  %v18301_v1 = vld [vmem:[%s22654_s1 + $0xb8] sm:$0xff]  }
 0x1bc   : > { %v1170_v48 = vpop.f32.mrf.mxu0  ;;  %16220 = vmatmul.mubr.bf16.gmra.mxu0 %v18290_v5  ;;  %v5575_v6 = vld [vmem:[#allocation2 + $0x99] sm:$0xff] }
 0x1bd   : > { %1614 = vst [vmem:[#allocation2 + $0xb0] sm:$0xff] %v1588_v3  ;;  %v1563_v43 = vadd.f32 %v19485_v11, %v1531_v36  ;;  %v1201_v7 = vadd.f32 %v1170_v48, %v19475_v60  ;;  %v1501_v14 = vpop.f32.mrf.mxu1  ;;  %16288 = vmatmul.mubr.bf16.gmra.mxu1 %v18291_v0  ;;  %v17633_v10 = vpack.i.bf16 %v5575_v6, %v5574_v35  ;;  %v5679_v13 = vld [vmem:[#allocation2 + $0x9a] sm:$0xff]  ;;  %v18300_v0 = vld [vmem:[%s18956_s22 + $0xd0] sm:$0xff]  }
 0x1be   : > { %16223 = vmatprep.mubr.msk.bf16.mxu0 %vm18804_vm0, %v19583_v56  ;;  %v15957_v9 = vpop.f32.mrf.mxu0  ;;  %16291 = vmatprep.mubr.msk.bf16.mxu1 %vm18804_vm0, %v19583_v56  ;;  %v18293_v60 = vld [vmem:[%s18956_s22 + $0x100] sm:$0xff]   ;;  %v17638_v44 = vpack.i.bf16 %v5679_v13, %v5678_v15  ;;  %v18302_v4 = vld [vmem:[%s22654_s1 + $0xf8] sm:$0xff]  }
 0x1bf   : > { %v1589_v8 = vmax.f32 %v1563_v43, 0.0  ;;  %v1532_v46 = vadd.f32 %v1501_v14, %v1201_v7  ;;  %v16025_v41 = vpop.f32.mrf.mxu1  ;;  %17634 = vrot.lane.b32.xlu1 %v17633_v10, %s18806_s29  ;;  %v18305_v43 = vld [vmem:[%s22654_s1 + $0xb0] sm:$0xff]  }
 0x1c0   : > { %v1173_v38 = vpop.f32.mrf.mxu0  ;;  %v5576_v33 = vld [vmem:[#allocation2 + $0xa1] sm:$0xff]  ;;  %v18308_v10 = vld [vmem:[%s22654_s1 + $0xf0] sm:$0xff]   ;;  %v18304_v41 = vld [vmem:[%s18956_s22 + $0xd8] sm:$0xff]  }
 0x1c1   : > { %1615 = vst [vmem:[#allocation2 + $0xb8] sm:$0xff] %v1589_v8  ;;  %v1564_v17 = vadd.f32 %v19485_v11, %v1532_v46  ;;  %v1202_v19 = vadd.f32 %v1173_v38, %v19480_v31  ;;  %v1504_v63 = vpop.f32.mrf.mxu1  ;;  %v19747_v8 = vld [vmem:[%s18956_s22 + $0xf8] sm:$0xff]  }
 0x1c2   : > { %v15958_v22 = vpop.f32.mrf.mxu0 }
 0x1c3   : > { %v1590_v24 = vmax.f32 %v1564_v17, 0.0  ;;  %v1533_v25 = vadd.f32 %v1504_v63, %v1202_v19  ;;  %v16026_v27 = vpop.f32.mrf.mxu1  ;;  %17639 = vrot.lane.b32.xlu1 %v17638_v44, %s18805_s28  ;;  %v18312_v19 = vld [vmem:[%s22654_s1 + $0xe8] sm:$0xff]  }
 0x1c4   : > { %v1844_v18 = vpop.f32.mrf.mxu0  ;;  %16224 = vmatmul.mubr.bf16.gmra.mxu0 %v18293_v60  ;;  %v5577_v16 = vld [vmem:[#allocation2 + $0xa9] sm:$0xff]  ;;  %v18316_v27 = vld [vmem:[%s22654_s1 + $0xe0] sm:$0xff]  }
 0x1c5   : > { %1616 = vst [vmem:[#allocation2 + $0xc0] sm:$0xff] %v1590_v24  ;;  %v1565_v51 = vadd.f32 %v19485_v11, %v1533_v25  ;;  %v2053_v12 = vpop.f32.mrf.mxu1  ;;  %16292 = vmatmul.mubr.bf16.gmra.mxu1 %v18294_v20  ;;  %v17643_v31 = vpack.i.bf16 %v5577_v16, %v5576_v33  ;;  %16227 = vmatprep.mubr.msk.bf16.mxu0 %vm18804_vm0, %v19583_v56  ;;  %v5681_v34 = vld [vmem:[#allocation2 + $0xaa] sm:$0xff]  ;;  %v5680_v11 = vld [vmem:[#allocation2 + $0xa2] sm:$0xff] }
 0x1c6   : > { %v19702_v50 = vadd.f32 %v2053_v12, %v1844_v18  ;;  %v16045_v53 = vpop.f32.mrf.mxu0  ;;  %16295 = vmatprep.mubr.msk.bf16.mxu1 %vm18804_vm0, %v19583_v56  ;;  %v17648_v57 = vpack.i.bf16 %v5681_v34, %v5680_v11  ;;  %v18311_v60 = vld [vmem:[%s22654_s1 + $0xa8] sm:$0xff]   ;;  %v18315_v24 = vld [vmem:[%s22654_s1 + $0xa0] sm:$0xff]  }
 0x1c7   : > { %v1591_v58 = vmax.f32 %v1565_v51, 0.0  ;;  %v16113_v39 = vpop.f32.mrf.mxu1  ;;  %17644 = vrot.lane.b32.xlu0 %v17643_v31, %s18806_s29  ;;  %v19776_v33 = vld [vmem:[%s18956_s22 + $0x100] sm:$0xff]   ;;  %v18318_v53 = vld [vmem:[%s22654_s1 + $0x98] sm:$0xff]  }
 0x1c8   : > { %v1847_v40 = vpop.f32.mrf.mxu0  ;;  %v5578_v28 = vld [vmem:[#allocation2 + $0xb1] sm:$0xff]  ;;  %v18307_v51 = vld [vmem:[%s18956_s22 + $0xe0] sm:$0xff]  }
 0x1c9   : > { %1617 = vst [vmem:[#allocation2 + $0xc8] sm:$0xff] %v1591_v58  ;;  %v2056_v21 = vpop.f32.mrf.mxu1  ;;  %v5682_v37 = vld [vmem:[#allocation2 + $0xb2] sm:$0xff] }
 0x1ca   : > { %v19709_v45 = vadd.f32 %v2056_v21, %v1847_v40  ;;  %v16046_v47 = vpop.f32.mrf.mxu0  ;;  %v18319_v58 = vld [vmem:[%s22654_s1 + $0xd8] sm:$0xff]   ;;  %v18322_v21 = vld [vmem:[%s22654_s1 + $0x90] sm:$0xff]  }
 0x1cb   : > { %v16114_v61 = vpop.f32.mrf.mxu1  ;;  %17649 = vrot.lane.b32.xlu0 %v17648_v57, %s18805_s28 }
 0x1cc   : > { %v1852_v62 = vpop.f32.mrf.mxu0  ;;  %16228 = vmatmul.mubr.bf16.gmra.mxu0 %v18297_v26  ;;  %v5579_v49 = vld [vmem:[#allocation2 + $0xb9] sm:$0xff]  ;;  %v19805_v61 = vld [vmem:[%s18956_s22 + $0x108] sm:$0xff]  }
 0x1cd   : > { %v2061_v52 = vpop.f32.mrf.mxu1  ;;  %16296 = vmatmul.mubr.bf16.gmra.mxu1 %v18298_v42  ;;  %v17653_v29 = vpack.i.bf16 %v5579_v49, %v5578_v28  ;;  %16315 = vmatprep.mubr.msk.bf16.mxu0 %vm18804_vm0, %v19583_v56  ;;  %v5683_v23 = vld [vmem:[#allocation2 + $0xba] sm:$0xff]  ;;  %v18323_v42 = vld [vmem:[%s22654_s1 + $0xd0] sm:$0xff]   ;;  %v18310_v28 = vld [vmem:[%s18956_s22 + $0xe8] sm:$0xff]  }
 0x1ce   : > { %v19714_v54 = vadd.f32 %v2061_v52, %v1852_v62  ;;  %v16049_v55 = vpop.f32.mrf.mxu0  ;;  %16383 = vmatprep.mubr.msk.bf16.mxu1 %vm18804_vm0, %v19583_v56  ;;  %v17658_v59 = vpack.i.bf16 %v5683_v23, %v5682_v37  ;;  %v18327_v23 = vld [vmem:[%s22654_s1 + $0xc8] sm:$0xff]  }
 0x1cf   : > { %v16117_v32 = vpop.f32.mrf.mxu1  ;;  %17654 = vrot.lane.b32.xlu1 %v17653_v29, %s18806_s29  ;;  %v18325_v29 = vld [vmem:[%s22654_s1 + $0x88] sm:$0xff]  }
 0x1d0   : > { %v1855_v5 = vpop.f32.mrf.mxu0 }
 0x1d1   : > { %v2064_v2 = vpop.f32.mrf.mxu1 }
 0x1d2   : > { %v19726_v3 = vadd.f32 %v2064_v2, %v1855_v5  ;;  %v16050_v36 = vpop.f32.mrf.mxu0 }
 0x1d3   : > { %v16118_v48 = vpop.f32.mrf.mxu1  ;;  %17659 = vrot.lane.b32.xlu1 %v17658_v59, %s18805_s28  ;;  %v18329_v59 = vld [vmem:[%s22654_s1 + $0x80] sm:$0xff]  }
 0x1d4   : > { %v1860_v35 = vpop.f32.mrf.mxu0  ;;  %16316 = vmatmul.mubr.bf16.vlgmr.msra.gmra.mxu0 %v19720_v30 }
 0x1d5   : > { %v2069_v6 = vpop.f32.mrf.mxu1  ;;  %16384 = vmatmul.mubr.bf16.vlgmr.msra.gmra.mxu1 %v18300_v0  ;;  %16436 = vmatpush3.bf16.msra.mxu0 %v18301_v1  ;;  %v18330_v1 = vld [vmem:[%s22654_s1 + $0xc0] sm:$0xff]  }
 0x1d6   : > { %v19736_v7 = vadd.f32 %v2069_v6, %v1860_v35  ;;  %v16053_v14 = vpop.f32.mrf.mxu0  ;;  %16504 = vmatpush3.bf16.msra.mxu1 %v18302_v4  ;;  %16319 = vmatprep.mubr.msk.bf16.mxu0 %vm18804_vm0, %v19583_v56  ;;  %v19834_v4 = vld [vmem:[%s18956_s22 + $0x110] sm:$0xff]  }
 0x1d7   : > { %v16121_v9 = vpop.f32.mrf.mxu1  ;;  %16387 = vmatprep.mubr.msk.bf16.mxu1 %vm18804_vm0, %v19583_v56  ;;  %16437 = vmatprep.subr.bf16.mxu0 %v19583_v56 }
 0x1d8   : > { %v1863_v13 = vpop.f32.mrf.mxu0  ;;  %16505 = vmatprep.subr.bf16.mxu1 %v19583_v56 }
 0x1d9   : > { %v2072_v46 = vpop.f32.mrf.mxu1  ;;  %16438 = vmatpush3.bf16.msra.mxu0 %v18305_v43 }
 0x1da   : > { %v19751_v38 = vadd.f32 %v2072_v46, %v1863_v13  ;;  %v16054_v15 = vpop.f32.mrf.mxu0  ;;  %16506 = vmatpush3.bf16.msra.mxu1 %v18308_v10  ;;  %16439 = vmatprep.subr.bf16.mxu0 %v19583_v56 }
 0x1db   : > { %v16122_v17 = vpop.f32.mrf.mxu1  ;;  %16507 = vmatprep.subr.bf16.mxu1 %v19583_v56  ;;  %v19850_v15 = vld [vmem:[%s18956_s22 + $0x118] sm:$0xff]  }
 0x1dc   : > { %v1868_v63 = vpop.f32.mrf.mxu0  ;;  %16320 = vmatmul.mubr.bf16.gmra.mxu0 %v19747_v8 }
 0x1dd   : > { %v2077_v44 = vpop.f32.mrf.mxu1  ;;  %16388 = vmatmul.mubr.bf16.gmra.mxu1 %v18304_v41  ;;  %16323 = vmatprep.mubr.msk.bf16.mxu0 %vm18804_vm0, %v19583_v56 }
 0x1de   : > { %v19764_v20 = vadd.f32 %v2077_v44, %v1868_v63  ;;  %v16057_v22 = vpop.f32.mrf.mxu0  ;;  %16391 = vmatprep.mubr.msk.bf16.mxu1 %vm18804_vm0, %v19583_v56  ;;  %16440 = vmatpush3.bf16.msra.mxu0 %v18311_v60 }
 0x1df   : > { %v16125_v25 = vpop.f32.mrf.mxu1  ;;  %16508 = vmatpush3.bf16.msra.mxu1 %v18312_v19  ;;  %16441 = vmatprep.subr.bf16.mxu0 %v19583_v56 }
 0x1e0   : > { %v1871_v18 = vpop.f32.mrf.mxu0  ;;  %16509 = vmatprep.subr.bf16.mxu1 %v19583_v56 }
 0x1e1   : > { %v2080_v16 = vpop.f32.mrf.mxu1 }
 0x1e2   : > { %v19780_v12 = vadd.f32 %v2080_v16, %v1871_v18  ;;  %v16058_v31 = vpop.f32.mrf.mxu0  ;;  %16442 = vmatpush3.bf16.msra.mxu0 %v18315_v24  ;;  %v5456_v18 = vld [vmem:[#allocation2 + $0x20] sm:$0xff]  ;;  %v5457_v16 = vld [vmem:[#allocation2 + $0x28] sm:$0xff] }
 0x1e3   : > { %v16126_v34 = vpop.f32.mrf.mxu1  ;;  %16510 = vmatpush3.bf16.msra.mxu1 %v18316_v27  ;;  %16443 = vmatprep.subr.bf16.mxu0 %v19583_v56 }
 0x1e4   : > { %v1876_v39 = vpop.f32.mrf.mxu0  ;;  %16324 = vmatmul.mubr.bf16.gmra.mxu0 %v19776_v33  ;;  %16511 = vmatprep.subr.bf16.mxu1 %v19583_v56 }
 0x1e5   : > { %v2085_v40 = vpop.f32.mrf.mxu1  ;;  %16392 = vmatmul.mubr.bf16.gmra.mxu1 %v18307_v51  ;;  %16327 = vmatprep.mubr.msk.bf16.mxu0 %vm18804_vm0, %v19583_v56 }
 0x1e6   : > { %v19793_v11 = vadd.f32 %v2085_v40, %v1876_v39  ;;  %v16061_v26 = vpop.f32.mrf.mxu0  ;;  %16395 = vmatprep.mubr.msk.bf16.mxu1 %vm18804_vm0, %v19583_v56  ;;  %16444 = vmatpush3.bf16.msra.mxu0 %v18318_v53 }
 0x1e7   : > { %v16129_v57 = vpop.f32.mrf.mxu1  ;;  %16512 = vmatpush3.bf16.msra.mxu1 %v18319_v58  ;;  %16445 = vmatprep.subr.bf16.mxu0 %v19583_v56 }
 0x1e8   : > { %v1879_v47 = vpop.f32.mrf.mxu0  ;;  %16513 = vmatprep.subr.bf16.mxu1 %v19583_v56 }
 0x1e9   : > { %v2088_v62 = vpop.f32.mrf.mxu1 }
 0x1ea   : > { %v19809_v49 = vadd.f32 %v2088_v62, %v1879_v47  ;;  %v16062_v52 = vpop.f32.mrf.mxu0  ;;  %16446 = vmatpush3.bf16.msra.mxu0 %v18322_v21  ;;  %v19869_v62 = vld [vmem:[%s18956_s22 + $0x120] sm:$0xff]  }
 0x1eb   : > { %v16130_v55 = vpop.f32.mrf.mxu1  ;;  %16514 = vmatpush3.bf16.msra.mxu1 %v18323_v42  ;;  %16447 = vmatprep.subr.bf16.mxu0 %v19583_v56 }
 0x1ec   : > { %v1884_v32 = vpop.f32.mrf.mxu0  ;;  %16328 = vmatmul.mubr.bf16.gmra.mxu0 %v19805_v61  ;;  %16515 = vmatprep.subr.bf16.mxu1 %v19583_v56 }
 0x1ed   : > { %v2093_v5 = vpop.f32.mrf.mxu1  ;;  %16396 = vmatmul.mubr.bf16.gmra.mxu1 %v18310_v28  ;;  %16331 = vmatprep.mubr.msk.bf16.mxu0 %vm18804_vm0, %v19583_v56 }
 0x1ee   : > { %v19822_v37 = vadd.f32 %v2093_v5, %v1884_v32  ;;  %v16065_v2 = vpop.f32.mrf.mxu0  ;;  %16399 = vmatprep.mubr.msk.bf16.mxu1 %vm18804_vm0, %v19583_v56  ;;  %16448 = vmatpush3.bf16.msra.mxu0 %v18325_v29 }
 0x1ef   : > { %v16133_v0 = vpop.f32.mrf.mxu1  ;;  %16516 = vmatpush3.bf16.msra.mxu1 %v18327_v23  ;;  %16449 = vmatprep.subr.bf16.mxu0 %v19583_v56 }
 0x1f0   : > { %v1887_v36 = vpop.f32.mrf.mxu0  ;;  %16517 = vmatprep.subr.bf16.mxu1 %v19583_v56 }
 0x1f1   : > { %v2096_v48 = vpop.f32.mrf.mxu1 }
 0x1f2   : > { %v19837_v35 = vadd.f32 %v2096_v48, %v1887_v36  ;;  %v16066_v6 = vpop.f32.mrf.mxu0  ;;  %16450 = vmatpush3.bf16.msra.mxu0 %v18329_v59  ;;  %v5459_v36 = vld [vmem:[#allocation2 + $0x38] sm:$0xff] }
 0x1f3   : > { %v16134_v43 = vpop.f32.mrf.mxu1  ;;  %16518 = vmatpush3.bf16.msra.mxu1 %v18330_v1  ;;  %16571 = vmatprep.subr.bf16.mxu0 %v19583_v56  ;;  %v5458_v1 = vld [vmem:[#allocation2 + $0x30] sm:$0xff] }
 0x1f4   : > { %v1892_v14 = vpop.f32.mrf.mxu0  ;;  %16332 = vmatmul.mubr.bf16.gmra.mxu0 %v19834_v4  ;;  %16639 = vmatprep.subr.bf16.mxu1 %v19583_v56 }
 0x1f5   : > { %v2101_v10 = vpop.f32.mrf.mxu1  ;;  %16400 = vmatmul.mubr.bf16.gmra.mxu1 %v19720_v30  ;;  %16335 = vmatprep.mubr.msk.bf16.mxu0 %vm18804_vm0, %v19583_v56 }
 0x1f6   : > { %v19845_v9 = vadd.f32 %v2101_v10, %v1892_v14  ;;  %v16069_v13 = vpop.f32.mrf.mxu0  ;;  %16403 = vmatprep.mubr.msk.bf16.mxu1 %vm18804_vm0, %v19583_v56 }
 0x1f7   : > { %v16137_v46 = vpop.f32.mrf.mxu1 }
 0x1f8   : > { %v1895_v41 = vpop.f32.mrf.mxu0 }
 0x1f9   : > { %v2104_v60 = vpop.f32.mrf.mxu1  ;;  %v17570_v17 = vpop.permute.xlu1 %17569 }
 0x1fa   : > { %v19852_v19 = vadd.f32 %v2104_v60, %v1895_v41  ;;  %v17572_v63 = vunpack.i.h.bf16 %v17570_v17  ;;  %v17571_v44 = vunpack.i.l.bf16 %v17570_v17  ;;  %v17565_v30 = vpop.permute.xlu0 %17564  ;;  %v16070_v22 = vpop.f32.mrf.mxu0 }
 0x1fb   : > { %v17567_v24 = vunpack.i.h.bf16 %v17565_v30  ;;  %v17566_v25 = vunpack.i.l.bf16 %v17565_v30  ;;  %v16138_v27 = vpop.f32.mrf.mxu1  ;;  %v19888_v30 = vld [vmem:[%s18956_s22 + $0x128] sm:$0xff]  }
 0x1fc   : > { %v1900_v51 = vpop.f32.mrf.mxu0  ;;  %16336 = vmatmul.mubr.bf16.gmra.mxu0 %v19850_v15 }
 0x1fd   : > { %v6602_v31 = vsel %vm6596_vm1, %v5457_v16, %v17567_v24  ;;  %v6601_v53 = vsel %vm6596_vm1, %v5456_v18, %v17566_v25  ;;  %v2109_v34 = vpop.f32.mrf.mxu1  ;;  %16404 = vmatmul.mubr.bf16.gmra.mxu1 %v19747_v8  ;;  %16339 = vmatprep.mubr.msk.bf16.mxu0 %vm18804_vm0, %v19583_v56 }
 0x1fe   : > { %v6707_v58 = vsel %vm6701_vm2, %v6602_v31, %v17572_v63  ;;  %v6706_v39 = vsel %vm6701_vm2, %v6601_v53, %v17571_v44  ;;  %v19862_v40 = vadd.f32 %v2109_v34, %v1900_v51  ;;  %v16073_v26 = vpop.f32.mrf.mxu0  ;;  %16407 = vmatprep.mubr.msk.bf16.mxu1 %vm18804_vm0, %v19583_v56  ;;  %v19894_v34 = vld [vmem:[#allocation2 + $0x340] sm:$0xff] }
 0x1ff   : > { %v6812_v21 = vsel %vm6806_vm3, %v6707_v58, %v5457_v16  ;;  %v6811_v57 = vsel %vm6806_vm3, %v6706_v39, %v5456_v18  ;;  %v16141_v42 = vpop.f32.mrf.mxu1  ;;  %v5460_v58 = vld [vmem:[#allocation2 + $0x40] sm:$0xff]  ;;  %v5461_v39 = vld [vmem:[#allocation2 + $0x48] sm:$0xff] }
 0x200   : > { %v14656_v47 = vpack.c.bf16 %v6812_v21, %v6811_v57  ;;  %v1903_v8 = vpop.f32.mrf.mxu0 }
 0x201   : > { %v2112_v28 = vpop.f32.mrf.mxu1  ;;  %v17580_v52 = vpop.permute.xlu1 %17579 }
 0x202   : > { %15012 = vst [vmem:[#allocation3 + $0x10] sm:$0xff] %v14656_v47   ;;  %v19871_v29 = vadd.f32 %v2112_v28, %v1903_v8  ;;  %v17582_v55 = vunpack.i.h.bf16 %v17580_v52  ;;  %v17581_v23 = vunpack.i.l.bf16 %v17580_v52  ;;  %v17575_v32 = vpop.permute.xlu0 %17574  ;;  %v16074_v5 = vpop.f32.mrf.mxu0 }
 0x203   : > { %v17577_v2 = vunpack.i.h.bf16 %v17575_v32  ;;  %v17576_v59 = vunpack.i.l.bf16 %v17575_v32  ;;  %v16142_v0 = vpop.f32.mrf.mxu1 }
 0x204   : > { %v1908_v48 = vpop.f32.mrf.mxu0  ;;  %16340 = vmatmul.mubr.bf16.gmra.mxu0 %v19869_v62 }
 0x205   : > { %v6604_v6 = vsel %vm6596_vm1, %v5459_v36, %v17577_v2  ;;  %v6603_v43 = vsel %vm6596_vm1, %v5458_v1, %v17576_v59  ;;  %v2117_v14 = vpop.f32.mrf.mxu1  ;;  %16408 = vmatmul.mubr.bf16.gmra.mxu1 %v19776_v33  ;;  %16343 = vmatprep.mubr.msk.bf16.mxu0 %vm18804_vm0, %v19583_v56 }
 0x206   : > { %v6709_v10 = vsel %vm6701_vm2, %v6604_v6, %v17582_v55  ;;  %v6708_v13 = vsel %vm6701_vm2, %v6603_v43, %v17581_v23  ;;  %v19881_v46 = vadd.f32 %v2117_v14, %v1908_v48  ;;  %v16077_v41 = vpop.f32.mrf.mxu0  ;;  %16411 = vmatprep.mubr.msk.bf16.mxu1 %vm18804_vm0, %v19583_v56  ;;  %v19907_v23 = vld [vmem:[%s18956_s22 + $0x130] sm:$0xff]  }
 0x207   : > { %v6814_v60 = vsel %vm6806_vm3, %v6709_v10, %v5459_v36  ;;  %v6813_v17 = vsel %vm6806_vm3, %v6708_v13, %v5458_v1  ;;  %v16145_v63 = vpop.f32.mrf.mxu1  ;;  %v5462_v41 = vld [vmem:[#allocation2 + $0x50] sm:$0xff] }
 0x208   : > { %v14661_v44 = vpack.c.bf16 %v6814_v60, %v6813_v17  ;;  %v1911_v33 = vpop.f32.mrf.mxu0  ;;  %v5463_v60 = vld [vmem:[#allocation2 + $0x58] sm:$0xff] }
 0x209   : > { %v2120_v22 = vpop.f32.mrf.mxu1  ;;  %v17585_v24 = vpop.permute.xlu0 %17584 }
 0x20a   : > { %15013 = vst [vmem:[#allocation3 + $0x18] sm:$0xff] %v14661_v44   ;;  %v19890_v25 = vadd.f32 %v2120_v22, %v1911_v33  ;;  %v16078_v27 = vpop.f32.mrf.mxu0  ;;  %v17587_v18 = vunpack.i.h.bf16 %v17585_v24  ;;  %v17586_v16 = vunpack.i.l.bf16 %v17585_v24 }
 0x20b   : > { %v16146_v51 = vpop.f32.mrf.mxu1 }
 0x20c   : > { %v1916_v31 = vpop.f32.mrf.mxu0  ;;  %16344 = vmatmul.mubr.bf16.gmra.mxu0 %v19888_v30  ;;  %v6606_v47 = vsel %vm6596_vm1, %v5461_v39, %v17587_v18  ;;  %v18324_v51 = vld [vmem:[%s18956_s22 + $0x138] sm:$0xff]  }
 0x20d   : > { %v2125_v56 = vpop.f32.mrf.mxu1  ;;  %16412 = vmatmul.mubr.bf16.gmra.mxu1 %v19805_v61  ;;  %v17590_v53 = vpop.permute.xlu0 %17589  ;;  %16347 = vmatprep.mubr.msk.bf16.mxu0 %vm18804_vm0, %v19894_v34  ;;  %v6605_v61 = vsel %vm6596_vm1, %v5460_v58, %v17586_v16 }
 0x20e   : > { %v19898_v26 = vadd.f32 %v2125_v56, %v1916_v31  ;;  %v17592_v21 = vunpack.i.h.bf16 %v17590_v53  ;;  %v17591_v57 = vunpack.i.l.bf16 %v17590_v53  ;;  %v16081_v42 = vpop.f32.mrf.mxu0  ;;  %16415 = vmatprep.mubr.msk.bf16.mxu1 %vm18804_vm0, %v19894_v34 }
 0x20f   : > { %v16149_v8 = vpop.f32.mrf.mxu1 }
 0x210   : > { %v6710_v28 = vsel %vm6701_vm2, %v6605_v61, %v17591_v57  ;;  %v6711_v52 = vsel %vm6701_vm2, %v6606_v47, %v17592_v21  ;;  %v1919_v55 = vpop.f32.mrf.mxu0 }
 0x211   : > { %v6815_v32 = vsel %vm6806_vm3, %v6710_v28, %v5460_v58  ;;  %v6816_v5 = vsel %vm6806_vm3, %v6711_v52, %v5461_v39  ;;  %v2128_v2 = vpop.f32.mrf.mxu1  ;;  %v17595_v59 = vpop.permute.xlu1 %17594 }
 0x212   : > { %v14666_v0 = vpack.c.bf16 %v6816_v5, %v6815_v32  ;;  %v19911_v1 = vadd.f32 %v2128_v2, %v1919_v55  ;;  %v16082_v36 = vpop.f32.mrf.mxu0  ;;  %v17597_v48 = vunpack.i.h.bf16 %v17595_v59  ;;  %v17596_v6 = vunpack.i.l.bf16 %v17595_v59  ;;  %v5464_v55 = vld [vmem:[#allocation2 + $0x60] sm:$0xff]  ;;  %v5465_v32 = vld [vmem:[#allocation2 + $0x68] sm:$0xff] }
 0x213   : > { %v16150_v43 = vpop.f32.mrf.mxu1 }
 0x214   : > { %15014 = vst [vmem:[#allocation3 + $0x20] sm:$0xff] %v14666_v0   ;;  %v1924_v14 = vpop.f32.mrf.mxu0  ;;  %16348 = vmatmul.mubr.bf16.gmra.mxu0 %v19907_v23  ;;  %v6608_v22 = vsel %vm6596_vm1, %v5463_v60, %v17597_v48  ;;  %v6607_v24 = vsel %vm6596_vm1, %v5462_v41, %v17596_v6 }
 0x215   : > { %v2133_v10 = vpop.f32.mrf.mxu1  ;;  %16416 = vmatmul.mubr.bf16.gmra.mxu1 %v19834_v4  ;;  %v17600_v13 = vpop.permute.xlu1 %17599  ;;  %16351 = vmatprep.mubr.msk.bf16.mxu0 %vm18804_vm0, %v19894_v34 }
 0x216   : > { %v19917_v17 = vadd.f32 %v2133_v10, %v1924_v14  ;;  %v17602_v63 = vunpack.i.h.bf16 %v17600_v13  ;;  %v17601_v44 = vunpack.i.l.bf16 %v17600_v13  ;;  %v16085_v33 = vpop.f32.mrf.mxu0  ;;  %16419 = vmatprep.mubr.msk.bf16.mxu1 %vm18804_vm0, %v19894_v34  ;;  %v18326_v10 = vld [vmem:[%s18956_s22 + $0x140] sm:$0xff]  }
 0x217   : > { %v16153_v4 = vpop.f32.mrf.mxu1 }
 0x218   : > { %v6712_v27 = vsel %vm6701_vm2, %v6607_v24, %v17601_v44  ;;  %v6713_v18 = vsel %vm6701_vm2, %v6608_v22, %v17602_v63  ;;  %v1927_v16 = vpop.f32.mrf.mxu0 }
 0x219   : > { %v6817_v31 = vsel %vm6806_vm3, %v6712_v27, %v5462_v41  ;;  %v6818_v56 = vsel %vm6806_vm3, %v6713_v18, %v5463_v60  ;;  %v2136_v53 = vpop.f32.mrf.mxu1  ;;  %v17605_v58 = vpop.permute.xlu0 %17604 }
 0x21a   : > { %v14671_v39 = vpack.c.bf16 %v6818_v56, %v6817_v31  ;;  %v19928_v21 = vadd.f32 %v2136_v53, %v1927_v16  ;;  %v16086_v57 = vpop.f32.mrf.mxu0  ;;  %v17607_v42 = vunpack.i.h.bf16 %v17605_v58  ;;  %v17606_v47 = vunpack.i.l.bf16 %v17605_v58  ;;  %v5466_v31 = vld [vmem:[#allocation2 + $0x70] sm:$0xff]  ;;  %v5467_v56 = vld [vmem:[#allocation2 + $0x78] sm:$0xff] }
 0x21b   : > { %v16154_v61 = vpop.f32.mrf.mxu1 }
 0x21c   : > { %15015 = vst [vmem:[#allocation3 + $0x28] sm:$0xff] %v14671_v39   ;;  %v1932_v8 = vpop.f32.mrf.mxu0  ;;  %16352 = vmatmul.mubr.bf16.gmra.mxu0 %v18324_v51  ;;  %v6610_v36 = vsel %vm6596_vm1, %v5465_v32, %v17607_v42  ;;  %v6609_v48 = vsel %vm6596_vm1, %v5464_v55, %v17606_v47 }
 0x21d   : > { %v2141_v28 = vpop.f32.mrf.mxu1  ;;  %16420 = vmatmul.mubr.bf16.gmra.mxu1 %v19850_v15  ;;  %v17610_v52 = vpop.permute.xlu0 %17609  ;;  %16355 = vmatprep.mubr.msk.bf16.mxu0 %vm18804_vm0, %v19894_v34 }
 0x21e   : > { %v19933_v5 = vadd.f32 %v2141_v28, %v1932_v8  ;;  %v17612_v2 = vunpack.i.h.bf16 %v17610_v52  ;;  %v17611_v59 = vunpack.i.l.bf16 %v17610_v52  ;;  %v16089_v0 = vpop.f32.mrf.mxu0  ;;  %16423 = vmatprep.mubr.msk.bf16.mxu1 %vm18804_vm0, %v19894_v34  ;;  %v18328_v52 = vld [vmem:[%s18956_s22 + $0x148] sm:$0xff]  }
 0x21f   : > { %v16157_v15 = vpop.f32.mrf.mxu1 }
 0x220   : > { %v6714_v6 = vsel %vm6701_vm2, %v6609_v48, %v17611_v59  ;;  %v6715_v43 = vsel %vm6701_vm2, %v6610_v36, %v17612_v2  ;;  %v1935_v14 = vpop.f32.mrf.mxu0 }
 0x221   : > { %v6819_v13 = vsel %vm6806_vm3, %v6714_v6, %v5464_v55  ;;  %v6820_v41 = vsel %vm6806_vm3, %v6715_v43, %v5465_v32  ;;  %v2144_v60 = vpop.f32.mrf.mxu1  ;;  %v17615_v63 = vpop.permute.xlu1 %17614 }
 0x222   : > { %v14676_v44 = vpack.c.bf16 %v6820_v41, %v6819_v13  ;;  %v19944_v33 = vadd.f32 %v2144_v60, %v1935_v14  ;;  %v16090_v22 = vpop.f32.mrf.mxu0  ;;  %v17617_v24 = vunpack.i.h.bf16 %v17615_v63  ;;  %v17616_v4 = vunpack.i.l.bf16 %v17615_v63  ;;  %v5468_v60 = vld [vmem:[#allocation2 + $0x80] sm:$0xff]  ;;  %v5469_v63 = vld [vmem:[#allocation2 + $0x88] sm:$0xff] }
 0x223   : > { %v16158_v27 = vpop.f32.mrf.mxu1 }
 0x224   : > { %15016 = vst [vmem:[#allocation3 + $0x30] sm:$0xff] %v14676_v44   ;;  %v1940_v18 = vpop.f32.mrf.mxu0  ;;  %16356 = vmatmul.mubr.bf16.gmra.mxu0 %v18326_v10  ;;  %v6612_v42 = vsel %vm6596_vm1, %v5467_v56, %v17617_v24  ;;  %v6611_v47 = vsel %vm6596_vm1, %v5466_v31, %v17616_v4 }
 0x225   : > { %v2149_v16 = vpop.f32.mrf.mxu1  ;;  %16424 = vmatmul.mubr.bf16.gmra.mxu1 %v19869_v62  ;;  %v17620_v51 = vpop.permute.xlu1 %17619  ;;  %16359 = vmatprep.mubr.msk.bf16.mxu0 %vm18804_vm0, %v19894_v34 }
 0x226   : > { %v19949_v53 = vadd.f32 %v2149_v16, %v1940_v18  ;;  %v17622_v58 = vunpack.i.h.bf16 %v17620_v51  ;;  %v17621_v39 = vunpack.i.l.bf16 %v17620_v51  ;;  %v16093_v57 = vpop.f32.mrf.mxu0  ;;  %16427 = vmatprep.mubr.msk.bf16.mxu1 %vm18804_vm0, %v19894_v34 }
 0x227   : > { %v16161_v62 = vpop.f32.mrf.mxu1 }
 0x228   : > { %v6716_v61 = vsel %vm6701_vm2, %v6611_v47, %v17621_v39  ;;  %v6717_v8 = vsel %vm6701_vm2, %v6612_v42, %v17622_v58  ;;  %v1943_v28 = vpop.f32.mrf.mxu0 }
 0x229   : > { %v6821_v55 = vsel %vm6806_vm3, %v6716_v61, %v5466_v31  ;;  %v6822_v32 = vsel %vm6806_vm3, %v6717_v8, %v5467_v56  ;;  %v2152_v2 = vpop.f32.mrf.mxu1  ;;  %v17625_v59 = vpop.permute.xlu0 %17624  ;;  %v18331_v31 = vld [vmem:[%s18956_s22 + $0x150] sm:$0xff]   ;;  %v19976_v56 = vld [vmem:[%s22655_s2] ss:$0 sm:$0xff] }
 0x22a   : > { %v14681_v0 = vpack.c.bf16 %v6822_v32, %v6821_v55  ;;  %v19960_v36 = vadd.f32 %v2152_v2, %v1943_v28  ;;  %v16094_v48 = vpop.f32.mrf.mxu0  ;;  %v17627_v15 = vunpack.i.h.bf16 %v17625_v59  ;;  %v17626_v6 = vunpack.i.l.bf16 %v17625_v59 }
 0x22b   : > { %v16162_v43 = vpop.f32.mrf.mxu1 }
 0x22c   : > { %15017 = vst [vmem:[#allocation3 + $0x38] sm:$0xff] %v14681_v0   ;;  %v2358_v14 = vpop.f32.mrf.mxu0  ;;  %16360 = vmatmul.mubr.bf16.gmra.mxu0 %v18328_v52  ;;  %v6614_v4 = vsel %vm6596_vm1, %v5469_v63, %v17627_v15  ;;  %v5471_v43 = vld [vmem:[#allocation2 + $0x98] sm:$0xff] }
 0x22d   : > { %v2461_v10 = vadd.f32 %v2358_v14, %v19702_v50  ;;  %v2689_v13 = vpop.f32.mrf.mxu1  ;;  %16428 = vmatmul.mubr.bf16.gmra.mxu1 %v19888_v30  ;;  %v17630_v41 = vpop.permute.xlu0 %17629  ;;  %16363 = vmatprep.mubr.msk.bf16.mxu0 %vm18804_vm0, %v19894_v34  ;;  %v6613_v50 = vsel %vm6596_vm1, %v5468_v60, %v17626_v6  ;;  %v5470_v6 = vld [vmem:[#allocation2 + $0x90] sm:$0xff] }
 0x22e   : > { %v17632_v44 = vunpack.i.h.bf16 %v17630_v41  ;;  %v17631_v22 = vunpack.i.l.bf16 %v17630_v41  ;;  %v16181_v24 = vpop.f32.mrf.mxu0  ;;  %16431 = vmatprep.mubr.msk.bf16.mxu1 %vm18804_vm0, %v19894_v34 }
 0x22f   : > { %v2792_v27 = vadd.f32 %v2689_v13, %v2461_v10  ;;  %v16249_v18 = vpop.f32.mrf.mxu1 }
 0x230   : > { %v6718_v30 = vsel %vm6701_vm2, %v6613_v50, %v17631_v22  ;;  %v6719_v16 = vsel %vm6701_vm2, %v6614_v4, %v17632_v44  ;;  %v2361_v51 = vpop.f32.mrf.mxu0  ;;  %v18332_v4 = vld [vmem:[%s18956_s22 + $0x110] sm:$0xff]  }
 0x231   : > { %v2818_v58 = vadd.f32 %v19976_v56, %v2792_v27  ;;  %v6823_v39 = vsel %vm6806_vm3, %v6718_v30, %v5468_v60  ;;  %v6824_v57 = vsel %vm6806_vm3, %v6719_v16, %v5469_v63  ;;  %v2462_v42 = vadd.f32 %v2361_v51, %v19709_v45  ;;  %v2692_v47 = vpop.f32.mrf.mxu1  ;;  %v17635_v62 = vpop.permute.xlu1 %17634 }
 0x232   : > { %v14686_v61 = vpack.c.bf16 %v6824_v57, %v6823_v39  ;;  %v16182_v8 = vpop.f32.mrf.mxu0  ;;  %v17637_v55 = vunpack.i.h.bf16 %v17635_v62  ;;  %v17636_v32 = vunpack.i.l.bf16 %v17635_v62 }
 0x233   : > { %v2844_v28 = vmax.f32 %v2818_v58, 0.0  ;;  %v2793_v52 = vadd.f32 %v2692_v47, %v2462_v42  ;;  %v16250_v2 = vpop.f32.mrf.mxu1  ;;  %v18334_v58 = vld [vmem:[%s22654_s1 + $0x78] sm:$0xff]  }
 0x234   : > { %15018 = vst [vmem:[#allocation3 + $0x40] sm:$0xff] %v14686_v61   ;;  %v2366_v59 = vpop.f32.mrf.mxu0  ;;  %16364 = vmatmul.mubr.bf16.gmra.mxu0 %v18331_v31  ;;  %v6615_v60 = vsel %vm6596_vm1, %v5470_v6, %v17636_v32  ;;  %v18333_v31 = vld [vmem:[%s18956_s22 + $0x130] sm:$0xff]   ;;  %v18335_v42 = vld [vmem:[%s22654_s1 + $0x38] sm:$0xff]  }
 0x235   : > { %2870 = vst [vmem:[#allocation2 + $0xd0] sm:$0xff] %v2844_v28  ;;  %v2819_v0 = vadd.f32 %v19976_v56, %v2793_v52  ;;  %v2463_v48 = vadd.f32 %v2366_v59, %v19714_v54  ;;  %v2697_v15 = vpop.f32.mrf.mxu1  ;;  %16432 = vmatmul.mubr.bf16.gmra.mxu1 %v19907_v23  ;;  %v17640_v45 = vpop.permute.xlu1 %17639  ;;  %16451 = vmatprep.mubr.msk.bf16.mxu0 %vm18804_vm0, %v19894_v34  ;;  %v18338_v2 = vld [vmem:[%s22654_s1 + $0x70] sm:$0xff]  }
 0x236   : > { %v17642_v14 = vunpack.i.h.bf16 %v17640_v45  ;;  %v17641_v10 = vunpack.i.l.bf16 %v17640_v45  ;;  %v16185_v13 = vpop.f32.mrf.mxu0  ;;  %16519 = vmatprep.mubr.msk.bf16.mxu1 %vm18804_vm0, %v19894_v34  ;;  %v6616_v54 = vsel %vm6596_vm1, %v5471_v43, %v17637_v55  ;;  %v5580_v55 = vld [vmem:[#allocation2 + $0xc1] sm:$0xff] }
 0x237   : > { %v2845_v41 = vmax.f32 %v2819_v0, 0.0  ;;  %v2794_v23 = vadd.f32 %v2697_v15, %v2463_v48  ;;  %v16253_v63 = vpop.f32.mrf.mxu1 }
 0x238   : > { %v6720_v44 = vsel %vm6701_vm2, %v6615_v60, %v17641_v10  ;;  %v6721_v22 = vsel %vm6701_vm2, %v6616_v54, %v17642_v14  ;;  %v2369_v24 = vpop.f32.mrf.mxu0 }
 0x239   : > { %2871 = vst [vmem:[#allocation2 + $0xd8] sm:$0xff] %v2845_v41  ;;  %v2820_v50 = vadd.f32 %v19976_v56, %v2794_v23  ;;  %v6825_v27 = vsel %vm6806_vm3, %v6720_v44, %v5470_v6  ;;  %v6826_v18 = vsel %vm6806_vm3, %v6721_v22, %v5471_v43  ;;  %v2464_v30 = vadd.f32 %v2369_v24, %v19726_v3  ;;  %v2700_v16 = vpop.f32.mrf.mxu1  ;;  %v17645_v51 = vpop.permute.xlu0 %17644  ;;  %v5472_v3 = vld [vmem:[#allocation2 + $0xa0] sm:$0xff]  ;;  %v5473_v43 = vld [vmem:[#allocation2 + $0xa8] sm:$0xff]  ;;  %v18341_v41 = vld [vmem:[%s22654_s1 + $0x30] sm:$0xff]  }
 0x23a   : > { %v14691_v39 = vpack.c.bf16 %v6826_v18, %v6825_v27  ;;  %v16186_v57 = vpop.f32.mrf.mxu0  ;;  %v17647_v61 = vunpack.i.h.bf16 %v17645_v51  ;;  %v17646_v8 = vunpack.i.l.bf16 %v17645_v51  ;;  %v5684_v44 = vld [vmem:[#allocation2 + $0xc2] sm:$0xff]  ;;  %v18336_v27 = vld [vmem:[%s18956_s22 + $0x118] sm:$0xff]  }
 0x23b   : > { %v2846_v47 = vmax.f32 %v2820_v50, 0.0  ;;  %v2795_v62 = vadd.f32 %v2700_v16, %v2464_v30  ;;  %v16254_v28 = vpop.f32.mrf.mxu1 }
 0x23c   : > { %15019 = vst [vmem:[#allocation3 + $0x48] sm:$0xff] %v14691_v39   ;;  %v2374_v52 = vpop.f32.mrf.mxu0  ;;  %16452 = vmatmul.mubr.bf16.vlgmr.msra.gmra.mxu0 %v18332_v4  ;;  %v5581_v32 = vld [vmem:[#allocation2 + $0xc9] sm:$0xff]  ;;  %v6618_v54 = vsel %vm6596_vm1, %v5473_v43, %v17647_v61  ;;  %v6617_v60 = vsel %vm6596_vm1, %v5472_v3, %v17646_v8  ;;  %v18337_v39 = vld [vmem:[%s18956_s22 + $0x138] sm:$0xff]  }
 0x23d   : > { %2872 = vst [vmem:[#allocation2 + $0xe0] sm:$0xff] %v2846_v47  ;;  %v2821_v59 = vadd.f32 %v19976_v56, %v2795_v62  ;;  %v2465_v0 = vadd.f32 %v2374_v52, %v19736_v7  ;;  %v2705_v48 = vpop.f32.mrf.mxu1  ;;  %16520 = vmatmul.mubr.bf16.vlgmr.msra.gmra.mxu1 %v18333_v31  ;;  %16572 = vmatpush3.bf16.msra.mxu0 %v18334_v58  ;;  %v17650_v15 = vpop.permute.xlu0 %17649  ;;  %v5685_v6 = vld [vmem:[#allocation2 + $0xca] sm:$0xff] }
 0x23e   : > { %v17663_v45 = vpack.i.bf16 %v5581_v32, %v5580_v55  ;;  %v17652_v14 = vunpack.i.h.bf16 %v17650_v15  ;;  %v17651_v10 = vunpack.i.l.bf16 %v17650_v15  ;;  %v16189_v13 = vpop.f32.mrf.mxu0  ;;  %16640 = vmatpush3.bf16.msra.mxu1 %v18335_v42  ;;  %16455 = vmatprep.mubr.msk.bf16.mxu0 %vm18804_vm0, %v19894_v34  ;;  %v17668_v50 = vpack.i.bf16 %v5685_v6, %v5684_v44  ;;  %v18344_v47 = vld [vmem:[%s22654_s1 + $0x68] sm:$0xff]   ;;  %v18351_v44 = vld [vmem:[%s22654_s1 + $0x20] sm:$0xff]  }
 0x23f   : > { %v2847_v7 = vmax.f32 %v2821_v59, 0.0  ;;  %v2796_v23 = vadd.f32 %v2705_v48, %v2465_v0  ;;  %v16257_v63 = vpop.f32.mrf.mxu1  ;;  %16523 = vmatprep.mubr.msk.bf16.mxu1 %vm18804_vm0, %v19894_v34  ;;  %16573 = vmatprep.subr.bf16.mxu0 %v19894_v34  ;;  %v5474_v59 = vld [vmem:[#allocation2 + $0xb0] sm:$0xff]  ;;  %v5475_v0 = vld [vmem:[#allocation2 + $0xb8] sm:$0xff] }
 0x240   : > { %17664 = vrot.lane.b32.xlu0 %v17663_v45, %s18806_s29  ;;  %v6722_v22 = vsel %vm6701_vm2, %v6617_v60, %v17651_v10  ;;  %v6723_v24 = vsel %vm6701_vm2, %v6618_v54, %v17652_v14  ;;  %v2377_v4 = vpop.f32.mrf.mxu0  ;;  %16641 = vmatprep.subr.bf16.mxu1 %v19894_v34  ;;  %v5582_v55 = vld [vmem:[#allocation2 + $0xd1] sm:$0xff] }
 0x241   : > { %2873 = vst [vmem:[#allocation2 + $0xe8] sm:$0xff] %v2847_v7  ;;  %v2822_v18 = vadd.f32 %v19976_v56, %v2796_v23  ;;  %v6827_v30 = vsel %vm6806_vm3, %v6722_v22, %v5472_v3  ;;  %v6828_v16 = vsel %vm6806_vm3, %v6723_v24, %v5473_v43  ;;  %v2466_v51 = vadd.f32 %v2377_v4, %v19751_v38  ;;  %v2708_v31 = vpop.f32.mrf.mxu1  ;;  %v17655_v58 = vpop.permute.xlu1 %17654  ;;  %v18345_v38 = vld [vmem:[%s22654_s1 + $0x28] sm:$0xff]   ;;  %v5686_v63 = vld [vmem:[#allocation2 + $0xd2] sm:$0xff] }
 0x242   : > { %16574 = vmatpush3.bf16.msra.mxu0 %v18338_v2  ;;  %v14696_v57 = vpack.c.bf16 %v6828_v16, %v6827_v30  ;;  %v16190_v42 = vpop.f32.mrf.mxu0  ;;  %16642 = vmatpush3.bf16.msra.mxu1 %v18341_v41  ;;  %v17657_v8 = vunpack.i.h.bf16 %v17655_v58  ;;  %v17656_v28 = vunpack.i.l.bf16 %v17655_v58  ;;  %v18340_v58 = vld [vmem:[%s18956_s22 + $0x140] sm:$0xff]  }
 0x243   : > { %16575 = vmatprep.subr.bf16.mxu0 %v19894_v34  ;;  %v2848_v62 = vmax.f32 %v2822_v18, 0.0  ;;  %v2797_v61 = vadd.f32 %v2708_v31, %v2466_v51  ;;  %v16258_v3 = vpop.f32.mrf.mxu1  ;;  %16643 = vmatprep.subr.bf16.mxu1 %v19894_v34  ;;  %v18354_v42 = vld [vmem:[%s22654_s1 + $0x58] sm:$0xff]  }
 0x244   : > { %17669 = vrot.lane.b32.xlu0 %v17668_v50, %s18805_s28  ;;  %15020 = vst [vmem:[#allocation3 + $0x50] sm:$0xff] %v14696_v57   ;;  %v2382_v52 = vpop.f32.mrf.mxu0  ;;  %16456 = vmatmul.mubr.bf16.gmra.mxu0 %v18336_v27  ;;  %v5583_v32 = vld [vmem:[#allocation2 + $0xd9] sm:$0xff]  ;;  %v6620_v7 = vsel %vm6596_vm1, %v5475_v0, %v17657_v8  ;;  %v6619_v54 = vsel %vm6596_vm1, %v5474_v59, %v17656_v28 }
 0x245   : > { %2874 = vst [vmem:[#allocation2 + $0xf0] sm:$0xff] %v2848_v62  ;;  %v2823_v2 = vadd.f32 %v19976_v56, %v2797_v61  ;;  %v2467_v48 = vadd.f32 %v2382_v52, %v19764_v20  ;;  %v2713_v15 = vpop.f32.mrf.mxu1  ;;  %16524 = vmatmul.mubr.bf16.gmra.mxu1 %v18337_v39  ;;  %v17660_v45 = vpop.permute.xlu1 %17659  ;;  %v17673_v6 = vpack.i.bf16 %v5583_v32, %v5582_v55  ;;  %v5687_v43 = vld [vmem:[#allocation2 + $0xda] sm:$0xff] }
 0x246   : > { %16459 = vmatprep.mubr.msk.bf16.mxu0 %vm18804_vm0, %v19894_v34  ;;  %v17662_v14 = vunpack.i.h.bf16 %v17660_v45  ;;  %v17661_v10 = vunpack.i.l.bf16 %v17660_v45  ;;  %v16193_v13 = vpop.f32.mrf.mxu0  ;;  %16527 = vmatprep.mubr.msk.bf16.mxu1 %vm18804_vm0, %v19894_v34  ;;  %v18350_v20 = vld [vmem:[%s22654_s1 + $0x60] sm:$0xff]   ;;  %v17678_v50 = vpack.i.bf16 %v5687_v43, %v5686_v63  ;;  %v18355_v3 = vld [vmem:[%s22654_s1 + $0x18] sm:$0xff]   ;;  %v18342_v43 = vld [vmem:[%s18956_s22 + $0x128] sm:$0xff]  }
 0x247   : > { %16576 = vmatpush3.bf16.msra.mxu0 %v18344_v47  ;;  %v2849_v41 = vmax.f32 %v2823_v2, 0.0  ;;  %v2798_v60 = vadd.f32 %v2713_v15, %v2467_v48  ;;  %v16261_v23 = vpop.f32.mrf.mxu1  ;;  %17674 = vrot.lane.b32.xlu1 %v17673_v6, %s18806_s29  ;;  %v18339_v27 = vld [vmem:[%s18956_s22 + $0x120] sm:$0xff]  }
 0x248   : > { %16644 = vmatpush3.bf16.msra.mxu1 %v18345_v38  ;;  %v6724_v22 = vsel %vm6701_vm2, %v6619_v54, %v17661_v10  ;;  %v6725_v24 = vsel %vm6701_vm2, %v6620_v7, %v17662_v14  ;;  %v2385_v4 = vpop.f32.mrf.mxu0  ;;  %16577 = vmatprep.subr.bf16.mxu0 %v19894_v34  ;;  %v5584_v28 = vld [vmem:[#allocation2 + $0xe1] sm:$0xff]  ;;  %v18361_v14 = vld [vmem:[%s22654_s1 + $0x10] sm:$0xff]  }
 0x249   : > { %16645 = vmatprep.subr.bf16.mxu1 %v19894_v34  ;;  %2875 = vst [vmem:[#allocation2 + $0xf8] sm:$0xff] %v2849_v41  ;;  %v2824_v18 = vadd.f32 %v19976_v56, %v2798_v60  ;;  %v6829_v30 = vsel %vm6806_vm3, %v6724_v22, %v5474_v59  ;;  %v6830_v16 = vsel %vm6806_vm3, %v6725_v24, %v5475_v0  ;;  %v2716_v31 = vpop.f32.mrf.mxu1  ;;  %v18360_v0 = vld [vmem:[%s22654_s1 + $0x50] sm:$0xff]   ;;  %v5688_v6 = vld [vmem:[#allocation2 + $0xe2] sm:$0xff] }
 0x24a   : > { %v2468_v51 = vadd.f32 %v2385_v4, %v19780_v12  ;;  %v14701_v39 = vpack.c.bf16 %v6830_v16, %v6829_v30  ;;  %v16194_v57 = vpop.f32.mrf.mxu0  ;;  %v18343_v7 = vld [vmem:[%s18956_s22 + $0x148] sm:$0xff]  }
 0x24b   : > { %16578 = vmatpush3.bf16.msra.mxu0 %v18350_v20  ;;  %v2850_v47 = vmax.f32 %v2824_v18, 0.0  ;;  %v16262_v61 = vpop.f32.mrf.mxu1  ;;  %17679 = vrot.lane.b32.xlu1 %v17678_v50, %s18805_s28  ;;  %v18364_v60 = vld [vmem:[%s22654_s1 + $0x48] sm:$0xff]  }
 0x24c   : > { %v2799_v62 = vadd.f32 %v2716_v31, %v2468_v51  ;;  %16646 = vmatpush3.bf16.msra.mxu1 %v18351_v44  ;;  %15021 = vst [vmem:[#allocation3 + $0x58] sm:$0xff] %v14701_v39   ;;  %v2390_v8 = vpop.f32.mrf.mxu0  ;;  %16460 = vmatmul.mubr.bf16.gmra.mxu0 %v18339_v27  ;;  %v5585_v12 = vld [vmem:[#allocation2 + $0xe9] sm:$0xff]  ;;  %v18370_v31 = vld [vmem:[%s22654_s1 + $0x40] sm:$0xff]  }
 0x24d   : > { %16579 = vmatprep.subr.bf16.mxu0 %v19894_v34  ;;  %2876 = vst [vmem:[#allocation2 + $0x100] sm:$0xff] %v2850_v47  ;;  %v2469_v52 = vadd.f32 %v2390_v8, %v19793_v11  ;;  %v2721_v55 = vpop.f32.mrf.mxu1  ;;  %16528 = vmatmul.mubr.bf16.gmra.mxu1 %v18340_v58  ;;  %v17683_v32 = vpack.i.bf16 %v5585_v12, %v5584_v28  ;;  %v5689_v59 = vld [vmem:[#allocation2 + $0xea] sm:$0xff] }
 0x24e   : > { %v2825_v38 = vadd.f32 %v19976_v56, %v2799_v62  ;;  %16463 = vmatprep.mubr.msk.bf16.mxu0 %vm18804_vm0, %v19894_v34  ;;  %v16197_v2 = vpop.f32.mrf.mxu0  ;;  %16531 = vmatprep.mubr.msk.bf16.mxu1 %vm18804_vm0, %v19894_v34  ;;  %v17688_v41 = vpack.i.bf16 %v5689_v59, %v5688_v6  ;;  %v18367_v4 = vld [vmem:[%s22654_s1 + $0x8] sm:$0xff]   ;;  %v18346_v47 = vld [vmem:[%s18956_s22 + $0x130] sm:$0xff]   ;;  %v18371_v62 = vld [vmem:[%s22654_s1] sm:$0xff]  }
 0x24f   : > { %16580 = vmatpush3.bf16.msra.mxu0 %v18354_v42  ;;  %v2800_v11 = vadd.f32 %v2721_v55, %v2469_v52  ;;  %v16265_v15 = vpop.f32.mrf.mxu1  ;;  %17684 = vrot.lane.b32.xlu0 %v17683_v32, %s18806_s29 }
 0x250   : > { %v2851_v48 = vmax.f32 %v2825_v38, 0.0  ;;  %16647 = vmatprep.subr.bf16.mxu1 %v19894_v34  ;;  %v2393_v45 = vpop.f32.mrf.mxu0  ;;  %16581 = vmatprep.subr.bf16.mxu0 %v19894_v34  ;;  %v5690_v42 = vld [vmem:[#allocation2 + $0xf2] sm:$0xff] }
 0x251   : > { %16648 = vmatpush3.bf16.msra.mxu1 %v18355_v3  ;;  %v2826_v10 = vadd.f32 %v19976_v56, %v2800_v11  ;;  %v2470_v13 = vadd.f32 %v2393_v45, %v19809_v49  ;;  %v2724_v20 = vpop.f32.mrf.mxu1  ;;  %v5586_v49 = vld [vmem:[#allocation2 + $0xf1] sm:$0xff] }
 0x252   : > { %2877 = vst [vmem:[#allocation2 + $0x108] sm:$0xff] %v2851_v48  ;;  %16649 = vmatprep.subr.bf16.mxu1 %v19894_v34  ;;  %v16198_v54 = vpop.f32.mrf.mxu0  ;;  %v18347_v3 = vld [vmem:[%s18956_s22 + $0x150] sm:$0xff]  }
 0x253   : > { %16582 = vmatpush3.bf16.msra.mxu0 %v18360_v0  ;;  %v2852_v23 = vmax.f32 %v2826_v10, 0.0  ;;  %v2801_v63 = vadd.f32 %v2724_v20, %v2470_v13  ;;  %v16266_v44 = vpop.f32.mrf.mxu1  ;;  %17689 = vrot.lane.b32.xlu0 %v17688_v41, %s18805_s28  ;;  %v18348_v20 = vld [vmem:[%s18956_s22 + $0x138] sm:$0xff]  }
 0x254   : > { %16583 = vmatprep.subr.bf16.mxu0 %v19894_v34  ;;  %v2398_v22 = vpop.f32.mrf.mxu0  ;;  %16464 = vmatmul.mubr.bf16.gmra.mxu0 %v18342_v43  ;;  %v5587_v24 = vld [vmem:[#allocation2 + $0xf9] sm:$0xff] }
 0x255   : > { %16650 = vmatpush3.bf16.msra.mxu1 %v18361_v14  ;;  %2878 = vst [vmem:[#allocation2 + $0x110] sm:$0xff] %v2852_v23  ;;  %v2827_v50 = vadd.f32 %v19976_v56, %v2801_v63  ;;  %v2471_v27 = vadd.f32 %v2398_v22, %v19822_v37  ;;  %v2729_v18 = vpop.f32.mrf.mxu1  ;;  %v17693_v30 = vpack.i.bf16 %v5587_v24, %v5586_v49  ;;  %v5691_v51 = vld [vmem:[#allocation2 + $0xfa] sm:$0xff]  ;;  %v5557_v63 = vld [vmem:[#allocation2 + $0x9] sm:$0xff] }
 0x256   : > { %16532 = vmatmul.mubr.bf16.gmra.mxu1 %v18343_v7  ;;  %16467 = vmatprep.mubr.msk.bf16.mxu0 %vm18804_vm0, %v19894_v34  ;;  %v16201_v16 = vpop.f32.mrf.mxu0  ;;  %v17698_v12 = vpack.i.bf16 %v5691_v51, %v5690_v42  ;;  %v18349_v23 = vld [vmem:[%s18956_s22 + $0x158] sm:$0xff]  }
 0x257   : > { %16535 = vmatprep.mubr.msk.bf16.mxu1 %vm18804_vm0, %v19894_v34  ;;  %16584 = vmatpush3.bf16.msra.mxu0 %v18364_v60  ;;  %v2853_v58 = vmax.f32 %v2827_v50, 0.0  ;;  %v2802_v37 = vadd.f32 %v2729_v18, %v2471_v27  ;;  %v16269_v39 = vpop.f32.mrf.mxu1 }
 0x258   : > { %17694 = vrot.lane.b32.xlu1 %v17693_v30, %s18806_s29  ;;  %16651 = vmatprep.subr.bf16.mxu1 %v19894_v34  ;;  %v2401_v57 = vpop.f32.mrf.mxu0 }
 0x259   : > { %16652 = vmatpush3.bf16.msra.mxu1 %v18367_v4  ;;  %16585 = vmatprep.subr.bf16.mxu0 %v19894_v34  ;;  %2879 = vst [vmem:[#allocation2 + $0x118] sm:$0xff] %v2853_v58  ;;  %v2828_v61 = vadd.f32 %v19976_v56, %v2802_v37  ;;  %v2472_v8 = vadd.f32 %v2401_v57, %v19837_v35  ;;  %v2732_v28 = vpop.f32.mrf.mxu1  ;;  %v5588_v59 = vld [vmem:[#allocation2 + $0x101] sm:$0xff]  ;;  %v5661_v37 = vld [vmem:[#allocation2 + $0xa] sm:$0xff] }
 0x25a   : > { %16653 = vmatprep.subr.bf16.mxu1 %v19894_v34  ;;  %v16202_v38 = vpop.f32.mrf.mxu0  ;;  %v5692_v13 = vld [vmem:[#allocation2 + $0x102] sm:$0xff] }
 0x25b   : > { %16586 = vmatpush3.bf16.msra.mxu0 %v18370_v31  ;;  %v2854_v52 = vmax.f32 %v2828_v61, 0.0  ;;  %v2803_v55 = vadd.f32 %v2732_v28, %v2472_v8  ;;  %v16270_v32 = vpop.f32.mrf.mxu1  ;;  %v5556_v4 = vld [vmem:[#allocation2 + $0x1] sm:$0xff] }
 0x25c   : > { %17699 = vrot.lane.b32.xlu1 %v17698_v12, %s18805_s28  ;;  %16707 = vmatprep.subr.bf16.mxu0 %v19894_v34  ;;  %v2406_v2 = vpop.f32.mrf.mxu0  ;;  %v5589_v0 = vld [vmem:[#allocation2 + $0x109] sm:$0xff]  ;;  %v17713_v27 = vpack.i.bf16 %v5557_v63, %v5556_v4  ;;  %v18352_v8 = vld [vmem:[%s18956_s22 + $0x140] sm:$0xff]  }
 0x25d   : > { %16468 = vmatmul.mubr.bf16.gmra.mxu0 %v18346_v47  ;;  %16654 = vmatpush3.bf16.msra.mxu1 %v18371_v62  ;;  %2880 = vst [vmem:[#allocation2 + $0x120] sm:$0xff] %v2854_v52  ;;  %v2829_v35 = vadd.f32 %v19976_v56, %v2803_v55  ;;  %v2473_v48 = vadd.f32 %v2406_v2, %v19845_v9  ;;  %v2737_v11 = vpop.f32.mrf.mxu1  ;;  %v5693_v6 = vld [vmem:[#allocation2 + $0x10a] sm:$0xff]  ;;  %v5660_v62 = vld [vmem:[#allocation2 + $0x2] sm:$0xff]  ;;  %v5559_v55 = vld [vmem:[#allocation2 + $0x19] sm:$0xff] }
 0x25e   : > { %16536 = vmatmul.mubr.bf16.gmra.mxu1 %v18347_v3  ;;  %v17703_v15 = vpack.i.bf16 %v5589_v0, %v5588_v59  ;;  %16471 = vmatprep.mubr.msk.bf16.mxu0 %vm18804_vm0, %v19894_v34  ;;  %v16205_v45 = vpop.f32.mrf.mxu0  ;;  %v17708_v60 = vpack.i.bf16 %v5693_v6, %v5692_v13  ;;  %v17733_v3 = vpack.i.bf16 %v5661_v37, %v5660_v62  ;;  %v18353_v52 = vld [vmem:[%s18956_s22 + $0x160] sm:$0xff]   ;;  %v18356_v63 = vld [vmem:[%s18956_s22 + $0x148] sm:$0xff]  }
 0x25f   : > { %16539 = vmatprep.mubr.msk.bf16.mxu1 %vm18804_vm0, %v19894_v34  ;;  %16775 = vmatprep.subr.bf16.mxu1 %v19894_v34  ;;  %v2855_v43 = vmax.f32 %v2829_v35, 0.0  ;;  %v2804_v14 = vadd.f32 %v2737_v11, %v2473_v48  ;;  %v16273_v10 = vpop.f32.mrf.mxu1  ;;  %v5558_v35 = vld [vmem:[#allocation2 + $0x11] sm:$0xff]  ;;  %v5663_v13 = vld [vmem:[#allocation2 + $0x1a] sm:$0xff] }
 0x260   : > { %17704 = vrot.lane.b32.xlu0 %v17703_v15, %s18806_s29  ;;  %v2409_v9 = vpop.f32.mrf.mxu0  ;;  %v5590_v18 = vld [vmem:[#allocation2 + $0x111] sm:$0xff]  ;;  %v17728_v11 = vpack.i.bf16 %v5559_v55, %v5558_v35  ;;  %v20151_v10 = vld [vmem:[#allocation2 + $0x340] sm:$0xff] }
 0x261   : > { %2881 = vst [vmem:[#allocation2 + $0x128] sm:$0xff] %v2855_v43  ;;  %v2830_v41 = vadd.f32 %v19976_v56, %v2804_v14  ;;  %v2474_v7 = vadd.f32 %v2409_v9, %v19852_v19  ;;  %v2740_v54 = vpop.f32.mrf.mxu1  ;;  %v5694_v61 = vld [vmem:[#allocation2 + $0x112] sm:$0xff] }
 0x262   : > { %v16206_v44 = vpop.f32.mrf.mxu0 }
 0x263   : > { %v2856_v22 = vmax.f32 %v2830_v41, 0.0  ;;  %v2805_v49 = vadd.f32 %v2740_v54, %v2474_v7  ;;  %v16274_v24 = vpop.f32.mrf.mxu1 }
 0x264   : > { %17709 = vrot.lane.b32.xlu0 %v17708_v60, %s18805_s28  ;;  %v2414_v50 = vpop.f32.mrf.mxu0  ;;  %v5591_v30 = vld [vmem:[#allocation2 + $0x119] sm:$0xff] }
 0x265   : > { %16472 = vmatmul.mubr.bf16.gmra.mxu0 %v18348_v20  ;;  %2882 = vst [vmem:[#allocation2 + $0x130] sm:$0xff] %v2856_v22  ;;  %v2831_v16 = vadd.f32 %v19976_v56, %v2805_v49  ;;  %v2475_v19 = vadd.f32 %v2414_v50, %v19862_v40  ;;  %v2745_v51 = vpop.f32.mrf.mxu1  ;;  %v17718_v31 = vpack.i.bf16 %v5591_v30, %v5590_v18  ;;  %v5695_v39 = vld [vmem:[#allocation2 + $0x11a] sm:$0xff]  ;;  %v5662_v60 = vld [vmem:[#allocation2 + $0x12] sm:$0xff]  ;;  %v18357_v50 = vld [vmem:[%s18956_s22 + $0x168] sm:$0xff]  }
 0x266   : > { %16540 = vmatmul.mubr.bf16.gmra.mxu1 %v18349_v23  ;;  %16475 = vmatprep.mubr.msk.bf16.mxu0 %vm18804_vm0, %v19894_v34  ;;  %v16209_v58 = vpop.f32.mrf.mxu0  ;;  %v17723_v38 = vpack.i.bf16 %v5695_v39, %v5694_v61  ;;  %v17738_v24 = vpack.i.bf16 %v5663_v13, %v5662_v60 }
 0x267   : > { %16543 = vmatprep.mubr.msk.bf16.mxu1 %vm18804_vm0, %v19894_v34  ;;  %v2857_v57 = vmax.f32 %v2831_v16, 0.0  ;;  %v2806_v42 = vadd.f32 %v2745_v51, %v2475_v19  ;;  %v16277_v47 = vpop.f32.mrf.mxu1  ;;  %17719 = vrot.lane.b32.xlu1 %v17718_v31, %s18806_s29 }
 0x268   : > { %17714 = vrot.lane.b32.xlu0 %v17713_v27, %s18806_s29  ;;  %v2417_v40 = vpop.f32.mrf.mxu0  ;;  %v5592_v15 = vld [vmem:[#allocation2 + $0x121] sm:$0xff] }
 0x269   : > { %2883 = vst [vmem:[#allocation2 + $0x138] sm:$0xff] %v2857_v57  ;;  %v2832_v28 = vadd.f32 %v19976_v56, %v2806_v42  ;;  %v2476_v12 = vadd.f32 %v2417_v40, %v19871_v29  ;;  %v2748_v34 = vpop.f32.mrf.mxu1  ;;  %v5696_v23 = vld [vmem:[#allocation2 + $0x122] sm:$0xff] }
 0x26a   : > { %v16210_v32 = vpop.f32.mrf.mxu0 }
 0x26b   : > { %v2858_v2 = vmax.f32 %v2832_v28, 0.0  ;;  %v2807_v59 = vadd.f32 %v2748_v34, %v2476_v12  ;;  %v16278_v0 = vpop.f32.mrf.mxu1  ;;  %17724 = vrot.lane.b32.xlu1 %v17723_v38, %s18805_s28  ;;  %v18359_v38 = vld [vmem:[%s18956_s22 + $0x170] sm:$0xff]  }
 0x26c   : > { %17734 = vrot.lane.b32.xlu0 %v17733_v3, %s18805_s28  ;;  %v2422_v48 = vpop.f32.mrf.mxu0  ;;  %v5593_v45 = vld [vmem:[#allocation2 + $0x129] sm:$0xff] }
 0x26d   : > { %16476 = vmatmul.mubr.bf16.gmra.mxu0 %v18352_v8  ;;  %2884 = vst [vmem:[#allocation2 + $0x140] sm:$0xff] %v2858_v2  ;;  %v2833_v29 = vadd.f32 %v19976_v56, %v2807_v59  ;;  %v2477_v6 = vadd.f32 %v2422_v48, %v19881_v46  ;;  %v2753_v43 = vpop.f32.mrf.mxu1  ;;  %v17743_v14 = vpack.i.bf16 %v5593_v45, %v5592_v15  ;;  %v5697_v20 = vld [vmem:[#allocation2 + $0x12a] sm:$0xff] }
 0x26e   : > { %16544 = vmatmul.mubr.bf16.gmra.mxu1 %v18353_v52  ;;  %16479 = vmatprep.mubr.msk.bf16.mxu0 %vm18804_vm0, %v20151_v10  ;;  %v16213_v9 = vpop.f32.mrf.mxu0  ;;  %v17748_v4 = vpack.i.bf16 %v5697_v20, %v5696_v23 }
 0x26f   : > { %16547 = vmatprep.mubr.msk.bf16.mxu1 %vm18804_vm0, %v20151_v10  ;;  %v2859_v41 = vmax.f32 %v2833_v29, 0.0  ;;  %v2808_v7 = vadd.f32 %v2753_v43, %v2477_v6  ;;  %v16281_v54 = vpop.f32.mrf.mxu1  ;;  %17729 = vrot.lane.b32.xlu1 %v17728_v11, %s18806_s29 }
 0x270   : > { %17744 = vrot.lane.b32.xlu0 %v17743_v14, %s18806_s29  ;;  %v2425_v46 = vpop.f32.mrf.mxu0  ;;  %v5594_v51 = vld [vmem:[#allocation2 + $0x131] sm:$0xff] }
 0x271   : > { %2885 = vst [vmem:[#allocation2 + $0x148] sm:$0xff] %v2859_v41  ;;  %v2834_v44 = vadd.f32 %v19976_v56, %v2808_v7  ;;  %v2478_v22 = vadd.f32 %v2425_v46, %v19890_v25  ;;  %v2756_v49 = vpop.f32.mrf.mxu1  ;;  %v5698_v8 = vld [vmem:[#allocation2 + $0x132] sm:$0xff] }
 0x272   : > { %v16214_v27 = vpop.f32.mrf.mxu0  ;;  %v18363_v46 = vld [vmem:[%s18956_s22 + $0x178] sm:$0xff]  }
 0x273   : > { %v2860_v18 = vmax.f32 %v2834_v44, 0.0  ;;  %v2809_v30 = vadd.f32 %v2756_v49, %v2478_v22  ;;  %v16282_v16 = vpop.f32.mrf.mxu1  ;;  %17739 = vrot.lane.b32.xlu1 %v17738_v24, %s18805_s28 }
 0x274   : > { %17749 = vrot.lane.b32.xlu0 %v17748_v4, %s18805_s28  ;;  %v2430_v19 = vpop.f32.mrf.mxu0  ;;  %v5595_v31 = vld [vmem:[#allocation2 + $0x139] sm:$0xff] }
 0x275   : > { %16480 = vmatmul.mubr.bf16.gmra.mxu0 %v18356_v63  ;;  %2886 = vst [vmem:[#allocation2 + $0x150] sm:$0xff] %v2860_v18  ;;  %v2835_v25 = vadd.f32 %v19976_v56, %v2809_v30  ;;  %v2479_v58 = vadd.f32 %v2430_v19, %v19898_v26  ;;  %v2761_v37 = vpop.f32.mrf.mxu1  ;;  %v17753_v39 = vpack.i.bf16 %v5595_v31, %v5594_v51  ;;  %v5699_v42 = vld [vmem:[#allocation2 + $0x13a] sm:$0xff]  ;;  %v18358_v26 = vld [vmem:[%s18956_s22 + $0x150] sm:$0xff]  }
 0x276   : > { %16548 = vmatmul.mubr.bf16.gmra.mxu1 %v18357_v50  ;;  %16483 = vmatprep.mubr.msk.bf16.mxu0 %vm18804_vm0, %v20151_v10  ;;  %v16217_v57 = vpop.f32.mrf.mxu0  ;;  %v17758_v3 = vpack.i.bf16 %v5699_v42, %v5698_v8  ;;  %v18366_v42 = vld [vmem:[%s18956_s22 + $0x180] sm:$0xff]  }
 0x277   : > { %16551 = vmatprep.mubr.msk.bf16.mxu1 %vm18804_vm0, %v20151_v10  ;;  %v2861_v47 = vmax.f32 %v2835_v25, 0.0  ;;  %v2810_v40 = vadd.f32 %v2761_v37, %v2479_v58  ;;  %v16285_v62 = vpop.f32.mrf.mxu1  ;;  %17754 = vrot.lane.b32.xlu1 %v17753_v39, %s18806_s29 }
 0x278   : > { %v2433_v61 = vpop.f32.mrf.mxu0  ;;  %v5596_v0 = vld [vmem:[#allocation2 + $0x141] sm:$0xff] }
 0x279   : > { %2887 = vst [vmem:[#allocation2 + $0x158] sm:$0xff] %v2861_v47  ;;  %v2836_v28 = vadd.f32 %v19976_v56, %v2810_v40  ;;  %v2480_v12 = vadd.f32 %v2433_v61, %v19911_v1  ;;  %v2764_v34 = vpop.f32.mrf.mxu1  ;;  %v5700_v13 = vld [vmem:[#allocation2 + $0x142] sm:$0xff] }
 0x27a   : > { %v16218_v52 = vpop.f32.mrf.mxu0 }
 0x27b   : > { %v2862_v55 = vmax.f32 %v2836_v28, 0.0  ;;  %v2811_v32 = vadd.f32 %v2764_v34, %v2480_v12  ;;  %v16286_v2 = vpop.f32.mrf.mxu1  ;;  %17759 = vrot.lane.b32.xlu1 %v17758_v3, %s18805_s28 }
 0x27c   : > { %v2438_v59 = vpop.f32.mrf.mxu0  ;;  %v5597_v35 = vld [vmem:[#allocation2 + $0x149] sm:$0xff] }
 0x27d   : > { %16484 = vmatmul.mubr.bf16.gmra.mxu0 %v18358_v26  ;;  %2888 = vst [vmem:[#allocation2 + $0x160] sm:$0xff] %v2862_v55  ;;  %v2837_v48 = vadd.f32 %v19976_v56, %v2811_v32  ;;  %v2481_v11 = vadd.f32 %v2438_v59, %v19917_v17  ;;  %v2769_v1 = vpop.f32.mrf.mxu1  ;;  %v17763_v15 = vpack.i.bf16 %v5597_v35, %v5596_v0  ;;  %v5701_v29 = vld [vmem:[#allocation2 + $0x14a] sm:$0xff]  ;;  %v18362_v17 = vld [vmem:[%s18956_s22 + $0x158] sm:$0xff]  }
 0x27e   : > { %16552 = vmatmul.mubr.bf16.gmra.mxu1 %v18359_v38  ;;  %16487 = vmatprep.mubr.msk.bf16.mxu0 %vm18804_vm0, %v20151_v10  ;;  %v16221_v45 = vpop.f32.mrf.mxu0  ;;  %v17768_v54 = vpack.i.bf16 %v5701_v29, %v5700_v13 }
 0x27f   : > { %16555 = vmatprep.mubr.msk.bf16.mxu1 %vm18804_vm0, %v20151_v10  ;;  %v2863_v6 = vmax.f32 %v2837_v48, 0.0  ;;  %v2812_v43 = vadd.f32 %v2769_v1, %v2481_v11  ;;  %v16289_v14 = vpop.f32.mrf.mxu1  ;;  %17764 = vrot.lane.b32.xlu0 %v17763_v15, %s18806_s29  ;;  %v18369_v15 = vld [vmem:[%s18956_s22 + $0x188] sm:$0xff]  }
 0x280   : > { %v2441_v9 = vpop.f32.mrf.mxu0  ;;  %v5598_v49 = vld [vmem:[#allocation2 + $0x151] sm:$0xff] }
 0x281   : > { %2889 = vst [vmem:[#allocation2 + $0x168] sm:$0xff] %v2863_v6  ;;  %v2838_v20 = vadd.f32 %v19976_v56, %v2812_v43  ;;  %v2482_v41 = vadd.f32 %v2441_v9, %v19928_v21  ;;  %v2772_v7 = vpop.f32.mrf.mxu1  ;;  %v5702_v25 = vld [vmem:[#allocation2 + $0x152] sm:$0xff] }
 0x282   : > { %v16222_v60 = vpop.f32.mrf.mxu0 }
 0x283   : > { %v2864_v23 = vmax.f32 %v2838_v20, 0.0  ;;  %v2813_v63 = vadd.f32 %v2772_v7, %v2482_v41  ;;  %v16290_v44 = vpop.f32.mrf.mxu1  ;;  %17769 = vrot.lane.b32.xlu0 %v17768_v54, %s18805_s28 }
 0x284   : > { %v2446_v22 = vpop.f32.mrf.mxu0  ;;  %v5599_v24 = vld [vmem:[#allocation2 + $0x159] sm:$0xff]  ;;  %v18372_v44 = vld [vmem:[%s18956_s22 + $0x170] sm:$0xff]  }
 0x285   : > { %16488 = vmatmul.mubr.bf16.gmra.mxu0 %v18362_v17  ;;  %2890 = vst [vmem:[#allocation2 + $0x170] sm:$0xff] %v2864_v23  ;;  %v2839_v4 = vadd.f32 %v19976_v56, %v2813_v63  ;;  %v2483_v50 = vadd.f32 %v2446_v22, %v19933_v5  ;;  %v2777_v21 = vpop.f32.mrf.mxu1  ;;  %v17773_v27 = vpack.i.bf16 %v5599_v24, %v5598_v49  ;;  %v5703_v30 = vld [vmem:[#allocation2 + $0x15a] sm:$0xff]  ;;  %v18373_v24 = vld [vmem:[%s18956_s22 + $0x190] sm:$0xff]  }
 0x286   : > { %16556 = vmatmul.mubr.bf16.gmra.mxu1 %v18363_v46  ;;  %16491 = vmatprep.mubr.msk.bf16.mxu0 %vm18804_vm0, %v20151_v10  ;;  %v16225_v18 = vpop.f32.mrf.mxu0  ;;  %v18365_v5 = vld [vmem:[%s18956_s22 + $0x160] sm:$0xff]   ;;  %v17778_v57 = vpack.i.bf16 %v5703_v30, %v5702_v25 }
 0x287   : > { %16559 = vmatprep.mubr.msk.bf16.mxu1 %vm18804_vm0, %v20151_v10  ;;  %v2865_v16 = vmax.f32 %v2839_v4, 0.0  ;;  %v2814_v19 = vadd.f32 %v2777_v21, %v2483_v50  ;;  %v16293_v51 = vpop.f32.mrf.mxu1  ;;  %17774 = vrot.lane.b32.xlu1 %v17773_v27, %s18806_s29 }
 0x288   : > { %v2449_v31 = vpop.f32.mrf.mxu0  ;;  %v5600_v26 = vld [vmem:[#allocation2 + $0x161] sm:$0xff] }
 0x289   : > { %2891 = vst [vmem:[#allocation2 + $0x178] sm:$0xff] %v2865_v16  ;;  %v2840_v58 = vadd.f32 %v19976_v56, %v2814_v19  ;;  %v2484_v37 = vadd.f32 %v2449_v31, %v19944_v33  ;;  %v2780_v39 = vpop.f32.mrf.mxu1  ;;  %v5704_v0 = vld [vmem:[#allocation2 + $0x162] sm:$0xff] }
 0x28a   : > { %v16226_v47 = vpop.f32.mrf.mxu0 }
 0x28b   : > { %v2866_v40 = vmax.f32 %v2840_v58, 0.0  ;;  %v2815_v62 = vadd.f32 %v2780_v39, %v2484_v37  ;;  %v16294_v61 = vpop.f32.mrf.mxu1  ;;  %17779 = vrot.lane.b32.xlu1 %v17778_v57, %s18805_s28  ;;  %v20239_v39 = vld [vmem:[%s18956_s22 + $0x158] sm:$0xff]  }
 0x28c   : > { %v2454_v8 = vpop.f32.mrf.mxu0  ;;  %v5601_v28 = vld [vmem:[#allocation2 + $0x169] sm:$0xff]  ;;  %v18375_v47 = vld [vmem:[%s18956_s22 + $0x138] sm:$0xff]  }
 0x28d   : > { %16492 = vmatmul.mubr.bf16.gmra.mxu0 %v18365_v5  ;;  %2892 = vst [vmem:[#allocation2 + $0x180] sm:$0xff] %v2866_v40  ;;  %v2841_v12 = vadd.f32 %v19976_v56, %v2815_v62  ;;  %v2485_v34 = vadd.f32 %v2454_v8, %v19949_v53  ;;  %v2785_v33 = vpop.f32.mrf.mxu1  ;;  %v17783_v3 = vpack.i.bf16 %v5601_v28, %v5600_v26  ;;  %v5705_v52 = vld [vmem:[#allocation2 + $0x16a] sm:$0xff]  ;;  %v18376_v40 = vld [vmem:[%s22654_s1 + $0xb8] sm:$0xff]  }
 0x28e   : > { %16560 = vmatmul.mubr.bf16.gmra.mxu1 %v18366_v42  ;;  %16495 = vmatprep.mubr.msk.bf16.mxu0 %vm18804_vm0, %v20151_v10  ;;  %v16229_v38 = vpop.f32.mrf.mxu0  ;;  %v18368_v53 = vld [vmem:[%s18956_s22 + $0x168] sm:$0xff]   ;;  %v17788_v1 = vpack.i.bf16 %v5705_v52, %v5704_v0  ;;  %v18377_v8 = vld [vmem:[%s22654_s1 + $0xf8] sm:$0xff]  }
 0x28f   : > { %16563 = vmatprep.mubr.msk.bf16.mxu1 %vm18804_vm0, %v20151_v10  ;;  %v2867_v55 = vmax.f32 %v2841_v12, 0.0  ;;  %v2816_v32 = vadd.f32 %v2785_v33, %v2485_v34  ;;  %v16297_v2 = vpop.f32.mrf.mxu1  ;;  %17784 = vrot.lane.b32.xlu0 %v17783_v3, %s18806_s29  ;;  %v18380_v34 = vld [vmem:[%s22654_s1 + $0xb0] sm:$0xff]  }
 0x290   : > { %v2457_v59 = vpop.f32.mrf.mxu0  ;;  %v5602_v9 = vld [vmem:[#allocation2 + $0x171] sm:$0xff] }
 0x291   : > { %2893 = vst [vmem:[#allocation2 + $0x188] sm:$0xff] %v2867_v55  ;;  %v2842_v35 = vadd.f32 %v19976_v56, %v2816_v32  ;;  %v2486_v48 = vadd.f32 %v2457_v59, %v19960_v36  ;;  %v2788_v11 = vpop.f32.mrf.mxu1  ;;  %v20216_v56 = vld [vmem:[%s22655_s2] ss:$0 sm:$0xff]  ;;  %v5706_v63 = vld [vmem:[#allocation2 + $0x172] sm:$0xff] }
 0x292   : > { %v16230_v45 = vpop.f32.mrf.mxu0  ;;  %v18383_v38 = vld [vmem:[%s22654_s1 + $0xf0] sm:$0xff]   ;;  %v20266_v32 = vld [vmem:[%s18956_s22 + $0x160] sm:$0xff]  }
 0x293   : > { %v2868_v29 = vmax.f32 %v2842_v35, 0.0  ;;  %v2817_v6 = vadd.f32 %v2788_v11, %v2486_v48  ;;  %v16298_v43 = vpop.f32.mrf.mxu1  ;;  %17789 = vrot.lane.b32.xlu0 %v17788_v1, %s18805_s28  ;;  %v18379_v59 = vld [vmem:[%s18956_s22 + $0x140] sm:$0xff]   ;;  %v18386_v35 = vld [vmem:[%s22654_s1 + $0xa8] sm:$0xff]  }
 0x294   : > { %v3122_v14 = vpop.f32.mrf.mxu0  ;;  %v5603_v13 = vld [vmem:[#allocation2 + $0x179] sm:$0xff]  ;;  %v18387_v11 = vld [vmem:[%s22654_s1 + $0xe8] sm:$0xff]  }
 0x295   : > { %16496 = vmatmul.mubr.bf16.gmra.mxu0 %v18368_v53  ;;  %2894 = vst [vmem:[#allocation2 + $0x190] sm:$0xff] %v2868_v29  ;;  %v2843_v36 = vadd.f32 %v20216_v56, %v2817_v6  ;;  %v3331_v17 = vpop.f32.mrf.mxu1  ;;  %v17793_v20 = vpack.i.bf16 %v5603_v13, %v5602_v9  ;;  %v5707_v54 = vld [vmem:[#allocation2 + $0x17a] sm:$0xff]  ;;  %v20295_v13 = vld [vmem:[%s18956_s22 + $0x168] sm:$0xff]  }
 0x296   : > { %16564 = vmatmul.mubr.bf16.gmra.mxu1 %v18369_v15  ;;  %16499 = vmatprep.mubr.msk.bf16.mxu0 %vm18804_vm0, %v20151_v10  ;;  %v20221_v41 = vadd.f32 %v3331_v17, %v3122_v14  ;;  %v16317_v7 = vpop.f32.mrf.mxu0  ;;  %v17798_v49 = vpack.i.bf16 %v5707_v54, %v5706_v63  ;;  %v18390_v6 = vld [vmem:[%s22654_s1 + $0xa0] sm:$0xff]  }
 0x297   : > { %16567 = vmatprep.mubr.msk.bf16.mxu1 %vm18804_vm0, %v20151_v10  ;;  %v2869_v46 = vmax.f32 %v2843_v36, 0.0  ;;  %v16385_v60 = vpop.f32.mrf.mxu1  ;;  %17794 = vrot.lane.b32.xlu1 %v17793_v20, %s18806_s29  ;;  %v18391_v14 = vld [vmem:[%s22654_s1 + $0xe0] sm:$0xff]   ;;  %v18382_v20 = vld [vmem:[%s18956_s22 + $0x148] sm:$0xff]  }
 0x298   : > { %v3125_v23 = vpop.f32.mrf.mxu0  ;;  %v5604_v18 = vld [vmem:[#allocation2 + $0x181] sm:$0xff] }
 0x299   : > { %2895 = vst [vmem:[#allocation2 + $0x198] sm:$0xff] %v2869_v46  ;;  %v3334_v22 = vpop.f32.mrf.mxu1  ;;  %v5708_v37 = vld [vmem:[#allocation2 + $0x182] sm:$0xff]  ;;  %v18393_v46 = vld [vmem:[%s22654_s1 + $0x98] sm:$0xff]  }
 0x29a   : > { %v20228_v4 = vadd.f32 %v3334_v22, %v3125_v23  ;;  %v16318_v50 = vpop.f32.mrf.mxu0 }
 0x29b   : > { %v16386_v21 = vpop.f32.mrf.mxu1  ;;  %17799 = vrot.lane.b32.xlu1 %v17798_v49, %s18805_s28  ;;  %v5476_v50 = vld [vmem:[#allocation2 + $0xc0] sm:$0xff] }
 0x29c   : > { %v3130_v27 = vpop.f32.mrf.mxu0  ;;  %v5605_v30 = vld [vmem:[#allocation2 + $0x189] sm:$0xff] }
 0x29d   : > { %16500 = vmatmul.mubr.bf16.gmra.mxu0 %v18372_v44  ;;  %v3339_v16 = vpop.f32.mrf.mxu1  ;;  %v17803_v19 = vpack.i.bf16 %v5605_v30, %v5604_v18  ;;  %v5709_v25 = vld [vmem:[#allocation2 + $0x18a] sm:$0xff]  ;;  %v18394_v44 = vld [vmem:[%s22654_s1 + $0xd8] sm:$0xff]  }
 0x29e   : > { %16568 = vmatmul.mubr.bf16.gmra.mxu1 %v18373_v24  ;;  %16587 = vmatprep.mubr.msk.bf16.mxu0 %vm18804_vm0, %v20151_v10  ;;  %v20233_v51 = vadd.f32 %v3339_v16, %v3130_v27  ;;  %v16321_v31 = vpop.f32.mrf.mxu0  ;;  %v17808_v42 = vpack.i.bf16 %v5709_v25, %v5708_v37  ;;  %v5477_v21 = vld [vmem:[#allocation2 + $0xc8] sm:$0xff] }
 0x29f   : > { %16655 = vmatprep.mubr.msk.bf16.mxu1 %vm18804_vm0, %v20151_v10  ;;  %v16389_v5 = vpop.f32.mrf.mxu1  ;;  %17804 = vrot.lane.b32.xlu0 %v17803_v19, %s18806_s29  ;;  %v18397_v19 = vld [vmem:[%s22654_s1 + $0x90] sm:$0xff]  }
 0x2a0   : > { %v3133_v58 = vpop.f32.mrf.mxu0 }
 0x2a1   : > { %v3342_v57 = vpop.f32.mrf.mxu1 }
 0x2a2   : > { %v20245_v62 = vadd.f32 %v3342_v57, %v3133_v58  ;;  %v16322_v61 = vpop.f32.mrf.mxu0  ;;  %v18398_v58 = vld [vmem:[%s22654_s1 + $0xd0] sm:$0xff]  }
 0x2a3   : > { %v16390_v26 = vpop.f32.mrf.mxu1  ;;  %17809 = vrot.lane.b32.xlu0 %v17808_v42, %s18805_s28 }
 0x2a4   : > { %v3138_v28 = vpop.f32.mrf.mxu0 }
 0x2a5   : > { %16588 = vmatmul.mubr.bf16.vlgmr.msra.gmra.mxu0 %v20239_v39  ;;  %v3347_v12 = vpop.f32.mrf.mxu1 }
 0x2a6   : > { %16656 = vmatmul.mubr.bf16.vlgmr.msra.gmra.mxu1 %v18375_v47  ;;  %16708 = vmatpush3.bf16.msra.mxu0 %v18376_v40  ;;  %v20255_v33 = vadd.f32 %v3347_v12, %v3138_v28  ;;  %v16325_v3 = vpop.f32.mrf.mxu0  ;;  %v20328_v47 = vld [vmem:[%s18956_s22 + $0x170] sm:$0xff]  }
 0x2a7   : > { %16776 = vmatpush3.bf16.msra.mxu1 %v18377_v8  ;;  %16591 = vmatprep.mubr.msk.bf16.mxu0 %vm18804_vm0, %v20151_v10  ;;  %v16393_v52 = vpop.f32.mrf.mxu1  ;;  %v18385_v28 = vld [vmem:[%s18956_s22 + $0x150] sm:$0xff]  }
 0x2a8   : > { %16659 = vmatprep.mubr.msk.bf16.mxu1 %vm18804_vm0, %v20151_v10  ;;  %16709 = vmatprep.subr.bf16.mxu0 %v20151_v10  ;;  %v3141_v55 = vpop.f32.mrf.mxu0 }
 0x2a9   : > { %16777 = vmatprep.subr.bf16.mxu1 %v20151_v10  ;;  %v3350_v2 = vpop.f32.mrf.mxu1 }
 0x2aa   : > { %16710 = vmatpush3.bf16.msra.mxu0 %v18380_v34  ;;  %v20270_v0 = vadd.f32 %v3350_v2, %v3141_v55  ;;  %v16326_v53 = vpop.f32.mrf.mxu0 }
 0x2ab   : > { %16778 = vmatpush3.bf16.msra.mxu1 %v18383_v38  ;;  %16711 = vmatprep.subr.bf16.mxu0 %v20151_v10  ;;  %v16394_v48 = vpop.f32.mrf.mxu1  ;;  %v18400_v38 = vld [vmem:[%s22654_s1 + $0x88] sm:$0xff]  }
 0x2ac   : > { %16779 = vmatprep.subr.bf16.mxu1 %v20151_v10  ;;  %v3146_v1 = vpop.f32.mrf.mxu0 }
 0x2ad   : > { %16592 = vmatmul.mubr.bf16.gmra.mxu0 %v20266_v32  ;;  %v3355_v15 = vpop.f32.mrf.mxu1 }
 0x2ae   : > { %16660 = vmatmul.mubr.bf16.gmra.mxu1 %v18379_v59  ;;  %16595 = vmatprep.mubr.msk.bf16.mxu0 %vm18804_vm0, %v20151_v10  ;;  %v20283_v45 = vadd.f32 %v3355_v15, %v3146_v1  ;;  %v16329_v29 = vpop.f32.mrf.mxu0  ;;  %v18402_v59 = vld [vmem:[%s22654_s1 + $0xc8] sm:$0xff]   ;;  %v5479_v1 = vld [vmem:[#allocation2 + $0xd8] sm:$0xff] }
 0x2af   : > { %16663 = vmatprep.mubr.msk.bf16.mxu1 %vm18804_vm0, %v20151_v10  ;;  %16712 = vmatpush3.bf16.msra.mxu0 %v18386_v35  ;;  %v16397_v43 = vpop.f32.mrf.mxu1 }
 0x2b0   : > { %16780 = vmatpush3.bf16.msra.mxu1 %v18387_v11  ;;  %16713 = vmatprep.subr.bf16.mxu0 %v20151_v10  ;;  %v3149_v9 = vpop.f32.mrf.mxu0  ;;  %v5478_v11 = vld [vmem:[#allocation2 + $0xd0] sm:$0xff] }
 0x2b1   : > { %16781 = vmatprep.subr.bf16.mxu1 %v20151_v10  ;;  %v3358_v36 = vpop.f32.mrf.mxu1 }
 0x2b2   : > { %v17665_v17 = vpop.permute.xlu0 %17664  ;;  %v20299_v7 = vadd.f32 %v3358_v36, %v3149_v9  ;;  %v16330_v54 = vpop.f32.mrf.mxu0 }
 0x2b3   : > { %16714 = vmatpush3.bf16.msra.mxu0 %v18390_v6  ;;  %v17667_v60 = vunpack.i.h.bf16 %v17665_v17  ;;  %v17666_v23 = vunpack.i.l.bf16 %v17665_v17  ;;  %v16398_v63 = vpop.f32.mrf.mxu1 }
 0x2b4   : > { %16782 = vmatpush3.bf16.msra.mxu1 %v18391_v14  ;;  %16715 = vmatprep.subr.bf16.mxu0 %v20151_v10  ;;  %v3154_v22 = vpop.f32.mrf.mxu0  ;;  %v18404_v14 = vld [vmem:[%s22654_s1 + $0x80] sm:$0xff]  }
 0x2b5   : > { %16596 = vmatmul.mubr.bf16.gmra.mxu0 %v20295_v13  ;;  %16783 = vmatprep.subr.bf16.mxu1 %v20151_v10  ;;  %v3363_v49 = vpop.f32.mrf.mxu1  ;;  %v6622_v31 = vsel %vm6596_vm1, %v5477_v21, %v17667_v60  ;;  %v6621_v25 = vsel %vm6596_vm1, %v5476_v50, %v17666_v23  ;;  %v20363_v23 = vld [vmem:[%s18956_s22 + $0x178] sm:$0xff]  }
 0x2b6   : > { %16664 = vmatmul.mubr.bf16.gmra.mxu1 %v18382_v20  ;;  %v17670_v24 = vpop.permute.xlu0 %17669  ;;  %16599 = vmatprep.mubr.msk.bf16.mxu0 %vm18804_vm0, %v20151_v10  ;;  %v20312_v27 = vadd.f32 %v3363_v49, %v3154_v22  ;;  %v16333_v16 = vpop.f32.mrf.mxu0  ;;  %v18405_v20 = vld [vmem:[%s22654_s1 + $0xc0] sm:$0xff]  }
 0x2b7   : > { %v17672_v18 = vunpack.i.h.bf16 %v17670_v24  ;;  %v17671_v30 = vunpack.i.l.bf16 %v17670_v24  ;;  %16667 = vmatprep.mubr.msk.bf16.mxu1 %vm18804_vm0, %v20151_v10  ;;  %16716 = vmatpush3.bf16.msra.mxu0 %v18393_v46  ;;  %v16401_v5 = vpop.f32.mrf.mxu1 }
 0x2b8   : > { %16784 = vmatpush3.bf16.msra.mxu1 %v18394_v44  ;;  %16717 = vmatprep.subr.bf16.mxu0 %v20151_v10  ;;  %v3157_v42 = vpop.f32.mrf.mxu0  ;;  %v5480_v5 = vld [vmem:[#allocation2 + $0xe0] sm:$0xff] }
 0x2b9   : > { %v6726_v37 = vsel %vm6701_vm2, %v6621_v25, %v17671_v30  ;;  %v6727_v57 = vsel %vm6701_vm2, %v6622_v31, %v17672_v18  ;;  %16785 = vmatprep.subr.bf16.mxu1 %v20151_v10  ;;  %v3366_v8 = vpop.f32.mrf.mxu1  ;;  %v17675_v26 = vpop.permute.xlu1 %17674 }
 0x2ba   : > { %v6831_v40 = vsel %vm6806_vm3, %v6726_v37, %v5476_v50  ;;  %v6832_v61 = vsel %vm6806_vm3, %v6727_v57, %v5477_v21  ;;  %v20334_v34 = vadd.f32 %v3366_v8, %v3157_v42  ;;  %v16334_v3 = vpop.f32.mrf.mxu0  ;;  %v17677_v52 = vunpack.i.h.bf16 %v17675_v26 }
 0x2bb   : > { %v14706_v12 = vpack.c.bf16 %v6832_v61, %v6831_v40  ;;  %16718 = vmatpush3.bf16.msra.mxu0 %v18397_v19  ;;  %v17676_v55 = vunpack.i.l.bf16 %v17675_v26  ;;  %v16402_v2 = vpop.f32.mrf.mxu1  ;;  %v20383_v3 = vld [vmem:[%s18956_s22 + $0x180] sm:$0xff]  }
 0x2bc   : > { %16786 = vmatpush3.bf16.msra.mxu1 %v18398_v58  ;;  %16719 = vmatprep.subr.bf16.mxu0 %v20151_v10  ;;  %v3162_v53 = vpop.f32.mrf.mxu0  ;;  %v6624_v9 = vsel %vm6596_vm1, %v5479_v1, %v17677_v52  ;;  %v5481_v58 = vld [vmem:[#allocation2 + $0xe8] sm:$0xff] }
 0x2bd   : > { %15022 = vst [vmem:[#allocation3 + $0x60] sm:$0xff] %v14706_v12   ;;  %16600 = vmatmul.mubr.bf16.gmra.mxu0 %v20328_v47  ;;  %16787 = vmatprep.subr.bf16.mxu1 %v20151_v10  ;;  %v3371_v35 = vpop.f32.mrf.mxu1  ;;  %v17680_v48 = vpop.permute.xlu1 %17679  ;;  %v6623_v36 = vsel %vm6596_vm1, %v5478_v11, %v17676_v55 }
 0x2be   : > { %16668 = vmatmul.mubr.bf16.gmra.mxu1 %v18385_v28  ;;  %16603 = vmatprep.mubr.msk.bf16.mxu0 %vm18804_vm0, %v20151_v10  ;;  %v20347_v15 = vadd.f32 %v3371_v35, %v3162_v53  ;;  %v17682_v29 = vunpack.i.h.bf16 %v17680_v48  ;;  %v17681_v6 = vunpack.i.l.bf16 %v17680_v48  ;;  %v16337_v43 = vpop.f32.mrf.mxu0 }
 0x2bf   : > { %16671 = vmatprep.mubr.msk.bf16.mxu1 %vm18804_vm0, %v20151_v10  ;;  %16720 = vmatpush3.bf16.msra.mxu0 %v18400_v38  ;;  %v16405_v17 = vpop.f32.mrf.mxu1 }
 0x2c0   : > { %16788 = vmatpush3.bf16.msra.mxu1 %v18402_v59  ;;  %16721 = vmatprep.subr.bf16.mxu0 %v20151_v10  ;;  %v6728_v54 = vsel %vm6701_vm2, %v6623_v36, %v17681_v6  ;;  %v6729_v46 = vsel %vm6701_vm2, %v6624_v9, %v17682_v29  ;;  %v3165_v60 = vpop.f32.mrf.mxu0  ;;  %v5483_v9 = vld [vmem:[#allocation2 + $0xf8] sm:$0xff] }
 0x2c1   : > { %16789 = vmatprep.subr.bf16.mxu1 %v20151_v10  ;;  %v6833_v63 = vsel %vm6806_vm3, %v6728_v54, %v5478_v11  ;;  %v6834_v44 = vsel %vm6806_vm3, %v6729_v46, %v5479_v1  ;;  %v3374_v22 = vpop.f32.mrf.mxu1  ;;  %v17685_v49 = vpop.permute.xlu0 %17684 }
 0x2c2   : > { %v14711_v24 = vpack.c.bf16 %v6834_v44, %v6833_v63  ;;  %v20368_v50 = vadd.f32 %v3374_v22, %v3165_v60  ;;  %v16338_v21 = vpop.f32.mrf.mxu0  ;;  %v17687_v18 = vunpack.i.h.bf16 %v17685_v49  ;;  %v17686_v30 = vunpack.i.l.bf16 %v17685_v49  ;;  %v20402_v49 = vld [vmem:[%s18956_s22 + $0x188] sm:$0xff]  }
 0x2c3   : > { %16722 = vmatpush3.bf16.msra.mxu0 %v18404_v14  ;;  %v16406_v16 = vpop.f32.mrf.mxu1  ;;  %v5482_v14 = vld [vmem:[#allocation2 + $0xf0] sm:$0xff] }
 0x2c4   : > { %16790 = vmatpush3.bf16.msra.mxu1 %v18405_v20  ;;  %15023 = vst [vmem:[#allocation3 + $0x68] sm:$0xff] %v14711_v24   ;;  %v3170_v19 = vpop.f32.mrf.mxu0  ;;  %v6626_v61 = vsel %vm6596_vm1, %v5481_v58, %v17687_v18  ;;  %v6625_v8 = vsel %vm6596_vm1, %v5480_v5, %v17686_v30 }
 0x2c5   : > { %16604 = vmatmul.mubr.bf16.gmra.mxu0 %v20363_v23  ;;  %v3379_v31 = vpop.f32.mrf.mxu1  ;;  %v17690_v25 = vpop.permute.xlu0 %17689 }
 0x2c6   : > { %16672 = vmatmul.mubr.bf16.gmra.mxu1 %v20239_v39  ;;  %16607 = vmatprep.mubr.msk.bf16.mxu0 %vm18804_vm0, %v20151_v10  ;;  %v20374_v37 = vadd.f32 %v3379_v31, %v3170_v19  ;;  %v17692_v57 = vunpack.i.h.bf16 %v17690_v25  ;;  %v17691_v42 = vunpack.i.l.bf16 %v17690_v25  ;;  %v16341_v40 = vpop.f32.mrf.mxu0 }
 0x2c7   : > { %16675 = vmatprep.mubr.msk.bf16.mxu1 %vm18804_vm0, %v20151_v10  ;;  %v16409_v39 = vpop.f32.mrf.mxu1 }
 0x2c8   : > { %v6730_v26 = vsel %vm6701_vm2, %v6625_v8, %v17691_v42  ;;  %v6731_v28 = vsel %vm6701_vm2, %v6626_v61, %v17692_v57  ;;  %v3173_v12 = vpop.f32.mrf.mxu0  ;;  %v20412_v42 = vld [vmem:[%s22656_s3 + $0x78] sm:$0xff]   ;;  %v5484_v39 = vld [vmem:[#allocation2 + $0x100] sm:$0xff] }
 0x2c9   : > { %v6835_v38 = vsel %vm6806_vm3, %v6730_v26, %v5480_v5  ;;  %v6836_v52 = vsel %vm6806_vm3, %v6731_v28, %v5481_v58  ;;  %v3382_v55 = vpop.f32.mrf.mxu1  ;;  %v20420_v8 = vld [vmem:[%s22656_s3 + $0x38] sm:$0xff]   ;;  %v5485_v26 = vld [vmem:[#allocation2 + $0x108] sm:$0xff]  ;;  %16843 = vmatprep.subr.bf16.mxu0 %v20412_v42 }
 0x2ca   : > { %v17695_v2 = vpop.permute.xlu1 %17694  ;;  %v14716_v59 = vpack.c.bf16 %v6836_v52, %v6835_v38  ;;  %v20387_v53 = vadd.f32 %v3382_v55, %v3173_v12  ;;  %v16342_v35 = vpop.f32.mrf.mxu0  ;;  %16891 = vmatprep.subr.bf16.mxu1 %v20420_v8 }
 0x2cb   : > { %v17697_v48 = vunpack.i.h.bf16 %v17695_v2  ;;  %v17696_v11 = vunpack.i.l.bf16 %v17695_v2  ;;  %v16410_v1 = vpop.f32.mrf.mxu1 }
 0x2cc   : > { %15024 = vst [vmem:[#allocation3 + $0x70] sm:$0xff] %v14716_v59   ;;  %v3178_v29 = vpop.f32.mrf.mxu0 }
 0x2cd   : > { %16608 = vmatmul.mubr.bf16.gmra.mxu0 %v20383_v3  ;;  %v3387_v6 = vpop.f32.mrf.mxu1  ;;  %v6628_v46 = vsel %vm6596_vm1, %v5483_v9, %v17697_v48  ;;  %v6627_v60 = vsel %vm6596_vm1, %v5482_v14, %v17696_v11  ;;  %v20433_v11 = vld [vmem:[%s18956_s22 + $0x190] sm:$0xff]  }
 0x2ce   : > { %16676 = vmatmul.mubr.bf16.gmra.mxu1 %v20266_v32  ;;  %v17700_v43 = vpop.permute.xlu1 %17699  ;;  %16611 = vmatprep.mubr.msk.bf16.mxu0 %vm18804_vm0, %v20151_v10  ;;  %v20393_v36 = vadd.f32 %v3387_v6, %v3178_v29  ;;  %v16345_v54 = vpop.f32.mrf.mxu0 }
 0x2cf   : > { %v17702_v17 = vunpack.i.h.bf16 %v17700_v43  ;;  %v17701_v20 = vunpack.i.l.bf16 %v17700_v43  ;;  %16679 = vmatprep.mubr.msk.bf16.mxu1 %vm18804_vm0, %v20151_v10  ;;  %v16413_v32 = vpop.f32.mrf.mxu1 }
 0x2d0   : > { %v3181_v22 = vpop.f32.mrf.mxu0 }
 0x2d1   : > { %v6732_v63 = vsel %vm6701_vm2, %v6627_v60, %v17701_v20  ;;  %v6733_v44 = vsel %vm6701_vm2, %v6628_v46, %v17702_v17  ;;  %v3390_v18 = vpop.f32.mrf.mxu1 }
 0x2d2   : > { %v6837_v24 = vsel %vm6806_vm3, %v6732_v63, %v5482_v14  ;;  %v6838_v21 = vsel %vm6806_vm3, %v6733_v44, %v5483_v9  ;;  %v17705_v30 = vpop.permute.xlu0 %17704  ;;  %v20406_v19 = vadd.f32 %v3390_v18, %v3181_v22  ;;  %v16346_v31 = vpop.f32.mrf.mxu0  ;;  %v5453_v18 = vld [vmem:[#allocation2 + $0x8] sm:$0xff] }
 0x2d3   : > { %v14721_v16 = vpack.c.bf16 %v6838_v21, %v6837_v24  ;;  %v17707_v25 = vunpack.i.h.bf16 %v17705_v30  ;;  %v17706_v5 = vunpack.i.l.bf16 %v17705_v30  ;;  %v16414_v58 = vpop.f32.mrf.mxu1  ;;  %v5452_v21 = vld [vmem:[#allocation2] sm:$0xff] }
 0x2d4   : > { %v3186_v57 = vpop.f32.mrf.mxu0 }
 0x2d5   : > { %15025 = vst [vmem:[#allocation3 + $0x78] sm:$0xff] %v14721_v16   ;;  %16612 = vmatmul.mubr.bf16.gmra.mxu0 %v20402_v49  ;;  %v3395_v40 = vpop.f32.mrf.mxu1  ;;  %v6629_v55 = vsel %vm6596_vm1, %v5484_v39, %v17706_v5 }
 0x2d6   : > { %16680 = vmatmul.mubr.bf16.gmra.mxu1 %v20295_v13  ;;  %v17710_v61 = vpop.permute.xlu0 %17709  ;;  %16615 = vmatprep.mubr.msk.bf16.mxu0 %vm18804_vm0, %v20151_v10  ;;  %v20422_v28 = vadd.f32 %v3395_v40, %v3186_v57  ;;  %v16349_v52 = vpop.f32.mrf.mxu0  ;;  %v6630_v13 = vsel %vm6596_vm1, %v5485_v26, %v17707_v25  ;;  %v5486_v57 = vld [vmem:[#allocation2 + $0x110] sm:$0xff]  ;;  %v5487_v40 = vld [vmem:[#allocation2 + $0x118] sm:$0xff] }
 0x2d7   : > { %v17712_v12 = vunpack.i.h.bf16 %v17710_v61  ;;  %v17711_v38 = vunpack.i.l.bf16 %v17710_v61  ;;  %16683 = vmatprep.mubr.msk.bf16.mxu1 %vm18804_vm0, %v20151_v10  ;;  %v16417_v2 = vpop.f32.mrf.mxu1 }
 0x2d8   : > { %v3189_v48 = vpop.f32.mrf.mxu0  ;;  %v20454_v2 = vld [vmem:[%s18956_s22 + $0x198] sm:$0xff]  }
 0x2d9   : > { %v6734_v59 = vsel %vm6701_vm2, %v6629_v55, %v17711_v38  ;;  %v6735_v35 = vsel %vm6701_vm2, %v6630_v13, %v17712_v12  ;;  %v3398_v6 = vpop.f32.mrf.mxu1  ;;  %v17720_v17 = vpop.permute.xlu1 %17719 }
 0x2da   : > { %v6839_v1 = vsel %vm6806_vm3, %v6734_v59, %v5484_v39  ;;  %v6840_v29 = vsel %vm6806_vm3, %v6735_v35, %v5485_v26  ;;  %v17715_v43 = vpop.permute.xlu0 %17714  ;;  %v20437_v9 = vadd.f32 %v3398_v6, %v3189_v48  ;;  %v16350_v20 = vpop.f32.mrf.mxu0  ;;  %v17722_v32 = vunpack.i.h.bf16 %v17720_v17 }
 0x2db   : > { %v14726_v14 = vpack.c.bf16 %v6840_v29, %v6839_v1  ;;  %v17717_v54 = vunpack.i.h.bf16 %v17715_v43  ;;  %v17716_v46 = vunpack.i.l.bf16 %v17715_v43  ;;  %v16418_v60 = vpop.f32.mrf.mxu1  ;;  %v17721_v63 = vunpack.i.l.bf16 %v17720_v17 }
 0x2dc   : > { %v3194_v44 = vpop.f32.mrf.mxu0  ;;  %v6632_v12 = vsel %vm6596_vm1, %v5487_v40, %v17722_v32 }
 0x2dd   : > { %15026 = vst [vmem:[#allocation3 + $0x80] sm:$0xff] %v14726_v14   ;;  %16616 = vmatmul.mubr.bf16.gmra.mxu0 %v20433_v11  ;;  %v3403_v22 = vpop.f32.mrf.mxu1  ;;  %v17725_v25 = vpop.permute.xlu1 %17724  ;;  %v6598_v58 = vsel %vm6596_vm1, %v5453_v18, %v17717_v54  ;;  %v6631_v38 = vsel %vm6596_vm1, %v5486_v57, %v17721_v63 }
 0x2de   : > { %16684 = vmatmul.mubr.bf16.gmra.mxu1 %v20328_v47  ;;  %v17735_v24 = vpop.permute.xlu0 %17734  ;;  %16619 = vmatprep.mubr.msk.bf16.mxu0 %vm18804_vm0, %v20151_v10  ;;  %v20443_v30 = vadd.f32 %v3403_v22, %v3194_v44  ;;  %v16353_v5 = vpop.f32.mrf.mxu0  ;;  %v6597_v47 = vsel %vm6596_vm1, %v5452_v21, %v17716_v46  ;;  %v17727_v61 = vunpack.i.h.bf16 %v17725_v25  ;;  %v17726_v39 = vunpack.i.l.bf16 %v17725_v25  ;;  %v5489_v25 = vld [vmem:[#allocation2 + $0x128] sm:$0xff] }
 0x2df   : > { %v17737_v16 = vunpack.i.h.bf16 %v17735_v24  ;;  %v17736_v31 = vunpack.i.l.bf16 %v17735_v24  ;;  %16687 = vmatprep.mubr.msk.bf16.mxu1 %vm18804_vm0, %v20151_v10  ;;  %v16421_v26 = vpop.f32.mrf.mxu1 }
 0x2e0   : > { %v3197_v55 = vpop.f32.mrf.mxu0  ;;  %v6736_v35 = vsel %vm6701_vm2, %v6631_v38, %v17726_v39  ;;  %v6737_v48 = vsel %vm6701_vm2, %v6632_v12, %v17727_v61  ;;  %v5454_v61 = vld [vmem:[#allocation2 + $0x10] sm:$0xff]  ;;  %v5455_v39 = vld [vmem:[#allocation2 + $0x18] sm:$0xff] }
 0x2e1   : > { %v6702_v52 = vsel %vm6701_vm2, %v6597_v47, %v17736_v31  ;;  %v6703_v13 = vsel %vm6701_vm2, %v6598_v58, %v17737_v16  ;;  %v3406_v1 = vpop.f32.mrf.mxu1  ;;  %v6841_v43 = vsel %vm6806_vm3, %v6736_v35, %v5486_v57  ;;  %v6842_v14 = vsel %vm6806_vm3, %v6737_v48, %v5487_v40  ;;  %v17730_v20 = vpop.permute.xlu1 %17729  ;;  %v20466_v31 = vld [vmem:[#allocation2 + $0x340] sm:$0xff] }
 0x2e2   : > { %v6807_v10 = vsel %vm6806_vm3, %v6702_v52, %v5452_v21  ;;  %v6808_v59 = vsel %vm6806_vm3, %v6703_v13, %v5453_v18  ;;  %v17745_v29 = vpop.permute.xlu0 %17744  ;;  %v20462_v17 = vadd.f32 %v3406_v1, %v3197_v55  ;;  %v16354_v54 = vpop.f32.mrf.mxu0  ;;  %v14731_v46 = vpack.c.bf16 %v6842_v14, %v6841_v43  ;;  %v5488_v21 = vld [vmem:[#allocation2 + $0x120] sm:$0xff] }
 0x2e3   : > { %v14646_v6 = vpack.c.bf16 %v6808_v59, %v6807_v10  ;;  %v17747_v60 = vunpack.i.h.bf16 %v17745_v29  ;;  %v16422_v32 = vpop.f32.mrf.mxu1  ;;  %v17732_v63 = vunpack.i.h.bf16 %v17730_v20  ;;  %v17731_v44 = vunpack.i.l.bf16 %v17730_v20  ;;  %v18399_v48 = vld [vmem:[%s18956_s22 + $0x1a0] sm:$0xff]  }
 0x2e4   : > { %v17746_v22 = vunpack.i.l.bf16 %v17745_v29  ;;  %v3202_v24 = vpop.f32.mrf.mxu0  ;;  %15027 = vst [vmem:[#allocation3 + $0x88] sm:$0xff] %v14731_v46  }
 0x2e5   : > { %14647 = vst [vmem:[#allocation3] sm:$0xff] %v14646_v6   ;;  %16620 = vmatmul.mubr.bf16.gmra.mxu0 %v20454_v2  ;;  %v3411_v18 = vpop.f32.mrf.mxu1  ;;  %v17740_v58 = vpop.permute.xlu1 %17739  ;;  %v6600_v13 = vsel %vm6596_vm1, %v5455_v39, %v17732_v63  ;;  %v6599_v55 = vsel %vm6596_vm1, %v5454_v61, %v17731_v44 }
 0x2e6   : > { %16688 = vmatmul.mubr.bf16.gmra.mxu1 %v20363_v23  ;;  %v17750_v16 = vpop.permute.xlu0 %17749  ;;  %16623 = vmatprep.mubr.msk.bf16.mxu0 %vm18804_vm0, %v20466_v31  ;;  %v20470_v5 = vadd.f32 %v3411_v18, %v3202_v24  ;;  %v16357_v40 = vpop.f32.mrf.mxu0  ;;  %v6634_v23 = vsel %vm6596_vm1, %v5489_v25, %v17747_v60  ;;  %v6633_v26 = vsel %vm6596_vm1, %v5488_v21, %v17746_v22  ;;  %v17742_v12 = vunpack.i.h.bf16 %v17740_v58 }
 0x2e7   : > { %v17752_v47 = vunpack.i.h.bf16 %v17750_v16  ;;  %v17751_v57 = vunpack.i.l.bf16 %v17750_v16  ;;  %16691 = vmatprep.mubr.msk.bf16.mxu1 %vm18804_vm0, %v20466_v31  ;;  %v17741_v38 = vunpack.i.l.bf16 %v17740_v58  ;;  %v16425_v52 = vpop.f32.mrf.mxu1  ;;  %v5491_v40 = vld [vmem:[#allocation2 + $0x138] sm:$0xff] }
 0x2e8   : > { %v3205_v35 = vpop.f32.mrf.mxu0  ;;  %v6705_v29 = vsel %vm6701_vm2, %v6600_v13, %v17742_v12 }
 0x2e9   : > { %v6738_v10 = vsel %vm6701_vm2, %v6633_v26, %v17751_v57  ;;  %v6739_v59 = vsel %vm6701_vm2, %v6634_v23, %v17752_v47  ;;  %v6704_v1 = vsel %vm6701_vm2, %v6599_v55, %v17741_v38  ;;  %v3414_v14 = vpop.f32.mrf.mxu1  ;;  %v6810_v54 = vsel %vm6806_vm3, %v6705_v29, %v5455_v39  ;;  %v17755_v32 = vpop.permute.xlu1 %17754  ;;  %v18401_v38 = vld [vmem:[%s18956_s22 + $0x1a8] sm:$0xff]  }
 0x2ea   : > { %v6843_v6 = vsel %vm6806_vm3, %v6738_v10, %v5488_v21  ;;  %v6844_v43 = vsel %vm6806_vm3, %v6739_v59, %v5489_v25  ;;  %v6809_v20 = vsel %vm6806_vm3, %v6704_v1, %v5454_v61  ;;  %v20487_v60 = vadd.f32 %v3414_v14, %v3205_v35  ;;  %v16358_v63 = vpop.f32.mrf.mxu0  ;;  %v5490_v25 = vld [vmem:[#allocation2 + $0x130] sm:$0xff] }
 0x2eb   : > { %v14736_v46 = vpack.c.bf16 %v6844_v43, %v6843_v6  ;;  %v14651_v44 = vpack.c.bf16 %v6810_v54, %v6809_v20  ;;  %v16426_v22 = vpop.f32.mrf.mxu1  ;;  %v17757_v24 = vunpack.i.h.bf16 %v17755_v32  ;;  %v17756_v18 = vunpack.i.l.bf16 %v17755_v32  ;;  %v5492_v32 = vld [vmem:[#allocation2 + $0x140] sm:$0xff]  ;;  %v5493_v63 = vld [vmem:[#allocation2 + $0x148] sm:$0xff] }
 0x2ec   : > { %v3210_v16 = vpop.f32.mrf.mxu0 }
 0x2ed   : > { %15028 = vst [vmem:[#allocation3 + $0x90] sm:$0xff] %v14736_v46   ;;  %16624 = vmatmul.mubr.bf16.gmra.mxu0 %v18399_v48  ;;  %15011 = vst [vmem:[#allocation3 + $0x8] sm:$0xff] %v14651_v44   ;;  %v3419_v21 = vpop.f32.mrf.mxu1  ;;  %v17760_v47 = vpop.permute.xlu1 %17759  ;;  %v6636_v26 = vsel %vm6596_vm1, %v5491_v40, %v17757_v24  ;;  %v6635_v12 = vsel %vm6596_vm1, %v5490_v25, %v17756_v18 }
 0x2ee   : > { %16692 = vmatmul.mubr.bf16.gmra.mxu1 %v20383_v3  ;;  %16627 = vmatprep.mubr.msk.bf16.mxu0 %vm18804_vm0, %v20466_v31  ;;  %v20492_v58 = vadd.f32 %v3419_v21, %v3210_v16  ;;  %v16361_v57 = vpop.f32.mrf.mxu0  ;;  %v17762_v61 = vunpack.i.h.bf16 %v17760_v47  ;;  %v17761_v39 = vunpack.i.l.bf16 %v17760_v47 }
 0x2ef   : > { %16695 = vmatprep.mubr.msk.bf16.mxu1 %vm18804_vm0, %v20466_v31  ;;  %v16429_v23 = vpop.f32.mrf.mxu1 }
 0x2f0   : > { %v3213_v3 = vpop.f32.mrf.mxu0  ;;  %v6740_v52 = vsel %vm6701_vm2, %v6635_v12, %v17761_v39  ;;  %v6741_v13 = vsel %vm6701_vm2, %v6636_v26, %v17762_v61 }
 0x2f1   : > { %v3422_v55 = vpop.f32.mrf.mxu1  ;;  %v17765_v10 = vpop.permute.xlu0 %17764  ;;  %v6845_v59 = vsel %vm6806_vm3, %v6740_v52, %v5490_v25  ;;  %v6846_v35 = vsel %vm6806_vm3, %v6741_v13, %v5491_v40  ;;  %v18403_v40 = vld [vmem:[%s18956_s22 + $0x1b0] sm:$0xff]  }
 0x2f2   : > { %v20503_v48 = vadd.f32 %v3422_v55, %v3213_v3  ;;  %v16362_v1 = vpop.f32.mrf.mxu0  ;;  %v14741_v29 = vpack.c.bf16 %v6846_v35, %v6845_v59  ;;  %v17767_v6 = vunpack.i.h.bf16 %v17765_v10  ;;  %v17766_v43 = vunpack.i.l.bf16 %v17765_v10 }
 0x2f3   : > { %v16430_v14 = vpop.f32.mrf.mxu1 }
 0x2f4   : > { %v3218_v20 = vpop.f32.mrf.mxu0  ;;  %15029 = vst [vmem:[#allocation3 + $0x98] sm:$0xff] %v14741_v29   ;;  %v6638_v16 = vsel %vm6596_vm1, %v5493_v63, %v17767_v6  ;;  %v6637_v21 = vsel %vm6596_vm1, %v5492_v32, %v17766_v43  ;;  %v5494_v29 = vld [vmem:[#allocation2 + $0x150] sm:$0xff]  ;;  %v5495_v6 = vld [vmem:[#allocation2 + $0x158] sm:$0xff] }
 0x2f5   : > { %16628 = vmatmul.mubr.bf16.gmra.mxu0 %v18401_v38  ;;  %v3427_v54 = vpop.f32.mrf.mxu1  ;;  %v17770_v46 = vpop.permute.xlu0 %17769 }
 0x2f6   : > { %16696 = vmatmul.mubr.bf16.gmra.mxu1 %v20402_v49  ;;  %16631 = vmatprep.mubr.msk.bf16.mxu0 %vm18804_vm0, %v20466_v31  ;;  %v20508_v44 = vadd.f32 %v3427_v54, %v3218_v20  ;;  %v17772_v22 = vunpack.i.h.bf16 %v17770_v46  ;;  %v17771_v24 = vunpack.i.l.bf16 %v17770_v46  ;;  %v16365_v18 = vpop.f32.mrf.mxu0 }
 0x2f7   : > { %16699 = vmatprep.mubr.msk.bf16.mxu1 %vm18804_vm0, %v20466_v31  ;;  %v16433_v49 = vpop.f32.mrf.mxu1 }
 0x2f8   : > { %v6742_v25 = vsel %vm6701_vm2, %v6637_v21, %v17771_v24  ;;  %v6743_v47 = vsel %vm6701_vm2, %v6638_v16, %v17772_v22  ;;  %v3221_v57 = vpop.f32.mrf.mxu0  ;;  %v18406_v24 = vld [vmem:[%s18956_s22 + $0x1b8] sm:$0xff]  }
 0x2f9   : > { %v6847_v61 = vsel %vm6806_vm3, %v6742_v25, %v5492_v32  ;;  %v6848_v39 = vsel %vm6806_vm3, %v6743_v47, %v5493_v63  ;;  %v3430_v23 = vpop.f32.mrf.mxu1  ;;  %v17775_v26 = vpop.permute.xlu1 %17774 }
 0x2fa   : > { %v14746_v12 = vpack.c.bf16 %v6848_v39, %v6847_v61  ;;  %v20519_v3 = vadd.f32 %v3430_v23, %v3221_v57  ;;  %v16366_v38 = vpop.f32.mrf.mxu0  ;;  %v17777_v52 = vunpack.i.h.bf16 %v17775_v26  ;;  %v17776_v13 = vunpack.i.l.bf16 %v17775_v26 }
 0x2fb   : > { %v16434_v55 = vpop.f32.mrf.mxu1 }
 0x2fc   : > { %15030 = vst [vmem:[#allocation3 + $0xa0] sm:$0xff] %v14746_v12   ;;  %v3636_v10 = vpop.f32.mrf.mxu0  ;;  %v6640_v54 = vsel %vm6596_vm1, %v5495_v6, %v17777_v52 }
 0x2fd   : > { %16632 = vmatmul.mubr.bf16.gmra.mxu0 %v18403_v40  ;;  %v3739_v59 = vadd.f32 %v3636_v10, %v20221_v41  ;;  %v3967_v35 = vpop.f32.mrf.mxu1  ;;  %v17780_v1 = vpop.permute.xlu1 %17779  ;;  %v6639_v41 = vsel %vm6596_vm1, %v5494_v29, %v17776_v13  ;;  %v5496_v10 = vld [vmem:[#allocation2 + $0x160] sm:$0xff] }
 0x2fe   : > { %16700 = vmatmul.mubr.bf16.gmra.mxu1 %v20433_v11  ;;  %16635 = vmatprep.mubr.msk.bf16.mxu0 %vm18804_vm0, %v20466_v31  ;;  %v17782_v43 = vunpack.i.h.bf16 %v17780_v1  ;;  %v17781_v14 = vunpack.i.l.bf16 %v17780_v1  ;;  %v16453_v20 = vpop.f32.mrf.mxu0 }
 0x2ff   : > { %16703 = vmatprep.mubr.msk.bf16.mxu1 %vm18804_vm0, %v20466_v31  ;;  %v4070_v46 = vadd.f32 %v3967_v35, %v3739_v59  ;;  %v16521_v32 = vpop.f32.mrf.mxu1  ;;  %v5497_v59 = vld [vmem:[#allocation2 + $0x168] sm:$0xff] }
 0x300   : > { %v6744_v11 = vsel %vm6701_vm2, %v6639_v41, %v17781_v14  ;;  %v6745_v63 = vsel %vm6701_vm2, %v6640_v54, %v17782_v43  ;;  %v3639_v22 = vpop.f32.mrf.mxu0 }
 0x301   : > { %v4096_v18 = vadd.f32 %v20216_v56, %v4070_v46  ;;  %v6849_v16 = vsel %vm6806_vm3, %v6744_v11, %v5494_v29  ;;  %v6850_v21 = vsel %vm6806_vm3, %v6745_v63, %v5495_v6  ;;  %v3740_v49 = vadd.f32 %v3639_v22, %v20228_v4  ;;  %v3970_v25 = vpop.f32.mrf.mxu1  ;;  %v17785_v47 = vpop.permute.xlu0 %17784  ;;  %v20539_v56 = vld [vmem:[%s22655_s2] ss:$0 sm:$0xff]  ;;  %v18407_v46 = vld [vmem:[%s18956_s22 + $0x178] sm:$0xff]  }
 0x302   : > { %v14751_v57 = vpack.c.bf16 %v6850_v21, %v6849_v16  ;;  %v16454_v40 = vpop.f32.mrf.mxu0  ;;  %v17787_v23 = vunpack.i.h.bf16 %v17785_v47  ;;  %v17786_v26 = vunpack.i.l.bf16 %v17785_v47  ;;  %v18408_v16 = vld [vmem:[%s18956_s22 + $0x198] sm:$0xff]  }
 0x303   : > { %v4122_v61 = vmax.f32 %v4096_v18, 0.0  ;;  %v4071_v39 = vadd.f32 %v3970_v25, %v3740_v49  ;;  %v16522_v12 = vpop.f32.mrf.mxu1 }
 0x304   : > { %15031 = vst [vmem:[#allocation3 + $0xa8] sm:$0xff] %v14751_v57   ;;  %v3644_v38 = vpop.f32.mrf.mxu0  ;;  %v6641_v43 = vsel %vm6596_vm1, %v5496_v10, %v17786_v26  ;;  %v18429_v12 = vld [vmem:[%s22656_s3 + $0x70] sm:$0xff]  }
 0x305   : > { %16636 = vmatmul.mubr.bf16.gmra.mxu0 %v18406_v24  ;;  %4148 = vst [vmem:[#allocation2 + $0x1a0] sm:$0xff] %v4122_v61  ;;  %v4097_v4 = vadd.f32 %v20539_v56, %v4071_v39  ;;  %v3741_v52 = vadd.f32 %v3644_v38, %v20233_v51  ;;  %v3975_v13 = vpop.f32.mrf.mxu1  ;;  %v17790_v55 = vpop.permute.xlu0 %17789  ;;  %v6642_v51 = vsel %vm6596_vm1, %v5497_v59, %v17787_v23  ;;  %v5606_v39 = vld [vmem:[#allocation2 + $0x191] sm:$0xff] }
 0x306   : > { %16704 = vmatmul.mubr.bf16.gmra.mxu1 %v20454_v2  ;;  %16723 = vmatprep.mubr.msk.bf16.mxu0 %vm18804_vm0, %v20466_v31  ;;  %v17792_v35 = vunpack.i.h.bf16 %v17790_v55  ;;  %v17791_v1 = vunpack.i.l.bf16 %v17790_v55  ;;  %v16457_v29 = vpop.f32.mrf.mxu0 }
 0x307   : > { %16791 = vmatprep.mubr.msk.bf16.mxu1 %vm18804_vm0, %v20466_v31  ;;  %v4123_v6 = vmax.f32 %v4097_v4, 0.0  ;;  %v4072_v2 = vadd.f32 %v3975_v13, %v3741_v52  ;;  %v16525_v14 = vpop.f32.mrf.mxu1 }
 0x308   : > { %v6746_v20 = vsel %vm6701_vm2, %v6641_v43, %v17791_v1  ;;  %v6747_v54 = vsel %vm6701_vm2, %v6642_v51, %v17792_v35  ;;  %v3647_v41 = vpop.f32.mrf.mxu0  ;;  %v5499_v35 = vld [vmem:[#allocation2 + $0x178] sm:$0xff] }
 0x309   : > { %4149 = vst [vmem:[#allocation2 + $0x1a8] sm:$0xff] %v4123_v6  ;;  %v4098_v32 = vadd.f32 %v20539_v56, %v4072_v2  ;;  %v6851_v11 = vsel %vm6806_vm3, %v6746_v20, %v5496_v10  ;;  %v6852_v63 = vsel %vm6806_vm3, %v6747_v54, %v5497_v59  ;;  %v3742_v22 = vadd.f32 %v3647_v41, %v20245_v62  ;;  %v3978_v24 = vpop.f32.mrf.mxu1  ;;  %v17795_v18 = vpop.permute.xlu1 %17794  ;;  %v18430_v62 = vld [vmem:[%s22656_s3 + $0x30] sm:$0xff]  }
 0x30a   : > { %v14756_v21 = vpack.c.bf16 %v6852_v63, %v6851_v11  ;;  %v16458_v49 = vpop.f32.mrf.mxu0  ;;  %v17797_v57 = vunpack.i.h.bf16 %v17795_v18  ;;  %v17796_v40 = vunpack.i.l.bf16 %v17795_v18  ;;  %v5498_v59 = vld [vmem:[#allocation2 + $0x170] sm:$0xff]  ;;  %v18433_v11 = vld [vmem:[%s22656_s3 + $0x68] sm:$0xff]  }
 0x30b   : > { %v4124_v25 = vmax.f32 %v4098_v32, 0.0  ;;  %v4073_v47 = vadd.f32 %v3978_v24, %v3742_v22  ;;  %v16526_v61 = vpop.f32.mrf.mxu1  ;;  %v5710_v20 = vld [vmem:[#allocation2 + $0x192] sm:$0xff] }
 0x30c   : > { %15032 = vst [vmem:[#allocation3 + $0xb0] sm:$0xff] %v14756_v21   ;;  %v3652_v23 = vpop.f32.mrf.mxu0  ;;  %v5607_v26 = vld [vmem:[#allocation2 + $0x199] sm:$0xff]  ;;  %v6644_v51 = vsel %vm6596_vm1, %v5499_v35, %v17797_v57  ;;  %v6643_v43 = vsel %vm6596_vm1, %v5498_v59, %v17796_v40 }
 0x30d   : > { %16724 = vmatmul.mubr.bf16.vlgmr.msra.gmra.mxu0 %v18407_v46  ;;  %4150 = vst [vmem:[#allocation2 + $0x1b0] sm:$0xff] %v4124_v25  ;;  %v4099_v38 = vadd.f32 %v20539_v56, %v4073_v47  ;;  %v3743_v4 = vadd.f32 %v3652_v23, %v20255_v33  ;;  %v3983_v52 = vpop.f32.mrf.mxu1  ;;  %v17800_v13 = vpop.permute.xlu1 %17799  ;;  %v17813_v55 = vpack.i.bf16 %v5607_v26, %v5606_v39  ;;  %v5711_v10 = vld [vmem:[#allocation2 + $0x19a] sm:$0xff]  ;;  %v18434_v47 = vld [vmem:[%s22656_s3 + $0x28] sm:$0xff]  }
 0x30e   : > { %16792 = vmatmul.mubr.bf16.vlgmr.msra.gmra.mxu1 %v18408_v16  ;;  %16727 = vmatprep.mubr.msk.bf16.mxu0 %vm18804_vm0, %v20466_v31  ;;  %v17802_v1 = vunpack.i.h.bf16 %v17800_v13  ;;  %v17801_v29 = vunpack.i.l.bf16 %v17800_v13  ;;  %v16461_v6 = vpop.f32.mrf.mxu0  ;;  %v17818_v32 = vpack.i.bf16 %v5711_v10, %v5710_v20  ;;  %v18410_v21 = vld [vmem:[%s18956_s22 + $0x1a0] sm:$0xff]  }
 0x30f   : > { %16795 = vmatprep.mubr.msk.bf16.mxu1 %vm18804_vm0, %v20466_v31  ;;  %16844 = vmatpush3.bf16.msra.mxu0 %v20412_v42  ;;  %v4125_v33 = vmax.f32 %v4099_v38, 0.0  ;;  %v4074_v2 = vadd.f32 %v3983_v52, %v3743_v4  ;;  %v16529_v14 = vpop.f32.mrf.mxu1  ;;  %v18409_v42 = vld [vmem:[%s18956_s22 + $0x180] sm:$0xff]  }
 0x310   : > { %17814 = vrot.lane.b32.xlu1 %v17813_v55, %s18806_s29  ;;  %16892 = vmatpush3.bf16.msra.mxu1 %v20420_v8  ;;  %v6748_v54 = vsel %vm6701_vm2, %v6643_v43, %v17801_v29  ;;  %v6749_v41 = vsel %vm6701_vm2, %v6644_v51, %v17802_v1  ;;  %v3655_v46 = vpop.f32.mrf.mxu0  ;;  %v5608_v26 = vld [vmem:[#allocation2 + $0x1a1] sm:$0xff] }
 0x311   : > { %16845 = vmatprep.subr.bf16.mxu0 %v18429_v12  ;;  %16893 = vmatprep.subr.bf16.mxu1 %v18430_v62  ;;  %4151 = vst [vmem:[#allocation2 + $0x1b8] sm:$0xff] %v4125_v33  ;;  %v4100_v63 = vadd.f32 %v20539_v56, %v4074_v2  ;;  %v6853_v22 = vsel %vm6806_vm3, %v6748_v54, %v5498_v59  ;;  %v3986_v18 = vpop.f32.mrf.mxu1  ;;  %v17805_v16 = vpop.permute.xlu0 %17804  ;;  %v18436_v59 = vld [vmem:[%s22656_s3 + $0x20] sm:$0xff]   ;;  %v5501_v1 = vld [vmem:[#allocation2 + $0x188] sm:$0xff] }
 0x312   : > { %v6854_v8 = vsel %vm6806_vm3, %v6749_v41, %v5499_v35  ;;  %v3744_v24 = vadd.f32 %v3655_v46, %v20270_v0  ;;  %v16462_v25 = vpop.f32.mrf.mxu0  ;;  %v17807_v61 = vunpack.i.h.bf16 %v17805_v16  ;;  %v17806_v39 = vunpack.i.l.bf16 %v17805_v16  ;;  %v5500_v35 = vld [vmem:[#allocation2 + $0x180] sm:$0xff] }
 0x313   : > { %v14761_v49 = vpack.c.bf16 %v6854_v8, %v6853_v22  ;;  %16846 = vmatpush3.bf16.msra.mxu0 %v18429_v12  ;;  %v4126_v57 = vmax.f32 %v4100_v63, 0.0  ;;  %v16530_v23 = vpop.f32.mrf.mxu1  ;;  %v18435_v12 = vld [vmem:[%s22656_s3 + $0x60] sm:$0xff]  }
 0x314   : > { %v4075_v40 = vadd.f32 %v3986_v18, %v3744_v24  ;;  %17819 = vrot.lane.b32.xlu1 %v17818_v32, %s18805_s28  ;;  %16894 = vmatpush3.bf16.msra.mxu1 %v18430_v62  ;;  %v3660_v0 = vpop.f32.mrf.mxu0  ;;  %v5609_v38 = vld [vmem:[#allocation2 + $0x1a9] sm:$0xff]  ;;  %v6646_v51 = vsel %vm6596_vm1, %v5501_v1, %v17807_v61  ;;  %v6645_v43 = vsel %vm6596_vm1, %v5500_v35, %v17806_v39 }
 0x315   : > { %15033 = vst [vmem:[#allocation3 + $0xb8] sm:$0xff] %v14761_v49   ;;  %16728 = vmatmul.mubr.bf16.gmra.mxu0 %v18409_v42  ;;  %16847 = vmatprep.subr.bf16.mxu0 %v18433_v11  ;;  %4152 = vst [vmem:[#allocation2 + $0x1c0] sm:$0xff] %v4126_v57  ;;  %v3745_v52 = vadd.f32 %v3660_v0, %v20283_v45  ;;  %v17810_v55 = vpop.permute.xlu0 %17809  ;;  %v17823_v10 = vpack.i.bf16 %v5609_v38, %v5608_v26  ;;  %v5713_v62 = vld [vmem:[#allocation2 + $0x1aa] sm:$0xff]  ;;  %v5712_v20 = vld [vmem:[#allocation2 + $0x1a2] sm:$0xff] }
 0x316   : > { %v4101_v4 = vadd.f32 %v20539_v56, %v4075_v40  ;;  %v3991_v13 = vpop.f32.mrf.mxu1  ;;  %16796 = vmatmul.mubr.bf16.gmra.mxu1 %v18410_v21  ;;  %16731 = vmatprep.mubr.msk.bf16.mxu0 %vm18804_vm0, %v20466_v31  ;;  %v17812_v29 = vunpack.i.h.bf16 %v17810_v55  ;;  %v17811_v6 = vunpack.i.l.bf16 %v17810_v55  ;;  %v16465_v33 = vpop.f32.mrf.mxu0  ;;  %v17828_v32 = vpack.i.bf16 %v5713_v62, %v5712_v20  ;;  %v18411_v42 = vld [vmem:[%s18956_s22 + $0x188] sm:$0xff]   ;;  %v18439_v49 = vld [vmem:[%s22656_s3 + $0x58] sm:$0xff]  }
 0x317   : > { %16799 = vmatprep.mubr.msk.bf16.mxu1 %vm18804_vm0, %v20466_v31  ;;  %16895 = vmatprep.subr.bf16.mxu1 %v18434_v47  ;;  %v4076_v2 = vadd.f32 %v3991_v13, %v3745_v52  ;;  %v18440_v40 = vld [vmem:[%s22656_s3 + $0x18] sm:$0xff]   ;;  %v18445_v20 = vld [vmem:[%s22656_s3 + $0x48] sm:$0xff]  }
 0x318   : > { %v4127_v45 = vmax.f32 %v4101_v4, 0.0  ;;  %v16533_v14 = vpop.f32.mrf.mxu1  ;;  %17824 = vrot.lane.b32.xlu0 %v17823_v10, %s18806_s29  ;;  %16848 = vmatpush3.bf16.msra.mxu0 %v18433_v11  ;;  %v6750_v54 = vsel %vm6701_vm2, %v6645_v43, %v17811_v6  ;;  %v6751_v41 = vsel %vm6701_vm2, %v6646_v51, %v17812_v29  ;;  %v3663_v46 = vpop.f32.mrf.mxu0  ;;  %v18412_v11 = vld [vmem:[%s18956_s22 + $0x1a8] sm:$0xff]   ;;  %v5610_v61 = vld [vmem:[#allocation2 + $0x1b1] sm:$0xff] }
 0x319   : > { %16896 = vmatpush3.bf16.msra.mxu1 %v18434_v47  ;;  %16849 = vmatprep.subr.bf16.mxu0 %v18435_v12  ;;  %v4102_v63 = vadd.f32 %v20539_v56, %v4076_v2  ;;  %v6855_v22 = vsel %vm6806_vm3, %v6750_v54, %v5500_v35  ;;  %v6856_v8 = vsel %vm6806_vm3, %v6751_v41, %v5501_v1  ;;  %v18442_v4 = vld [vmem:[%s22656_s3 + $0x10] sm:$0xff]  }
 0x31a   : > { %4153 = vst [vmem:[#allocation2 + $0x1c8] sm:$0xff] %v4127_v45  ;;  %v3746_v24 = vadd.f32 %v3663_v46, %v20299_v7  ;;  %v3994_v18 = vpop.f32.mrf.mxu1  ;;  %16897 = vmatprep.subr.bf16.mxu1 %v18436_v59  ;;  %v14766_v16 = vpack.c.bf16 %v6856_v8, %v6855_v22  ;;  %v16466_v21 = vpop.f32.mrf.mxu0  ;;  %v18413_v35 = vld [vmem:[%s18956_s22 + $0x190] sm:$0xff]  }
 0x31b   : > { %v4128_v25 = vmax.f32 %v4102_v63, 0.0  ;;  %v18414_v45 = vld [vmem:[%s18956_s22 + $0x1b0] sm:$0xff]   ;;  %v18449_v21 = vld [vmem:[%s22656_s3 + $0x40] sm:$0xff]  }
 0x31c   : > { %v4077_v47 = vadd.f32 %v3994_v18, %v3746_v24  ;;  %v16534_v57 = vpop.f32.mrf.mxu1  ;;  %17829 = vrot.lane.b32.xlu0 %v17828_v32, %s18805_s28  ;;  %16850 = vmatpush3.bf16.msra.mxu0 %v18435_v12  ;;  %15034 = vst [vmem:[#allocation3 + $0xc0] sm:$0xff] %v14766_v16   ;;  %v5611_v39 = vld [vmem:[#allocation2 + $0x1b9] sm:$0xff]  ;;  %v18441_v12 = vld [vmem:[%s22656_s3 + $0x50] sm:$0xff]  }
 0x31d   : > { %v3668_v7 = vpop.f32.mrf.mxu0  ;;  %16732 = vmatmul.mubr.bf16.gmra.mxu0 %v18411_v42  ;;  %16898 = vmatpush3.bf16.msra.mxu1 %v18436_v59  ;;  %4154 = vst [vmem:[#allocation2 + $0x1d0] sm:$0xff] %v4128_v25  ;;  %v17833_v38 = vpack.i.bf16 %v5611_v39, %v5610_v61  ;;  %v5714_v59 = vld [vmem:[#allocation2 + $0x1b2] sm:$0xff]  ;;  %v18450_v18 = vld [vmem:[%s22656_s3] sm:$0xff]  }
 0x31e   : > { %v4103_v23 = vadd.f32 %v20539_v56, %v4077_v47  ;;  %v3747_v0 = vadd.f32 %v3668_v7, %v20312_v27  ;;  %v3999_v26 = vpop.f32.mrf.mxu1  ;;  %16800 = vmatmul.mubr.bf16.gmra.mxu1 %v18412_v11  ;;  %16735 = vmatprep.mubr.msk.bf16.mxu0 %vm18804_vm0, %v20466_v31  ;;  %v5715_v27 = vld [vmem:[#allocation2 + $0x1ba] sm:$0xff] }
 0x31f   : > { %v16469_v52 = vpop.f32.mrf.mxu0  ;;  %16803 = vmatprep.mubr.msk.bf16.mxu1 %vm18804_vm0, %v20466_v31  ;;  %16851 = vmatprep.subr.bf16.mxu0 %v18439_v49  ;;  %v17838_v33 = vpack.i.bf16 %v5715_v27, %v5714_v59  ;;  %v18415_v47 = vld [vmem:[%s18956_s22 + $0x198] sm:$0xff]  }
 0x320   : > { %v4129_v13 = vmax.f32 %v4103_v23, 0.0  ;;  %v4078_v55 = vadd.f32 %v3999_v26, %v3747_v0  ;;  %v16537_v10 = vpop.f32.mrf.mxu1  ;;  %17834 = vrot.lane.b32.xlu1 %v17833_v38, %s18806_s29  ;;  %16899 = vmatprep.subr.bf16.mxu1 %v18440_v40  ;;  %v18416_v39 = vld [vmem:[%s18956_s22 + $0x1b8] sm:$0xff]  }
 0x321   : > { %v3671_v62 = vpop.f32.mrf.mxu0  ;;  %16852 = vmatpush3.bf16.msra.mxu0 %v18439_v49  ;;  %16900 = vmatpush3.bf16.msra.mxu1 %v18440_v40  ;;  %v5612_v41 = vld [vmem:[#allocation2 + $0x1c1] sm:$0xff]  ;;  %v20670_v27 = vld [vmem:[%s22656_s3 + $0x78] sm:$0xff]  }
 0x322   : > { %4155 = vst [vmem:[#allocation2 + $0x1d8] sm:$0xff] %v4129_v13  ;;  %v4104_v1 = vadd.f32 %v20539_v56, %v4078_v55  ;;  %v3748_v29 = vadd.f32 %v3671_v62, %v20334_v34  ;;  %v4002_v6 = vpop.f32.mrf.mxu1  ;;  %16853 = vmatprep.subr.bf16.mxu0 %v18441_v12  ;;  %16901 = vmatprep.subr.bf16.mxu1 %v18442_v4  ;;  %v18446_v34 = vld [vmem:[%s22656_s3 + $0x8] sm:$0xff]  }
 0x323   : > { %v16470_v51 = vpop.f32.mrf.mxu0  ;;  %v5716_v25 = vld [vmem:[#allocation2 + $0x1c2] sm:$0xff] }
 0x324   : > { %v4130_v43 = vmax.f32 %v4104_v1, 0.0  ;;  %v4079_v2 = vadd.f32 %v4002_v6, %v3748_v29  ;;  %v16538_v14 = vpop.f32.mrf.mxu1  ;;  %17839 = vrot.lane.b32.xlu1 %v17838_v33, %s18805_s28  ;;  %v5613_v46 = vld [vmem:[#allocation2 + $0x1c9] sm:$0xff] }
 0x325   : > { %v3676_v54 = vpop.f32.mrf.mxu0  ;;  %16736 = vmatmul.mubr.bf16.gmra.mxu0 %v18413_v35  ;;  %16902 = vmatpush3.bf16.msra.mxu1 %v18442_v4  ;;  %v17843_v22 = vpack.i.bf16 %v5613_v46, %v5612_v41  ;;  %v5717_v24 = vld [vmem:[#allocation2 + $0x1ca] sm:$0xff] }
 0x326   : > { %4156 = vst [vmem:[#allocation2 + $0x1e0] sm:$0xff] %v4130_v43  ;;  %v4105_v32 = vadd.f32 %v20539_v56, %v4079_v2  ;;  %v3749_v42 = vadd.f32 %v3676_v54, %v20347_v15  ;;  %v4007_v63 = vpop.f32.mrf.mxu1  ;;  %16804 = vmatmul.mubr.bf16.gmra.mxu1 %v18414_v45  ;;  %16739 = vmatprep.mubr.msk.bf16.mxu0 %vm18804_vm0, %v20466_v31  ;;  %v18417_v45 = vld [vmem:[%s18956_s22 + $0x1a0] sm:$0xff]  }
 0x327   : > { %v16473_v8 = vpop.f32.mrf.mxu0  ;;  %16807 = vmatprep.mubr.msk.bf16.mxu1 %vm18804_vm0, %v20466_v31  ;;  %16854 = vmatpush3.bf16.msra.mxu0 %v18441_v12  ;;  %v17848_v61 = vpack.i.bf16 %v5717_v24, %v5716_v25  ;;  %v20665_v12 = vld [vmem:[%s22656_s3 + $0xb8] sm:$0xff]  }
 0x328   : > { %v4131_v11 = vmax.f32 %v4105_v32, 0.0  ;;  %v4080_v15 = vadd.f32 %v4007_v63, %v3749_v42  ;;  %v16541_v16 = vpop.f32.mrf.mxu1  ;;  %17844 = vrot.lane.b32.xlu0 %v17843_v22, %s18806_s29  ;;  %16855 = vmatprep.subr.bf16.mxu0 %v18445_v20 }
 0x329   : > { %v3679_v49 = vpop.f32.mrf.mxu0  ;;  %16903 = vmatprep.subr.bf16.mxu1 %v18446_v34  ;;  %v5718_v33 = vld [vmem:[#allocation2 + $0x1d2] sm:$0xff] }
 0x32a   : > { %4157 = vst [vmem:[#allocation2 + $0x1e8] sm:$0xff] %v4131_v11  ;;  %v4106_v57 = vadd.f32 %v20539_v56, %v4080_v15  ;;  %v3750_v40 = vadd.f32 %v3679_v49, %v20368_v50  ;;  %v4010_v7 = vpop.f32.mrf.mxu1  ;;  %16904 = vmatpush3.bf16.msra.mxu1 %v18446_v34  ;;  %v5614_v50 = vld [vmem:[#allocation2 + $0x1d1] sm:$0xff] }
 0x32b   : > { %v16474_v23 = vpop.f32.mrf.mxu0  ;;  %16856 = vmatpush3.bf16.msra.mxu0 %v18445_v20  ;;  %16905 = vmatprep.subr.bf16.mxu1 %v18450_v18  ;;  %v18418_v20 = vld [vmem:[%s18956_s22 + $0x1c0] sm:$0xff]  }
 0x32c   : > { %v4132_v0 = vmax.f32 %v4106_v57, 0.0  ;;  %v4081_v26 = vadd.f32 %v4010_v7, %v3750_v40  ;;  %v16542_v38 = vpop.f32.mrf.mxu1  ;;  %17849 = vrot.lane.b32.xlu0 %v17848_v61, %s18805_s28  ;;  %16857 = vmatprep.subr.bf16.mxu0 %v18449_v21  ;;  %v18420_v61 = vld [vmem:[%s18956_s22 + $0x1c8] sm:$0xff]  }
 0x32d   : > { %v3684_v4 = vpop.f32.mrf.mxu0  ;;  %16740 = vmatmul.mubr.bf16.gmra.mxu0 %v18415_v47  ;;  %v5615_v52 = vld [vmem:[#allocation2 + $0x1d9] sm:$0xff] }
 0x32e   : > { %4158 = vst [vmem:[#allocation2 + $0x1f0] sm:$0xff] %v4132_v0  ;;  %v4107_v13 = vadd.f32 %v20539_v56, %v4081_v26  ;;  %v3751_v55 = vadd.f32 %v3684_v4, %v20374_v37  ;;  %v4015_v10 = vpop.f32.mrf.mxu1  ;;  %16808 = vmatmul.mubr.bf16.gmra.mxu1 %v18416_v39  ;;  %v17853_v62 = vpack.i.bf16 %v5615_v52, %v5614_v50  ;;  %v5719_v35 = vld [vmem:[#allocation2 + $0x1da] sm:$0xff] }
 0x32f   : > { %16743 = vmatprep.mubr.msk.bf16.mxu0 %vm18804_vm0, %v20466_v31  ;;  %v16477_v59 = vpop.f32.mrf.mxu0  ;;  %16811 = vmatprep.mubr.msk.bf16.mxu1 %vm18804_vm0, %v20466_v31  ;;  %v17858_v14 = vpack.i.bf16 %v5719_v35, %v5718_v33 }
 0x330   : > { %16858 = vmatpush3.bf16.msra.mxu0 %v18449_v21  ;;  %v4133_v1 = vmax.f32 %v4107_v13, 0.0  ;;  %v4082_v29 = vadd.f32 %v4015_v10, %v3751_v55  ;;  %v16545_v6 = vpop.f32.mrf.mxu1  ;;  %17854 = vrot.lane.b32.xlu1 %v17853_v62, %s18806_s29 }
 0x331   : > { %16906 = vmatpush3.bf16.msra.mxu1 %v18450_v18  ;;  %v3687_v37 = vpop.f32.mrf.mxu0  ;;  %16939 = vmatprep.subr.bf16.mxu0 %v20665_v12  ;;  %v5616_v42 = vld [vmem:[#allocation2 + $0x1e1] sm:$0xff] }
 0x332   : > { %16987 = vmatprep.subr.bf16.mxu1 %v20670_v27  ;;  %4159 = vst [vmem:[#allocation2 + $0x1f8] sm:$0xff] %v4133_v1  ;;  %v4108_v51 = vadd.f32 %v20539_v56, %v4082_v29  ;;  %v3752_v43 = vadd.f32 %v3687_v37, %v20387_v53  ;;  %v4018_v2 = vpop.f32.mrf.mxu1  ;;  %v5720_v25 = vld [vmem:[#allocation2 + $0x1e2] sm:$0xff] }
 0x333   : > { %v16478_v54 = vpop.f32.mrf.mxu0 }
 0x334   : > { %v4134_v41 = vmax.f32 %v4108_v51, 0.0  ;;  %v4083_v46 = vadd.f32 %v4018_v2, %v3752_v43  ;;  %v16546_v34 = vpop.f32.mrf.mxu1  ;;  %17859 = vrot.lane.b32.xlu1 %v17858_v14, %s18805_s28  ;;  %v18422_v43 = vld [vmem:[%s18956_s22 + $0x1d0] sm:$0xff]  }
 0x335   : > { %v3692_v32 = vpop.f32.mrf.mxu0  ;;  %16744 = vmatmul.mubr.bf16.gmra.mxu0 %v18417_v45  ;;  %v5617_v63 = vld [vmem:[#allocation2 + $0x1e9] sm:$0xff] }
 0x336   : > { %4160 = vst [vmem:[#allocation2 + $0x200] sm:$0xff] %v4134_v41  ;;  %v4109_v22 = vadd.f32 %v20539_v56, %v4083_v46  ;;  %v3753_v8 = vadd.f32 %v3692_v32, %v20393_v36  ;;  %v4023_v53 = vpop.f32.mrf.mxu1  ;;  %16812 = vmatmul.mubr.bf16.gmra.mxu1 %v18418_v20  ;;  %v17863_v24 = vpack.i.bf16 %v5617_v63, %v5616_v42  ;;  %v5721_v11 = vld [vmem:[#allocation2 + $0x1ea] sm:$0xff]  ;;  %v20712_v63 = vld [vmem:[#allocation2 + $0x340] sm:$0xff] }
 0x337   : > { %16747 = vmatprep.mubr.msk.bf16.mxu0 %vm18804_vm0, %v20466_v31  ;;  %v16481_v18 = vpop.f32.mrf.mxu0  ;;  %16815 = vmatprep.mubr.msk.bf16.mxu1 %vm18804_vm0, %v20466_v31  ;;  %v18419_v36 = vld [vmem:[%s18956_s22 + $0x1a8] sm:$0xff]   ;;  %v17868_v7 = vpack.i.bf16 %v5721_v11, %v5720_v25 }
 0x338   : > { %v4135_v15 = vmax.f32 %v4109_v22, 0.0  ;;  %v4084_v16 = vadd.f32 %v4023_v53, %v3753_v8  ;;  %v16549_v21 = vpop.f32.mrf.mxu1  ;;  %17864 = vrot.lane.b32.xlu0 %v17863_v24, %s18806_s29 }
 0x339   : > { %v3695_v49 = vpop.f32.mrf.mxu0  ;;  %v5618_v4 = vld [vmem:[#allocation2 + $0x1f1] sm:$0xff] }
 0x33a   : > { %4161 = vst [vmem:[#allocation2 + $0x208] sm:$0xff] %v4135_v15  ;;  %v4110_v47 = vadd.f32 %v20539_v56, %v4084_v16  ;;  %v3754_v57 = vadd.f32 %v3695_v49, %v20406_v19  ;;  %v4026_v40 = vpop.f32.mrf.mxu1  ;;  %v5722_v6 = vld [vmem:[#allocation2 + $0x1f2] sm:$0xff] }
 0x33b   : > { %v16482_v39 = vpop.f32.mrf.mxu0  ;;  %v18423_v15 = vld [vmem:[%s18956_s22 + $0x1b8] sm:$0xff]  }
 0x33c   : > { %v4136_v23 = vmax.f32 %v4110_v47, 0.0  ;;  %v4085_v0 = vadd.f32 %v4026_v40, %v3754_v57  ;;  %v16550_v26 = vpop.f32.mrf.mxu1  ;;  %17869 = vrot.lane.b32.xlu0 %v17868_v7, %s18805_s28 }
 0x33d   : > { %v3700_v38 = vpop.f32.mrf.mxu0  ;;  %16748 = vmatmul.mubr.bf16.gmra.mxu0 %v18419_v36  ;;  %v5619_v50 = vld [vmem:[#allocation2 + $0x1f9] sm:$0xff] }
 0x33e   : > { %4162 = vst [vmem:[#allocation2 + $0x210] sm:$0xff] %v4136_v23  ;;  %v4111_v52 = vadd.f32 %v20539_v56, %v4085_v0  ;;  %v3755_v13 = vadd.f32 %v3700_v38, %v20422_v28  ;;  %v4031_v19 = vpop.f32.mrf.mxu1  ;;  %16816 = vmatmul.mubr.bf16.gmra.mxu1 %v18420_v61  ;;  %v17873_v55 = vpack.i.bf16 %v5619_v50, %v5618_v4  ;;  %v5723_v62 = vld [vmem:[#allocation2 + $0x1fa] sm:$0xff]  ;;  %v18421_v28 = vld [vmem:[%s18956_s22 + $0x1b0] sm:$0xff]  }
 0x33f   : > { %16751 = vmatprep.mubr.msk.bf16.mxu0 %vm18804_vm0, %v20466_v31  ;;  %v16485_v10 = vpop.f32.mrf.mxu0  ;;  %16819 = vmatprep.mubr.msk.bf16.mxu1 %vm18804_vm0, %v20466_v31  ;;  %v17878_v51 = vpack.i.bf16 %v5723_v62, %v5722_v6  ;;  %v18424_v36 = vld [vmem:[%s18956_s22 + $0x1d8] sm:$0xff]  }
 0x340   : > { %v4137_v59 = vmax.f32 %v4111_v52, 0.0  ;;  %v4086_v35 = vadd.f32 %v4031_v19, %v3755_v13  ;;  %v16553_v1 = vpop.f32.mrf.mxu1  ;;  %17874 = vrot.lane.b32.xlu1 %v17873_v55, %s18806_s29 }
 0x341   : > { %v3703_v29 = vpop.f32.mrf.mxu0  ;;  %v5620_v41 = vld [vmem:[#allocation2 + $0x201] sm:$0xff] }
 0x342   : > { %4163 = vst [vmem:[#allocation2 + $0x218] sm:$0xff] %v4137_v59  ;;  %v4112_v37 = vadd.f32 %v20539_v56, %v4086_v35  ;;  %v3756_v33 = vadd.f32 %v3703_v29, %v20437_v9  ;;  %v4034_v45 = vpop.f32.mrf.mxu1  ;;  %v5724_v11 = vld [vmem:[#allocation2 + $0x202] sm:$0xff] }
 0x343   : > { %v16486_v2 = vpop.f32.mrf.mxu0  ;;  %v18426_v29 = vld [vmem:[%s18956_s22 + $0x1e0] sm:$0xff]  }
 0x344   : > { %v4138_v14 = vmax.f32 %v4112_v37, 0.0  ;;  %v4087_v31 = vadd.f32 %v4034_v45, %v3756_v33  ;;  %v16554_v20 = vpop.f32.mrf.mxu1  ;;  %17879 = vrot.lane.b32.xlu1 %v17878_v51, %s18805_s28 }
 0x345   : > { %v3708_v54 = vpop.f32.mrf.mxu0  ;;  %16752 = vmatmul.mubr.bf16.gmra.mxu0 %v18421_v28  ;;  %v5621_v46 = vld [vmem:[#allocation2 + $0x209] sm:$0xff] }
 0x346   : > { %4164 = vst [vmem:[#allocation2 + $0x220] sm:$0xff] %v4138_v14  ;;  %v4113_v34 = vadd.f32 %v20539_v56, %v4087_v31  ;;  %v3757_v32 = vadd.f32 %v3708_v54, %v20443_v30  ;;  %v4039_v9 = vpop.f32.mrf.mxu1  ;;  %16820 = vmatmul.mubr.bf16.gmra.mxu1 %v18422_v43  ;;  %v17883_v42 = vpack.i.bf16 %v5621_v46, %v5620_v41  ;;  %v5725_v8 = vld [vmem:[#allocation2 + $0x20a] sm:$0xff] }
 0x347   : > { %16755 = vmatprep.mubr.msk.bf16.mxu0 %vm18804_vm0, %v20712_v63  ;;  %v16489_v22 = vpop.f32.mrf.mxu0  ;;  %16823 = vmatprep.mubr.msk.bf16.mxu1 %vm18804_vm0, %v20712_v63  ;;  %v17888_v25 = vpack.i.bf16 %v5725_v8, %v5724_v11 }
 0x348   : > { %v4139_v53 = vmax.f32 %v4113_v34, 0.0  ;;  %v4088_v24 = vadd.f32 %v4039_v9, %v3757_v32  ;;  %v16557_v18 = vpop.f32.mrf.mxu1  ;;  %17884 = vrot.lane.b32.xlu0 %v17883_v42, %s18806_s29 }
 0x349   : > { %v3711_v30 = vpop.f32.mrf.mxu0  ;;  %v5622_v39 = vld [vmem:[#allocation2 + $0x211] sm:$0xff] }
 0x34a   : > { %4165 = vst [vmem:[#allocation2 + $0x228] sm:$0xff] %v4139_v53  ;;  %v4114_v16 = vadd.f32 %v20539_v56, %v4088_v24  ;;  %v3758_v21 = vadd.f32 %v3711_v30, %v20462_v17  ;;  %v4042_v49 = vpop.f32.mrf.mxu1  ;;  %v5726_v10 = vld [vmem:[#allocation2 + $0x212] sm:$0xff]  ;;  %v18432_v24 = vld [vmem:[%s18956_s22 + $0x1e8] sm:$0xff]  }
 0x34b   : > { %v16490_v47 = vpop.f32.mrf.mxu0 }
 0x34c   : > { %v4140_v57 = vmax.f32 %v4114_v16, 0.0  ;;  %v4089_v40 = vadd.f32 %v4042_v49, %v3758_v21  ;;  %v16558_v7 = vpop.f32.mrf.mxu1  ;;  %17889 = vrot.lane.b32.xlu0 %v17888_v25, %s18805_s28 }
 0x34d   : > { %v3716_v61 = vpop.f32.mrf.mxu0  ;;  %16756 = vmatmul.mubr.bf16.gmra.mxu0 %v18423_v15  ;;  %v5623_v23 = vld [vmem:[#allocation2 + $0x219] sm:$0xff] }
 0x34e   : > { %4166 = vst [vmem:[#allocation2 + $0x230] sm:$0xff] %v4140_v57  ;;  %v4115_v0 = vadd.f32 %v20539_v56, %v4089_v40  ;;  %v3759_v26 = vadd.f32 %v3716_v61, %v20470_v5  ;;  %v4047_v17 = vpop.f32.mrf.mxu1  ;;  %16824 = vmatmul.mubr.bf16.gmra.mxu1 %v18424_v36  ;;  %v17893_v38 = vpack.i.bf16 %v5623_v23, %v5622_v39  ;;  %v5727_v50 = vld [vmem:[#allocation2 + $0x21a] sm:$0xff] }
 0x34f   : > { %16759 = vmatprep.mubr.msk.bf16.mxu0 %vm18804_vm0, %v20712_v63  ;;  %v16493_v4 = vpop.f32.mrf.mxu0  ;;  %16827 = vmatprep.mubr.msk.bf16.mxu1 %vm18804_vm0, %v20712_v63  ;;  %v18425_v5 = vld [vmem:[%s18956_s22 + $0x1c0] sm:$0xff]   ;;  %v17898_v1 = vpack.i.bf16 %v5727_v50, %v5726_v10  ;;  %v18438_v50 = vld [vmem:[%s18956_s22 + $0x1f0] sm:$0xff]  }
 0x350   : > { %v4141_v52 = vmax.f32 %v4115_v0, 0.0  ;;  %v4090_v13 = vadd.f32 %v4047_v17, %v3759_v26  ;;  %v16561_v19 = vpop.f32.mrf.mxu1  ;;  %17894 = vrot.lane.b32.xlu1 %v17893_v38, %s18806_s29 }
 0x351   : > { %v3719_v55 = vpop.f32.mrf.mxu0  ;;  %v5624_v51 = vld [vmem:[#allocation2 + $0x221] sm:$0xff] }
 0x352   : > { %4167 = vst [vmem:[#allocation2 + $0x238] sm:$0xff] %v4141_v52  ;;  %v4116_v62 = vadd.f32 %v20539_v56, %v4090_v13  ;;  %v3760_v59 = vadd.f32 %v3719_v55, %v20487_v60  ;;  %v4050_v35 = vpop.f32.mrf.mxu1  ;;  %v5728_v9 = vld [vmem:[#allocation2 + $0x222] sm:$0xff] }
 0x353   : > { %v16494_v6 = vpop.f32.mrf.mxu0 }
 0x354   : > { %v4142_v28 = vmax.f32 %v4116_v62, 0.0  ;;  %v4091_v37 = vadd.f32 %v4050_v35, %v3760_v59  ;;  %v16562_v33 = vpop.f32.mrf.mxu1  ;;  %17899 = vrot.lane.b32.xlu1 %v17898_v1, %s18805_s28 }
 0x355   : > { %v3724_v45 = vpop.f32.mrf.mxu0  ;;  %16760 = vmatmul.mubr.bf16.gmra.mxu0 %v18425_v5  ;;  %v5625_v43 = vld [vmem:[#allocation2 + $0x229] sm:$0xff] }
 0x356   : > { %4168 = vst [vmem:[#allocation2 + $0x240] sm:$0xff] %v4142_v28  ;;  %v4117_v2 = vadd.f32 %v20539_v56, %v4091_v37  ;;  %v3761_v14 = vadd.f32 %v3724_v45, %v20492_v58  ;;  %v4055_v60 = vpop.f32.mrf.mxu1  ;;  %16828 = vmatmul.mubr.bf16.gmra.mxu1 %v18426_v29  ;;  %v17903_v31 = vpack.i.bf16 %v5625_v43, %v5624_v51  ;;  %v5729_v54 = vld [vmem:[#allocation2 + $0x22a] sm:$0xff]  ;;  %v18443_v45 = vld [vmem:[%s18956_s22 + $0x1d8] sm:$0xff]  }
 0x357   : > { %16763 = vmatprep.mubr.msk.bf16.mxu0 %vm18804_vm0, %v20712_v63  ;;  %v16497_v20 = vpop.f32.mrf.mxu0  ;;  %16831 = vmatprep.mubr.msk.bf16.mxu1 %vm18804_vm0, %v20712_v63  ;;  %v18431_v58 = vld [vmem:[%s18956_s22 + $0x1c8] sm:$0xff]   ;;  %v17908_v53 = vpack.i.bf16 %v5729_v54, %v5728_v9 }
 0x358   : > { %v4143_v41 = vmax.f32 %v4117_v2, 0.0  ;;  %v4092_v46 = vadd.f32 %v4055_v60, %v3761_v14  ;;  %v16565_v34 = vpop.f32.mrf.mxu1  ;;  %17904 = vrot.lane.b32.xlu0 %v17903_v31, %s18806_s29  ;;  %v18444_v2 = vld [vmem:[%s18956_s22 + $0x1f8] sm:$0xff]   ;;  %v18448_v54 = vld [vmem:[#allocation3] sm:$0xff]  }
 0x359   : > { %v3727_v32 = vpop.f32.mrf.mxu0  ;;  %v5626_v21 = vld [vmem:[#allocation2 + $0x231] sm:$0xff] }
 0x35a   : > { %4169 = vst [vmem:[#allocation2 + $0x248] sm:$0xff] %v4143_v41  ;;  %v4118_v42 = vadd.f32 %v20539_v56, %v4092_v46  ;;  %v3762_v22 = vadd.f32 %v3727_v32, %v20503_v48  ;;  %v4058_v8 = vpop.f32.mrf.mxu1  ;;  %v5730_v0 = vld [vmem:[#allocation2 + $0x232] sm:$0xff] }
 0x35b   : > { %v16498_v18 = vpop.f32.mrf.mxu0  ;;  %v18447_v20 = vld [vmem:[#allocation3 + $0x10] sm:$0xff]  }
 0x35c   : > { %v4144_v30 = vmax.f32 %v4118_v42, 0.0  ;;  %v4093_v11 = vadd.f32 %v4058_v8, %v3762_v22  ;;  %v16566_v15 = vpop.f32.mrf.mxu1  ;;  %17909 = vrot.lane.b32.xlu0 %v17908_v53, %s18805_s28 }
 0x35d   : > { %v3732_v16 = vpop.f32.mrf.mxu0  ;;  %16764 = vmatmul.mubr.bf16.gmra.mxu0 %v18431_v58  ;;  %v5627_v49 = vld [vmem:[#allocation2 + $0x239] sm:$0xff] }
 0x35e   : > { %4170 = vst [vmem:[#allocation2 + $0x250] sm:$0xff] %v4144_v30  ;;  %v4119_v25 = vadd.f32 %v20539_v56, %v4093_v11  ;;  %v3763_v36 = vadd.f32 %v3732_v16, %v20508_v44  ;;  %v4063_v48 = vpop.f32.mrf.mxu1  ;;  %16832 = vmatmul.mubr.bf16.gmra.mxu1 %v18432_v24  ;;  %v17913_v47 = vpack.i.bf16 %v5627_v49, %v5626_v21  ;;  %v5731_v40 = vld [vmem:[#allocation2 + $0x23a] sm:$0xff]  ;;  %v18437_v44 = vld [vmem:[%s18956_s22 + $0x1d0] sm:$0xff]   ;;  %v18453_v49 = vld [vmem:[#allocation3 + $0x20] sm:$0xff]   ;;  %s14486_s22 = sshll.u32 %s18880_s13, 4  ;;  %s18747_s13 = scalar_lea.vmem %s18746_s25, 32 }
 0x35f   : > { %16767 = vmatprep.mubr.msk.bf16.mxu0 %vm18804_vm0, %v20712_v63  ;;  %v16501_v57 = vpop.f32.mrf.mxu0  ;;  %16835 = vmatprep.mubr.msk.bf16.mxu1 %vm18804_vm0, %v20712_v63  ;;  %v17918_v4 = vpack.i.bf16 %v5731_v40, %v5730_v0  ;;  %v18451_v15 = vld [vmem:[#allocation3 + $0x18] sm:$0xff]   ;;  %v18452_v21 = vld [vmem:[#allocation3 + $0x8] sm:$0xff]   ;;  %s13668_s17 = scalar_lea.hbm %s22662_s9, %s14486_s22 }
 0x360   : > { %v4145_v7 = vmax.f32 %v4119_v25, 0.0  ;;  %v4094_v61 = vadd.f32 %v4063_v48, %v3763_v36  ;;  %v16569_v39 = vpop.f32.mrf.mxu1  ;;  %17914 = vrot.lane.b32.xlu1 %v17913_v47, %s18806_s29  ;;  %v18464_v25 = vld [vmem:[%s22656_s3 + $0xb0] sm:$0xff]  }
 0x361   : > { %v3735_v23 = vpop.f32.mrf.mxu0  ;;  %v5628_v5 = vld [vmem:[#allocation2 + $0x241] sm:$0xff]  ;;  %v18465_v48 = vld [vmem:[%s22656_s3 + $0x70] sm:$0xff]  }
 0x362   : > { %4171 = vst [vmem:[#allocation2 + $0x258] sm:$0xff] %v4145_v7  ;;  %v4120_v26 = vadd.f32 %v20539_v56, %v4094_v61  ;;  %v3764_v17 = vadd.f32 %v3735_v23, %v20519_v3  ;;  %v4066_v38 = vpop.f32.mrf.mxu1  ;;  %v18467_v61 = vld [vmem:[%s22656_s3 + $0xa8] sm:$0xff]  }
 0x363   : > { %v16502_v52 = vpop.f32.mrf.mxu0  ;;  %v18468_v23 = vld [vmem:[%s22656_s3 + $0x68] sm:$0xff]  }
 0x364   : > { %v4146_v13 = vmax.f32 %v4120_v26, 0.0  ;;  %v4095_v19 = vadd.f32 %v4066_v38, %v3764_v17  ;;  %v16570_v55 = vpop.f32.mrf.mxu1  ;;  %17919 = vrot.lane.b32.xlu1 %v17918_v4, %s18805_s28  ;;  %v18454_v17 = vld [vmem:[#allocation3 + $0x28] sm:$0xff]   ;;  %v18455_v38 = vld [vmem:[#allocation3 + $0x30] sm:$0xff]  }
 0x365   : > { %v4400_v10 = vpop.f32.mrf.mxu0  ;;  %16768 = vmatmul.mubr.bf16.gmra.mxu0 %v18437_v44  ;;  %v5629_v62 = vld [vmem:[#allocation2 + $0x249] sm:$0xff] }
 0x366   : > { %4172 = vst [vmem:[#allocation2 + $0x260] sm:$0xff] %v4146_v13  ;;  %v4121_v59 = vadd.f32 %v20539_v56, %v4095_v19  ;;  %v4609_v35 = vpop.f32.mrf.mxu1  ;;  %16836 = vmatmul.mubr.bf16.gmra.mxu1 %v18438_v50  ;;  %v17923_v3 = vpack.i.bf16 %v5629_v62, %v5628_v5  ;;  %16771 = vmatprep.mubr.msk.bf16.mxu0 %vm18804_vm0, %v20712_v63  ;;  %v5733_v6 = vld [vmem:[#allocation2 + $0x24a] sm:$0xff]  ;;  %v5732_v56 = vld [vmem:[#allocation2 + $0x242] sm:$0xff]  ;;  %v18474_v62 = vld [vmem:[%s22656_s3 + $0x58] sm:$0xff]  }
 0x367   : > { %v20763_v1 = vadd.f32 %v4609_v35, %v4400_v10  ;;  %v16589_v29 = vpop.f32.mrf.mxu0  ;;  %16839 = vmatprep.mubr.msk.bf16.mxu1 %vm18804_vm0, %v20712_v63  ;;  %v17928_v43 = vpack.i.bf16 %v5733_v6, %v5732_v56  ;;  %v18471_v50 = vld [vmem:[%s22656_s3 + $0x60] sm:$0xff]   ;;  %v18473_v10 = vld [vmem:[%s22656_s3 + $0x98] sm:$0xff]   ;;  %v18457_v56 = vld [vmem:[#allocation3 + $0x40] sm:$0xff]  }
 0x368   : > { %v4147_v28 = vmax.f32 %v4121_v59, 0.0  ;;  %v16657_v37 = vpop.f32.mrf.mxu1  ;;  %17924 = vrot.lane.b32.xlu0 %v17923_v3, %s18806_s29  ;;  %v18456_v6 = vld [vmem:[#allocation3 + $0x38] sm:$0xff]  }
 0x369   : > { %v4403_v33 = vpop.f32.mrf.mxu0  ;;  %v5630_v41 = vld [vmem:[#allocation2 + $0x251] sm:$0xff] }
 0x36a   : > { %4173 = vst [vmem:[#allocation2 + $0x268] sm:$0xff] %v4147_v28  ;;  %v4612_v51 = vpop.f32.mrf.mxu1  ;;  %v5734_v53 = vld [vmem:[#allocation2 + $0x252] sm:$0xff] }
 0x36b   : > { %v20770_v14 = vadd.f32 %v4612_v51, %v4403_v33  ;;  %v16590_v60 = vpop.f32.mrf.mxu0 }
 0x36c   : > { %v16658_v31 = vpop.f32.mrf.mxu1  ;;  %17929 = vrot.lane.b32.xlu0 %v17928_v43, %s18805_s28  ;;  %v18477_v43 = vld [vmem:[%s22656_s3 + $0x50] sm:$0xff]  }
 0x36d   : > { %v4408_v63 = vpop.f32.mrf.mxu0  ;;  %16772 = vmatmul.mubr.bf16.gmra.mxu0 %v18443_v45  ;;  %v5631_v46 = vld [vmem:[#allocation2 + $0x259] sm:$0xff]  ;;  %v18476_v45 = vld [vmem:[%s22656_s3 + $0x90] sm:$0xff]  }
 0x36e   : > { %v4617_v34 = vpop.f32.mrf.mxu1  ;;  %16840 = vmatmul.mubr.bf16.gmra.mxu1 %v18444_v2  ;;  %16859 = vmatprep.mubr.bf16.mxu0 %v18447_v20  ;;  %v17933_v32 = vpack.i.bf16 %v5631_v46, %v5630_v41  ;;  %v5735_v42 = vld [vmem:[#allocation2 + $0x25a] sm:$0xff]  ;;  %v5502_v31 = vld [vmem:[#allocation2 + $0x190] sm:$0xff] }
 0x36f   : > { %v20773_v9 = vadd.f32 %v4617_v34, %v4408_v63  ;;  %16907 = vmatprep.mubr.bf16.mxu1 %v18448_v54  ;;  %v16593_v58 = vpop.f32.mrf.mxu0  ;;  %v17938_v18 = vpack.i.bf16 %v5735_v42, %v5734_v53  ;;  %v18479_v42 = vld [vmem:[%s22656_s3 + $0x88] sm:$0xff]  }
 0x370   : > { %v16661_v22 = vpop.f32.mrf.mxu1  ;;  %17934 = vrot.lane.b32.xlu1 %v17933_v32, %s18806_s29 }
 0x371   : > { %v4411_v8 = vpop.f32.mrf.mxu0 }
 0x372   : > { %v4620_v24 = vpop.f32.mrf.mxu1 }
 0x373   : > { %v20776_v30 = vadd.f32 %v4620_v24, %v4411_v8  ;;  %v16594_v11 = vpop.f32.mrf.mxu0  ;;  %v18480_v24 = vld [vmem:[%s22656_s3 + $0x48] sm:$0xff]  }
 0x374   : > { %v16662_v16 = vpop.f32.mrf.mxu1  ;;  %17939 = vrot.lane.b32.xlu1 %v17938_v18, %s18805_s28 }
 0x375   : > { %v4416_v36 = vpop.f32.mrf.mxu0  ;;  %16860 = vmatmul.mubr.bf16.vlgmr.msra.gmra.mxu0 %v18451_v15 }
 0x376   : > { %v4625_v47 = vpop.f32.mrf.mxu1  ;;  %16908 = vmatmul.mubr.bf16.vlgmr.msra.gmra.mxu1 %v18452_v21  ;;  %16863 = vmatprep.mubr.bf16.mxu0 %v18453_v49 }
 0x377   : > { %v20785_v57 = vadd.f32 %v4625_v47, %v4416_v36  ;;  %16911 = vmatprep.mubr.bf16.mxu1 %v18447_v20  ;;  %v16597_v40 = vpop.f32.mrf.mxu0  ;;  %16940 = vmatpush3.bf16.msra.mxu0 %v20665_v12  ;;  %v5503_v20 = vld [vmem:[#allocation2 + $0x198] sm:$0xff]  ;;  %v18458_v36 = vld [vmem:[#allocation3 + $0x48] sm:$0xff]  }
 0x378   : > { %v16665_v7 = vpop.f32.mrf.mxu1  ;;  %16988 = vmatpush3.bf16.msra.mxu1 %v20670_v27  ;;  %16941 = vmatprep.subr.bf16.mxu0 %v18464_v25  ;;  %v18470_v27 = vld [vmem:[%s22656_s3 + $0xa0] sm:$0xff]  }
 0x379   : > { %v4419_v39 = vpop.f32.mrf.mxu0  ;;  %16989 = vmatprep.subr.bf16.mxu1 %v18465_v48  ;;  %v18459_v7 = vld [vmem:[#allocation3 + $0x50] sm:$0xff]  }
 0x37a   : > { %v4628_v0 = vpop.f32.mrf.mxu1 }
 0x37b   : > { %v20795_v44 = vadd.f32 %v4628_v0, %v4419_v39  ;;  %v16598_v26 = vpop.f32.mrf.mxu0  ;;  %16942 = vmatpush3.bf16.msra.mxu0 %v18464_v25 }
 0x37c   : > { %v16666_v12 = vpop.f32.mrf.mxu1  ;;  %16990 = vmatpush3.bf16.msra.mxu1 %v18465_v48  ;;  %16943 = vmatprep.subr.bf16.mxu0 %v18467_v61 }
 0x37d   : > { %v4424_v4 = vpop.f32.mrf.mxu0  ;;  %16864 = vmatmul.mubr.bf16.gmra.mxu0 %v18454_v17  ;;  %16991 = vmatprep.subr.bf16.mxu1 %v18468_v23  ;;  %v5505_v12 = vld [vmem:[#allocation2 + $0x1a8] sm:$0xff] }
 0x37e   : > { %v4633_v52 = vpop.f32.mrf.mxu1  ;;  %16912 = vmatmul.mubr.bf16.gmra.mxu1 %v18451_v15  ;;  %16867 = vmatprep.mubr.bf16.mxu0 %v18455_v38 }
 0x37f   : > { %v20803_v13 = vadd.f32 %v4633_v52, %v4424_v4  ;;  %16915 = vmatprep.mubr.bf16.mxu1 %v18453_v49  ;;  %v16601_v19 = vpop.f32.mrf.mxu0  ;;  %16944 = vmatpush3.bf16.msra.mxu0 %v18467_v61  ;;  %v18483_v61 = vld [vmem:[%s22656_s3 + $0x80] sm:$0xff]  }
 0x380   : > { %v16669_v55 = vpop.f32.mrf.mxu1  ;;  %16992 = vmatpush3.bf16.msra.mxu1 %v18468_v23  ;;  %16945 = vmatprep.subr.bf16.mxu0 %v18470_v27  ;;  %v18484_v23 = vld [vmem:[%s22656_s3 + $0x40] sm:$0xff]  }
 0x381   : > { %v4427_v5 = vpop.f32.mrf.mxu0  ;;  %16993 = vmatprep.subr.bf16.mxu1 %v18471_v50 }
 0x382   : > { %v4636_v59 = vpop.f32.mrf.mxu1  ;;  %v17815_v35 = vpop.permute.xlu1 %17814 }
 0x383   : > { %v20811_v3 = vadd.f32 %v4636_v59, %v4427_v5  ;;  %v16602_v29 = vpop.f32.mrf.mxu0  ;;  %16946 = vmatpush3.bf16.msra.mxu0 %v18470_v27  ;;  %v17817_v28 = vunpack.i.h.bf16 %v17815_v35  ;;  %v17816_v37 = vunpack.i.l.bf16 %v17815_v35  ;;  %v20855_v35 = vld [vmem:[%s22656_s3 + $0xb8] sm:$0xff]  }
 0x384   : > { %v16670_v33 = vpop.f32.mrf.mxu1  ;;  %16994 = vmatpush3.bf16.msra.mxu1 %v18471_v50  ;;  %16947 = vmatprep.subr.bf16.mxu0 %v18473_v10 }
 0x385   : > { %v4432_v51 = vpop.f32.mrf.mxu0  ;;  %16868 = vmatmul.mubr.bf16.gmra.mxu0 %v18456_v6  ;;  %16995 = vmatprep.subr.bf16.mxu1 %v18474_v62  ;;  %v6648_v34 = vsel %vm6596_vm1, %v5503_v20, %v17817_v28  ;;  %v6647_v32 = vsel %vm6596_vm1, %v5502_v31, %v17816_v37 }
 0x386   : > { %v4641_v2 = vpop.f32.mrf.mxu1  ;;  %16916 = vmatmul.mubr.bf16.gmra.mxu1 %v18454_v17  ;;  %16871 = vmatprep.mubr.bf16.mxu0 %v18457_v56  ;;  %v17820_v60 = vpop.permute.xlu1 %17819  ;;  %v5504_v17 = vld [vmem:[#allocation2 + $0x1a0] sm:$0xff] }
 0x387   : > { %v20819_v63 = vadd.f32 %v4641_v2, %v4432_v51  ;;  %v17822_v54 = vunpack.i.h.bf16 %v17820_v60  ;;  %v17821_v41 = vunpack.i.l.bf16 %v17820_v60  ;;  %16919 = vmatprep.mubr.bf16.mxu1 %v18455_v38  ;;  %v16605_v46 = vpop.f32.mrf.mxu0  ;;  %16948 = vmatpush3.bf16.msra.mxu0 %v18473_v10  ;;  %v20848_v10 = vld [vmem:[%s22656_s3 + $0x38] sm:$0xff]   ;;  %v18460_v51 = vld [vmem:[#allocation3 + $0x58] sm:$0xff]  }
 0x388   : > { %v16673_v58 = vpop.f32.mrf.mxu1  ;;  %16996 = vmatpush3.bf16.msra.mxu1 %v18474_v62  ;;  %16949 = vmatprep.subr.bf16.mxu0 %v18476_v45  ;;  %v5506_v46 = vld [vmem:[#allocation2 + $0x1b0] sm:$0xff] }
 0x389   : > { %v6752_v22 = vsel %vm6701_vm2, %v6647_v32, %v17821_v41  ;;  %v6753_v8 = vsel %vm6701_vm2, %v6648_v34, %v17822_v54  ;;  %v4435_v53 = vpop.f32.mrf.mxu0  ;;  %16997 = vmatprep.subr.bf16.mxu1 %v18477_v43  ;;  %v5507_v34 = vld [vmem:[#allocation2 + $0x1b8] sm:$0xff] }
 0x38a   : > { %v6857_v18 = vsel %vm6806_vm3, %v6752_v22, %v5502_v31  ;;  %v6858_v11 = vsel %vm6806_vm3, %v6753_v8, %v5503_v20  ;;  %v4644_v15 = vpop.f32.mrf.mxu1  ;;  %v17825_v16 = vpop.permute.xlu0 %17824  ;;  %v18463_v31 = vld [vmem:[#allocation3 + $0x60] sm:$0xff]  }
 0x38b   : > { %v14771_v21 = vpack.c.bf16 %v6858_v11, %v6857_v18  ;;  %v20833_v49 = vadd.f32 %v4644_v15, %v4435_v53  ;;  %v16606_v25 = vpop.f32.mrf.mxu0  ;;  %16950 = vmatpush3.bf16.msra.mxu0 %v18476_v45  ;;  %v17827_v48 = vunpack.i.h.bf16 %v17825_v16  ;;  %v17826_v47 = vunpack.i.l.bf16 %v17825_v16 }
 0x38c   : > { %v16674_v40 = vpop.f32.mrf.mxu1  ;;  %16998 = vmatpush3.bf16.msra.mxu1 %v18477_v43  ;;  %16951 = vmatprep.subr.bf16.mxu0 %v18479_v42 }
 0x38d   : > { %15035 = vst [vmem:[#allocation3 + $0xc8] sm:$0xff] %v14771_v21   ;;  %v4440_v39 = vpop.f32.mrf.mxu0  ;;  %16872 = vmatmul.mubr.bf16.gmra.mxu0 %v18458_v36  ;;  %16999 = vmatprep.subr.bf16.mxu1 %v18480_v24  ;;  %v6650_v52 = vsel %vm6596_vm1, %v5505_v12, %v17827_v48  ;;  %v6649_v19 = vsel %vm6596_vm1, %v5504_v17, %v17826_v47 }
 0x38e   : > { %v4649_v0 = vpop.f32.mrf.mxu1  ;;  %16920 = vmatmul.mubr.bf16.gmra.mxu1 %v18456_v6  ;;  %16875 = vmatprep.mubr.bf16.mxu0 %v18459_v7  ;;  %v17830_v26 = vpop.permute.xlu0 %17829 }
 0x38f   : > { %v20841_v38 = vadd.f32 %v4649_v0, %v4440_v39  ;;  %v17832_v27 = vunpack.i.h.bf16 %v17830_v26  ;;  %v17831_v4 = vunpack.i.l.bf16 %v17830_v26  ;;  %16923 = vmatprep.mubr.bf16.mxu1 %v18457_v56  ;;  %v16609_v50 = vpop.f32.mrf.mxu0  ;;  %16952 = vmatpush3.bf16.msra.mxu0 %v18479_v42  ;;  %v18469_v0 = vld [vmem:[#allocation3 + $0x70] sm:$0xff]  }
 0x390   : > { %v16677_v55 = vpop.f32.mrf.mxu1  ;;  %17000 = vmatpush3.bf16.msra.mxu1 %v18480_v24  ;;  %16953 = vmatprep.subr.bf16.mxu0 %v18483_v61 }
 0x391   : > { %v6754_v5 = vsel %vm6701_vm2, %v6649_v19, %v17831_v4  ;;  %v6755_v62 = vsel %vm6701_vm2, %v6650_v52, %v17832_v27  ;;  %v4443_v59 = vpop.f32.mrf.mxu0  ;;  %17001 = vmatprep.subr.bf16.mxu1 %v18484_v23  ;;  %v5508_v27 = vld [vmem:[#allocation2 + $0x1c0] sm:$0xff]  ;;  %v5509_v4 = vld [vmem:[#allocation2 + $0x1c8] sm:$0xff] }
 0x392   : > { %v6859_v29 = vsel %vm6806_vm3, %v6754_v5, %v5504_v17  ;;  %v6860_v6 = vsel %vm6806_vm3, %v6755_v62, %v5505_v12  ;;  %v4652_v28 = vpop.f32.mrf.mxu1  ;;  %v17835_v37 = vpop.permute.xlu1 %17834 }
 0x393   : > { %v14776_v33 = vpack.c.bf16 %v6860_v6, %v6859_v29  ;;  %v20859_v56 = vadd.f32 %v4652_v28, %v4443_v59  ;;  %v16610_v45 = vpop.f32.mrf.mxu0  ;;  %16954 = vmatpush3.bf16.msra.mxu0 %v18483_v61  ;;  %v17837_v43 = vunpack.i.h.bf16 %v17835_v37  ;;  %v17836_v2 = vunpack.i.l.bf16 %v17835_v37 }
 0x394   : > { %v16678_v60 = vpop.f32.mrf.mxu1  ;;  %17002 = vmatpush3.bf16.msra.mxu1 %v18484_v23  ;;  %17035 = vmatprep.subr.bf16.mxu0 %v20848_v10 }
 0x395   : > { %15036 = vst [vmem:[#allocation3 + $0xd0] sm:$0xff] %v14776_v33   ;;  %v4448_v20 = vpop.f32.mrf.mxu0  ;;  %16876 = vmatmul.mubr.bf16.gmra.mxu0 %v18460_v51  ;;  %17083 = vmatprep.subr.bf16.mxu1 %v20855_v35  ;;  %v6652_v8 = vsel %vm6596_vm1, %v5507_v34, %v17837_v43  ;;  %v6651_v53 = vsel %vm6596_vm1, %v5506_v46, %v17836_v2 }
 0x396   : > { %v4657_v54 = vpop.f32.mrf.mxu1  ;;  %16924 = vmatmul.mubr.bf16.gmra.mxu1 %v18458_v36  ;;  %16879 = vmatprep.mubr.bf16.mxu0 %v18463_v31  ;;  %v17840_v41 = vpop.permute.xlu1 %17839 }
 0x397   : > { %v20863_v32 = vadd.f32 %v4657_v54, %v4448_v20  ;;  %v17842_v58 = vunpack.i.h.bf16 %v17840_v41  ;;  %v17841_v42 = vunpack.i.l.bf16 %v17840_v41  ;;  %16927 = vmatprep.mubr.bf16.mxu1 %v18459_v7  ;;  %v16613_v22 = vpop.f32.mrf.mxu0  ;;  %v18466_v7 = vld [vmem:[#allocation3 + $0x68] sm:$0xff]  }
 0x398   : > { %v16681_v24 = vpop.f32.mrf.mxu1  ;;  %v5510_v22 = vld [vmem:[#allocation2 + $0x1d0] sm:$0xff] }
 0x399   : > { %v6756_v18 = vsel %vm6701_vm2, %v6651_v53, %v17841_v42  ;;  %v6757_v11 = vsel %vm6701_vm2, %v6652_v8, %v17842_v58  ;;  %v4451_v15 = vpop.f32.mrf.mxu0  ;;  %v5511_v8 = vld [vmem:[#allocation2 + $0x1d8] sm:$0xff] }
 0x39a   : > { %v6861_v16 = vsel %vm6806_vm3, %v6756_v18, %v5506_v46  ;;  %v6862_v21 = vsel %vm6806_vm3, %v6757_v11, %v5507_v34  ;;  %v4660_v25 = vpop.f32.mrf.mxu1  ;;  %v17845_v36 = vpop.permute.xlu0 %17844  ;;  %v18475_v46 = vld [vmem:[#allocation3 + $0x80] sm:$0xff]  }
 0x39b   : > { %v14781_v48 = vpack.c.bf16 %v6862_v21, %v6861_v16  ;;  %v20871_v47 = vadd.f32 %v4660_v25, %v4451_v15  ;;  %v16614_v40 = vpop.f32.mrf.mxu0  ;;  %v17847_v61 = vunpack.i.h.bf16 %v17845_v36  ;;  %v17846_v39 = vunpack.i.l.bf16 %v17845_v36 }
 0x39c   : > { %v16682_v23 = vpop.f32.mrf.mxu1 }
 0x39d   : > { %15037 = vst [vmem:[#allocation3 + $0xd8] sm:$0xff] %v14781_v48   ;;  %v4456_v26 = vpop.f32.mrf.mxu0  ;;  %16880 = vmatmul.mubr.bf16.gmra.mxu0 %v18466_v7  ;;  %v6654_v5 = vsel %vm6596_vm1, %v5509_v4, %v17847_v61  ;;  %v6653_v62 = vsel %vm6596_vm1, %v5508_v27, %v17846_v39 }
 0x39e   : > { %v4665_v17 = vpop.f32.mrf.mxu1  ;;  %16928 = vmatmul.mubr.bf16.gmra.mxu1 %v18460_v51  ;;  %16883 = vmatprep.mubr.bf16.mxu0 %v18469_v0  ;;  %v17850_v12 = vpop.permute.xlu0 %17849 }
 0x39f   : > { %v20873_v50 = vadd.f32 %v4665_v17, %v4456_v26  ;;  %v17852_v52 = vunpack.i.h.bf16 %v17850_v12  ;;  %v17851_v19 = vunpack.i.l.bf16 %v17850_v12  ;;  %16931 = vmatprep.mubr.bf16.mxu1 %v18463_v31  ;;  %v16617_v55 = vpop.f32.mrf.mxu0  ;;  %v18472_v31 = vld [vmem:[#allocation3 + $0x78] sm:$0xff]   ;;  %v18478_v17 = vld [vmem:[#allocation3 + $0x88] sm:$0xff]  }
 0x3a0   : > { %v16685_v59 = vpop.f32.mrf.mxu1  ;;  %v20893_v55 = vld [vmem:[#allocation3 + $0x90] sm:$0xff]  }
 0x3a1   : > { %v6758_v29 = vsel %vm6701_vm2, %v6653_v62, %v17851_v19  ;;  %v6759_v6 = vsel %vm6701_vm2, %v6654_v5, %v17852_v52  ;;  %v4459_v28 = vpop.f32.mrf.mxu0  ;;  %v18481_v52 = vld [vmem:[#allocation3 + $0x20] sm:$0xff]   ;;  %v5512_v59 = vld [vmem:[#allocation2 + $0x1e0] sm:$0xff] }
 0x3a2   : > { %v6863_v37 = vsel %vm6806_vm3, %v6758_v29, %v5508_v27  ;;  %v6864_v33 = vsel %vm6806_vm3, %v6759_v6, %v5509_v4  ;;  %v4668_v45 = vpop.f32.mrf.mxu1  ;;  %v17855_v51 = vpop.permute.xlu1 %17854  ;;  %v5513_v29 = vld [vmem:[#allocation2 + $0x1e8] sm:$0xff] }
 0x3a3   : > { %v14786_v43 = vpack.c.bf16 %v6864_v33, %v6863_v37  ;;  %v20881_v2 = vadd.f32 %v4668_v45, %v4459_v28  ;;  %v16618_v60 = vpop.f32.mrf.mxu0  ;;  %v17857_v20 = vunpack.i.h.bf16 %v17855_v51  ;;  %v17856_v54 = vunpack.i.l.bf16 %v17855_v51 }
 0x3a4   : > { %v16686_v41 = vpop.f32.mrf.mxu1 }
 0x3a5   : > { %15038 = vst [vmem:[#allocation3 + $0xe0] sm:$0xff] %v14786_v43   ;;  %v4464_v34 = vpop.f32.mrf.mxu0  ;;  %16884 = vmatmul.mubr.bf16.gmra.mxu0 %v18472_v31  ;;  %v6656_v15 = vsel %vm6596_vm1, %v5511_v8, %v17857_v20  ;;  %v6655_v16 = vsel %vm6596_vm1, %v5510_v22, %v17856_v54 }
 0x3a6   : > { %v4673_v58 = vpop.f32.mrf.mxu1  ;;  %16932 = vmatmul.mubr.bf16.gmra.mxu1 %v18466_v7  ;;  %16887 = vmatprep.mubr.bf16.mxu0 %v18475_v46  ;;  %v17860_v42 = vpop.permute.xlu1 %17859 }
 0x3a7   : > { %v20883_v53 = vadd.f32 %v4673_v58, %v4464_v34  ;;  %v17862_v24 = vunpack.i.h.bf16 %v17860_v42  ;;  %v17861_v18 = vunpack.i.l.bf16 %v17860_v42  ;;  %16935 = vmatprep.mubr.bf16.mxu1 %v18469_v0  ;;  %v16621_v11 = vpop.f32.mrf.mxu0  ;;  %v18485_v58 = vld [vmem:[#allocation3 + $0x28] sm:$0xff]  }
 0x3a8   : > { %v16689_v21 = vpop.f32.mrf.mxu1  ;;  %v20908_v11 = vld [vmem:[#allocation3 + $0xa0] sm:$0xff]  }
 0x3a9   : > { %v6760_v25 = vsel %vm6701_vm2, %v6655_v16, %v17861_v18  ;;  %v6761_v36 = vsel %vm6701_vm2, %v6656_v15, %v17862_v24  ;;  %v4467_v48 = vpop.f32.mrf.mxu0  ;;  %v20906_v24 = vld [vmem:[#allocation3 + $0x98] sm:$0xff]   ;;  %v18487_v18 = vld [vmem:[#allocation3 + $0x30] sm:$0xff]  }
 0x3aa   : > { %v6865_v40 = vsel %vm6806_vm3, %v6760_v25, %v5510_v22  ;;  %v6866_v7 = vsel %vm6806_vm3, %v6761_v36, %v5511_v8  ;;  %v4676_v61 = vpop.f32.mrf.mxu1  ;;  %v17865_v39 = vpop.permute.xlu0 %17864  ;;  %v18507_v25 = vld [vmem:[%s22656_s3 + $0x30] sm:$0xff]  }
 0x3ab   : > { %v14791_v23 = vpack.c.bf16 %v6866_v7, %v6865_v40  ;;  %v20891_v26 = vadd.f32 %v4676_v61, %v4467_v48  ;;  %v16622_v0 = vpop.f32.mrf.mxu0  ;;  %v17867_v12 = vunpack.i.h.bf16 %v17865_v39  ;;  %v17866_v27 = vunpack.i.l.bf16 %v17865_v39  ;;  %v18508_v48 = vld [vmem:[%s22656_s3 + $0xb0] sm:$0xff]   ;;  %v5515_v39 = vld [vmem:[#allocation2 + $0x1f8] sm:$0xff] }
 0x3ac   : > { %v16690_v4 = vpop.f32.mrf.mxu1  ;;  %v5514_v61 = vld [vmem:[#allocation2 + $0x1f0] sm:$0xff] }
 0x3ad   : > { %15039 = vst [vmem:[#allocation3 + $0xe8] sm:$0xff] %v14791_v23   ;;  %v4472_v19 = vpop.f32.mrf.mxu0  ;;  %16888 = vmatmul.mubr.bf16.gmra.mxu0 %v18478_v17  ;;  %v6658_v45 = vsel %vm6596_vm1, %v5513_v29, %v17867_v12  ;;  %v6657_v51 = vsel %vm6596_vm1, %v5512_v59, %v17866_v27 }
 0x3ae   : > { %v4681_v5 = vpop.f32.mrf.mxu1  ;;  %16936 = vmatmul.mubr.bf16.gmra.mxu1 %v18472_v31  ;;  %16955 = vmatprep.mubr.bf16.mxu0 %v18481_v52  ;;  %v17870_v62 = vpop.permute.xlu0 %17869 }
 0x3af   : > { %v20895_v6 = vadd.f32 %v4681_v5, %v4472_v19  ;;  %v17872_v28 = vunpack.i.h.bf16 %v17870_v62  ;;  %v17871_v37 = vunpack.i.l.bf16 %v17870_v62  ;;  %17003 = vmatprep.mubr.bf16.mxu1 %v20893_v55  ;;  %v16625_v33 = vpop.f32.mrf.mxu0  ;;  %v18511_v19 = vld [vmem:[%s22656_s3 + $0x28] sm:$0xff]  }
 0x3b0   : > { %v16693_v43 = vpop.f32.mrf.mxu1  ;;  %v18489_v33 = vld [vmem:[#allocation3 + $0x38] sm:$0xff]  }
 0x3b1   : > { %v6762_v60 = vsel %vm6701_vm2, %v6657_v51, %v17871_v37  ;;  %v6763_v31 = vsel %vm6701_vm2, %v6658_v45, %v17872_v28  ;;  %v4475_v20 = vpop.f32.mrf.mxu0 }
 0x3b2   : > { %v6867_v54 = vsel %vm6806_vm3, %v6762_v60, %v5512_v59  ;;  %v6868_v41 = vsel %vm6806_vm3, %v6763_v31, %v5513_v29  ;;  %v4684_v46 = vpop.f32.mrf.mxu1  ;;  %v17875_v34 = vpop.permute.xlu1 %17874  ;;  %v20936_v60 = vld [vmem:[#allocation3 + $0xa8] sm:$0xff]   ;;  %v18491_v31 = vld [vmem:[#allocation3 + $0x40] sm:$0xff]  }
 0x3b3   : > { %v14796_v42 = vpack.c.bf16 %v6868_v41, %v6867_v54  ;;  %v20904_v22 = vadd.f32 %v4684_v46, %v4475_v20  ;;  %v16626_v8 = vpop.f32.mrf.mxu0  ;;  %v17877_v15 = vunpack.i.h.bf16 %v17875_v34  ;;  %v17876_v16 = vunpack.i.l.bf16 %v17875_v34  ;;  %v20938_v20 = vld [vmem:[#allocation3 + $0xb0] sm:$0xff]   ;;  %v18515_v34 = vld [vmem:[%s22656_s3 + $0x20] sm:$0xff]  }
 0x3b4   : > { %v16694_v21 = vpop.f32.mrf.mxu1 }
 0x3b5   : > { %15040 = vst [vmem:[#allocation3 + $0xf0] sm:$0xff] %v14796_v42   ;;  %v4480_v36 = vpop.f32.mrf.mxu0  ;;  %16956 = vmatmul.mubr.bf16.vlgmr.msra.gmra.mxu0 %v18485_v58  ;;  %v6660_v27 = vsel %vm6596_vm1, %v5515_v39, %v17877_v15  ;;  %v6659_v4 = vsel %vm6596_vm1, %v5514_v61, %v17876_v16  ;;  %v18516_v42 = vld [vmem:[%s22656_s3 + $0xa0] sm:$0xff]   ;;  %v5517_v16 = vld [vmem:[#allocation2 + $0x208] sm:$0xff] }
 0x3b6   : > { %v4689_v40 = vpop.f32.mrf.mxu1  ;;  %17004 = vmatmul.mubr.bf16.vlgmr.msra.gmra.mxu1 %v20906_v24  ;;  %16959 = vmatprep.mubr.bf16.mxu0 %v18487_v18  ;;  %v17880_v7 = vpop.permute.xlu1 %17879  ;;  %v5516_v15 = vld [vmem:[#allocation2 + $0x200] sm:$0xff] }
 0x3b7   : > { %v20917_v23 = vadd.f32 %v4689_v40, %v4480_v36  ;;  %v17882_v0 = vunpack.i.h.bf16 %v17880_v7  ;;  %v17881_v17 = vunpack.i.l.bf16 %v17880_v7  ;;  %17007 = vmatprep.mubr.bf16.mxu1 %v20908_v11  ;;  %v16629_v12 = vpop.f32.mrf.mxu0  ;;  %17036 = vmatpush3.bf16.msra.mxu0 %v20848_v10  ;;  %v18512_v10 = vld [vmem:[%s22656_s3 + $0xa8] sm:$0xff]  }
 0x3b8   : > { %v16697_v52 = vpop.f32.mrf.mxu1  ;;  %17084 = vmatpush3.bf16.msra.mxu1 %v20855_v35  ;;  %17037 = vmatprep.subr.bf16.mxu0 %v18507_v25 }
 0x3b9   : > { %v6764_v5 = vsel %vm6701_vm2, %v6659_v4, %v17881_v17  ;;  %v6765_v62 = vsel %vm6701_vm2, %v6660_v27, %v17882_v0  ;;  %v4483_v59 = vpop.f32.mrf.mxu0  ;;  %17085 = vmatprep.subr.bf16.mxu1 %v18508_v48  ;;  %v18520_v27 = vld [vmem:[%s22656_s3 + $0x98] sm:$0xff]  }
 0x3ba   : > { %v6869_v29 = vsel %vm6806_vm3, %v6764_v5, %v5514_v61  ;;  %v6870_v28 = vsel %vm6806_vm3, %v6765_v62, %v5515_v39  ;;  %v4692_v35 = vpop.f32.mrf.mxu1  ;;  %v17885_v37 = vpop.permute.xlu0 %17884  ;;  %v18519_v39 = vld [vmem:[%s22656_s3 + $0x18] sm:$0xff]   ;;  %v18493_v62 = vld [vmem:[#allocation3 + $0x48] sm:$0xff]  }
 0x3bb   : > { %v14801_v45 = vpack.c.bf16 %v6870_v28, %v6869_v29  ;;  %v20934_v51 = vadd.f32 %v4692_v35, %v4483_v59  ;;  %v16630_v43 = vpop.f32.mrf.mxu0  ;;  %17038 = vmatpush3.bf16.msra.mxu0 %v18507_v25  ;;  %v17887_v54 = vunpack.i.h.bf16 %v17885_v37  ;;  %v17886_v41 = vunpack.i.l.bf16 %v17885_v37  ;;  %v20964_v28 = vld [vmem:[#allocation3 + $0xb8] sm:$0xff]   ;;  %v18495_v35 = vld [vmem:[#allocation3 + $0x50] sm:$0xff]   ;;  %v20966_v37 = vld [vmem:[#allocation3 + $0xc0] sm:$0xff]  }
 0x3bc   : > { %v16698_v46 = vpop.f32.mrf.mxu1  ;;  %17086 = vmatpush3.bf16.msra.mxu1 %v18508_v48  ;;  %17039 = vmatprep.subr.bf16.mxu0 %v18511_v19 }
 0x3bd   : > { %15041 = vst [vmem:[#allocation3 + $0xf8] sm:$0xff] %v14801_v45   ;;  %v4488_v58 = vpop.f32.mrf.mxu0  ;;  %16960 = vmatmul.mubr.bf16.gmra.mxu0 %v18489_v33  ;;  %17087 = vmatprep.subr.bf16.mxu1 %v18512_v10  ;;  %v6662_v40 = vsel %vm6596_vm1, %v5517_v16, %v17887_v54  ;;  %v6661_v7 = vsel %vm6596_vm1, %v5516_v15, %v17886_v41  ;;  %v18524_v41 = vld [vmem:[%s22656_s3 + $0x90] sm:$0xff]  }
 0x3be   : > { %v4697_v8 = vpop.f32.mrf.mxu1  ;;  %17008 = vmatmul.mubr.bf16.gmra.mxu1 %v20936_v60  ;;  %16963 = vmatprep.mubr.bf16.mxu0 %v18491_v31  ;;  %v17890_v18 = vpop.permute.xlu0 %17889  ;;  %v18523_v31 = vld [vmem:[%s22656_s3 + $0x10] sm:$0xff]  }
 0x3bf   : > { %v20947_v21 = vadd.f32 %v4697_v8, %v4488_v58  ;;  %v17892_v25 = vunpack.i.h.bf16 %v17890_v18  ;;  %v17891_v36 = vunpack.i.l.bf16 %v17890_v18  ;;  %17011 = vmatprep.mubr.bf16.mxu1 %v20938_v20  ;;  %v16633_v48 = vpop.f32.mrf.mxu0  ;;  %17040 = vmatpush3.bf16.msra.mxu0 %v18511_v19  ;;  %v5518_v58 = vld [vmem:[#allocation2 + $0x210] sm:$0xff] }
 0x3c0   : > { %v16701_v61 = vpop.f32.mrf.mxu1  ;;  %17088 = vmatpush3.bf16.msra.mxu1 %v18512_v10  ;;  %17041 = vmatprep.subr.bf16.mxu0 %v18515_v34 }
 0x3c1   : > { %v6766_v0 = vsel %vm6701_vm2, %v6661_v7, %v17891_v36  ;;  %v6767_v17 = vsel %vm6701_vm2, %v6662_v40, %v17892_v25  ;;  %v4491_v12 = vpop.f32.mrf.mxu0  ;;  %17089 = vmatprep.subr.bf16.mxu1 %v18516_v42  ;;  %v18527_v40 = vld [vmem:[%s22656_s3 + $0x8] sm:$0xff]  }
 0x3c2   : > { %v6871_v4 = vsel %vm6806_vm3, %v6766_v0, %v5516_v15  ;;  %v6872_v52 = vsel %vm6806_vm3, %v6767_v17, %v5517_v16  ;;  %v4700_v19 = vpop.f32.mrf.mxu1  ;;  %v17895_v5 = vpop.permute.xlu1 %17894 }
 0x3c3   : > { %v14806_v59 = vpack.c.bf16 %v6872_v52, %v6871_v4  ;;  %v20962_v10 = vadd.f32 %v4700_v19, %v4491_v12  ;;  %v16634_v29 = vpop.f32.mrf.mxu0  ;;  %17042 = vmatpush3.bf16.msra.mxu0 %v18515_v34  ;;  %v17897_v33 = vunpack.i.h.bf16 %v17895_v5  ;;  %v17896_v45 = vunpack.i.l.bf16 %v17895_v5  ;;  %v18497_v52 = vld [vmem:[#allocation3 + $0x58] sm:$0xff]  }
 0x3c4   : > { %v16702_v43 = vpop.f32.mrf.mxu1  ;;  %17090 = vmatpush3.bf16.msra.mxu1 %v18516_v42  ;;  %17043 = vmatprep.subr.bf16.mxu0 %v18519_v39  ;;  %v5519_v42 = vld [vmem:[#allocation2 + $0x218] sm:$0xff]  ;;  %v18531_v29 = vld [vmem:[%s22656_s3] sm:$0xff]  }
 0x3c5   : > { %15042 = vst [vmem:[#allocation3 + $0x100] sm:$0xff] %v14806_v59   ;;  %v4496_v54 = vpop.f32.mrf.mxu0  ;;  %16964 = vmatmul.mubr.bf16.gmra.mxu0 %v18493_v62  ;;  %17091 = vmatprep.subr.bf16.mxu1 %v18520_v27  ;;  %v6664_v25 = vsel %vm6596_vm1, %v5519_v42, %v17897_v33  ;;  %v6663_v36 = vsel %vm6596_vm1, %v5518_v58, %v17896_v45  ;;  %v18499_v59 = vld [vmem:[#allocation3 + $0x60] sm:$0xff]  }
 0x3c6   : > { %v4705_v46 = vpop.f32.mrf.mxu1  ;;  %17012 = vmatmul.mubr.bf16.gmra.mxu1 %v20964_v28  ;;  %16967 = vmatprep.mubr.bf16.mxu0 %v18495_v35  ;;  %v17900_v34 = vpop.permute.xlu1 %17899  ;;  %v18532_v35 = vld [vmem:[%s22656_s3 + $0x80] sm:$0xff]  }
 0x3c7   : > { %v20975_v8 = vadd.f32 %v4705_v46, %v4496_v54  ;;  %v17902_v18 = vunpack.i.h.bf16 %v17900_v34  ;;  %v17901_v15 = vunpack.i.l.bf16 %v17900_v34  ;;  %17015 = vmatprep.mubr.bf16.mxu1 %v20966_v37  ;;  %v16637_v16 = vpop.f32.mrf.mxu0  ;;  %17044 = vmatpush3.bf16.msra.mxu0 %v18519_v39  ;;  %v18528_v39 = vld [vmem:[%s22656_s3 + $0x88] sm:$0xff]   ;;  %v20998_v54 = vld [vmem:[#allocation3 + $0xc8] sm:$0xff]   ;;  %v21000_v34 = vld [vmem:[#allocation3 + $0xd0] sm:$0xff]  }
 0x3c8   : > { %v16705_v48 = vpop.f32.mrf.mxu1  ;;  %17092 = vmatpush3.bf16.msra.mxu1 %v18520_v27  ;;  %17045 = vmatprep.subr.bf16.mxu0 %v18523_v31 }
 0x3c9   : > { %v6768_v7 = vsel %vm6701_vm2, %v6663_v36, %v17901_v15  ;;  %v6769_v61 = vsel %vm6701_vm2, %v6664_v25, %v17902_v18  ;;  %v4499_v0 = vpop.f32.mrf.mxu0  ;;  %17093 = vmatprep.subr.bf16.mxu1 %v18524_v41  ;;  %v5520_v18 = vld [vmem:[#allocation2 + $0x220] sm:$0xff]  ;;  %v5521_v15 = vld [vmem:[#allocation2 + $0x228] sm:$0xff] }
 0x3ca   : > { %v6873_v17 = vsel %vm6806_vm3, %v6768_v7, %v5518_v58  ;;  %v6874_v12 = vsel %vm6806_vm3, %v6769_v61, %v5519_v42  ;;  %v4708_v27 = vpop.f32.mrf.mxu1  ;;  %v17905_v4 = vpop.permute.xlu0 %17904 }
 0x3cb   : > { %v14811_v19 = vpack.c.bf16 %v6874_v12, %v6873_v17  ;;  %v20990_v5 = vadd.f32 %v4708_v27, %v4499_v0  ;;  %v16638_v62 = vpop.f32.mrf.mxu0  ;;  %17046 = vmatpush3.bf16.msra.mxu0 %v18523_v31  ;;  %v17907_v33 = vunpack.i.h.bf16 %v17905_v4  ;;  %v17906_v45 = vunpack.i.l.bf16 %v17905_v4 }
 0x3cc   : > { %v16706_v43 = vpop.f32.mrf.mxu1  ;;  %17094 = vmatpush3.bf16.msra.mxu1 %v18524_v41  ;;  %17047 = vmatprep.subr.bf16.mxu0 %v18527_v40 }
 0x3cd   : > { %15043 = vst [vmem:[#allocation3 + $0x108] sm:$0xff] %v14811_v19   ;;  %v4914_v46 = vpop.f32.mrf.mxu0  ;;  %16968 = vmatmul.mubr.bf16.gmra.mxu0 %v18497_v52  ;;  %17095 = vmatprep.subr.bf16.mxu1 %v18528_v39  ;;  %v6666_v36 = vsel %vm6596_vm1, %v5521_v15, %v17907_v33  ;;  %v6665_v48 = vsel %vm6596_vm1, %v5520_v18, %v17906_v45  ;;  %v18501_v43 = vld [vmem:[#allocation3 + $0x68] sm:$0xff]  }
 0x3ce   : > { %v5017_v31 = vadd.f32 %v4914_v46, %v20763_v1  ;;  %v5245_v58 = vpop.f32.mrf.mxu1  ;;  %17016 = vmatmul.mubr.bf16.gmra.mxu1 %v20998_v54  ;;  %16971 = vmatprep.mubr.bf16.mxu0 %v18499_v59  ;;  %v17910_v42 = vpop.permute.xlu0 %17909  ;;  %v21010_v1 = vld [vmem:[%s22656_s3 + $0x78] sm:$0xff]  }
 0x3cf   : > { %v17912_v16 = vunpack.i.h.bf16 %v17910_v42  ;;  %v17911_v25 = vunpack.i.l.bf16 %v17910_v42  ;;  %17019 = vmatprep.mubr.bf16.mxu1 %v21000_v34  ;;  %v16725_v41 = vpop.f32.mrf.mxu0  ;;  %17048 = vmatpush3.bf16.msra.mxu0 %v18527_v40  ;;  %v21017_v40 = vld [vmem:[%s22656_s3 + $0x38] sm:$0xff]  }
 0x3d0   : > { %v5348_v7 = vadd.f32 %v5245_v58, %v5017_v31  ;;  %v16793_v61 = vpop.f32.mrf.mxu1  ;;  %17096 = vmatpush3.bf16.msra.mxu1 %v18528_v39  ;;  %17049 = vmatprep.subr.bf16.mxu0 %v18531_v29  ;;  %v21022_v39 = vld [vmem:[%s22655_s2] ss:$0 sm:$0xff]  ;;  %v18505_v46 = vld [vmem:[#allocation3 + $0x70] sm:$0xff]  }
 0x3d1   : > { %v6770_v0 = vsel %vm6701_vm2, %v6665_v48, %v17911_v25  ;;  %v6771_v17 = vsel %vm6701_vm2, %v6666_v36, %v17912_v16  ;;  %v4917_v12 = vpop.f32.mrf.mxu0  ;;  %17097 = vmatprep.subr.bf16.mxu1 %v18532_v35  ;;  %v21028_v41 = vld [vmem:[#allocation3 + $0xd8] sm:$0xff]  }
 0x3d2   : > { %v5374_v27 = vadd.f32 %v21022_v39, %v5348_v7  ;;  %v6875_v4 = vsel %vm6806_vm3, %v6770_v0, %v5520_v18  ;;  %v6876_v52 = vsel %vm6806_vm3, %v6771_v17, %v5521_v15  ;;  %v5018_v19 = vadd.f32 %v4917_v12, %v20770_v14  ;;  %v5248_v62 = vpop.f32.mrf.mxu1  ;;  %v17915_v59 = vpop.permute.xlu1 %17914  ;;  %v21031_v14 = vld [vmem:[#allocation3 + $0xe0] sm:$0xff]   ;;  %v5523_v7 = vld [vmem:[#allocation2 + $0x238] sm:$0xff] }
 0x3d3   : > { %v14816_v33 = vpack.c.bf16 %v6876_v52, %v6875_v4  ;;  %v16726_v45 = vpop.f32.mrf.mxu0  ;;  %17050 = vmatpush3.bf16.msra.mxu0 %v18531_v29  ;;  %v17917_v42 = vunpack.i.h.bf16 %v17915_v59  ;;  %v17916_v16 = vunpack.i.l.bf16 %v17915_v59 }
 0x3d4   : > { %v5400_v31 = vmax.f32 %v5374_v27, 0.0  ;;  %v5349_v58 = vadd.f32 %v5248_v62, %v5018_v19  ;;  %v16794_v25 = vpop.f32.mrf.mxu1  ;;  %17098 = vmatpush3.bf16.msra.mxu1 %v18532_v35  ;;  %17131 = vmatprep.subr.bf16.mxu0 %v21010_v1  ;;  %v5522_v35 = vld [vmem:[#allocation2 + $0x230] sm:$0xff] }
 0x3d5   : > { %15044 = vst [vmem:[#allocation3 + $0x110] sm:$0xff] %v14816_v33   ;;  %v4922_v18 = vpop.f32.mrf.mxu0  ;;  %16972 = vmatmul.mubr.bf16.gmra.mxu0 %v18501_v43  ;;  %17179 = vmatprep.subr.bf16.mxu1 %v21017_v40  ;;  %v6668_v27 = vsel %vm6596_vm1, %v5523_v7, %v17917_v42  ;;  %v6667_v4 = vsel %vm6596_vm1, %v5522_v35, %v17916_v16  ;;  %v18509_v25 = vld [vmem:[#allocation3 + $0x78] sm:$0xff]  }
 0x3d6   : > { %5426 = vst [vmem:[#allocation2 + $0x270] sm:$0xff] %v5400_v31  ;;  %v5375_v29 = vadd.f32 %v21022_v39, %v5349_v58  ;;  %v5019_v15 = vadd.f32 %v4922_v18, %v20773_v9  ;;  %v5253_v36 = vpop.f32.mrf.mxu1  ;;  %17020 = vmatmul.mubr.bf16.gmra.mxu1 %v21028_v41  ;;  %16975 = vmatprep.mubr.bf16.mxu0 %v18505_v46  ;;  %v17920_v48 = vpop.permute.xlu1 %17919  ;;  %v18513_v18 = vld [vmem:[#allocation3 + $0x80] sm:$0xff]  }
 0x3d7   : > { %v17922_v61 = vunpack.i.h.bf16 %v17920_v48  ;;  %v17921_v0 = vunpack.i.l.bf16 %v17920_v48  ;;  %17023 = vmatprep.mubr.bf16.mxu1 %v21031_v14  ;;  %v16729_v17 = vpop.f32.mrf.mxu0 }
 0x3d8   : > { %v5401_v12 = vmax.f32 %v5375_v29, 0.0  ;;  %v5350_v52 = vadd.f32 %v5253_v36, %v5019_v15  ;;  %v16797_v19 = vpop.f32.mrf.mxu1  ;;  %v5632_v29 = vld [vmem:[#allocation2 + $0x261] sm:$0xff]  ;;  %v21046_v17 = vld [vmem:[#allocation3 + $0xe8] sm:$0xff]  }
 0x3d9   : > { %v6772_v9 = vsel %vm6701_vm2, %v6667_v4, %v17921_v0  ;;  %v6773_v62 = vsel %vm6701_vm2, %v6668_v27, %v17922_v61  ;;  %v4925_v59 = vpop.f32.mrf.mxu0 }
 0x3da   : > { %5427 = vst [vmem:[#allocation2 + $0x278] sm:$0xff] %v5401_v12  ;;  %v5376_v33 = vadd.f32 %v21022_v39, %v5350_v52  ;;  %v6877_v45 = vsel %vm6806_vm3, %v6772_v9, %v5522_v35  ;;  %v6878_v43 = vsel %vm6806_vm3, %v6773_v62, %v5523_v7  ;;  %v5020_v46 = vadd.f32 %v4925_v59, %v20776_v30  ;;  %v5256_v31 = vpop.f32.mrf.mxu1  ;;  %v17925_v58 = vpop.permute.xlu0 %17924  ;;  %v21048_v7 = vld [vmem:[#allocation3 + $0xf0] sm:$0xff]   ;;  %v5524_v62 = vld [vmem:[#allocation2 + $0x240] sm:$0xff]  ;;  %v5525_v59 = vld [vmem:[#allocation2 + $0x248] sm:$0xff] }
 0x3db   : > { %v14821_v42 = vpack.c.bf16 %v6878_v43, %v6877_v45  ;;  %v16730_v16 = vpop.f32.mrf.mxu0  ;;  %v17927_v48 = vunpack.i.h.bf16 %v17925_v58  ;;  %v17926_v61 = vunpack.i.l.bf16 %v17925_v58 }
 0x3dc   : > { %v5402_v15 = vmax.f32 %v5376_v33, 0.0  ;;  %v5351_v36 = vadd.f32 %v5256_v31, %v5020_v46  ;;  %v16798_v0 = vpop.f32.mrf.mxu1  ;;  %v5736_v16 = vld [vmem:[#allocation2 + $0x262] sm:$0xff] }
 0x3dd   : > { %15045 = vst [vmem:[#allocation3 + $0x118] sm:$0xff] %v14821_v42   ;;  %v4930_v35 = vpop.f32.mrf.mxu0  ;;  %16976 = vmatmul.mubr.bf16.gmra.mxu0 %v18509_v25  ;;  %v5633_v30 = vld [vmem:[#allocation2 + $0x269] sm:$0xff]  ;;  %v6670_v31 = vsel %vm6596_vm1, %v5525_v59, %v17927_v48  ;;  %v6669_v58 = vsel %vm6596_vm1, %v5524_v62, %v17926_v61 }
 0x3de   : > { %5428 = vst [vmem:[#allocation2 + $0x280] sm:$0xff] %v5402_v15  ;;  %v5377_v12 = vadd.f32 %v21022_v39, %v5351_v36  ;;  %v5021_v27 = vadd.f32 %v4930_v35, %v20785_v57  ;;  %v5261_v4 = vpop.f32.mrf.mxu1  ;;  %17024 = vmatmul.mubr.bf16.gmra.mxu1 %v21046_v17  ;;  %16979 = vmatprep.mubr.bf16.mxu0 %v18513_v18  ;;  %v17930_v52 = vpop.permute.xlu0 %17929  ;;  %v5737_v9 = vld [vmem:[#allocation2 + $0x26a] sm:$0xff] }
 0x3df   : > { %v17943_v19 = vpack.i.bf16 %v5633_v30, %v5632_v29  ;;  %v17932_v33 = vunpack.i.h.bf16 %v17930_v52  ;;  %v17931_v45 = vunpack.i.l.bf16 %v17930_v52  ;;  %17027 = vmatprep.mubr.bf16.mxu1 %v21048_v7  ;;  %v16733_v43 = vpop.f32.mrf.mxu0  ;;  %v17948_v15 = vpack.i.bf16 %v5737_v9, %v5736_v16  ;;  %v21063_v52 = vld [vmem:[#allocation3 + $0xf8] sm:$0xff]  }
 0x3e0   : > { %v5403_v46 = vmax.f32 %v5377_v12, 0.0  ;;  %v5352_v57 = vadd.f32 %v5261_v4, %v5021_v27  ;;  %v16801_v42 = vpop.f32.mrf.mxu1  ;;  %v18517_v4 = vld [vmem:[#allocation3 + $0x88] sm:$0xff]  }
 0x3e1   : > { %17944 = vrot.lane.b32.xlu0 %v17943_v19, %s18806_s29  ;;  %v6774_v25 = vsel %vm6701_vm2, %v6669_v58, %v17931_v45  ;;  %v6775_v18 = vsel %vm6701_vm2, %v6670_v31, %v17932_v33  ;;  %v4933_v29 = vpop.f32.mrf.mxu0  ;;  %v18521_v19 = vld [vmem:[#allocation3 + $0x90] sm:$0xff]  }
 0x3e2   : > { %5429 = vst [vmem:[#allocation2 + $0x288] sm:$0xff] %v5403_v46  ;;  %v5378_v36 = vadd.f32 %v21022_v39, %v5352_v57  ;;  %v6879_v0 = vsel %vm6806_vm3, %v6774_v25, %v5524_v62  ;;  %v6880_v48 = vsel %vm6806_vm3, %v6775_v18, %v5525_v59  ;;  %v5022_v61 = vadd.f32 %v4933_v29, %v20795_v44  ;;  %v5264_v35 = vpop.f32.mrf.mxu1  ;;  %v17935_v30 = vpop.permute.xlu1 %17934  ;;  %v18522_v62 = vld [vmem:[#allocation3 + $0x100] sm:$0xff]   ;;  %v5634_v44 = vld [vmem:[#allocation2 + $0x271] sm:$0xff] }
 0x3e3   : > { %v14826_v12 = vpack.c.bf16 %v6880_v48, %v6879_v0  ;;  %v16734_v27 = vpop.f32.mrf.mxu0  ;;  %v17937_v9 = vunpack.i.h.bf16 %v17935_v30  ;;  %v17936_v43 = vunpack.i.l.bf16 %v17935_v30  ;;  %v5526_v29 = vld [vmem:[#allocation2 + $0x250] sm:$0xff] }
 0x3e4   : > { %v5404_v33 = vmax.f32 %v5378_v36, 0.0  ;;  %v5353_v45 = vadd.f32 %v5264_v35, %v5022_v61  ;;  %v16802_v46 = vpop.f32.mrf.mxu1  ;;  %v5738_v27 = vld [vmem:[#allocation2 + $0x272] sm:$0xff] }
 0x3e5   : > { %17949 = vrot.lane.b32.xlu0 %v17948_v15, %s18805_s28  ;;  %15046 = vst [vmem:[#allocation3 + $0x120] sm:$0xff] %v14826_v12   ;;  %v4938_v59 = vpop.f32.mrf.mxu0  ;;  %16980 = vmatmul.mubr.bf16.gmra.mxu0 %v18517_v4  ;;  %v5635_v31 = vld [vmem:[#allocation2 + $0x279] sm:$0xff]  ;;  %v6671_v30 = vsel %vm6596_vm1, %v5526_v29, %v17936_v43 }
 0x3e6   : > { %5430 = vst [vmem:[#allocation2 + $0x290] sm:$0xff] %v5404_v33  ;;  %v5379_v58 = vadd.f32 %v21022_v39, %v5353_v45  ;;  %v5023_v57 = vadd.f32 %v4938_v59, %v20803_v13  ;;  %v5269_v42 = vpop.f32.mrf.mxu1  ;;  %17028 = vmatmul.mubr.bf16.gmra.mxu1 %v21063_v52  ;;  %16983 = vmatprep.mubr.bf16.mxu0 %v18521_v19  ;;  %v17940_v16 = vpop.permute.xlu1 %17939  ;;  %v5739_v18 = vld [vmem:[#allocation2 + $0x27a] sm:$0xff] }
 0x3e7   : > { %v17953_v25 = vpack.i.bf16 %v5635_v31, %v5634_v44  ;;  %v5527_v15 = vld [vmem:[#allocation2 + $0x258] sm:$0xff]  ;;  %v17942_v36 = vunpack.i.h.bf16 %v17940_v16  ;;  %v17941_v0 = vunpack.i.l.bf16 %v17940_v16  ;;  %17031 = vmatprep.mubr.bf16.mxu1 %v18522_v62  ;;  %v16737_v48 = vpop.f32.mrf.mxu0  ;;  %v17958_v45 = vpack.i.bf16 %v5739_v18, %v5738_v27  ;;  %v18526_v18 = vld [vmem:[#allocation3 + $0x108] sm:$0xff]  }
 0x3e8   : > { %v5405_v61 = vmax.f32 %v5379_v58, 0.0  ;;  %v6672_v35 = vsel %vm6596_vm1, %v5527_v15, %v17937_v9  ;;  %v5354_v12 = vadd.f32 %v5269_v42, %v5023_v57  ;;  %v16805_v13 = vpop.f32.mrf.mxu1  ;;  %v18525_v58 = vld [vmem:[#allocation3 + $0x98] sm:$0xff]   ;;  %v18529_v57 = vld [vmem:[#allocation3 + $0x80] sm:$0xff]  }
 0x3e9   : > { %17954 = vrot.lane.b32.xlu1 %v17953_v25, %s18806_s29  ;;  %v6776_v4 = vsel %vm6701_vm2, %v6671_v30, %v17941_v0  ;;  %v6777_v19 = vsel %vm6701_vm2, %v6672_v35, %v17942_v36  ;;  %v4941_v33 = vpop.f32.mrf.mxu0  ;;  %v18530_v0 = vld [vmem:[#allocation3 + $0xa0] sm:$0xff]  }
 0x3ea   : > { %5431 = vst [vmem:[#allocation2 + $0x298] sm:$0xff] %v5405_v61  ;;  %v5380_v46 = vadd.f32 %v21022_v39, %v5354_v12  ;;  %v6881_v62 = vsel %vm6806_vm3, %v6776_v4, %v5526_v29  ;;  %v6882_v9 = vsel %vm6806_vm3, %v6777_v19, %v5527_v15  ;;  %v5024_v43 = vadd.f32 %v4941_v33, %v20811_v3  ;;  %v5272_v59 = vpop.f32.mrf.mxu1  ;;  %v5636_v29 = vld [vmem:[#allocation2 + $0x281] sm:$0xff] }
 0x3eb   : > { %v14831_v44 = vpack.c.bf16 %v6882_v9, %v6881_v62  ;;  %v16738_v31 = vpop.f32.mrf.mxu0  ;;  %v5740_v33 = vld [vmem:[#allocation2 + $0x282] sm:$0xff] }
 0x3ec   : > { %v5406_v42 = vmax.f32 %v5380_v46, 0.0  ;;  %v5355_v16 = vadd.f32 %v5272_v59, %v5024_v43  ;;  %v16806_v25 = vpop.f32.mrf.mxu1  ;;  %v18533_v43 = vld [vmem:[#allocation3 + $0x88] sm:$0xff]  }
 0x3ed   : > { %17959 = vrot.lane.b32.xlu1 %v17958_v45, %s18805_s28  ;;  %15047 = vst [vmem:[#allocation3 + $0x128] sm:$0xff] %v14831_v44   ;;  %v4946_v36 = vpop.f32.mrf.mxu0  ;;  %16984 = vmatmul.mubr.bf16.gmra.mxu0 %v18525_v58  ;;  %v5637_v48 = vld [vmem:[#allocation2 + $0x289] sm:$0xff]  ;;  %v18535_v44 = vld [vmem:[#allocation3 + $0xb0] sm:$0xff]  }
 0x3ee   : > { %5432 = vst [vmem:[#allocation2 + $0x2a0] sm:$0xff] %v5406_v42  ;;  %v5381_v3 = vadd.f32 %v21022_v39, %v5355_v16  ;;  %v5025_v15 = vadd.f32 %v4946_v36, %v20819_v63  ;;  %v5277_v61 = vpop.f32.mrf.mxu1  ;;  %17032 = vmatmul.mubr.bf16.gmra.mxu1 %v18526_v18  ;;  %17051 = vmatprep.mubr.bf16.mxu0 %v18529_v57  ;;  %v5741_v12 = vld [vmem:[#allocation2 + $0x28a] sm:$0xff] }
 0x3ef   : > { %v17963_v35 = vpack.i.bf16 %v5637_v48, %v5636_v29  ;;  %17099 = vmatprep.mubr.bf16.mxu1 %v18530_v0  ;;  %v16741_v30 = vpop.f32.mrf.mxu0  ;;  %v17968_v62 = vpack.i.bf16 %v5741_v12, %v5740_v33  ;;  %v18534_v59 = vld [vmem:[#allocation3 + $0xa8] sm:$0xff]  }
 0x3f0   : > { %v5407_v13 = vmax.f32 %v5381_v3, 0.0  ;;  %v5356_v27 = vadd.f32 %v5277_v61, %v5025_v15  ;;  %v16809_v4 = vpop.f32.mrf.mxu1  ;;  %v18546_v42 = vld [vmem:[%s22656_s3 + $0x70] sm:$0xff]  }
 0x3f1   : > { %17964 = vrot.lane.b32.xlu0 %v17963_v35, %s18806_s29  ;;  %v4949_v19 = vpop.f32.mrf.mxu0  ;;  %v5638_v25 = vld [vmem:[#allocation2 + $0x291] sm:$0xff] }
 0x3f2   : > { %5433 = vst [vmem:[#allocation2 + $0x2a8] sm:$0xff] %v5407_v13  ;;  %v5382_v45 = vadd.f32 %v21022_v39, %v5356_v27  ;;  %v5026_v46 = vadd.f32 %v4949_v19, %v20833_v49  ;;  %v5280_v63 = vpop.f32.mrf.mxu1  ;;  %v18547_v49 = vld [vmem:[%s22656_s3 + $0x30] sm:$0xff]  }
 0x3f3   : > { %v16742_v9 = vpop.f32.mrf.mxu0  ;;  %v5742_v13 = vld [vmem:[#allocation2 + $0x292] sm:$0xff] }
 0x3f4   : > { %v5408_v31 = vmax.f32 %v5382_v45, 0.0  ;;  %v5357_v58 = vadd.f32 %v5280_v63, %v5026_v46  ;;  %v16810_v57 = vpop.f32.mrf.mxu1  ;;  %v18536_v63 = vld [vmem:[#allocation3 + $0xb8] sm:$0xff]  }
 0x3f5   : > { %17969 = vrot.lane.b32.xlu0 %v17968_v62, %s18805_s28  ;;  %v4954_v16 = vpop.f32.mrf.mxu0  ;;  %17052 = vmatmul.mubr.bf16.vlgmr.msra.gmra.mxu0 %v18533_v43  ;;  %v5639_v18 = vld [vmem:[#allocation2 + $0x299] sm:$0xff]  ;;  %v18537_v62 = vld [vmem:[#allocation3 + $0xc0] sm:$0xff]  }
 0x3f6   : > { %5434 = vst [vmem:[#allocation2 + $0x2b0] sm:$0xff] %v5408_v31  ;;  %v5383_v36 = vadd.f32 %v21022_v39, %v5357_v58  ;;  %v5027_v0 = vadd.f32 %v4954_v16, %v20841_v38  ;;  %v5285_v29 = vpop.f32.mrf.mxu1  ;;  %17100 = vmatmul.mubr.bf16.vlgmr.msra.gmra.mxu1 %v18534_v59  ;;  %17055 = vmatprep.mubr.bf16.mxu0 %v20893_v55  ;;  %v5743_v15 = vld [vmem:[#allocation2 + $0x29a] sm:$0xff]  ;;  %v18549_v38 = vld [vmem:[%s22656_s3 + $0x68] sm:$0xff]  }
 0x3f7   : > { %v17973_v48 = vpack.i.bf16 %v5639_v18, %v5638_v25  ;;  %17103 = vmatprep.mubr.bf16.mxu1 %v18535_v44  ;;  %v16745_v3 = vpop.f32.mrf.mxu0  ;;  %17132 = vmatpush3.bf16.msra.mxu0 %v21010_v1  ;;  %v17978_v4 = vpack.i.bf16 %v5743_v15, %v5742_v13  ;;  %v18552_v59 = vld [vmem:[%s22656_s3 + $0x60] sm:$0xff]   ;;  %v18555_v15 = vld [vmem:[%s22656_s3 + $0x58] sm:$0xff]  }
 0x3f8   : > { %v5409_v61 = vmax.f32 %v5383_v36, 0.0  ;;  %v5358_v35 = vadd.f32 %v5285_v29, %v5027_v0  ;;  %v16813_v30 = vpop.f32.mrf.mxu1  ;;  %17180 = vmatpush3.bf16.msra.mxu1 %v21017_v40  ;;  %17133 = vmatprep.subr.bf16.mxu0 %v18546_v42  ;;  %v18550_v40 = vld [vmem:[%s22656_s3 + $0x28] sm:$0xff]   ;;  %v18556_v13 = vld [vmem:[%s22656_s3 + $0x18] sm:$0xff]  }
 0x3f9   : > { %17974 = vrot.lane.b32.xlu1 %v17973_v48, %s18806_s29  ;;  %v4957_v12 = vpop.f32.mrf.mxu0  ;;  %17181 = vmatprep.subr.bf16.mxu1 %v18547_v49  ;;  %v5744_v36 = vld [vmem:[#allocation2 + $0x2a2] sm:$0xff] }
 0x3fa   : > { %5435 = vst [vmem:[#allocation2 + $0x2b8] sm:$0xff] %v5409_v61  ;;  %v5384_v55 = vadd.f32 %v21022_v39, %v5358_v35  ;;  %v5028_v1 = vadd.f32 %v4957_v12, %v20859_v56  ;;  %v5288_v27 = vpop.f32.mrf.mxu1  ;;  %v5640_v56 = vld [vmem:[#allocation2 + $0x2a1] sm:$0xff]  ;;  %v18538_v12 = vld [vmem:[#allocation3 + $0xc8] sm:$0xff]  }
 0x3fb   : > { %v16746_v19 = vpop.f32.mrf.mxu0  ;;  %17134 = vmatpush3.bf16.msra.mxu0 %v18546_v42 }
 0x3fc   : > { %v5410_v33 = vmax.f32 %v5384_v55, 0.0  ;;  %v5359_v45 = vadd.f32 %v5288_v27, %v5028_v1  ;;  %v16814_v46 = vpop.f32.mrf.mxu1  ;;  %17182 = vmatpush3.bf16.msra.mxu1 %v18547_v49  ;;  %17135 = vmatprep.subr.bf16.mxu0 %v18549_v38 }
 0x3fd   : > { %17979 = vrot.lane.b32.xlu1 %v17978_v4, %s18805_s28  ;;  %v4962_v9 = vpop.f32.mrf.mxu0  ;;  %17056 = vmatmul.mubr.bf16.gmra.mxu0 %v20906_v24  ;;  %v5641_v43 = vld [vmem:[#allocation2 + $0x2a9] sm:$0xff]  ;;  %v18553_v24 = vld [vmem:[%s22656_s3 + $0x20] sm:$0xff]  }
 0x3fe   : > { %5436 = vst [vmem:[#allocation2 + $0x2c0] sm:$0xff] %v5410_v33  ;;  %v5385_v44 = vadd.f32 %v21022_v39, %v5359_v45  ;;  %v5029_v31 = vadd.f32 %v4962_v9, %v20863_v32  ;;  %v5293_v58 = vpop.f32.mrf.mxu1  ;;  %17104 = vmatmul.mubr.bf16.gmra.mxu1 %v18536_v63  ;;  %17059 = vmatprep.mubr.bf16.mxu0 %v20908_v11  ;;  %v5745_v16 = vld [vmem:[#allocation2 + $0x2aa] sm:$0xff] }
 0x3ff   : > { %v17983_v57 = vpack.i.bf16 %v5641_v43, %v5640_v56  ;;  %17107 = vmatprep.mubr.bf16.mxu1 %v18537_v62  ;;  %v16749_v42 = vpop.f32.mrf.mxu0  ;;  %17183 = vmatprep.subr.bf16.mxu1 %v18550_v40  ;;  %v17988_v48 = vpack.i.bf16 %v5745_v16, %v5744_v36  ;;  %v18558_v33 = vld [vmem:[%s22656_s3 + $0x50] sm:$0xff]   ;;  %v18541_v16 = vld [vmem:[#allocation3 + $0xe0] sm:$0xff]  }
 0x400   : > { %v5411_v25 = vmax.f32 %v5385_v44, 0.0  ;;  %v5360_v18 = vadd.f32 %v5293_v58, %v5029_v31  ;;  %v16817_v49 = vpop.f32.mrf.mxu1  ;;  %17136 = vmatpush3.bf16.msra.mxu0 %v18549_v38  ;;  %17184 = vmatpush3.bf16.msra.mxu1 %v18550_v40  ;;  %v18539_v38 = vld [vmem:[#allocation3 + $0xd0] sm:$0xff]   ;;  %v18540_v42 = vld [vmem:[#allocation3 + $0xd8] sm:$0xff]  }
 0x401   : > { %17984 = vrot.lane.b32.xlu0 %v17983_v57, %s18806_s29  ;;  %v4965_v32 = vpop.f32.mrf.mxu0  ;;  %17137 = vmatprep.subr.bf16.mxu0 %v18552_v59  ;;  %v5642_v55 = vld [vmem:[#allocation2 + $0x2b1] sm:$0xff] }
 0x402   : > { %5437 = vst [vmem:[#allocation2 + $0x2c8] sm:$0xff] %v5411_v25  ;;  %v5386_v11 = vadd.f32 %v21022_v39, %v5360_v18  ;;  %v5030_v0 = vadd.f32 %v4965_v32, %v20871_v47  ;;  %v5296_v29 = vpop.f32.mrf.mxu1  ;;  %17185 = vmatprep.subr.bf16.mxu1 %v18553_v24  ;;  %v5746_v9 = vld [vmem:[#allocation2 + $0x2b2] sm:$0xff]  ;;  %v18561_v25 = vld [vmem:[%s22656_s3 + $0x48] sm:$0xff]  }
 0x403   : > { %v16750_v3 = vpop.f32.mrf.mxu0  ;;  %v18562_v32 = vld [vmem:[%s22656_s3 + $0x8] sm:$0xff]  }
 0x404   : > { %v5412_v61 = vmax.f32 %v5386_v11, 0.0  ;;  %v5361_v35 = vadd.f32 %v5296_v29, %v5030_v0  ;;  %v16818_v30 = vpop.f32.mrf.mxu1  ;;  %17138 = vmatpush3.bf16.msra.mxu0 %v18552_v59  ;;  %17186 = vmatpush3.bf16.msra.mxu1 %v18553_v24  ;;  %v18566_v3 = vld [vmem:[%s22656_s3] sm:$0xff]  }
 0x405   : > { %17989 = vrot.lane.b32.xlu0 %v17988_v48, %s18805_s28  ;;  %v4970_v47 = vpop.f32.mrf.mxu0  ;;  %17060 = vmatmul.mubr.bf16.gmra.mxu0 %v20936_v60  ;;  %v5643_v1 = vld [vmem:[#allocation2 + $0x2b9] sm:$0xff]  ;;  %v18559_v60 = vld [vmem:[%s22656_s3 + $0x10] sm:$0xff]  }
 0x406   : > { %5438 = vst [vmem:[#allocation2 + $0x2d0] sm:$0xff] %v5412_v61  ;;  %v5387_v27 = vadd.f32 %v21022_v39, %v5361_v35  ;;  %v5031_v4 = vadd.f32 %v4970_v47, %v20873_v50  ;;  %v5301_v19 = vpop.f32.mrf.mxu1  ;;  %17108 = vmatmul.mubr.bf16.gmra.mxu1 %v18538_v12  ;;  %17063 = vmatprep.mubr.bf16.mxu0 %v20938_v20  ;;  %v5747_v46 = vld [vmem:[#allocation2 + $0x2ba] sm:$0xff] }
 0x407   : > { %v17993_v40 = vpack.i.bf16 %v5643_v1, %v5642_v55  ;;  %17111 = vmatprep.mubr.bf16.mxu1 %v18539_v38  ;;  %v16753_v45 = vpop.f32.mrf.mxu0  ;;  %17139 = vmatprep.subr.bf16.mxu0 %v18555_v15  ;;  %v17998_v44 = vpack.i.bf16 %v5747_v46, %v5746_v9 }
 0x408   : > { %v5413_v63 = vmax.f32 %v5387_v27, 0.0  ;;  %v5362_v62 = vadd.f32 %v5301_v19, %v5031_v4  ;;  %v16821_v50 = vpop.f32.mrf.mxu1  ;;  %17187 = vmatprep.subr.bf16.mxu1 %v18556_v13  ;;  %17140 = vmatpush3.bf16.msra.mxu0 %v18555_v15  ;;  %v18542_v19 = vld [vmem:[#allocation3 + $0xe8] sm:$0xff]  }
 0x409   : > { %17994 = vrot.lane.b32.xlu1 %v17993_v40, %s18806_s29  ;;  %v4973_v20 = vpop.f32.mrf.mxu0  ;;  %17188 = vmatpush3.bf16.msra.mxu1 %v18556_v13  ;;  %v5748_v30 = vld [vmem:[#allocation2 + $0x2c2] sm:$0xff] }
 0x40a   : > { %5439 = vst [vmem:[#allocation2 + $0x2d8] sm:$0xff] %v5413_v63  ;;  %v5388_v56 = vadd.f32 %v21022_v39, %v5362_v62  ;;  %v5032_v43 = vadd.f32 %v4973_v20, %v20881_v2  ;;  %v5304_v59 = vpop.f32.mrf.mxu1  ;;  %17141 = vmatprep.subr.bf16.mxu0 %v18558_v33  ;;  %17189 = vmatprep.subr.bf16.mxu1 %v18559_v60  ;;  %v5644_v2 = vld [vmem:[#allocation2 + $0x2c1] sm:$0xff] }
 0x40b   : > { %v16754_v31 = vpop.f32.mrf.mxu0 }
 0x40c   : > { %v5414_v58 = vmax.f32 %v5388_v56, 0.0  ;;  %v5363_v57 = vadd.f32 %v5304_v59, %v5032_v43  ;;  %v16822_v24 = vpop.f32.mrf.mxu1  ;;  %17142 = vmatpush3.bf16.msra.mxu0 %v18558_v33  ;;  %v18545_v33 = vld [vmem:[#allocation3 + $0xf0] sm:$0xff]  }
 0x40d   : > { %17999 = vrot.lane.b32.xlu1 %v17998_v44, %s18805_s28  ;;  %v4978_v18 = vpop.f32.mrf.mxu0  ;;  %17064 = vmatmul.mubr.bf16.gmra.mxu0 %v20964_v28  ;;  %v5645_v49 = vld [vmem:[#allocation2 + $0x2c9] sm:$0xff]  ;;  %v21168_v43 = vld [vmem:[%s22656_s3 + $0xb8] sm:$0xff]  }
 0x40e   : > { %17190 = vmatpush3.bf16.msra.mxu1 %v18559_v60  ;;  %5440 = vst [vmem:[#allocation2 + $0x2e0] sm:$0xff] %v5414_v58  ;;  %v5389_v36 = vadd.f32 %v21022_v39, %v5363_v57  ;;  %v5033_v11 = vadd.f32 %v4978_v18, %v20883_v53  ;;  %v5309_v0 = vpop.f32.mrf.mxu1  ;;  %17067 = vmatprep.mubr.bf16.mxu0 %v20966_v37  ;;  %v5749_v28 = vld [vmem:[#allocation2 + $0x2ca] sm:$0xff]  ;;  %v18565_v53 = vld [vmem:[%s22656_s3 + $0x40] sm:$0xff]  }
 0x40f   : > { %17112 = vmatmul.mubr.bf16.gmra.mxu1 %v18540_v42  ;;  %v18003_v29 = vpack.i.bf16 %v5645_v49, %v5644_v2  ;;  %v16757_v48 = vpop.f32.mrf.mxu0  ;;  %17143 = vmatprep.subr.bf16.mxu0 %v18561_v25  ;;  %v18008_v38 = vpack.i.bf16 %v5749_v28, %v5748_v30  ;;  %v18551_v2 = vld [vmem:[#allocation3 + $0x100] sm:$0xff]  }
 0x410   : > { %17115 = vmatprep.mubr.bf16.mxu1 %v18541_v16  ;;  %v5415_v15 = vmax.f32 %v5389_v36, 0.0  ;;  %v5364_v61 = vadd.f32 %v5309_v0, %v5033_v11  ;;  %v16825_v35 = vpop.f32.mrf.mxu1  ;;  %17191 = vmatprep.subr.bf16.mxu1 %v18562_v32 }
 0x411   : > { %18004 = vrot.lane.b32.xlu0 %v18003_v29, %s18806_s29  ;;  %v4981_v37 = vpop.f32.mrf.mxu0  ;;  %17144 = vmatpush3.bf16.msra.mxu0 %v18561_v25  ;;  %v5646_v60 = vld [vmem:[#allocation2 + $0x2d1] sm:$0xff]  ;;  %v18548_v25 = vld [vmem:[#allocation3 + $0xf8] sm:$0xff]  }
 0x412   : > { %5441 = vst [vmem:[#allocation2 + $0x2e8] sm:$0xff] %v5415_v15  ;;  %v5390_v12 = vadd.f32 %v21022_v39, %v5364_v61  ;;  %v5034_v13 = vadd.f32 %v4981_v37, %v20891_v26  ;;  %v5312_v47 = vpop.f32.mrf.mxu1  ;;  %17192 = vmatpush3.bf16.msra.mxu1 %v18562_v32  ;;  %17145 = vmatprep.subr.bf16.mxu0 %v18565_v53  ;;  %v5750_v59 = vld [vmem:[#allocation2 + $0x2d2] sm:$0xff] }
 0x413   : > { %v16758_v55 = vpop.f32.mrf.mxu0  ;;  %17193 = vmatprep.subr.bf16.mxu1 %v18566_v3 }
 0x414   : > { %v5416_v1 = vmax.f32 %v5390_v12, 0.0  ;;  %v5365_v27 = vadd.f32 %v5312_v47, %v5034_v13  ;;  %v16826_v4 = vpop.f32.mrf.mxu1  ;;  %v18554_v47 = vld [vmem:[#allocation3 + $0x108] sm:$0xff]   ;;  %v18557_v55 = vld [vmem:[#allocation3 + $0x110] sm:$0xff]  }
 0x415   : > { %18009 = vrot.lane.b32.xlu0 %v18008_v38, %s18805_s28  ;;  %v4986_v40 = vpop.f32.mrf.mxu0  ;;  %17068 = vmatmul.mubr.bf16.gmra.mxu0 %v20998_v54  ;;  %v5647_v45 = vld [vmem:[#allocation2 + $0x2d9] sm:$0xff] }
 0x416   : > { %5442 = vst [vmem:[#allocation2 + $0x2f0] sm:$0xff] %v5416_v1  ;;  %v5391_v26 = vadd.f32 %v21022_v39, %v5365_v27  ;;  %v5035_v46 = vadd.f32 %v4986_v40, %v20895_v6  ;;  %v5317_v63 = vpop.f32.mrf.mxu1  ;;  %17071 = vmatprep.mubr.bf16.mxu0 %v21000_v34  ;;  %v18013_v62 = vpack.i.bf16 %v5647_v45, %v5646_v60  ;;  %v5751_v20 = vld [vmem:[#allocation2 + $0x2da] sm:$0xff] }
 0x417   : > { %17116 = vmatmul.mubr.bf16.gmra.mxu1 %v18542_v19  ;;  %v16761_v50 = vpop.f32.mrf.mxu0  ;;  %17146 = vmatpush3.bf16.msra.mxu0 %v18565_v53  ;;  %v18018_v58 = vpack.i.bf16 %v5751_v20, %v5750_v59  ;;  %v18563_v59 = vld [vmem:[#allocation3 + $0x110] sm:$0xff]  }
 0x418   : > { %17119 = vmatprep.mubr.bf16.mxu1 %v18545_v33  ;;  %v5417_v9 = vmax.f32 %v5391_v26, 0.0  ;;  %v5366_v56 = vadd.f32 %v5317_v63, %v5035_v46  ;;  %v16829_v54 = vpop.f32.mrf.mxu1  ;;  %18014 = vrot.lane.b32.xlu1 %v18013_v62, %s18806_s29 }
 0x419   : > { %17194 = vmatpush3.bf16.msra.mxu1 %v18566_v3  ;;  %v4989_v6 = vpop.f32.mrf.mxu0  ;;  %17227 = vmatprep.subr.bf16.mxu0 %v21168_v43  ;;  %v5648_v49 = vld [vmem:[#allocation2 + $0x2e1] sm:$0xff] }
 0x41a   : > { %5443 = vst [vmem:[#allocation2 + $0x2f8] sm:$0xff] %v5417_v9  ;;  %v5392_v34 = vadd.f32 %v21022_v39, %v5366_v56  ;;  %v5036_v44 = vadd.f32 %v4989_v6, %v20904_v22  ;;  %v5320_v31 = vpop.f32.mrf.mxu1  ;;  %v5752_v61 = vld [vmem:[#allocation2 + $0x2e2] sm:$0xff] }
 0x41b   : > { %v16762_v57 = vpop.f32.mrf.mxu0  ;;  %v18560_v6 = vld [vmem:[#allocation3 + $0x118] sm:$0xff]  }
 0x41c   : > { %v5418_v24 = vmax.f32 %v5392_v34, 0.0  ;;  %v5367_v42 = vadd.f32 %v5320_v31, %v5036_v44  ;;  %v16830_v16 = vpop.f32.mrf.mxu1  ;;  %18019 = vrot.lane.b32.xlu1 %v18018_v58, %s18805_s28  ;;  %v18564_v44 = vld [vmem:[#allocation3 + $0x100] sm:$0xff]  }
 0x41d   : > { %v4994_v18 = vpop.f32.mrf.mxu0  ;;  %17072 = vmatmul.mubr.bf16.gmra.mxu0 %v21028_v41  ;;  %v5649_v32 = vld [vmem:[#allocation2 + $0x2e9] sm:$0xff] }
 0x41e   : > { %5444 = vst [vmem:[#allocation2 + $0x300] sm:$0xff] %v5418_v24  ;;  %v5393_v22 = vadd.f32 %v21022_v39, %v5367_v42  ;;  %v5037_v36 = vadd.f32 %v4994_v18, %v20917_v23  ;;  %v5325_v11 = vpop.f32.mrf.mxu1  ;;  %17075 = vmatprep.mubr.bf16.mxu0 %v21031_v14  ;;  %v18023_v0 = vpack.i.bf16 %v5649_v32, %v5648_v49  ;;  %v5753_v48 = vld [vmem:[#allocation2 + $0x2ea] sm:$0xff] }
 0x41f   : > { %17120 = vmatmul.mubr.bf16.gmra.mxu1 %v18548_v25  ;;  %v16765_v29 = vpop.f32.mrf.mxu0  ;;  %v18028_v37 = vpack.i.bf16 %v5753_v48, %v5752_v61  ;;  %v18578_v61 = vld [vmem:[%s22656_s3 + $0xb0] sm:$0xff]  }
 0x420   : > { %17123 = vmatprep.mubr.bf16.mxu1 %v18551_v2  ;;  %v5419_v28 = vmax.f32 %v5393_v22, 0.0  ;;  %v5368_v3 = vadd.f32 %v5325_v11, %v5037_v36  ;;  %v16833_v15 = vpop.f32.mrf.mxu1  ;;  %18024 = vrot.lane.b32.xlu0 %v18023_v0, %s18806_s29  ;;  %v18567_v29 = vld [vmem:[#allocation3 + $0x118] sm:$0xff]  }
 0x421   : > { %v4997_v41 = vpop.f32.mrf.mxu0  ;;  %v5650_v1 = vld [vmem:[#allocation2 + $0x2f1] sm:$0xff] }
 0x422   : > { %5445 = vst [vmem:[#allocation2 + $0x308] sm:$0xff] %v5419_v28  ;;  %v5394_v35 = vadd.f32 %v21022_v39, %v5368_v3  ;;  %v5038_v23 = vadd.f32 %v4997_v41, %v20934_v51  ;;  %v5328_v53 = vpop.f32.mrf.mxu1  ;;  %v5754_v63 = vld [vmem:[#allocation2 + $0x2f2] sm:$0xff]  ;;  %v18569_v41 = vld [vmem:[#allocation3 + $0x120] sm:$0xff]  }
 0x423   : > { %v16766_v30 = vpop.f32.mrf.mxu0  ;;  %v18568_v15 = vld [vmem:[#allocation3 + $0x108] sm:$0xff]  }
 0x424   : > { %v5420_v14 = vmax.f32 %v5394_v35, 0.0  ;;  %v5369_v12 = vadd.f32 %v5328_v53, %v5038_v23  ;;  %v16834_v13 = vpop.f32.mrf.mxu1  ;;  %18029 = vrot.lane.b32.xlu0 %v18028_v37, %s18805_s28 }
 0x425   : > { %v5002_v38 = vpop.f32.mrf.mxu0  ;;  %17076 = vmatmul.mubr.bf16.gmra.mxu0 %v21046_v17  ;;  %v5651_v27 = vld [vmem:[#allocation2 + $0x2f9] sm:$0xff] }
 0x426   : > { %5446 = vst [vmem:[#allocation2 + $0x310] sm:$0xff] %v5420_v14  ;;  %v5395_v4 = vadd.f32 %v21022_v39, %v5369_v12  ;;  %v5039_v51 = vadd.f32 %v5002_v38, %v20947_v21  ;;  %v5333_v19 = vpop.f32.mrf.mxu1  ;;  %17079 = vmatprep.mubr.bf16.mxu0 %v21048_v7  ;;  %v18033_v40 = vpack.i.bf16 %v5651_v27, %v5650_v1  ;;  %v5755_v60 = vld [vmem:[#allocation2 + $0x2fa] sm:$0xff] }
 0x427   : > { %17124 = vmatmul.mubr.bf16.gmra.mxu1 %v18554_v47  ;;  %v16769_v33 = vpop.f32.mrf.mxu0  ;;  %v18038_v20 = vpack.i.bf16 %v5755_v60, %v5754_v63 }
 0x428   : > { %17127 = vmatprep.mubr.bf16.mxu1 %v18557_v55  ;;  %v5421_v45 = vmax.f32 %v5395_v4, 0.0  ;;  %v5370_v26 = vadd.f32 %v5333_v19, %v5039_v51  ;;  %v16837_v46 = vpop.f32.mrf.mxu1  ;;  %18034 = vrot.lane.b32.xlu1 %v18033_v40, %s18806_s29  ;;  %v18580_v55 = vld [vmem:[%s22656_s3 + $0xa8] sm:$0xff]  }
 0x429   : > { %v5005_v17 = vpop.f32.mrf.mxu0  ;;  %v5652_v31 = vld [vmem:[#allocation2 + $0x301] sm:$0xff] }
 0x42a   : > { %5447 = vst [vmem:[#allocation2 + $0x318] sm:$0xff] %v5421_v45  ;;  %v5396_v62 = vadd.f32 %v21022_v39, %v5370_v26  ;;  %v5040_v21 = vadd.f32 %v5005_v17, %v20962_v10  ;;  %v5336_v50 = vpop.f32.mrf.mxu1  ;;  %v5756_v32 = vld [vmem:[#allocation2 + $0x302] sm:$0xff] }
 0x42b   : > { %v16770_v9 = vpop.f32.mrf.mxu0  ;;  %v18582_v45 = vld [vmem:[%s22656_s3 + $0xa0] sm:$0xff]  }
 0x42c   : > { %v5422_v7 = vmax.f32 %v5396_v62, 0.0  ;;  %v5371_v56 = vadd.f32 %v5336_v50, %v5040_v21  ;;  %v16838_v54 = vpop.f32.mrf.mxu1  ;;  %18039 = vrot.lane.b32.xlu1 %v18038_v20, %s18805_s28  ;;  %v18584_v9 = vld [vmem:[%s22656_s3 + $0x98] sm:$0xff]  }
 0x42d   : > { %v5010_v34 = vpop.f32.mrf.mxu0  ;;  %17080 = vmatmul.mubr.bf16.gmra.mxu0 %v21063_v52  ;;  %v5653_v58 = vld [vmem:[#allocation2 + $0x309] sm:$0xff] }
 0x42e   : > { %5448 = vst [vmem:[#allocation2 + $0x320] sm:$0xff] %v5422_v7  ;;  %v5397_v57 = vadd.f32 %v21022_v39, %v5371_v56  ;;  %v5041_v10 = vadd.f32 %v5010_v34, %v20975_v8  ;;  %v5341_v24 = vpop.f32.mrf.mxu1  ;;  %17147 = vmatprep.mubr.bf16.mxu0 %v18563_v59  ;;  %v18043_v42 = vpack.i.bf16 %v5653_v58, %v5652_v31  ;;  %v5757_v25 = vld [vmem:[#allocation2 + $0x30a] sm:$0xff] }
 0x42f   : > { %17128 = vmatmul.mubr.bf16.gmra.mxu1 %v18560_v6  ;;  %v16773_v16 = vpop.f32.mrf.mxu0  ;;  %v18048_v11 = vpack.i.bf16 %v5757_v25, %v5756_v32 }
 0x430   : > { %17195 = vmatprep.mubr.bf16.mxu1 %v18564_v44  ;;  %v5423_v18 = vmax.f32 %v5397_v57, 0.0  ;;  %v5372_v2 = vadd.f32 %v5341_v24, %v5041_v10  ;;  %v16841_v49 = vpop.f32.mrf.mxu1  ;;  %18044 = vrot.lane.b32.xlu0 %v18043_v42, %s18806_s29  ;;  %v18586_v24 = vld [vmem:[%s22656_s3 + $0x90] sm:$0xff]  }
 0x431   : > { %v5013_v52 = vpop.f32.mrf.mxu0  ;;  %v5758_v4 = vld [vmem:[#allocation2 + $0x312] sm:$0xff] }
 0x432   : > { %5449 = vst [vmem:[#allocation2 + $0x328] sm:$0xff] %v5423_v18  ;;  %v5398_v22 = vadd.f32 %v21022_v39, %v5372_v2  ;;  %v5042_v36 = vadd.f32 %v5013_v52, %v20990_v5  ;;  %v5344_v8 = vpop.f32.mrf.mxu1  ;;  %v5654_v39 = vld [vmem:[#allocation2 + $0x311] sm:$0xff]  ;;  %v18734_v5 = vld [vmem:[%s22655_s2] ss:$0 sm:$0xff]  ;;  %v18588_v52 = vld [vmem:[%s22656_s3 + $0x88] sm:$0xff]  }
 0x433   : > { %v16774_v0 = vpop.f32.mrf.mxu0 }
 0x434   : > { %v5424_v48 = vmax.f32 %v5398_v22, 0.0  ;;  %v5373_v28 = vadd.f32 %v5344_v8, %v5042_v36  ;;  %v16842_v3 = vpop.f32.mrf.mxu1  ;;  %18049 = vrot.lane.b32.xlu0 %v18048_v11, %s18805_s28 }
 0x435   : > { %v16861_v35 = vpop.f32.mrf.mxu0  ;;  %17148 = vmatmul.mubr.bf16.vlgmr.msra.gmra.mxu0 %v18567_v29  ;;  %v5655_v23 = vld [vmem:[#allocation2 + $0x319] sm:$0xff] }
 0x436   : > { %5450 = vst [vmem:[#allocation2 + $0x330] sm:$0xff] %v5424_v48  ;;  %v5399_v53 = vadd.f32 %v18734_v5, %v5373_v28  ;;  %v16909_v37 = vpop.f32.mrf.mxu1  ;;  %17151 = vmatprep.mubr.bf16.mxu0 %v18569_v41  ;;  %v18053_v30 = vpack.i.bf16 %v5655_v23, %v5654_v39  ;;  %v5759_v13 = vld [vmem:[#allocation2 + $0x31a] sm:$0xff]  ;;  %17228 = vmatpush3.bf16.msra.mxu0 %v21168_v43  ;;  %v18570_v43 = vld [vmem:[#allocation3 + $0x128] sm:$0xff]  }
 0x437   : > { %17196 = vmatmul.mubr.bf16.vlgmr.msra.gmra.mxu1 %v18568_v15  ;;  %v21203_v14 = vadd.f32 %v16909_v37, %v16861_v35  ;;  %v7678_v12 = vpop.f32.mrf.mxu0  ;;  %17229 = vmatprep.subr.bf16.mxu0 %v18578_v61  ;;  %v18058_v19 = vpack.i.bf16 %v5759_v13, %v5758_v4  ;;  %v5528_v13 = vld [vmem:[#allocation2 + $0x260] sm:$0xff] }
 0x438   : > { %17199 = vmatprep.mubr.bf16.mxu1 %v18563_v59  ;;  %v5425_v47 = vmax.f32 %v5399_v53, 0.0  ;;  %v7899_v38 = vpop.f32.mrf.mxu1  ;;  %18054 = vrot.lane.b32.xlu1 %v18053_v30, %s18806_s29 }
 0x439   : > { %v21210_v1 = vadd.f32 %v7899_v38, %v7678_v12  ;;  %v16862_v27 = vpop.f32.mrf.mxu0  ;;  %v5656_v46 = vld [vmem:[#allocation2 + $0x321] sm:$0xff] }
 0x43a   : > { %5451 = vst [vmem:[#allocation2 + $0x338] sm:$0xff] %v5425_v47  ;;  %v16910_v51 = vpop.f32.mrf.mxu1  ;;  %17230 = vmatpush3.bf16.msra.mxu0 %v18578_v61  ;;  %v5760_v56 = vld [vmem:[#allocation2 + $0x322] sm:$0xff] }
 0x43b   : > { %v21212_v40 = vadd.f32 %v16910_v51, %v16862_v27  ;;  %v21214_v33 = vpop.f32.mrf.mxu0  ;;  %17231 = vmatprep.subr.bf16.mxu0 %v18580_v55  ;;  %v5529_v47 = vld [vmem:[#allocation2 + $0x268] sm:$0xff] }
 0x43c   : > { %v21216_v60 = vpop.f32.mrf.mxu1  ;;  %18059 = vrot.lane.b32.xlu1 %v18058_v19, %s18805_s28 }
 0x43d   : > { %v21222_v26 = vpop.f32.mrf.mxu0  ;;  %17152 = vmatmul.mubr.bf16.gmra.mxu0 %v18570_v43  ;;  %v5657_v17 = vld [vmem:[#allocation2 + $0x329] sm:$0xff] }
 0x43e   : > { %v21224_v63 = vpop.f32.mrf.mxu1  ;;  %v18063_v62 = vpack.i.bf16 %v5657_v17, %v5656_v46  ;;  %v5761_v50 = vld [vmem:[#allocation2 + $0x32a] sm:$0xff]  ;;  %17232 = vmatpush3.bf16.msra.mxu0 %v18580_v55 }
 0x43f   : > { %17200 = vmatmul.mubr.bf16.gmra.mxu1 %v18567_v29  ;;  %v21226_v21 = vpop.f32.mrf.mxu0  ;;  %17233 = vmatprep.subr.bf16.mxu0 %v18582_v45  ;;  %v18068_v34 = vpack.i.bf16 %v5761_v50, %v5760_v56  ;;  %v18590_v29 = vld [vmem:[%s22656_s3 + $0x80] sm:$0xff]  }
 0x440   : > { %17203 = vmatprep.mubr.bf16.mxu1 %v18569_v41  ;;  %v21228_v20 = vpop.f32.mrf.mxu1  ;;  %18064 = vrot.lane.b32.xlu0 %v18063_v62, %s18806_s29 }
 0x441   : > { %v21234_v7 = vpop.f32.mrf.mxu0  ;;  %v5658_v54 = vld [vmem:[#allocation2 + $0x331] sm:$0xff]  ;;  %v5659_v6 = vld [vmem:[#allocation2 + $0x339] sm:$0xff] }
 0x442   : > { %v21236_v59 = vpop.f32.mrf.mxu1  ;;  %v18073_v44 = vpack.i.bf16 %v5659_v6, %v5658_v54  ;;  %v5762_v58 = vld [vmem:[#allocation2 + $0x332] sm:$0xff]  ;;  %v5763_v57 = vld [vmem:[#allocation2 + $0x33a] sm:$0xff]  ;;  %17234 = vmatpush3.bf16.msra.mxu0 %v18582_v45 }
 0x443   : > { %v21238_v31 = vpop.f32.mrf.mxu0  ;;  %17235 = vmatprep.subr.bf16.mxu0 %v18584_v9  ;;  %v18078_v25 = vpack.i.bf16 %v5763_v57, %v5762_v58 }
 0x444   : > { %v21240_v10 = vpop.f32.mrf.mxu1  ;;  %18069 = vrot.lane.b32.xlu0 %v18068_v34, %s18805_s28  ;;  %18074 = vrot.lane.b32.xlu1 %v18073_v44, %s18806_s29 }
 0x445   : > { %v16869_v42 = vpop.f32.mrf.mxu0 }
 0x446   : > { %v16917_v16 = vpop.f32.mrf.mxu1  ;;  %17236 = vmatpush3.bf16.msra.mxu0 %v18584_v9 }
 0x447   : > { %17204 = vmatmul.mubr.bf16.gmra.mxu1 %v18570_v43  ;;  %v21247_v18 = vadd.f32 %v16917_v16, %v16869_v42  ;;  %v7710_v2 = vpop.f32.mrf.mxu0  ;;  %17237 = vmatprep.subr.bf16.mxu0 %v18586_v24 }
 0x448   : > { %v7931_v49 = vpop.f32.mrf.mxu1  ;;  %18079 = vrot.lane.b32.xlu1 %v18078_v25, %s18805_s28 }
 0x449   : > { %v21253_v32 = vadd.f32 %v7931_v49, %v7710_v2  ;;  %v16870_v22 = vpop.f32.mrf.mxu0  ;;  %v5530_v2 = vld [vmem:[#allocation2 + $0x270] sm:$0xff]  ;;  %v5531_v49 = vld [vmem:[#allocation2 + $0x278] sm:$0xff] }
 0x44a   : > { %v16918_v36 = vpop.f32.mrf.mxu1  ;;  %17238 = vmatpush3.bf16.msra.mxu0 %v18586_v24 }
 0x44b   : > { %v21255_v8 = vadd.f32 %v16918_v36, %v16870_v22  ;;  %v21257_v11 = vpop.f32.mrf.mxu0  ;;  %17239 = vmatprep.subr.bf16.mxu0 %v18588_v52 }
 0x44c   : > { %v21259_v0 = vpop.f32.mrf.mxu1 }
 0x44d   : > { %v21264_v48 = vpop.f32.mrf.mxu0 }
 0x44e   : > { %v21266_v28 = vpop.f32.mrf.mxu1  ;;  %17240 = vmatpush3.bf16.msra.mxu0 %v18588_v52 }
 0x44f   : > { %v21268_v3 = vpop.f32.mrf.mxu0  ;;  %17241 = vmatprep.subr.bf16.mxu0 %v18590_v29 }
 0x450   : > { %v21270_v15 = vpop.f32.mrf.mxu1 }
 0x451   : > { %v21272_v41 = vpop.f32.mrf.mxu0 }
 0x452   : > { %v21274_v61 = vpop.f32.mrf.mxu1  ;;  %17242 = vmatpush3.bf16.msra.mxu0 %v18590_v29 }
 0x453   : > { %v17945_v35 = vpop.permute.xlu0 %17944  ;;  %v21276_v39 = vpop.f32.mrf.mxu0 }
 0x454   : > { %v17947_v23 = vunpack.i.h.bf16 %v17945_v35  ;;  %v17946_v5 = vunpack.i.l.bf16 %v17945_v35  ;;  %v21278_v53 = vpop.f32.mrf.mxu1 }
 0x455   : > { %v16877_v37 = vpop.f32.mrf.mxu0 }
 0x456   : > { %v16925_v30 = vpop.f32.mrf.mxu1  ;;  %v6674_v51 = vsel %vm6596_vm1, %v5529_v47, %v17947_v23  ;;  %v6673_v19 = vsel %vm6596_vm1, %v5528_v13, %v17946_v5 }
 0x457   : > { %v17950_v12 = vpop.permute.xlu0 %17949  ;;  %v21280_v38 = vadd.f32 %v16925_v30, %v16877_v37  ;;  %v7742_v4 = vpop.f32.mrf.mxu0 }
 0x458   : > { %v17952_v55 = vunpack.i.h.bf16 %v17950_v12  ;;  %v17951_v27 = vunpack.i.l.bf16 %v17950_v12  ;;  %v7963_v43 = vpop.f32.mrf.mxu1 }
 0x459   : > { %v21286_v17 = vadd.f32 %v7963_v43, %v7742_v4  ;;  %v16878_v62 = vpop.f32.mrf.mxu0 }
 0x45a   : > { %v6778_v45 = vsel %vm6701_vm2, %v6673_v19, %v17951_v27  ;;  %v6779_v46 = vsel %vm6701_vm2, %v6674_v51, %v17952_v55  ;;  %v16926_v56 = vpop.f32.mrf.mxu1 }
 0x45b   : > { %v6883_v50 = vsel %vm6806_vm3, %v6778_v45, %v5528_v13  ;;  %v6884_v9 = vsel %vm6806_vm3, %v6779_v46, %v5529_v47  ;;  %v17955_v54 = vpop.permute.xlu1 %17954  ;;  %v21290_v34 = vadd.f32 %v16926_v56, %v16878_v62  ;;  %v21292_v44 = vpop.f32.mrf.mxu0  ;;  %v5533_v56 = vld [vmem:[#allocation2 + $0x288] sm:$0xff] }
 0x45c   : > { %v14836_v6 = vpack.c.bf16 %v6884_v9, %v6883_v50  ;;  %v17957_v58 = vunpack.i.h.bf16 %v17955_v54  ;;  %v17956_v57 = vunpack.i.l.bf16 %v17955_v54  ;;  %v21294_v24 = vpop.f32.mrf.mxu1  ;;  %v5532_v9 = vld [vmem:[#allocation2 + $0x280] sm:$0xff] }
 0x45d   : > { %v21296_v42 = vpop.f32.mrf.mxu0 }
 0x45e   : > { %15048 = vst [vmem:[#allocation3 + $0x130] sm:$0xff] %v14836_v6   ;;  %v21298_v16 = vpop.f32.mrf.mxu1  ;;  %v6676_v29 = vsel %vm6596_vm1, %v5531_v49, %v17957_v58  ;;  %v6675_v35 = vsel %vm6596_vm1, %v5530_v2, %v17956_v57 }
 0x45f   : > { %v17960_v25 = vpop.permute.xlu1 %17959  ;;  %v21300_v36 = vpop.f32.mrf.mxu0 }
 0x460   : > { %v17962_v52 = vunpack.i.h.bf16 %v17960_v25  ;;  %v17961_v22 = vunpack.i.l.bf16 %v17960_v25  ;;  %v21304_v23 = vpop.f32.mrf.mxu1 }
 0x461   : > { %v21308_v30 = vpop.f32.mrf.mxu0 }
 0x462   : > { %v6780_v5 = vsel %vm6701_vm2, %v6675_v35, %v17961_v22  ;;  %v6781_v37 = vsel %vm6701_vm2, %v6676_v29, %v17962_v52  ;;  %v21312_v47 = vpop.f32.mrf.mxu1 }
 0x463   : > { %v6885_v12 = vsel %vm6806_vm3, %v6780_v5, %v5530_v2  ;;  %v6886_v13 = vsel %vm6806_vm3, %v6781_v37, %v5531_v49  ;;  %v17965_v55 = vpop.permute.xlu0 %17964  ;;  %v21314_v4 = vpop.f32.mrf.mxu0 }
 0x464   : > { %v14841_v27 = vpack.c.bf16 %v6886_v13, %v6885_v12  ;;  %v17967_v51 = vunpack.i.h.bf16 %v17965_v55  ;;  %v17966_v19 = vunpack.i.l.bf16 %v17965_v55  ;;  %v21316_v43 = vpop.f32.mrf.mxu1 }
 0x465   : > { %v18571_v45 = vld [vmem:[#allocation3 + $0x130] sm:$0xff]   ;;  %v16885_v46 = vpop.f32.mrf.mxu0 }
 0x466   : > { %15049 = vst [vmem:[#allocation3 + $0x138] sm:$0xff] %v14841_v27   ;;  %v16933_v62 = vpop.f32.mrf.mxu1  ;;  %17155 = vmatprep.mubr.bf16.mxu0 %v18571_v45  ;;  %17207 = vmatprep.mubr.bf16.mxu1 %v18571_v45  ;;  %v6678_v25 = vsel %vm6596_vm1, %v5533_v56, %v17967_v51  ;;  %v6677_v2 = vsel %vm6596_vm1, %v5532_v9, %v17966_v19 }
 0x467   : > { %v17970_v50 = vpop.permute.xlu0 %17969  ;;  %v21318_v54 = vadd.f32 %v16933_v62, %v16885_v46  ;;  %v7774_v57 = vpop.f32.mrf.mxu0 }
 0x468   : > { %v17972_v6 = vunpack.i.h.bf16 %v17970_v50  ;;  %v17971_v58 = vunpack.i.l.bf16 %v17970_v50  ;;  %v7995_v49 = vpop.f32.mrf.mxu1 }
 0x469   : > { %v21324_v29 = vadd.f32 %v7995_v49, %v7774_v57  ;;  %v16886_v35 = vpop.f32.mrf.mxu0  ;;  %v5535_v57 = vld [vmem:[#allocation2 + $0x298] sm:$0xff] }
 0x46a   : > { %v6782_v52 = vsel %vm6701_vm2, %v6677_v2, %v17971_v58  ;;  %v6783_v22 = vsel %vm6701_vm2, %v6678_v25, %v17972_v6  ;;  %v16934_v12 = vpop.f32.mrf.mxu1  ;;  %v5534_v58 = vld [vmem:[#allocation2 + $0x290] sm:$0xff] }
 0x46b   : > { %22671 = vst [vmem:[#allocation13_spill] sm:$0xff] %v21324_v29  ;;  %v6887_v5 = vsel %vm6806_vm3, %v6782_v52, %v5532_v9  ;;  %v6888_v37 = vsel %vm6806_vm3, %v6783_v22, %v5533_v56  ;;  %v17975_v13 = vpop.permute.xlu1 %17974  ;;  %v21328_v27 = vadd.f32 %v16934_v12, %v16886_v35  ;;  %v21330_v51 = vpop.f32.mrf.mxu0  ;;  %v18601_v56 = vld [vmem:[%s22658_s5 + $0xb8] sm:$0xff]  }
 0x46c   : > { %v14846_v55 = vpack.c.bf16 %v6888_v37, %v6887_v5  ;;  %v17977_v19 = vunpack.i.h.bf16 %v17975_v13  ;;  %v17976_v45 = vunpack.i.l.bf16 %v17975_v13  ;;  %v21332_v46 = vpop.f32.mrf.mxu1  ;;  %17347 = vmatprep.subr.bf16.mxu0 %v18601_v56 }
 0x46d   : > { %22672 = vst [vmem:[#allocation14_spill] sm:$0xff] %v21328_v27  ;;  %v18572_v62 = vld [vmem:[#allocation3 + $0x138] sm:$0xff]   ;;  %v21334_v50 = vpop.f32.mrf.mxu0 }
 0x46e   : > { %15050 = vst [vmem:[#allocation3 + $0x140] sm:$0xff] %v14846_v55   ;;  %v21336_v6 = vpop.f32.mrf.mxu1  ;;  %17156 = vmatmul.mubr.bf16.gmra.mxu0 %v18572_v62  ;;  %17208 = vmatmul.mubr.bf16.gmra.mxu1 %v18572_v62  ;;  %v6680_v52 = vsel %vm6596_vm1, %v5535_v57, %v17977_v19  ;;  %v6679_v22 = vsel %vm6596_vm1, %v5534_v58, %v17976_v45 }
 0x46f   : > { %v17980_v9 = vpop.permute.xlu1 %17979  ;;  %v21341_v49 = vpop.f32.mrf.mxu0 }
 0x470   : > { %v17982_v25 = vunpack.i.h.bf16 %v17980_v9  ;;  %v17981_v2 = vunpack.i.l.bf16 %v17980_v9  ;;  %22673 = vst [vmem:[#allocation15_spill] sm:$0xff] %v21341_v49  ;;  %v21345_v35 = vpop.f32.mrf.mxu1 }
 0x471   : > { %22674 = vst [vmem:[#allocation16_spill] sm:$0xff] %v21345_v35  ;;  %v21349_v12 = vpop.f32.mrf.mxu0 }
 0x472   : > { %v6784_v5 = vsel %vm6701_vm2, %v6679_v22, %v17981_v2  ;;  %v6785_v37 = vsel %vm6701_vm2, %v6680_v52, %v17982_v25  ;;  %22675 = vst [vmem:[#allocation17_spill] sm:$0xff] %v21349_v12  ;;  %v21353_v62 = vpop.f32.mrf.mxu1 }
 0x473   : > { %v6889_v13 = vsel %vm6806_vm3, %v6784_v5, %v5534_v58  ;;  %v6890_v55 = vsel %vm6806_vm3, %v6785_v37, %v5535_v57  ;;  %22676 = vst [vmem:[#allocation18_spill] sm:$0xff] %v21353_v62  ;;  %v17985_v9 = vpop.permute.xlu0 %17984  ;;  %v21355_v19 = vpop.f32.mrf.mxu0  ;;  %v5536_v58 = vld [vmem:[#allocation2 + $0x2a0] sm:$0xff]  ;;  %v5537_v57 = vld [vmem:[#allocation2 + $0x2a8] sm:$0xff] }
 0x474   : > { %v14851_v49 = vpack.c.bf16 %v6890_v55, %v6889_v13  ;;  %22677 = vst [vmem:[#allocation19_spill] sm:$0xff] %v21355_v19  ;;  %v17987_v45 = vunpack.i.h.bf16 %v17985_v9  ;;  %v17986_v27 = vunpack.i.l.bf16 %v17985_v9  ;;  %v21357_v35 = vpop.f32.mrf.mxu1 }
 0x475   : > { %22678 = vst [vmem:[#allocation20_spill] sm:$0xff] %v21357_v35  ;;  %v18573_v56 = vld [vmem:[#allocation3 + $0x140] sm:$0xff]   ;;  %v16957_v2 = vpop.f32.mrf.mxu0 }
 0x476   : > { %15051 = vst [vmem:[#allocation3 + $0x148] sm:$0xff] %v14851_v49   ;;  %v21359_v25 = vpop.f32.mrf.mxu1  ;;  %17159 = vmatprep.mubr.bf16.mxu0 %v18573_v56  ;;  %17211 = vmatprep.mubr.bf16.mxu1 %v18573_v56  ;;  %v8381_v22 = vadd.f32 %v16957_v2, %v21203_v14  ;;  %v6682_v55 = vsel %vm6596_vm1, %v5537_v57, %v17987_v45  ;;  %v21367_v49 = vld [vmem:[%s22657_s4] ss:$0 sm:$0xff] }
 0x477   : > { %22679 = vst [vmem:[#allocation21_spill] sm:$0xff] %v21359_v25  ;;  %v17990_v52 = vpop.permute.xlu0 %17989  ;;  %v8252_v13 = vpop.f32.mrf.mxu0  ;;  %v6681_v9 = vsel %vm6596_vm1, %v5536_v58, %v17986_v27  ;;  %v7903_v27 = vadd.f32 %v21216_v60, %v21214_v33 }
 0x478   : > { %v17992_v5 = vunpack.i.h.bf16 %v17990_v52  ;;  %v17991_v37 = vunpack.i.l.bf16 %v17990_v52  ;;  %v21369_v25 = vpop.f32.mrf.mxu1  ;;  %v8419_v62 = vadd.f32 %v21367_v49, %v8381_v22 }
 0x479   : > { %22680 = vst [vmem:[#allocation22_spill] sm:$0xff] %v21369_v25  ;;  %v16958_v19 = vpop.f32.mrf.mxu0  ;;  %v8379_v25 = vadd.f32 %v8252_v13, %v21210_v1  ;;  %v7927_v1 = vadd.f32 %v21236_v59, %v21234_v7  ;;  %v7919_v13 = vadd.f32 %v21240_v10, %v21238_v31 }
 0x47a   : > { %v6786_v56 = vsel %vm6701_vm2, %v6681_v9, %v17991_v37  ;;  %v6787_v35 = vsel %vm6701_vm2, %v6682_v55, %v17992_v5  ;;  %v21375_v52 = vpop.f32.mrf.mxu1  ;;  %v7924_v5 = vadd.f32 %v21224_v63, %v21222_v26  ;;  %v8382_v33 = vadd.f32 %v16958_v19, %v21212_v40 }
 0x47b   : > { %v6891_v14 = vsel %vm6806_vm3, %v6786_v56, %v5536_v58  ;;  %v6892_v2 = vsel %vm6806_vm3, %v6787_v35, %v5537_v57  ;;  %v17995_v45 = vpop.permute.xlu1 %17994  ;;  %v8255_v29 = vpop.f32.mrf.mxu0  ;;  %v7916_v57 = vadd.f32 %v21228_v20, %v21226_v21  ;;  %v8451_v56 = vmax.f32 %v8419_v62, 0.0  ;;  %v5538_v20 = vld [vmem:[#allocation2 + $0x2b0] sm:$0xff] }
 0x47c   : > { %v14856_v12 = vpack.c.bf16 %v6892_v2, %v6891_v14  ;;  %v17997_v37 = vunpack.i.h.bf16 %v17995_v45  ;;  %v17996_v55 = vunpack.i.l.bf16 %v17995_v45  ;;  %v21383_v58 = vpop.f32.mrf.mxu1  ;;  %v8380_v60 = vadd.f32 %v8255_v29, %v7903_v27 }
 0x47d   : > { %v18574_v35 = vld [vmem:[#allocation3 + $0x148] sm:$0xff]   ;;  %v16961_v22 = vpop.f32.mrf.mxu0  ;;  %v8417_v21 = vadd.f32 %v21367_v49, %v8379_v25  ;;  %v8420_v2 = vadd.f32 %v21367_v49, %v8382_v33 }
 0x47e   : > { %15052 = vst [vmem:[#allocation3 + $0x150] sm:$0xff] %v14856_v12   ;;  %v8385_v26 = vadd.f32 %v16961_v22, %v7924_v5  ;;  %v21392_v63 = vpop.f32.mrf.mxu1  ;;  %17160 = vmatmul.mubr.bf16.gmra.mxu0 %v18574_v35  ;;  %17212 = vmatmul.mubr.bf16.gmra.mxu1 %v18574_v35  ;;  %v5539_v12 = vld [vmem:[#allocation2 + $0x2b8] sm:$0xff]  ;;  %v6683_v7 = vsel %vm6596_vm1, %v5538_v20, %v17996_v55 }
 0x47f   : > { %v18000_v9 = vpop.permute.xlu1 %17999  ;;  %v8268_v19 = vpop.f32.mrf.mxu0  ;;  %v6684_v14 = vsel %vm6596_vm1, %v5539_v12, %v17997_v37  ;;  %v8418_v62 = vadd.f32 %v21367_v49, %v8380_v60 }
 0x480   : > { %v18002_v40 = vunpack.i.h.bf16 %v18000_v9  ;;  %v18001_v29 = vunpack.i.l.bf16 %v18000_v9  ;;  %v8423_v59 = vadd.f32 %v21367_v49, %v8385_v26  ;;  %v8383_v31 = vadd.f32 %v8268_v19, %v7916_v57  ;;  %v21398_v10 = vpop.f32.mrf.mxu1 }
 0x481   : > { %22681 = vst [vmem:[#allocation23_spill] sm:$0xff] %v21398_v10  ;;  %v16962_v27 = vpop.f32.mrf.mxu0  ;;  %v8449_v26 = vmax.f32 %v8417_v21, 0.0 }
 0x482   : > { %v6788_v25 = vsel %vm6701_vm2, %v6683_v7, %v18001_v29  ;;  %v6789_v45 = vsel %vm6701_vm2, %v6684_v14, %v18002_v40  ;;  %v8455_v5 = vmax.f32 %v8423_v59, 0.0  ;;  %v8421_v55 = vadd.f32 %v21367_v49, %v8383_v31  ;;  %v21407_v22 = vpop.f32.mrf.mxu1 }
 0x483   : > { %v6893_v35 = vsel %vm6806_vm3, %v6788_v25, %v5538_v20  ;;  %v6894_v37 = vsel %vm6806_vm3, %v6789_v45, %v5539_v12  ;;  %v18005_v57 = vpop.permute.xlu0 %18004  ;;  %v8386_v33 = vadd.f32 %v16962_v27, %v7927_v1  ;;  %v8271_v60 = vpop.f32.mrf.mxu0  ;;  %v8452_v31 = vmax.f32 %v8420_v2, 0.0 }
 0x484   : > { %v14861_v9 = vpack.c.bf16 %v6894_v37, %v6893_v35  ;;  %v18007_v19 = vunpack.i.h.bf16 %v18005_v57  ;;  %v10673_v10 = vmax.f32 %v8451_v56, %v8455_v5  ;;  %v8453_v29 = vmax.f32 %v8421_v55, 0.0  ;;  %v21409_v14 = vpop.f32.mrf.mxu1  ;;  %v5541_v5 = vld [vmem:[#allocation2 + $0x2c8] sm:$0xff] }
 0x485   : > { %v18006_v7 = vunpack.i.l.bf16 %v18005_v57  ;;  %v8384_v40 = vadd.f32 %v8271_v60, %v7919_v13  ;;  %v18575_v59 = vld [vmem:[#allocation3 + $0x150] sm:$0xff]   ;;  %v8424_v20 = vadd.f32 %v21367_v49, %v8386_v33  ;;  %v16965_v12 = vpop.f32.mrf.mxu0  ;;  %v8450_v25 = vmax.f32 %v8418_v62, 0.0  ;;  %v5540_v13 = vld [vmem:[#allocation2 + $0x2c0] sm:$0xff] }
 0x486   : > { %15053 = vst [vmem:[#allocation3 + $0x158] sm:$0xff] %v14861_v9   ;;  %10677 = vst [vmem:[#allocation5 + $0x10] sm:$0xff] %v10673_v10  ;;  %v10671_v45 = vmax.f32 %v8449_v26, %v8453_v29  ;;  %v21413_v1 = vpop.f32.mrf.mxu1  ;;  %17163 = vmatprep.mubr.bf16.mxu0 %v18575_v59  ;;  %17215 = vmatprep.mubr.bf16.mxu1 %v18575_v59  ;;  %v8389_v35 = vadd.f32 %v16965_v12, %v21247_v18 }
 0x487   : > { %v8422_v21 = vadd.f32 %v21367_v49, %v8384_v40  ;;  %v18010_v27 = vpop.permute.xlu0 %18009  ;;  %v8456_v56 = vmax.f32 %v8424_v20, 0.0  ;;  %v8284_v57 = vpop.f32.mrf.mxu0  ;;  %v6686_v2 = vsel %vm6596_vm1, %v5541_v5, %v18007_v19  ;;  %v6685_v10 = vsel %vm6596_vm1, %v5540_v13, %v18006_v7 }
 0x488   : > { %v18012_v37 = vunpack.i.h.bf16 %v18010_v27  ;;  %v18011_v55 = vunpack.i.l.bf16 %v18010_v27  ;;  %10675 = vst [vmem:[#allocation5] sm:$0xff] %v10671_v45  ;;  %v8387_v26 = vadd.f32 %v8284_v57, %v21253_v32  ;;  %v21419_v9 = vpop.f32.mrf.mxu1  ;;  %v7935_v7 = vadd.f32 %v21259_v0, %v21257_v11 }
 0x489   : > { %v8454_v62 = vmax.f32 %v8422_v21, 0.0  ;;  %v10674_v33 = vmax.f32 %v8452_v31, %v8456_v56  ;;  %v16966_v40 = vpop.f32.mrf.mxu0  ;;  %v8427_v32 = vadd.f32 %v21367_v49, %v8389_v35  ;;  %v7948_v11 = vadd.f32 %v21270_v15, %v21268_v3  ;;  %v5542_v15 = vld [vmem:[#allocation2 + $0x2d0] sm:$0xff] }
 0x48a   : > { %v6790_v60 = vsel %vm6701_vm2, %v6685_v10, %v18011_v55  ;;  %v6791_v29 = vsel %vm6701_vm2, %v6686_v2, %v18012_v37  ;;  %v21425_v12 = vpop.f32.mrf.mxu1  ;;  %v18015_v19 = vpop.permute.xlu1 %18014  ;;  %v21431_v45 = vadd.f32 %v21367_v49, %v8387_v26  ;;  %v8390_v0 = vadd.f32 %v16966_v40, %v21255_v8 }
 0x48b   : > { %v10672_v18 = vmax.f32 %v8450_v25, %v8454_v62  ;;  %v6895_v59 = vsel %vm6806_vm3, %v6790_v60, %v5540_v13  ;;  %v6896_v20 = vsel %vm6806_vm3, %v6791_v29, %v5541_v5  ;;  %10678 = vst [vmem:[#allocation5 + $0x18] sm:$0xff] %v10674_v33  ;;  %v8287_v21 = vpop.f32.mrf.mxu0  ;;  %v7956_v25 = vadd.f32 %v21266_v28, %v21264_v48  ;;  %v5543_v62 = vld [vmem:[#allocation2 + $0x2d8] sm:$0xff] }
 0x48c   : > { %v14866_v31 = vpack.c.bf16 %v6896_v20, %v6895_v59  ;;  %v18017_v27 = vunpack.i.h.bf16 %v18015_v19  ;;  %v18016_v56 = vunpack.i.l.bf16 %v18015_v19  ;;  %v21435_v13 = vpop.f32.mrf.mxu1  ;;  %v8388_v35 = vadd.f32 %v8287_v21, %v7935_v7 }
 0x48d   : > { %10676 = vst [vmem:[#allocation5 + $0x8] sm:$0xff] %v10672_v18  ;;  %v18577_v5 = vld [vmem:[#allocation3 + $0x158] sm:$0xff]   ;;  %v16969_v37 = vpop.f32.mrf.mxu0  ;;  %v7959_v55 = vadd.f32 %v21274_v61, %v21272_v41  ;;  %v7951_v48 = vadd.f32 %v21278_v53, %v21276_v39  ;;  %v8459_v10 = vmax.f32 %v8427_v32, 0.0  ;;  %v8457_v3 = vmax.f32 %v21431_v45, 0.0 }
 0x48e   : > { %15054 = vst [vmem:[#allocation3 + $0x160] sm:$0xff] %v14866_v31   ;;  %v8393_v28 = vadd.f32 %v16969_v37, %v7956_v25  ;;  %v21444_v57 = vpop.f32.mrf.mxu1  ;;  %v18020_v2 = vpop.permute.xlu1 %18019  ;;  %17164 = vmatmul.mubr.bf16.gmra.mxu0 %v18577_v5  ;;  %17216 = vmatmul.mubr.bf16.gmra.mxu1 %v18577_v5  ;;  %v6688_v60 = vsel %vm6596_vm1, %v5543_v62, %v18017_v27 }
 0x48f   : > { %v18022_v8 = vunpack.i.h.bf16 %v18020_v2  ;;  %v18021_v26 = vunpack.i.l.bf16 %v18020_v2  ;;  %v8300_v33 = vpop.f32.mrf.mxu0  ;;  %v6687_v41 = vsel %vm6596_vm1, %v5542_v15, %v18016_v56  ;;  %v8428_v29 = vadd.f32 %v21367_v49, %v8390_v0 }
 0x490   : > { %v8431_v61 = vadd.f32 %v21367_v49, %v8393_v28  ;;  %v8391_v39 = vadd.f32 %v8300_v33, %v7948_v11  ;;  %v21450_v53 = vpop.f32.mrf.mxu1  ;;  %v21454_v40 = vadd.f32 %v21367_v49, %v8388_v35 }
 0x491   : > { %v6792_v18 = vsel %vm6701_vm2, %v6687_v41, %v18021_v26  ;;  %v6793_v59 = vsel %vm6701_vm2, %v6688_v60, %v18022_v8  ;;  %v16970_v20 = vpop.f32.mrf.mxu0  ;;  %v7967_v60 = vadd.f32 %v21294_v24, %v21292_v44 }
 0x492   : > { %v10857_v19 = vld [vmem:[#allocation5 + $0x10] ss:$2 sm:$0xff]  ;;  %v10905_v7 = vld [vmem:[#allocation5 + $0x11] ss:$2 sm:$0xff]  ;;  %v8463_v32 = vmax.f32 %v8431_v61, 0.0  ;;  %v6897_v31 = vsel %vm6806_vm3, %v6792_v18, %v5542_v15  ;;  %v6898_v45 = vsel %vm6806_vm3, %v6793_v59, %v5543_v62  ;;  %v8429_v21 = vadd.f32 %v21367_v49, %v8391_v39  ;;  %v21461_v25 = vpop.f32.mrf.mxu1  ;;  %v18025_v27 = vpop.permute.xlu0 %18024 }
 0x493   : > { %v21463_v56 = vmax.f32 %v10857_v19, %v10905_v7  ;;  %v14871_v0 = vpack.c.bf16 %v6898_v45, %v6897_v31  ;;  %v8394_v35 = vadd.f32 %v16970_v20, %v7959_v55  ;;  %v18027_v37 = vunpack.i.h.bf16 %v18025_v27  ;;  %v8303_v28 = vpop.f32.mrf.mxu0  ;;  %v5545_v31 = vld [vmem:[#allocation2 + $0x2e8] sm:$0xff] }
 0x494   : > { %v10855_v5 = vld [vmem:[#allocation5] ss:$2 sm:$0xff]  ;;  %v10903_v11 = vld [vmem:[#allocation5 + $0x1] ss:$2 sm:$0xff]  ;;  %v10689_v8 = vmax.f32 %v8459_v10, %v8463_v32  ;;  %v8461_v26 = vmax.f32 %v8429_v21, 0.0  ;;  %v18026_v33 = vunpack.i.l.bf16 %v18025_v27  ;;  %v21465_v15 = vpop.f32.mrf.mxu1  ;;  %v8392_v61 = vadd.f32 %v8303_v28, %v7951_v48  ;;  %v5544_v32 = vld [vmem:[#allocation2 + $0x2e0] sm:$0xff] }
 0x495   : > { %22682 = vst [vmem:[#allocation24_spill] sm:$0xff] %v21463_v56  ;;  %v10950_v2 = vmax.f32 %v10855_v5, %v10903_v11  ;;  %v18579_v62 = vld [vmem:[#allocation3 + $0x160] sm:$0xff]   ;;  %15055 = vst [vmem:[#allocation3 + $0x168] sm:$0xff] %v14871_v0   ;;  %v8432_v41 = vadd.f32 %v21367_v49, %v8394_v35  ;;  %v16973_v39 = vpop.f32.mrf.mxu0  ;;  %v8460_v55 = vmax.f32 %v8428_v29, 0.0  ;;  %v8458_v29 = vmax.f32 %v21454_v40, 0.0 }
 0x496   : > { %10693 = vst [vmem:[#allocation5 + $0x30] sm:$0xff] %v10689_v8  ;;  %v10687_v59 = vmax.f32 %v8457_v3, %v8461_v26  ;;  %v8397_v10 = vadd.f32 %v16973_v39, %v21280_v38  ;;  %v21472_v20 = vpop.f32.mrf.mxu1  ;;  %v18030_v19 = vpop.permute.xlu0 %18029  ;;  %17167 = vmatprep.mubr.bf16.mxu0 %v18579_v62  ;;  %v8430_v44 = vadd.f32 %v21367_v49, %v8392_v61 }
 0x497   : > { %v14906_v18 = vpack.c.bf16 %v21463_v56, %v10950_v2  ;;  %v8464_v7 = vmax.f32 %v8432_v41, 0.0  ;;  %v18032_v24 = vunpack.i.h.bf16 %v18030_v19  ;;  %v18031_v45 = vunpack.i.l.bf16 %v18030_v19  ;;  %v8316_v48 = vpop.f32.mrf.mxu0  ;;  %17219 = vmatprep.mubr.bf16.mxu1 %v18579_v62 }
 0x498   : > { %10691 = vst [vmem:[#allocation5 + $0x20] sm:$0xff] %v10687_v59  ;;  %v6690_v3 = vsel %vm6596_vm1, %v5545_v31, %v18027_v37  ;;  %v6689_v38 = vsel %vm6596_vm1, %v5544_v32, %v18026_v33  ;;  %v8395_v21 = vadd.f32 %v8316_v48, %v21286_v17  ;;  %v21479_v27 = vpop.f32.mrf.mxu1  ;;  %v8462_v11 = vmax.f32 %v8430_v44, 0.0  ;;  %v5546_v44 = vld [vmem:[#allocation2 + $0x2f0] sm:$0xff] }
 0x499   : > { %14907 = vst [vmem:[#allocation6] sm:$0xff] %v14906_v18   ;;  %v10690_v5 = vmax.f32 %v8460_v55, %v8464_v7  ;;  %v6794_v0 = vsel %vm6701_vm2, %v6689_v38, %v18031_v45  ;;  %v6795_v35 = vsel %vm6701_vm2, %v6690_v3, %v18032_v24  ;;  %v16974_v28 = vpop.f32.mrf.mxu0  ;;  %v21484_v2 = vadd.f32 %v21367_v49, %v8397_v10 }
 0x49a   : > { %v6899_v40 = vsel %vm6806_vm3, %v6794_v0, %v5544_v32  ;;  %v6900_v37 = vsel %vm6806_vm3, %v6795_v35, %v5545_v31  ;;  %v21489_v8 = vadd.f32 %v21367_v49, %v8395_v21  ;;  %v21491_v17 = vpop.f32.mrf.mxu1  ;;  %v18035_v26 = vpop.permute.xlu1 %18034  ;;  %v10688_v33 = vmax.f32 %v8458_v29, %v8462_v11 }
 0x49b   : > { %10694 = vst [vmem:[#allocation5 + $0x38] sm:$0xff] %v10690_v5  ;;  %v14876_v62 = vpack.c.bf16 %v6900_v37, %v6899_v40  ;;  %v8398_v41 = vadd.f32 %v16974_v28, %v21290_v34  ;;  %v18037_v61 = vunpack.i.h.bf16 %v18035_v26  ;;  %v8319_v39 = vpop.f32.mrf.mxu0  ;;  %v7988_v18 = vadd.f32 %v21298_v16, %v21296_v42 }
 0x49c   : > { %v7980_v55 = vadd.f32 %v21304_v23, %v21300_v36  ;;  %v18036_v59 = vunpack.i.l.bf16 %v18035_v26  ;;  %v21498_v10 = vpop.f32.mrf.mxu1  ;;  %v18581_v19 = vld [vmem:[#allocation3 + $0x168] sm:$0xff]   ;;  %v7991_v7 = vadd.f32 %v21312_v47, %v21308_v30  ;;  %v7983_v32 = vadd.f32 %v21316_v43, %v21314_v4  ;;  %10692 = vst [vmem:[#allocation5 + $0x28] sm:$0xff] %v10688_v33  ;;  %v5547_v30 = vld [vmem:[#allocation2 + $0x2f8] sm:$0xff] }
 0x49d   : > { %15056 = vst [vmem:[#allocation3 + $0x170] sm:$0xff] %v14876_v62   ;;  %v21505_v34 = vadd.f32 %v21367_v49, %v8398_v41  ;;  %v8396_v31 = vadd.f32 %v8319_v39, %v7967_v60  ;;  %v16977_v42 = vpop.f32.mrf.mxu0  ;;  %v21509_v16 = vadd.f32 %v21332_v46, %v21330_v51  ;;  %v21513_v36 = vadd.f32 %v21336_v6, %v21334_v50 }
 0x49e   : > { %v8467_v23 = vmax.f32 %v21484_v2, 0.0  ;;  %v8401_v47 = vadd.f32 %v16977_v42, %v7988_v18  ;;  %v21516_v4 = vpop.f32.mrf.mxu1  ;;  %v18040_v43 = vpop.permute.xlu1 %18039  ;;  %17168 = vmatmul.mubr.bf16.gmra.mxu0 %v18581_v19  ;;  %17220 = vmatmul.mubr.bf16.gmra.mxu1 %v18581_v19  ;;  %v8465_v60 = vmax.f32 %v21489_v8, 0.0  ;;  %v6692_v24 = vsel %vm6596_vm1, %v5547_v30, %v18037_v61 }
 0x49f   : > { %v18042_v51 = vunpack.i.h.bf16 %v18040_v43  ;;  %v18041_v46 = vunpack.i.l.bf16 %v18040_v43  ;;  %v8332_v45 = vpop.f32.mrf.mxu0  ;;  %v6691_v50 = vsel %vm6596_vm1, %v5546_v44, %v18036_v59  ;;  %v11173_v38 = vrot.slane %v21463_v56, 1 }
 0x4a0   : > { %v8439_v6 = vadd.f32 %v21367_v49, %v8401_v47  ;;  %v8399_v48 = vadd.f32 %v8332_v45, %v7980_v55  ;;  %v21522_v29 = vpop.f32.mrf.mxu1  ;;  %v11144_v3 = vld [vmem:[#allocation6] sm:$0xe]  ;;  %v8468_v21 = vmax.f32 %v21505_v34, 0.0  ;;  %v8434_v5 = vadd.f32 %v21367_v49, %v8396_v31 }
 0x4a1   : > { %v6796_v11 = vsel %vm6701_vm2, %v6691_v50, %v18041_v46  ;;  %v6797_v0 = vsel %vm6701_vm2, %v6692_v24, %v18042_v51  ;;  %v16978_v35 = vpop.f32.mrf.mxu0  ;;  %v11145_v55 = vunpack.c.l.bf16 %v11144_v3  ;;  %v5549_v46 = vld [vmem:[#allocation2 + $0x308] sm:$0xff] }
 0x4a2   : > { %v10861_v28 = vld [vmem:[#allocation5 + $0x30] ss:$2 sm:$0xff]  ;;  %v10909_v2 = vld [vmem:[#allocation5 + $0x31] ss:$2 sm:$0xff]  ;;  %v8471_v40 = vmax.f32 %v8439_v6, 0.0  ;;  %v6901_v37 = vsel %vm6806_vm3, %v6796_v11, %v5546_v44  ;;  %v6902_v8 = vsel %vm6806_vm3, %v6797_v0, %v5547_v30  ;;  %v8437_v26 = vadd.f32 %v21367_v49, %v8399_v48  ;;  %v21532_v33 = vpop.f32.mrf.mxu1  ;;  %v18045_v62 = vpop.permute.xlu0 %18044 }
 0x4a3   : > { %v14881_v41 = vpack.c.bf16 %v6902_v8, %v6901_v37  ;;  %v8402_v61 = vadd.f32 %v16978_v35, %v7991_v7  ;;  %v18047_v39 = vunpack.i.h.bf16 %v18045_v62  ;;  %v8335_v18 = vpop.f32.mrf.mxu0  ;;  %v10859_v59 = vld [vmem:[#allocation5 + $0x20] ss:$2 sm:$0xff]  ;;  %v10907_v19 = vld [vmem:[#allocation5 + $0x21] ss:$2 sm:$0xff]  ;;  %v18046_v42 = vunpack.i.l.bf16 %v18045_v62  ;;  %v5548_v0 = vld [vmem:[#allocation2 + $0x300] sm:$0xff] }
 0x4a4   : > { %v10705_v34 = vmax.f32 %v8467_v23, %v8471_v40  ;;  %v8469_v31 = vmax.f32 %v8437_v26, 0.0  ;;  %v8400_v47 = vadd.f32 %v8335_v18, %v7983_v32  ;;  %v21534_v43 = vpop.f32.mrf.mxu1  ;;  %v18583_v30 = vld [vmem:[#allocation3 + $0x170] sm:$0xff]   ;;  %v21536_v44 = vmax.f32 %v10861_v28, %v10909_v2 }
 0x4a5   : > { %v21538_v24 = vmax.f32 %v10859_v59, %v10907_v19  ;;  %v8466_v51 = vmax.f32 %v8434_v5, 0.0  ;;  %15057 = vst [vmem:[#allocation3 + $0x178] sm:$0xff] %v14881_v41   ;;  %v8440_v7 = vadd.f32 %v21367_v49, %v8402_v61  ;;  %v16981_v45 = vpop.f32.mrf.mxu0  ;;  %v6694_v23 = vsel %vm6596_vm1, %v5549_v46, %v18047_v39  ;;  %17171 = vmatprep.mubr.bf16.mxu0 %v18583_v30  ;;  %v22683_v37 = vld [vmem:[#allocation13_spill] sm:$0xff] }
 0x4a6   : > { %10709 = vst [vmem:[#allocation5 + $0x50] sm:$0xff] %v10705_v34  ;;  %v10703_v50 = vmax.f32 %v8465_v60, %v8469_v31  ;;  %v8438_v6 = vadd.f32 %v21367_v49, %v8400_v47  ;;  %v8405_v32 = vadd.f32 %v16981_v45, %v21318_v54  ;;  %v21544_v48 = vpop.f32.mrf.mxu1  ;;  %v18050_v3 = vpop.permute.xlu0 %18049  ;;  %17223 = vmatprep.mubr.bf16.mxu1 %v18583_v30  ;;  %v11172_v26 = vrot.slane %v11145_v55, 1  ;;  %v22684_v47 = vld [vmem:[#allocation14_spill] sm:$0xff] }
 0x4a7   : > { %v14911_v5 = vpack.c.bf16 %v21536_v44, %v21538_v24  ;;  %v8472_v11 = vmax.f32 %v8440_v7, 0.0  ;;  %v18052_v35 = vunpack.i.h.bf16 %v18050_v3  ;;  %v18051_v28 = vunpack.i.l.bf16 %v18050_v3  ;;  %v8348_v2 = vpop.f32.mrf.mxu0 }
 0x4a8   : > { %10707 = vst [vmem:[#allocation5 + $0x40] sm:$0xff] %v10703_v50  ;;  %v6693_v60 = vsel %vm6596_vm1, %v5548_v0, %v18046_v42  ;;  %v8470_v40 = vmax.f32 %v8438_v6, 0.0  ;;  %v8403_v8 = vadd.f32 %v8348_v2, %v22683_v37  ;;  %v21550_v54 = vpop.f32.mrf.mxu1  ;;  %v21555_v59 = vadd.f32 %v21367_v49, %v8405_v32  ;;  %v22686_v50 = vld [vmem:[#allocation16_spill] sm:$0xff]  ;;  %v22687_v6 = vld [vmem:[#allocation17_spill] sm:$0xff]  ;;  %v22688_v32 = vld [vmem:[#allocation18_spill] sm:$0xff] }
 0x4a9   : > { %15062 = vst [vmem:[#allocation6 + $0x8] sm:$0xff] %v14911_v5   ;;  %v10706_v62 = vmax.f32 %v8468_v21, %v8472_v11  ;;  %v6798_v41 = vsel %vm6701_vm2, %v6693_v60, %v18051_v28  ;;  %v6799_v61 = vsel %vm6701_vm2, %v6694_v23, %v18052_v35  ;;  %v16982_v39 = vpop.f32.mrf.mxu0  ;;  %v8023_v3 = vadd.f32 %v22688_v32, %v22687_v6  ;;  %v22689_v35 = vld [vmem:[#allocation19_spill] sm:$0xff]  ;;  %v22690_v28 = vld [vmem:[#allocation20_spill] sm:$0xff] }
 0x4aa   : > { %v10704_v18 = vmax.f32 %v8466_v51, %v8470_v40  ;;  %v6903_v19 = vsel %vm6806_vm3, %v6798_v41, %v5548_v0  ;;  %v6904_v34 = vsel %vm6806_vm3, %v6799_v61, %v5549_v46  ;;  %v21559_v31 = vpop.f32.mrf.mxu1  ;;  %v18055_v42 = vpop.permute.xlu1 %18054  ;;  %v21562_v21 = vadd.f32 %v21367_v49, %v8403_v8  ;;  %v22685_v51 = vld [vmem:[#allocation15_spill] sm:$0xff]  ;;  %v5551_v61 = vld [vmem:[#allocation2 + $0x318] sm:$0xff] }
 0x4ab   : > { %10710 = vst [vmem:[#allocation5 + $0x58] sm:$0xff] %v10706_v62  ;;  %v14886_v55 = vpack.c.bf16 %v6904_v34, %v6903_v19  ;;  %v8406_v30 = vadd.f32 %v16982_v39, %v22684_v47  ;;  %v18057_v7 = vunpack.i.h.bf16 %v18055_v42  ;;  %v8351_v45 = vpop.f32.mrf.mxu0  ;;  %v8012_v23 = vadd.f32 %v22686_v50, %v22685_v51  ;;  %v5550_v34 = vld [vmem:[#allocation2 + $0x310] sm:$0xff] }
 0x4ac   : > { %10708 = vst [vmem:[#allocation5 + $0x48] sm:$0xff] %v10704_v18  ;;  %v18056_v46 = vunpack.i.l.bf16 %v18055_v42  ;;  %v21569_v5 = vpop.f32.mrf.mxu1  ;;  %v18585_v11 = vld [vmem:[#allocation3 + $0x178] sm:$0xff]   ;;  %v22663_v0 = vrot.slane %v21538_v24, 1  ;;  %v8015_v2 = vadd.f32 %v22690_v28, %v22689_v35  ;;  %v8404_v40 = vadd.f32 %v8351_v45, %v21509_v16 }
 0x4ad   : > { %15058 = vst [vmem:[#allocation3 + $0x180] sm:$0xff] %v14886_v55   ;;  %v21575_v60 = vadd.f32 %v21367_v49, %v8406_v30  ;;  %v16985_v37 = vpop.f32.mrf.mxu0  ;;  %v11174_v8 = vsel %vm11171_vm4, %v11172_v26, %v11173_v38  ;;  %v8475_v62 = vmax.f32 %v21555_v59, 0.0  ;;  %v8473_v41 = vmax.f32 %v21562_v21, 0.0  ;;  %17172 = vmatmul.mubr.bf16.gmra.mxu0 %v18585_v11  ;;  %17224 = vmatmul.mubr.bf16.gmra.mxu1 %v18585_v11 }
 0x4ae   : > { %v8409_v39 = vadd.f32 %v16985_v37, %v21513_v36  ;;  %v21584_v18 = vpop.f32.mrf.mxu1  ;;  %v18060_v19 = vpop.permute.xlu1 %18059  ;;  %v6696_v16 = vsel %vm6596_vm1, %v5551_v61, %v18057_v7  ;;  %v11176_v26 = vsel %vm11171_vm4, %v11173_v38, %v22663_v0  ;;  %v6695_v59 = vsel %vm6596_vm1, %v5550_v34, %v18056_v46 }
 0x4af   : > { %v18062_v42 = vunpack.i.h.bf16 %v18060_v19  ;;  %v18061_v55 = vunpack.i.l.bf16 %v18060_v19  ;;  %v8364_v47 = vpop.f32.mrf.mxu0  ;;  %v18083_v45 = vpack.i.bf16 %v11176_v26, %v11174_v8  ;;  %v8476_v51 = vmax.f32 %v21575_v60, 0.0 }
 0x4b0   : > { %v8447_v36 = vadd.f32 %v21367_v49, %v8409_v39  ;;  %v8407_v21 = vadd.f32 %v8364_v47, %v8012_v23  ;;  %v21594_v30 = vpop.f32.mrf.mxu1  ;;  %v21598_v7 = vadd.f32 %v21367_v49, %v8404_v40 }
 0x4b1   : > { %v6800_v50 = vsel %vm6701_vm2, %v6695_v59, %v18061_v55  ;;  %v6801_v6 = vsel %vm6701_vm2, %v6696_v16, %v18062_v42  ;;  %v16986_v32 = vpop.f32.mrf.mxu0  ;;  %18084 = vrot.lane.b32.xlu0 %v18083_v45, %s18805_s28  ;;  %v5553_v42 = vld [vmem:[#allocation2 + $0x328] sm:$0xff] }
 0x4b2   : > { %v10865_v11 = vld [vmem:[#allocation5 + $0x50] ss:$2 sm:$0xff]  ;;  %v10913_v38 = vld [vmem:[#allocation5 + $0x51] ss:$2 sm:$0xff]  ;;  %v8479_v35 = vmax.f32 %v8447_v36, 0.0  ;;  %v6905_v46 = vsel %vm6806_vm3, %v6800_v50, %v5550_v34  ;;  %v6906_v23 = vsel %vm6806_vm3, %v6801_v6, %v5551_v61  ;;  %v8445_v28 = vadd.f32 %v21367_v49, %v8407_v21  ;;  %v21605_v37 = vpop.f32.mrf.mxu1  ;;  %v18065_v60 = vpop.permute.xlu0 %18064 }
 0x4b3   : > { %v21608_v40 = vmax.f32 %v10865_v11, %v10913_v38  ;;  %v10863_v8 = vld [vmem:[#allocation5 + $0x40] ss:$2 sm:$0xff]  ;;  %v10911_v39 = vld [vmem:[#allocation5 + $0x41] ss:$2 sm:$0xff]  ;;  %v14891_v19 = vpack.c.bf16 %v6906_v23, %v6905_v46  ;;  %v8410_v16 = vadd.f32 %v16986_v32, %v8023_v3  ;;  %v18067_v55 = vunpack.i.h.bf16 %v18065_v60  ;;  %v8367_v47 = vpop.f32.mrf.mxu0  ;;  %v5552_v6 = vld [vmem:[#allocation2 + $0x320] sm:$0xff] }
 0x4b4   : > { %v21610_v26 = vmax.f32 %v10863_v8, %v10911_v39  ;;  %v10721_v34 = vmax.f32 %v8475_v62, %v8479_v35  ;;  %v8477_v61 = vmax.f32 %v8445_v28, 0.0  ;;  %v18066_v59 = vunpack.i.l.bf16 %v18065_v60  ;;  %v21612_v36 = vpop.f32.mrf.mxu1  ;;  %v18587_v21 = vld [vmem:[#allocation3 + $0x180] sm:$0xff]   ;;  %v22691_v46 = vld [vmem:[#allocation21_spill] sm:$0xff] }
 0x4b5   : > { %v8474_v50 = vmax.f32 %v21598_v7, 0.0  ;;  %15059 = vst [vmem:[#allocation3 + $0x188] sm:$0xff] %v14891_v19   ;;  %v8448_v45 = vadd.f32 %v21367_v49, %v8410_v16  ;;  %v6698_v11 = vsel %vm6596_vm1, %v5553_v42, %v18067_v55  ;;  %v8408_v3 = vadd.f32 %v8367_v47, %v8015_v2  ;;  %v17053_v32 = vpop.f32.mrf.mxu0  ;;  %17175 = vmatprep.mubr.bf16.mxu0 %v18587_v21 }
 0x4b6   : > { %v14916_v38 = vpack.c.bf16 %v21608_v40, %v21610_v26  ;;  %10725 = vst [vmem:[#allocation5 + $0x70] sm:$0xff] %v10721_v34  ;;  %v10719_v62 = vmax.f32 %v8473_v41, %v8477_v61  ;;  %v6697_v35 = vsel %vm6596_vm1, %v5552_v6, %v18066_v59  ;;  %v8989_v23 = vadd.f32 %v17053_v32, %v22691_v46  ;;  %v17101_v28 = vpop.f32.mrf.mxu1  ;;  %v18070_v60 = vpop.permute.xlu0 %18069  ;;  %v22692_v41 = vld [vmem:[#allocation22_spill] sm:$0xff] }
 0x4b7   : > { %v8480_v7 = vmax.f32 %v8448_v45, 0.0  ;;  %v8446_v8 = vadd.f32 %v21367_v49, %v8408_v3  ;;  %v18072_v39 = vunpack.i.h.bf16 %v18070_v60  ;;  %v18071_v19 = vunpack.i.l.bf16 %v18070_v60  ;;  %v18075_v16 = vpop.permute.xlu1 %18074  ;;  %v8980_v2 = vpop.f32.mrf.mxu0 }
 0x4b8   : > { %15063 = vst [vmem:[#allocation6 + $0x10] sm:$0xff] %v14916_v38   ;;  %10723 = vst [vmem:[#allocation5 + $0x60] sm:$0xff] %v10719_v62  ;;  %v9462_v55 = vadd.f32 %v17101_v28, %v8989_v23  ;;  %v18077_v47 = vunpack.i.h.bf16 %v18075_v16  ;;  %v18076_v34 = vunpack.i.l.bf16 %v18075_v16  ;;  %v8981_v61 = vadd.f32 %v8980_v2, %v22692_v41  ;;  %v9333_v59 = vpop.f32.mrf.mxu1  ;;  %v5554_v23 = vld [vmem:[#allocation2 + $0x330] sm:$0xff]  ;;  %v5555_v28 = vld [vmem:[#allocation2 + $0x338] sm:$0xff] }
 0x4b9   : > { %v10722_v0 = vmax.f32 %v8476_v51, %v8480_v7  ;;  %v8478_v32 = vmax.f32 %v8446_v8, 0.0  ;;  %v6802_v46 = vsel %vm6701_vm2, %v6697_v35, %v18071_v19  ;;  %v6803_v21 = vsel %vm6701_vm2, %v6698_v11, %v18072_v39  ;;  %v17054_v45 = vpop.f32.mrf.mxu0  ;;  %v18622_v11 = vld [vmem:[%s22658_s5 + $0x78] sm:$0xff]  }
 0x4ba   : > { %v6907_v3 = vsel %vm6806_vm3, %v6802_v46, %v5552_v6  ;;  %v6908_v60 = vsel %vm6806_vm3, %v6803_v21, %v5553_v42  ;;  %v17102_v56 = vpop.f32.mrf.mxu1  ;;  %v9460_v16 = vadd.f32 %v9333_v59, %v8981_v61  ;;  %v11177_v51 = vrot.slane %v21536_v44, 1  ;;  %v18591_v59 = vld [vmem:[#allocation3 + $0x120] sm:$0xff]   ;;  %17275 = vmatprep.subr.bf16.mxu1 %v18622_v11 }
 0x4bb   : > { %10726 = vst [vmem:[#allocation5 + $0x78] sm:$0xff] %v10722_v0  ;;  %v10720_v38 = vmax.f32 %v8474_v50, %v8478_v32  ;;  %v14896_v62 = vpack.c.bf16 %v6908_v60, %v6907_v3  ;;  %v18080_v2 = vpop.permute.xlu1 %18079  ;;  %v8983_v41 = vpop.f32.mrf.mxu0  ;;  %v21632_v35 = vadd.f32 %v21367_v49, %v9462_v55  ;;  %v8992_v42 = vadd.f32 %v17054_v45, %v21375_v52 }
 0x4bc   : > { %v18082_v6 = vunpack.i.h.bf16 %v18080_v2  ;;  %v18081_v0 = vunpack.i.l.bf16 %v18080_v2  ;;  %v9336_v50 = vpop.f32.mrf.mxu1  ;;  %v18589_v7 = vld [vmem:[#allocation3 + $0x188] sm:$0xff]   ;;  %v6699_v8 = vsel %vm6596_vm1, %v5554_v23, %v18076_v34  ;;  %v6700_v39 = vsel %vm6596_vm1, %v5555_v28, %v18077_v47  ;;  %17276 = vmatpush3.bf16.msra.mxu1 %v18622_v11 }
 0x4bd   : > { %10724 = vst [vmem:[#allocation5 + $0x68] sm:$0xff] %v10720_v38  ;;  %15060 = vst [vmem:[#allocation3 + $0x190] sm:$0xff] %v14896_v62   ;;  %v8984_v19 = vadd.f32 %v8983_v41, %v21383_v58  ;;  %v17057_v61 = vpop.f32.mrf.mxu0  ;;  %v21639_v55 = vadd.f32 %v21367_v49, %v9460_v16  ;;  %17176 = vmatmul.mubr.bf16.gmra.mxu0 %v18589_v7  ;;  %v9463_v45 = vadd.f32 %v17102_v56, %v8992_v42  ;;  %v22693_v38 = vld [vmem:[#allocation23_spill] sm:$0xff] }
 0x4be   : > { %v6804_v52 = vsel %vm6701_vm2, %v6699_v8, %v18081_v0  ;;  %v6805_v32 = vsel %vm6701_vm2, %v6700_v39, %v18082_v6  ;;  %v9005_v46 = vadd.f32 %v17057_v61, %v21392_v63  ;;  %v17105_v21 = vpop.f32.mrf.mxu1  ;;  %17243 = vmatprep.mubr.bf16.mxu0 %v18591_v59  ;;  %v18623_v2 = vld [vmem:[%s22658_s5 + $0x70] sm:$0xff]   ;;  %v22694_v56 = vrot.slane %v21538_v24, 1 }
 0x4bf   : > { %v6909_v34 = vsel %vm6806_vm3, %v6804_v52, %v5554_v23  ;;  %v6910_v47 = vsel %vm6806_vm3, %v6805_v32, %v5555_v28  ;;  %v8996_v58 = vpop.f32.mrf.mxu0  ;;  %v9461_v63 = vadd.f32 %v9336_v50, %v8984_v19  ;;  %v11179_v28 = vrot.slane %v21610_v26, 1  ;;  %17277 = vmatprep.subr.bf16.mxu1 %v18623_v2  ;;  %v21661_v19 = vld [vmem:[%s22657_s4] ss:$0 sm:$0xff]  ;;  %v18592_v52 = vld [vmem:[#allocation3 + $0x128] sm:$0xff]  }
 0x4c0   : > { %v14901_v3 = vpack.c.bf16 %v6910_v47, %v6909_v34  ;;  %v9466_v60 = vadd.f32 %v17105_v21, %v9005_v46  ;;  %v8997_v62 = vadd.f32 %v8996_v58, %v22693_v38  ;;  %v9349_v16 = vpop.f32.mrf.mxu1  ;;  %v11178_v23 = vsel %vm11171_vm4, %v22694_v56, %v11177_v51  ;;  %17278 = vmatpush3.bf16.msra.mxu1 %v18623_v2  ;;  %v18593_v47 = vld [vmem:[#allocation3 + $0x130] sm:$0xff]  }
 0x4c1   : > { %v17058_v41 = vpop.f32.mrf.mxu0  ;;  %v9526_v11 = vmax.f32 %v21632_v35, 0.0  ;;  %v9524_v50 = vmax.f32 %v21639_v55, 0.0  ;;  %v9495_v61 = vadd.f32 %v21661_v19, %v9463_v45 }
 0x4c2   : > { %v10869_v42 = vld [vmem:[#allocation5 + $0x70] ss:$2 sm:$0xff]  ;;  %v10917_v6 = vld [vmem:[#allocation5 + $0x71] ss:$2 sm:$0xff]  ;;  %15061 = vst [vmem:[#allocation3 + $0x198] sm:$0xff] %v14901_v3   ;;  %v9498_v0 = vadd.f32 %v21367_v49, %v9466_v60  ;;  %v9464_v7 = vadd.f32 %v9349_v16, %v8997_v62  ;;  %v9008_v8 = vadd.f32 %v17058_v41, %v21407_v22  ;;  %v17106_v39 = vpop.f32.mrf.mxu1  ;;  %v11180_v49 = vsel %vm11171_vm4, %v11177_v51, %v11179_v28  ;;  %v18624_v22 = vld [vmem:[%s22658_s5 + $0x68] sm:$0xff]  }
 0x4c3   : > { %v8999_v59 = vpop.f32.mrf.mxu0  ;;  %v21672_v58 = vmax.f32 %v10869_v42, %v10917_v6  ;;  %v9493_v51 = vadd.f32 %v21661_v19, %v9461_v63  ;;  %v18088_v38 = vpack.i.bf16 %v11180_v49, %v11178_v23  ;;  %v18603_v62 = vld [vmem:[%s22658_s5 + $0xb0] sm:$0xff]   ;;  %17279 = vmatprep.subr.bf16.mxu1 %v18624_v22  ;;  %v18625_v23 = vld [vmem:[%s22658_s5 + $0x60] sm:$0xff]  }
 0x4c4   : > { %v10867_v35 = vld [vmem:[#allocation5 + $0x60] ss:$2 sm:$0xff]  ;;  %v10915_v55 = vld [vmem:[#allocation5 + $0x61] ss:$2 sm:$0xff]  ;;  %v9530_v32 = vmax.f32 %v9498_v0, 0.0  ;;  %v9496_v46 = vadd.f32 %v21661_v19, %v9464_v7  ;;  %v9467_v21 = vadd.f32 %v17106_v39, %v9008_v8  ;;  %v9000_v34 = vadd.f32 %v8999_v59, %v21409_v14  ;;  %v9352_v45 = vpop.f32.mrf.mxu1  ;;  %v18736_v59 = vld [vmem:[%s22658_s5 + $0xb8] sm:$0xff]   ;;  %17280 = vmatpush3.bf16.msra.mxu1 %v18624_v22 }
 0x4c5   : > { %v21674_v3 = vmax.f32 %v10867_v35, %v10915_v55  ;;  %v17061_v60 = vpop.f32.mrf.mxu0  ;;  %17244 = vmatmul.mubr.bf16.vlgmr.msra.gmra.mxu0 %v18592_v52  ;;  %18089 = vrot.lane.b32.xlu1 %v18088_v38, %s18805_s28 }
 0x4c6   : > { %v10737_v16 = vmax.f32 %v9526_v11, %v9530_v32  ;;  %v9528_v2 = vmax.f32 %v9496_v46, 0.0  ;;  %v9499_v41 = vadd.f32 %v21661_v19, %v9467_v21  ;;  %v9465_v14 = vadd.f32 %v9352_v45, %v9000_v34  ;;  %v17109_v56 = vpop.f32.mrf.mxu1  ;;  %17247 = vmatprep.mubr.bf16.mxu0 %v18593_v47  ;;  %17348 = vmatpush3.bf16.msra.mxu0 %v18736_v59 }
 0x4c7   : > { %v14921_v42 = vpack.c.bf16 %v21672_v58, %v21674_v3  ;;  %v9021_v6 = vadd.f32 %v17061_v60, %v21413_v1  ;;  %v9012_v63 = vpop.f32.mrf.mxu0  ;;  %v9527_v11 = vmax.f32 %v9495_v61, 0.0  ;;  %17349 = vmatprep.subr.bf16.mxu0 %v18603_v62  ;;  %v18605_v61 = vld [vmem:[%s22658_s5 + $0xa8] sm:$0xff]   ;;  %17281 = vmatprep.subr.bf16.mxu1 %v18625_v23  ;;  %v11181_v32 = vrot.slane %v21608_v40, 1 }
 0x4c8   : > { %10741 = vst [vmem:[#allocation5 + $0x90] sm:$0xff] %v10737_v16  ;;  %v10735_v0 = vmax.f32 %v9524_v50, %v9528_v2  ;;  %v9531_v7 = vmax.f32 %v9499_v41, 0.0  ;;  %v9497_v8 = vadd.f32 %v21661_v19, %v9465_v14  ;;  %v9365_v39 = vpop.f32.mrf.mxu1  ;;  %v9013_v1 = vadd.f32 %v9012_v63, %v21419_v9  ;;  %v18626_v9 = vld [vmem:[%s22658_s5 + $0x58] sm:$0xff]   ;;  %v18595_v16 = vld [vmem:[#allocation3 + $0x140] sm:$0xff]   ;;  %v18607_v41 = vld [vmem:[%s22658_s5 + $0xa0] sm:$0xff]   ;;  %17282 = vmatpush3.bf16.msra.mxu1 %v18625_v23 }
 0x4c9   : > { %15064 = vst [vmem:[#allocation6 + $0x18] sm:$0xff] %v14921_v42   ;;  %v17062_v52 = vpop.f32.mrf.mxu0  ;;  %v9525_v50 = vmax.f32 %v9493_v51, 0.0  ;;  %v9470_v46 = vadd.f32 %v17109_v56, %v9021_v6  ;;  %v11183_v22 = vrot.slane %v21674_v3, 1  ;;  %v18594_v51 = vld [vmem:[#allocation3 + $0x138] sm:$0xff]   ;;  %17283 = vmatprep.subr.bf16.mxu1 %v18626_v9 }
 0x4ca   : > { %10739 = vst [vmem:[#allocation5 + $0x80] sm:$0xff] %v10735_v0  ;;  %v10738_v49 = vmax.f32 %v9527_v11, %v9531_v7  ;;  %v9529_v35 = vmax.f32 %v9497_v8, 0.0  ;;  %v17110_v55 = vpop.f32.mrf.mxu1  ;;  %v9024_v45 = vadd.f32 %v17062_v52, %v21425_v12  ;;  %17350 = vmatpush3.bf16.msra.mxu0 %v18603_v62  ;;  %v9468_v60 = vadd.f32 %v9365_v39, %v9013_v1 }
 0x4cb   : > { %v9015_v21 = vpop.f32.mrf.mxu0  ;;  %v11184_v2 = vsel %vm11171_vm4, %v11181_v32, %v11183_v22  ;;  %17351 = vmatprep.subr.bf16.mxu0 %v18605_v61  ;;  %v11182_v62 = vsel %vm11171_vm4, %v11179_v28, %v11181_v32  ;;  %v9502_v56 = vadd.f32 %v21661_v19, %v9470_v46 }
 0x4cc   : > { %10742 = vst [vmem:[#allocation5 + $0x98] sm:$0xff] %v10738_v49  ;;  %v10736_v34 = vmax.f32 %v9525_v50, %v9529_v35  ;;  %v9368_v47 = vpop.f32.mrf.mxu1  ;;  %v9016_v42 = vadd.f32 %v9015_v21, %v21435_v13  ;;  %v18093_v63 = vpack.i.bf16 %v11184_v2, %v11182_v62  ;;  %v9471_v11 = vadd.f32 %v17110_v55, %v9024_v45  ;;  %v18628_v13 = vld [vmem:[%s22658_s5 + $0x50] sm:$0xff]  }
 0x4cd   : > { %v17065_v38 = vpop.f32.mrf.mxu0  ;;  %17248 = vmatmul.mubr.bf16.gmra.mxu0 %v18594_v51  ;;  %v9500_v28 = vadd.f32 %v21661_v19, %v9468_v60  ;;  %17284 = vmatpush3.bf16.msra.mxu1 %v18626_v9  ;;  %v9534_v50 = vmax.f32 %v9502_v56, 0.0  ;;  %v18596_v45 = vld [vmem:[#allocation3 + $0x148] sm:$0xff]   ;;  %v18629_v9 = vld [vmem:[%s22658_s5 + $0x48] sm:$0xff]  }
 0x4ce   : > { %10740 = vst [vmem:[#allocation5 + $0x88] sm:$0xff] %v10736_v34  ;;  %v9037_v14 = vadd.f32 %v17065_v38, %v21444_v57  ;;  %17251 = vmatprep.mubr.bf16.mxu0 %v18595_v16  ;;  %17352 = vmatpush3.bf16.msra.mxu0 %v18605_v61  ;;  %v18609_v57 = vld [vmem:[%s22658_s5 + $0x98] sm:$0xff]   ;;  %v9469_v49 = vadd.f32 %v9368_v47, %v9016_v42 }
 0x4cf   : > { %v17113_v12 = vpop.f32.mrf.mxu1  ;;  %v9028_v6 = vpop.f32.mrf.mxu0  ;;  %18094 = vrot.lane.b32.xlu0 %v18093_v63, %s18805_s28  ;;  %17353 = vmatprep.subr.bf16.mxu0 %v18607_v41  ;;  %v9503_v55 = vadd.f32 %v21661_v19, %v9471_v11  ;;  %v9532_v38 = vmax.f32 %v9500_v28, 0.0 }
 0x4d0   : > { %v9474_v0 = vadd.f32 %v17113_v12, %v9037_v14  ;;  %v9029_v23 = vadd.f32 %v9028_v6, %v21450_v53  ;;  %17285 = vmatprep.subr.bf16.mxu1 %v18628_v13  ;;  %v18597_v14 = vld [vmem:[#allocation3 + $0x150] sm:$0xff]   ;;  %v9501_v6 = vadd.f32 %v21661_v19, %v9469_v49 }
 0x4d1   : > { %v9381_v7 = vpop.f32.mrf.mxu1  ;;  %v17066_v8 = vpop.f32.mrf.mxu0  ;;  %17286 = vmatpush3.bf16.msra.mxu1 %v18628_v13 }
 0x4d2   : > { %v9506_v39 = vadd.f32 %v21661_v19, %v9474_v0  ;;  %v9472_v59 = vadd.f32 %v9381_v7, %v9029_v23  ;;  %v9040_v53 = vadd.f32 %v17066_v8, %v21461_v25  ;;  %17354 = vmatpush3.bf16.msra.mxu0 %v18607_v41  ;;  %v18611_v25 = vld [vmem:[%s22658_s5 + $0x90] sm:$0xff]   ;;  %17287 = vmatprep.subr.bf16.mxu1 %v18629_v9  ;;  %v9535_v7 = vmax.f32 %v9503_v55, 0.0  ;;  %v18598_v55 = vld [vmem:[#allocation3 + $0x158] sm:$0xff]  }
 0x4d3   : > { %v17114_v1 = vpop.f32.mrf.mxu1  ;;  %v10873_v52 = vld [vmem:[#allocation5 + $0x90] ss:$2 sm:$0xff]  ;;  %v10921_v61 = vld [vmem:[#allocation5 + $0x91] ss:$2 sm:$0xff]  ;;  %v9031_v35 = vpop.f32.mrf.mxu0  ;;  %17355 = vmatprep.subr.bf16.mxu0 %v18609_v57 }
 0x4d4   : > { %v9538_v32 = vmax.f32 %v9506_v39, 0.0  ;;  %v9504_v46 = vadd.f32 %v21661_v19, %v9472_v59  ;;  %v9475_v21 = vadd.f32 %v17114_v1, %v9040_v53  ;;  %v21733_v47 = vmax.f32 %v10873_v52, %v10921_v61  ;;  %v18613_v53 = vld [vmem:[%s22658_s5 + $0x88] sm:$0xff]  }
 0x4d5   : > { %v9384_v34 = vpop.f32.mrf.mxu1  ;;  %v10871_v51 = vld [vmem:[#allocation5 + $0x80] ss:$2 sm:$0xff]  ;;  %v10919_v60 = vld [vmem:[#allocation5 + $0x81] ss:$2 sm:$0xff]  ;;  %v9032_v16 = vadd.f32 %v9031_v35, %v21465_v15  ;;  %v17069_v2 = vpop.f32.mrf.mxu0  ;;  %17252 = vmatmul.mubr.bf16.gmra.mxu0 %v18596_v45  ;;  %v18630_v15 = vld [vmem:[%s22658_s5 + $0x40] sm:$0xff]   ;;  %17288 = vmatpush3.bf16.msra.mxu1 %v18629_v9  ;;  %v9533_v61 = vmax.f32 %v9501_v6, 0.0 }
 0x4d6   : > { %v21736_v12 = vmax.f32 %v10871_v51, %v10919_v60  ;;  %v10753_v41 = vmax.f32 %v9534_v50, %v9538_v32  ;;  %v9536_v62 = vmax.f32 %v9504_v46, 0.0  ;;  %v9507_v56 = vadd.f32 %v21661_v19, %v9475_v21  ;;  %17255 = vmatprep.mubr.bf16.mxu0 %v18597_v14  ;;  %17356 = vmatpush3.bf16.msra.mxu0 %v18609_v57  ;;  %v18599_v51 = vld [vmem:[#allocation3 + $0x160] sm:$0xff]   ;;  %v18615_v9 = vld [vmem:[%s22658_s5 + $0x80] sm:$0xff]  }
 0x4d7   : > { %v17117_v42 = vpop.f32.mrf.mxu1  ;;  %v9473_v63 = vadd.f32 %v9384_v34, %v9032_v16  ;;  %v9053_v11 = vadd.f32 %v17069_v2, %v21472_v20  ;;  %v9044_v0 = vpop.f32.mrf.mxu0  ;;  %17357 = vmatprep.subr.bf16.mxu0 %v18611_v25  ;;  %17289 = vmatprep.subr.bf16.mxu1 %v18630_v15  ;;  %v11185_v32 = vrot.slane %v21672_v58, 1 }
 0x4d8   : > { %v14926_v23 = vpack.c.bf16 %v21733_v47, %v21736_v12  ;;  %10757 = vst [vmem:[#allocation5 + $0xb0] sm:$0xff] %v10753_v41  ;;  %v10751_v28 = vmax.f32 %v9532_v38, %v9536_v62  ;;  %v9539_v8 = vmax.f32 %v9507_v56, 0.0  ;;  %v9045_v20 = vadd.f32 %v9044_v0, %v21479_v27 }
 0x4d9   : > { %v9397_v13 = vpop.f32.mrf.mxu1  ;;  %v9505_v39 = vadd.f32 %v21661_v19, %v9473_v63  ;;  %v17070_v59 = vpop.f32.mrf.mxu0  ;;  %v9478_v49 = vadd.f32 %v17117_v42, %v9053_v11  ;;  %v11187_v46 = vrot.slane %v21736_v12, 1  ;;  %17290 = vmatpush3.bf16.msra.mxu1 %v18630_v15 }
 0x4da   : > { %15065 = vst [vmem:[#allocation6 + $0x20] sm:$0xff] %v14926_v23   ;;  %10755 = vst [vmem:[#allocation5 + $0xa0] sm:$0xff] %v10751_v28  ;;  %v10754_v1 = vmax.f32 %v9535_v7, %v9539_v8  ;;  %v9056_v57 = vadd.f32 %v17070_v59, %v21491_v17  ;;  %17358 = vmatpush3.bf16.msra.mxu0 %v18611_v25  ;;  %v9476_v34 = vadd.f32 %v9397_v13, %v9045_v20 }
 0x4db   : > { %v17118_v52 = vpop.f32.mrf.mxu1  ;;  %v9537_v50 = vmax.f32 %v9505_v39, 0.0  ;;  %v9047_v35 = vpop.f32.mrf.mxu0  ;;  %17359 = vmatprep.subr.bf16.mxu0 %v18613_v53  ;;  %v9510_v17 = vadd.f32 %v21661_v19, %v9478_v49  ;;  %v11188_v2 = vsel %vm11171_vm4, %v11185_v32, %v11187_v46 }
 0x4dc   : > { %10758 = vst [vmem:[#allocation5 + $0xb8] sm:$0xff] %v10754_v1  ;;  %v9048_v16 = vadd.f32 %v9047_v35, %v21498_v10  ;;  %v9479_v14 = vadd.f32 %v17118_v52, %v9056_v57  ;;  %v9508_v42 = vadd.f32 %v21661_v19, %v9476_v34 }
 0x4dd   : > { %v9400_v27 = vpop.f32.mrf.mxu1  ;;  %v10752_v21 = vmax.f32 %v9533_v61, %v9537_v50  ;;  %v17073_v45 = vpop.f32.mrf.mxu0  ;;  %17256 = vmatmul.mubr.bf16.gmra.mxu0 %v18598_v55  ;;  %v9542_v7 = vmax.f32 %v9510_v17, 0.0  ;;  %v18602_v61 = vld [vmem:[#allocation3 + $0x170] sm:$0xff]  }
 0x4de   : > { %v9069_v60 = vadd.f32 %v17073_v45, %v21516_v4  ;;  %17259 = vmatprep.mubr.bf16.mxu0 %v18599_v51  ;;  %v11186_v4 = vsel %vm11171_vm4, %v11183_v22, %v11185_v32  ;;  %17360 = vmatpush3.bf16.msra.mxu0 %v18613_v53  ;;  %v9511_v22 = vadd.f32 %v21661_v19, %v9479_v14  ;;  %v18600_v53 = vld [vmem:[#allocation3 + $0x168] sm:$0xff]   ;;  %v9540_v1 = vmax.f32 %v9508_v42, 0.0 }
 0x4df   : > { %v17121_v38 = vpop.f32.mrf.mxu1  ;;  %10756 = vst [vmem:[#allocation5 + $0xa8] sm:$0xff] %v10752_v21  ;;  %v9060_v25 = vpop.f32.mrf.mxu0  ;;  %v18098_v10 = vpack.i.bf16 %v11188_v2, %v11186_v4  ;;  %17361 = vmatprep.subr.bf16.mxu0 %v18615_v9 }
 0x4e0   : > { %v9482_v41 = vadd.f32 %v17121_v38, %v9069_v60  ;;  %v9061_v62 = vadd.f32 %v9060_v25, %v21522_v29  ;;  %v9477_v29 = vadd.f32 %v9400_v27, %v9048_v16 }
 0x4e1   : > { %v9413_v56 = vpop.f32.mrf.mxu1  ;;  %v17074_v6 = vpop.f32.mrf.mxu0  ;;  %18099 = vrot.lane.b32.xlu1 %v18098_v10, %s18805_s28 }
 0x4e2   : > { %v9514_v63 = vadd.f32 %v21661_v19, %v9482_v41  ;;  %v9480_v11 = vadd.f32 %v9413_v56, %v9061_v62  ;;  %v9072_v0 = vadd.f32 %v17074_v6, %v21532_v33  ;;  %17362 = vmatpush3.bf16.msra.mxu0 %v18615_v9  ;;  %v9509_v45 = vadd.f32 %v21661_v19, %v9477_v29 }
 0x4e3   : > { %v17122_v15 = vpop.f32.mrf.mxu1  ;;  %v10877_v23 = vld [vmem:[#allocation5 + $0xb0] ss:$2 sm:$0xff]  ;;  %v9063_v28 = vpop.f32.mrf.mxu0  ;;  %v10925_v8 = vld [vmem:[#allocation5 + $0xb1] ss:$2 sm:$0xff]  ;;  %v9543_v9 = vmax.f32 %v9511_v22, 0.0 }
 0x4e4   : > { %v9546_v13 = vmax.f32 %v9514_v63, 0.0  ;;  %v9512_v39 = vadd.f32 %v21661_v19, %v9480_v11  ;;  %v9483_v20 = vadd.f32 %v17122_v15, %v9072_v0  ;;  %v9064_v33 = vadd.f32 %v9063_v28, %v21534_v43  ;;  %v18604_v63 = vld [vmem:[#allocation3 + $0x178] sm:$0xff]  }
 0x4e5   : > { %v9416_v59 = vpop.f32.mrf.mxu1  ;;  %v17077_v52 = vpop.f32.mrf.mxu0  ;;  %17260 = vmatmul.mubr.bf16.gmra.mxu0 %v18600_v53  ;;  %v21776_v21 = vmax.f32 %v10877_v23, %v10925_v8  ;;  %v9541_v56 = vmax.f32 %v9509_v45, 0.0  ;;  %v11189_v11 = vrot.slane %v21733_v47, 1 }
 0x4e6   : > { %v10875_v50 = vld [vmem:[#allocation5 + $0xa0] ss:$2 sm:$0xff]  ;;  %v10923_v49 = vld [vmem:[#allocation5 + $0xa1] ss:$2 sm:$0xff]  ;;  %v10769_v35 = vmax.f32 %v9542_v7, %v9546_v13  ;;  %v9544_v57 = vmax.f32 %v9512_v39, 0.0  ;;  %v9515_v27 = vadd.f32 %v21661_v19, %v9483_v20  ;;  %v9085_v55 = vadd.f32 %v17077_v52, %v21544_v48  ;;  %17263 = vmatprep.mubr.bf16.mxu0 %v18602_v61 }
 0x4e7   : > { %v17125_v32 = vpop.f32.mrf.mxu1  ;;  %v21778_v34 = vmax.f32 %v10875_v50, %v10923_v49  ;;  %v9481_v51 = vadd.f32 %v9416_v59, %v9064_v33  ;;  %v9076_v43 = vpop.f32.mrf.mxu0  ;;  %v18606_v7 = vld [vmem:[#allocation3 + $0x180] sm:$0xff]  }
 0x4e8   : > { %10773 = vst [vmem:[#allocation5 + $0xd0] sm:$0xff] %v10769_v35  ;;  %v10767_v60 = vmax.f32 %v9540_v1, %v9544_v57  ;;  %v9547_v38 = vmax.f32 %v9515_v27, 0.0  ;;  %v9486_v25 = vadd.f32 %v17125_v32, %v9085_v55  ;;  %v9077_v41 = vadd.f32 %v9076_v43, %v21550_v54  ;;  %v18608_v43 = vld [vmem:[#allocation3 + $0x188] sm:$0xff]  }
 0x4e9   : > { %v9429_v17 = vpop.f32.mrf.mxu1  ;;  %v14931_v16 = vpack.c.bf16 %v21776_v21, %v21778_v34  ;;  %v9513_v48 = vadd.f32 %v21661_v19, %v9481_v51  ;;  %v17078_v2 = vpop.f32.mrf.mxu0  ;;  %v11191_v29 = vrot.slane %v21778_v34, 1 }
 0x4ea   : > { %10771 = vst [vmem:[#allocation5 + $0xc0] sm:$0xff] %v10767_v60  ;;  %v10770_v14 = vmax.f32 %v9543_v9, %v9547_v38  ;;  %v9088_v6 = vadd.f32 %v17078_v2, %v21559_v31  ;;  %v9518_v15 = vadd.f32 %v21661_v19, %v9486_v25  ;;  %v9484_v54 = vadd.f32 %v9429_v17, %v9077_v41  ;;  %v18610_v60 = vld [vmem:[#allocation3 + $0x190] sm:$0xff]  }
 0x4eb   : > { %v17126_v62 = vpop.f32.mrf.mxu1  ;;  %15066 = vst [vmem:[#allocation6 + $0x28] sm:$0xff] %v14931_v16   ;;  %v9545_v4 = vmax.f32 %v9513_v48, 0.0  ;;  %v9079_v42 = vpop.f32.mrf.mxu0  ;;  %v11192_v13 = vsel %vm11171_vm4, %v11189_v11, %v11191_v29 }
 0x4ec   : > { %10774 = vst [vmem:[#allocation5 + $0xd8] sm:$0xff] %v10770_v14  ;;  %v9080_v22 = vadd.f32 %v9079_v42, %v21569_v5  ;;  %v9487_v39 = vadd.f32 %v17126_v62, %v9088_v6  ;;  %v9550_v1 = vmax.f32 %v9518_v15, 0.0  ;;  %v9516_v5 = vadd.f32 %v21661_v19, %v9484_v54  ;;  %v18614_v54 = vld [vmem:[#allocation6 + $0x8] sm:$0xff]  }
 0x4ed   : > { %v9432_v10 = vpop.f32.mrf.mxu1  ;;  %v10768_v0 = vmax.f32 %v9541_v56, %v9545_v4  ;;  %v17081_v23 = vpop.f32.mrf.mxu0  ;;  %17264 = vmatmul.mubr.bf16.gmra.mxu0 %v18604_v63  ;;  %v11193_v15 = vrot.slane %v21776_v21, 1 }
 0x4ee   : > { %v9101_v28 = vadd.f32 %v17081_v23, %v21584_v18  ;;  %17267 = vmatprep.mubr.bf16.mxu0 %v18606_v7  ;;  %v11190_v18 = vsel %vm11171_vm4, %v11187_v46, %v11189_v11  ;;  %v9485_v55 = vadd.f32 %v9432_v10, %v9080_v22  ;;  %v9519_v32 = vadd.f32 %v21661_v19, %v9487_v39  ;;  %v18612_v23 = vld [vmem:[#allocation3 + $0x198] sm:$0xff]  }
 0x4ef   : > { %v17129_v8 = vpop.f32.mrf.mxu1  ;;  %10772 = vst [vmem:[#allocation5 + $0xc8] sm:$0xff] %v10768_v0  ;;  %v9092_v31 = vpop.f32.mrf.mxu0  ;;  %v18103_v52 = vpack.i.bf16 %v11192_v13, %v11190_v18  ;;  %v18616_v13 = vld [vmem:[#allocation6 + $0x10] sm:$0xff]  }
 0x4f0   : > { %v9490_v20 = vadd.f32 %v17129_v8, %v9101_v28  ;;  %v9093_v59 = vadd.f32 %v9092_v31, %v21594_v30  ;;  %v9517_v62 = vadd.f32 %v21661_v19, %v9485_v55  ;;  %v9551_v4 = vmax.f32 %v9519_v32, 0.0 }
 0x4f1   : > { %v9445_v53 = vpop.f32.mrf.mxu1  ;;  %v17082_v33 = vpop.f32.mrf.mxu0  ;;  %18104 = vrot.lane.b32.xlu0 %v18103_v52, %s18805_s28  ;;  %v18618_v52 = vld [vmem:[#allocation6 + $0x20] sm:$0xff]  }
 0x4f2   : > { %v9522_v61 = vadd.f32 %v21661_v19, %v9490_v20  ;;  %v9488_v50 = vadd.f32 %v9445_v53, %v9093_v59  ;;  %v9104_v49 = vadd.f32 %v17082_v33, %v21605_v37  ;;  %v9548_v37 = vmax.f32 %v9516_v5, 0.0  ;;  %v18617_v20 = vld [vmem:[#allocation6 + $0x18] sm:$0xff]   ;;  %v18619_v5 = vld [vmem:[#allocation6 + $0x28] sm:$0xff]  }
 0x4f3   : > { %v17130_v35 = vpop.f32.mrf.mxu1  ;;  %v10881_v57 = vld [vmem:[#allocation5 + $0xd0] ss:$2 sm:$0xff]  ;;  %v10929_v27 = vld [vmem:[#allocation5 + $0xd1] ss:$2 sm:$0xff]  ;;  %v9095_v30 = vpop.f32.mrf.mxu0  ;;  %v9549_v11 = vmax.f32 %v9517_v62, 0.0 }
 0x4f4   : > { %v9554_v46 = vmax.f32 %v9522_v61, 0.0  ;;  %v9520_v45 = vadd.f32 %v21661_v19, %v9488_v50  ;;  %v9491_v51 = vadd.f32 %v17130_v35, %v9104_v49  ;;  %v9096_v9 = vadd.f32 %v9095_v30, %v21612_v36 }
 0x4f5   : > { %v9448_v2 = vpop.f32.mrf.mxu1  ;;  %17268 = vmatmul.mubr.bf16.gmra.mxu0 %v18608_v43  ;;  %v21806_v14 = vmax.f32 %v10881_v57, %v10929_v27  ;;  %v21834_v55 = vpop.f32.mrf.mxu0  ;;  %v18737_v43 = vld [vmem:[#allocation6] sm:$0xff] }
 0x4f6   : > { %v10879_v38 = vld [vmem:[#allocation5 + $0xc0] ss:$2 sm:$0xff]  ;;  %v10927_v17 = vld [vmem:[#allocation5 + $0xc1] ss:$2 sm:$0xff]  ;;  %v10785_v16 = vmax.f32 %v9550_v1, %v9554_v46  ;;  %v9552_v48 = vmax.f32 %v9520_v45, 0.0  ;;  %v9523_v25 = vadd.f32 %v21661_v19, %v9491_v51  ;;  %v9489_v56 = vadd.f32 %v9448_v2, %v9096_v9  ;;  %17271 = vmatprep.mubr.bf16.mxu0 %v18610_v60 }
 0x4f7   : > { %v21808_v41 = vmax.f32 %v10879_v38, %v10927_v17  ;;  %v11197_v33 = vrot.slane %v21806_v14, 1  ;;  %v21836_v30 = vpop.f32.mrf.mxu0  ;;  %v14965_v9 = vunpack.c.l.bf16 %v18737_v43  ;;  %v22695_v38 = vld [vmem:[#allocation24_spill] sm:$0xff] }
 0x4f8   : > { %10789 = vst [vmem:[#allocation5 + $0xf0] sm:$0xff] %v10785_v16  ;;  %v10783_v36 = vmax.f32 %v9548_v37, %v9552_v48  ;;  %v9555_v42 = vmax.f32 %v9523_v25, 0.0  ;;  %v9521_v10 = vadd.f32 %v21661_v19, %v9489_v56  ;;  %v11194_v19 = vsel %vm11171_vm4, %v11191_v29, %v11193_v15 }
 0x4f9   : > { %v14936_v6 = vpack.c.bf16 %v21806_v14, %v21808_v41  ;;  %v11195_v28 = vrot.slane %v21808_v41, 1  ;;  %v21838_v32 = vpop.f32.mrf.mxu0 }
 0x4fa   : > { %10787 = vst [vmem:[#allocation5 + $0xe0] sm:$0xff] %v10783_v36  ;;  %v10786_v63 = vmax.f32 %v9551_v4, %v9555_v42  ;;  %v9553_v0 = vmax.f32 %v9521_v10, 0.0  ;;  %v18675_v10 = vld [vmem:[#allocation6 + $0x20] sm:$0xff]  }
 0x4fb   : > { %15067 = vst [vmem:[#allocation6 + $0x30] sm:$0xff] %v14936_v6   ;;  %v11196_v8 = vsel %vm11171_vm4, %v11193_v15, %v11195_v28  ;;  %v11198_v50 = vsel %vm11171_vm4, %v11195_v28, %v11197_v33  ;;  %v21840_v60 = vpop.f32.mrf.mxu0 }
 0x4fc   : > { %10790 = vst [vmem:[#allocation5 + $0xf8] sm:$0xff] %v10786_v63  ;;  %v10784_v7 = vmax.f32 %v9549_v11, %v9553_v0  ;;  %v18108_v22 = vpack.i.bf16 %v11196_v8, %v11194_v19 }
 0x4fd   : > { %17272 = vmatmul.mubr.bf16.gmra.mxu0 %v18612_v23  ;;  %v21845_v25 = vpop.f32.mrf.mxu0 }
 0x4fe   : > { %10788 = vst [vmem:[#allocation5 + $0xe8] sm:$0xff] %v10784_v7  ;;  %17363 = vmatprep.mubr.bf16.mxu0 %v18614_v54  ;;  %18109 = vrot.lane.b32.xlu1 %v18108_v22, %s18805_s28 }
 0x4ff   : > { %v21847_v42 = vpop.f32.mrf.mxu0 }
 0x501   : > { %v21853_v0 = vpop.f32.mrf.mxu0 }
 0x502   : > { %v18620_v57 = vld [vmem:[#allocation6 + $0x30] sm:$0xff]  }
 0x503   : > { %v10885_v31 = vld [vmem:[#allocation5 + $0xf0] ss:$2 sm:$0xff]  ;;  %v10933_v39 = vld [vmem:[#allocation5 + $0xf1] ss:$2 sm:$0xff]  ;;  %v21857_v7 = vpop.f32.mrf.mxu0 }
 0x504   : > { %v21821_v18 = vmax.f32 %v10885_v31, %v10933_v39 }
 0x505   : > { %v10883_v59 = vld [vmem:[#allocation5 + $0xe0] ss:$2 sm:$0xff]  ;;  %v10931_v53 = vld [vmem:[#allocation5 + $0xe1] ss:$2 sm:$0xff]  ;;  %17364 = vmatmul.mubr.bf16.vlgmr.msra.gmra.mxu0 %v18616_v13 }
 0x506   : > { %17367 = vmatprep.mubr.bf16.mxu0 %v18617_v20  ;;  %v21823_v1 = vmax.f32 %v10883_v59, %v10931_v53 }
 0x508   : > { %v14941_v29 = vpack.c.bf16 %v21821_v18, %v21823_v1  ;;  %v22665_v61 = vrot.slane %v21823_v1, 1 }
 0x50a   : > { %15068 = vst [vmem:[#allocation6 + $0x38] sm:$0xff] %v14941_v29   ;;  %v11200_v49 = vsel %vm11171_vm4, %v11197_v33, %v22665_v61 }
 0x50b   : > { %v18113_v35 = vpack.i.bf16 %v11200_v49, %v11198_v50 }
 0x50d   : > { %17368 = vmatmul.mubr.bf16.gmra.mxu0 %v18618_v52  ;;  %18114 = vrot.lane.b32.xlu0 %v18113_v35, %s18805_s28 }
 0x50e   : > { %17371 = vmatprep.mubr.bf16.mxu0 %v18619_v5 }
 0x511   : > { %v18621_v27 = vld [vmem:[#allocation6 + $0x38] sm:$0xff]  }
 0x515   : > { %17372 = vmatmul.mubr.bf16.gmra.mxu0 %v18620_v57 }
 0x516   : > { %17375 = vmatprep.mubr.bf16.mxu0 %v18621_v27  ;;  %v18637_v27 = vld [vmem:[%s22658_s5 + $0x138] sm:$0xff]  }
 0x517   : > { %17419 = vmatprep.subr.bf16.mxu0 %v18637_v27 }
 0x518   : > { %17420 = vmatpush3.bf16.msra.mxu0 %v18637_v27 }
 0x523   : > { %v18085_v46 = vpop.permute.xlu0 %18084 }
 0x524   : > { %v18087_v45 = vunpack.i.h.bf16 %v18085_v46  ;;  %v18086_v51 = vunpack.i.l.bf16 %v18085_v46 }
 0x526   : > { %v11297_v17 = vsel %vm6701_vm2, %v22695_v38, %v18087_v45  ;;  %v11296_v37 = vsel %vm6701_vm2, %v14965_v9, %v18086_v51 }
 0x527   : > { %v14619_v16 = vpack.c.bf16 %v11297_v17, %v11297_v17  ;;  %v14618_v48 = vpack.c.bf16 %v11296_v37, %v11296_v37  ;;  %v18638_v37 = vld [vmem:[%s22658_s5 + $0x130] sm:$0xff]  }
 0x528   : > { %17421 = vmatprep.subr.bf16.mxu0 %v18638_v37 }
 0x529   : > { %v11401_v2 = vshrl.u32 %v14618_v48, 16  ;;  %v11404_v62 = vshll.u32 %v14618_v48, 16  ;;  %v11410_v56 = vshll.u32 %v14619_v16, 16  ;;  %v11414_v23 = vshrl.u32 %v14619_v16, 16  ;;  %17422 = vmatpush3.bf16.msra.mxu0 %v18638_v37 }
 0x52b   : > { %v11403_v4 = vrot.slane %v11401_v2, 4  ;;  %v11406_v36 = vrot.slane %v11404_v62, 5  ;;  %v11412_v63 = vrot.slane %v11410_v56, 5  ;;  %v11416_v28 = vrot.slane %v11414_v23, 4 }
 0x52d   : > { %v11407_v6 = vor.u32 %v11406_v36, %v11403_v4  ;;  %v11417_v20 = vor.u32 %v11416_v28, %v11412_v63 }
 0x52e   : > { %v21859_v54 = vpop.f32.mrf.mxu0 }
 0x52f   : > { %v11408_v11 = vrot.slane %v11407_v6, 4  ;;  %v11418_v49 = vrot.slane %v11417_v20, 4 }
 0x530   : > { %v21861_v31 = vpop.f32.mrf.mxu0 }
 0x531   : > { %v11413_v15 = vsel %vm21849_vm7, %v11408_v11, %v11412_v63  ;;  %v18640_v11 = vld [vmem:[%s22658_s5 + $0x128] sm:$0xff]  }
 0x532   : > { %11668 = vst [vmem:[#allocation7] sm:$0xf] %v11413_v15  ;;  %v21867_v50 = vpop.f32.mrf.mxu0  ;;  %17423 = vmatprep.subr.bf16.mxu0 %v18640_v11 }
 0x533   : > { %17424 = vmatpush3.bf16.msra.mxu0 %v18640_v11 }
 0x534   : > { %v21874_v43 = vpop.f32.mrf.mxu0 }
 0x537   : > { %v18090_v19 = vpop.permute.xlu1 %18089 }
 0x538   : > { %v18092_v8 = vunpack.i.h.bf16 %v18090_v19  ;;  %v18091_v22 = vunpack.i.l.bf16 %v18090_v19 }
 0x53a   : > { %v11299_v13 = vsel %vm6701_vm2, %v21536_v44, %v18092_v8  ;;  %v11298_v39 = vsel %vm6701_vm2, %v21538_v24, %v18091_v22 }
 0x53b   : > { %v14621_v59 = vpack.c.bf16 %v11299_v13, %v11299_v13  ;;  %v14620_v53 = vpack.c.bf16 %v11298_v39, %v11298_v39  ;;  %v18641_v13 = vld [vmem:[%s22658_s5 + $0x120] sm:$0xff]  }
 0x53c   : > { %17425 = vmatprep.subr.bf16.mxu0 %v18641_v13 }
 0x53d   : > { %v11430_v29 = vshll.u32 %v14621_v59, 16  ;;  %v11434_v33 = vshrl.u32 %v14621_v59, 16  ;;  %v11420_v52 = vshll.u32 %v14620_v53, 16  ;;  %v11424_v5 = vshrl.u32 %v14620_v53, 16  ;;  %17426 = vmatpush3.bf16.msra.mxu0 %v18641_v13  ;;  %v21899_v53 = vpop.f32.mrf.mxu1 }
 0x53e   : > { %v21879_v16 = vpop.f32.mrf.mxu0 }
 0x53f   : > { %v11422_v35 = vrot.slane %v11420_v52, 5  ;;  %v11426_v57 = vrot.slane %v11424_v5, 4  ;;  %v11432_v44 = vrot.slane %v11430_v29, 5  ;;  %v11436_v46 = vrot.slane %v11434_v33, 4  ;;  %v18642_v52 = vld [vmem:[%s22658_s5 + $0x118] sm:$0xff]  }
 0x540   : > { %v21890_v15 = vpop.f32.mrf.mxu0  ;;  %17427 = vmatprep.subr.bf16.mxu0 %v18642_v52 }
 0x541   : > { %v11423_v24 = vsel %vm21849_vm7, %v11418_v49, %v11422_v35  ;;  %v11427_v45 = vor.u32 %v11426_v57, %v11422_v35  ;;  %v18095_v51 = vpop.permute.xlu0 %18094  ;;  %v11437_v62 = vor.u32 %v11436_v46, %v11432_v44  ;;  %17428 = vmatpush3.bf16.msra.mxu0 %v18642_v52  ;;  %v21910_v35 = vpop.f32.mrf.mxu1  ;;  %v18643_v46 = vld [vmem:[%s22658_s5 + $0x110] sm:$0xff]  }
 0x542   : > { %11669 = vst [vmem:[#allocation7 + $0x4] sm:$0xf] %v11423_v24  ;;  %v18097_v9 = vunpack.i.h.bf16 %v18095_v51  ;;  %v18096_v38 = vunpack.i.l.bf16 %v18095_v51  ;;  %v21897_v39 = vpop.f32.mrf.mxu0  ;;  %17429 = vmatprep.subr.bf16.mxu0 %v18643_v46 }
 0x543   : > { %v11428_v17 = vrot.slane %v11427_v45, 4 }
 0x544   : > { %v11301_v48 = vsel %vm6701_vm2, %v21608_v40, %v18097_v9  ;;  %v11300_v2 = vsel %vm6701_vm2, %v21610_v26, %v18096_v38  ;;  %v11438_v40 = vrot.slane %v11437_v62, 4  ;;  %v21906_v5 = vpop.f32.mrf.mxu0  ;;  %v18645_v62 = vld [vmem:[%s22658_s5 + $0x108] sm:$0xff]  }
 0x545   : > { %v11433_v56 = vsel %vm21849_vm7, %v11428_v17, %v11432_v44  ;;  %v14623_v4 = vpack.c.bf16 %v11301_v48, %v11301_v48  ;;  %v14622_v36 = vpack.c.bf16 %v11300_v2, %v11300_v2  ;;  %17430 = vmatpush3.bf16.msra.mxu0 %v18643_v46  ;;  %v21921_v17 = vpop.f32.mrf.mxu1 }
 0x546   : > { %11670 = vst [vmem:[#allocation7 + $0x8] sm:$0xf] %v11433_v56  ;;  %v18647_v56 = vld [vmem:[%s22658_s5 + $0x100] sm:$0xff]   ;;  %17431 = vmatprep.subr.bf16.mxu0 %v18645_v62 }
 0x547   : > { %v11440_v6 = vshll.u32 %v14622_v36, 16  ;;  %v11444_v63 = vshrl.u32 %v14622_v36, 16  ;;  %v11450_v23 = vshll.u32 %v14623_v4, 16  ;;  %v11454_v29 = vshrl.u32 %v14623_v4, 16 }
 0x548   : > { %v18807_v4 = vmov 0  }
 0x549   : > { %v11442_v26 = vrot.slane %v11440_v6, 5  ;;  %v11446_v28 = vrot.slane %v11444_v63, 4  ;;  %v18627_v19 = vld [vmem:[#allocation7] sm:$0xff]   ;;  %v11452_v20 = vrot.slane %v11450_v23, 5  ;;  %v11456_v57 = vrot.slane %v11454_v29, 4  ;;  %17432 = vmatpush3.bf16.msra.mxu0 %v18645_v62  ;;  %v21931_v6 = vpop.f32.mrf.mxu1 }
 0x54a   : > { %17291 = vmatprep.mubr.bf16.mxu1 %v18627_v19  ;;  %332 = vst [vmem:[#allocation6 + $0x60] sm:$0xf] %v18807_v4  ;;  %17433 = vmatprep.subr.bf16.mxu0 %v18647_v56 }
 0x54b   : > { %v11443_v8 = vsel %vm21849_vm7, %v11438_v40, %v11442_v26  ;;  %v11447_v22 = vor.u32 %v11446_v28, %v11442_v26  ;;  %v11457_v37 = vor.u32 %v11456_v57, %v11452_v20 }
 0x54c   : > { %11671 = vst [vmem:[#allocation7 + $0xc] sm:$0xf] %v11443_v8  ;;  %v21937_v8 = vpop.f32.mrf.mxu1 }
 0x54d   : > { %v11448_v59 = vrot.slane %v11447_v22, 4  ;;  %v11458_v63 = vrot.slane %v11457_v37, 4  ;;  %17434 = vmatpush3.bf16.msra.mxu0 %v18647_v56 }
 0x54e   : > { %v21908_v49 = vpop.f32.mrf.mxu0  ;;  %v21946_v52 = vpop.f32.mrf.mxu1 }
 0x54f   : > { %v11453_v33 = vsel %vm21849_vm7, %v11448_v59, %v11452_v20  ;;  %v21939_v59 = vld [vmem:[#allocation2 + $0x340] sm:$0xff] }
 0x550   : > { %11672 = vst [vmem:[#allocation7 + $0x10] sm:$0xf] %v11453_v33  ;;  %v21915_v51 = vpop.f32.mrf.mxu0  ;;  %22698 = vst [vmem:[#allocation13_spill] sm:$0xff] %v21939_v59  ;;  %17491 = vmatprep.subr.bf16.mxu0 %v21939_v59  ;;  %v21954_v37 = vpop.f32.mrf.mxu1 }
 0x553   : > { %v18100_v27 = vpop.permute.xlu1 %18099  ;;  %v18631_v44 = vld [vmem:[#allocation7 + $0x8] sm:$0xff]  }
 0x554   : > { %v18102_v24 = vunpack.i.h.bf16 %v18100_v27  ;;  %v18101_v45 = vunpack.i.l.bf16 %v18100_v27  ;;  %17292 = vmatmul.mubr.bf16.vlgmr.msra.gmra.mxu1 %v18631_v44 }
 0x556   : > { %v11303_v9 = vsel %vm6701_vm2, %v21672_v58, %v18102_v24  ;;  %v11302_v38 = vsel %vm6701_vm2, %v21674_v3, %v18101_v45  ;;  %v21929_v3 = vpop.f32.mrf.mxu0 }
 0x557   : > { %v14625_v48 = vpack.c.bf16 %v11303_v9, %v11303_v9  ;;  %v14624_v2 = vpack.c.bf16 %v11302_v38, %v11302_v38 }
 0x558   : > { %v21935_v19 = vpop.f32.mrf.mxu0 }
 0x559   : > { %v11460_v58 = vshll.u32 %v14624_v2, 16  ;;  %v11464_v36 = vshrl.u32 %v14624_v2, 16  ;;  %v11470_v11 = vshll.u32 %v14625_v48, 16  ;;  %v11474_v13 = vshrl.u32 %v14625_v48, 16 }
 0x55b   : > { %v11462_v40 = vrot.slane %v11460_v58, 5  ;;  %v11466_v23 = vrot.slane %v11464_v36, 4  ;;  %v11472_v22 = vrot.slane %v11470_v11, 5  ;;  %v11476_v57 = vrot.slane %v11474_v13, 4  ;;  %v21958_v36 = vpop.f32.mrf.mxu1 }
 0x55d   : > { %v11463_v26 = vsel %vm21849_vm7, %v11458_v63, %v11462_v40  ;;  %v11467_v28 = vor.u32 %v11466_v23, %v11462_v40  ;;  %v11477_v48 = vor.u32 %v11476_v57, %v11472_v22 }
 0x55e   : > { %11673 = vst [vmem:[#allocation7 + $0x14] sm:$0xf] %v11463_v26  ;;  %v21942_v29 = vpop.f32.mrf.mxu0 }
 0x55f   : > { %v11468_v20 = vrot.slane %v11467_v28, 4  ;;  %v11478_v63 = vrot.slane %v11477_v48, 4 }
 0x560   : > { %v21948_v44 = vpop.f32.mrf.mxu0 }
 0x561   : > { %v11473_v33 = vsel %vm21849_vm7, %v11468_v20, %v11472_v22  ;;  %v21966_v22 = vpop.f32.mrf.mxu1 }
 0x562   : > { %11674 = vst [vmem:[#allocation7 + $0x18] sm:$0xf] %v11473_v33  ;;  %v21956_v56 = vpop.f32.mrf.mxu0 }
 0x563   : > { %v18105_v27 = vpop.permute.xlu0 %18104 }
 0x564   : > { %v18107_v46 = vunpack.i.h.bf16 %v18105_v27  ;;  %v18106_v24 = vunpack.i.l.bf16 %v18105_v27 }
 0x565   : > { %v18632_v45 = vld [vmem:[#allocation7 + $0x10] sm:$0xff]  }
 0x566   : > { %v11305_v9 = vsel %vm6701_vm2, %v21733_v47, %v18107_v46  ;;  %v11304_v38 = vsel %vm6701_vm2, %v21736_v12, %v18106_v24  ;;  %17295 = vmatprep.mubr.bf16.mxu1 %v18632_v45  ;;  %v21960_v47 = vpop.f32.mrf.mxu0  ;;  %v21972_v46 = vpop.f32.mrf.mxu1 }
 0x567   : > { %v14627_v2 = vpack.c.bf16 %v11305_v9, %v11305_v9  ;;  %v14626_v62 = vpack.c.bf16 %v11304_v38, %v11304_v38 }
 0x569   : > { %v11480_v4 = vshll.u32 %v14626_v62, 16  ;;  %v11484_v58 = vshrl.u32 %v14626_v62, 16  ;;  %v11490_v11 = vshll.u32 %v14627_v2, 16  ;;  %v11494_v20 = vshrl.u32 %v14627_v2, 16 }
 0x56b   : > { %v11482_v40 = vrot.slane %v11480_v4, 5  ;;  %v11486_v23 = vrot.slane %v11484_v58, 4  ;;  %v11492_v13 = vrot.slane %v11490_v11, 5  ;;  %v11496_v24 = vrot.slane %v11494_v20, 4  ;;  %v21980_v58 = vpop.f32.mrf.mxu1 }
 0x56d   : > { %v11483_v12 = vsel %vm21849_vm7, %v11478_v63, %v11482_v40  ;;  %v11487_v26 = vor.u32 %v11486_v23, %v11482_v40  ;;  %v21964_v28 = vpop.f32.mrf.mxu0  ;;  %v11497_v63 = vor.u32 %v11496_v24, %v11492_v13  ;;  %v21984_v20 = vpop.f32.mrf.mxu1 }
 0x56e   : > { %11675 = vst [vmem:[#allocation7 + $0x1c] sm:$0xf] %v11483_v12 }
 0x56f   : > { %v11488_v33 = vrot.slane %v11487_v26, 4  ;;  %v21970_v27 = vpop.f32.mrf.mxu0 }
 0x570   : > { %v18110_v45 = vpop.permute.xlu1 %18109 }
 0x571   : > { %v11493_v57 = vsel %vm21849_vm7, %v11488_v33, %v11492_v13  ;;  %v18112_v9 = vunpack.i.h.bf16 %v18110_v45  ;;  %v18111_v38 = vunpack.i.l.bf16 %v18110_v45  ;;  %v21974_v62 = vpop.f32.mrf.mxu0  ;;  %v11498_v33 = vrot.slane %v11497_v63, 4 }
 0x572   : > { %11676 = vst [vmem:[#allocation7 + $0x20] sm:$0xf] %v11493_v57  ;;  %22699 = vst [vmem:[#allocation14_spill] sm:$0xff] %v21974_v62 }
 0x573   : > { %v11307_v4 = vsel %vm6701_vm2, %v21776_v21, %v18112_v9  ;;  %v11306_v2 = vsel %vm6701_vm2, %v21778_v34, %v18111_v38  ;;  %v21982_v26 = vpop.f32.mrf.mxu0  ;;  %v21988_v9 = vpop.f32.mrf.mxu1 }
 0x574   : > { %v14629_v11 = vpack.c.bf16 %v11307_v4, %v11307_v4  ;;  %v14628_v40 = vpack.c.bf16 %v11306_v2, %v11306_v2  ;;  %22700 = vst [vmem:[#allocation15_spill] sm:$0xff] %v21982_v26 }
 0x575   : > { %v18633_v48 = vld [vmem:[#allocation7 + $0x18] sm:$0xff]   ;;  %v21996_v63 = vpop.f32.mrf.mxu1 }
 0x576   : > { %17296 = vmatmul.mubr.bf16.gmra.mxu1 %v18633_v48  ;;  %v11500_v23 = vshll.u32 %v14628_v40, 16  ;;  %v11504_v12 = vshrl.u32 %v14628_v40, 16  ;;  %v11510_v57 = vshll.u32 %v14629_v11, 16  ;;  %v11514_v34 = vshrl.u32 %v14629_v11, 16 }
 0x578   : > { %v11502_v45 = vrot.slane %v11500_v23, 5  ;;  %v11506_v61 = vrot.slane %v11504_v12, 4  ;;  %v11512_v48 = vrot.slane %v11510_v57, 5  ;;  %v11516_v40 = vrot.slane %v11514_v34, 4  ;;  %v22004_v57 = vpop.f32.mrf.mxu1 }
 0x57a   : > { %v11503_v13 = vsel %vm21849_vm7, %v11498_v33, %v11502_v45  ;;  %v11507_v24 = vor.u32 %v11506_v61, %v11502_v45  ;;  %v10064_v45 = vadd.f32 %v21899_v53, %v21834_v55 }
 0x57b   : > { %11677 = vst [vmem:[#allocation7 + $0x24] sm:$0xf] %v11503_v13  ;;  %v11517_v13 = vor.u32 %v11516_v40, %v11512_v48  ;;  %v22012_v40 = vpop.f32.mrf.mxu1 }
 0x57c   : > { %v11508_v4 = vrot.slane %v11507_v24, 4 }
 0x57d   : > { %v21986_v21 = vpop.f32.mrf.mxu0 }
 0x57e   : > { %22701 = vst [vmem:[#allocation16_spill] sm:$0xff] %v21986_v21  ;;  %v11513_v23 = vsel %vm21849_vm7, %v11508_v4, %v11512_v48 }
 0x57f   : > { %v21992_v38 = vpop.f32.mrf.mxu0  ;;  %11678 = vst [vmem:[#allocation7 + $0x28] sm:$0xf] %v11513_v23  ;;  %v18115_v11 = vpop.permute.xlu0 %18114 }
 0x580   : > { %22702 = vst [vmem:[#allocation17_spill] sm:$0xff] %v21992_v38  ;;  %v18117_v59 = vunpack.i.h.bf16 %v18115_v11  ;;  %v18116_v33 = vunpack.i.l.bf16 %v18115_v11  ;;  %v10056_v11 = vadd.f32 %v21910_v35, %v21836_v30  ;;  %v10067_v30 = vadd.f32 %v21921_v17, %v21838_v32 }
 0x581   : > { %v21994_v2 = vpop.f32.mrf.mxu0  ;;  %v10059_v35 = vadd.f32 %v21931_v6, %v21840_v60 }
 0x582   : > { %22703 = vst [vmem:[#allocation18_spill] sm:$0xff] %v21994_v2  ;;  %v11309_v24 = vsel %vm6701_vm2, %v21806_v14, %v18117_v59  ;;  %v11308_v34 = vsel %vm6701_vm2, %v21808_v41, %v18116_v33  ;;  %v18634_v4 = vld [vmem:[#allocation7 + $0x20] sm:$0xff]   ;;  %v11518_v14 = vrot.slane %v11517_v13, 4 }
 0x583   : > { %v22000_v12 = vpop.f32.mrf.mxu0  ;;  %v14631_v2 = vpack.c.bf16 %v11309_v24, %v11309_v24  ;;  %17299 = vmatprep.mubr.bf16.mxu1 %v18634_v4 }
 0x584   : > { %22704 = vst [vmem:[#allocation19_spill] sm:$0xff] %v22000_v12  ;;  %v14630_v12 = vpack.c.bf16 %v11308_v34, %v11308_v34 }
 0x585   : > { %v17245_v61 = vpop.f32.mrf.mxu0  ;;  %v11530_v55 = vshll.u32 %v14631_v2, 16  ;;  %v11534_v53 = vshrl.u32 %v14631_v2, 16  ;;  %v10080_v2 = vadd.f32 %v21937_v8, %v21845_v25  ;;  %v10072_v25 = vadd.f32 %v21946_v52, %v21847_v42 }
 0x586   : > { %v10537_v26 = vadd.f32 %v17245_v61, %v10064_v45  ;;  %v11520_v21 = vshll.u32 %v14630_v12, 16  ;;  %v11524_v48 = vshrl.u32 %v14630_v12, 16  ;;  %v22024_v12 = vpop.f32.mrf.mxu1  ;;  %v22029_v61 = vld [vmem:[%s22657_s4] ss:$0 sm:$0xff] }
 0x587   : > { %v10408_v23 = vpop.f32.mrf.mxu0  ;;  %v22014_v62 = vrot.slane %v11530_v55, 5  ;;  %v22016_v41 = vrot.slane %v11534_v53, 4 }
 0x588   : > { %v10535_v59 = vadd.f32 %v10408_v23, %v10056_v11  ;;  %v11522_v33 = vrot.slane %v11520_v21, 5  ;;  %v11526_v24 = vrot.slane %v11524_v48, 4  ;;  %v10569_v21 = vadd.f32 %v22029_v61, %v10537_v26  ;;  %v22041_v55 = vpop.f32.mrf.mxu1 }
 0x589   : > { %v17246_v38 = vpop.f32.mrf.mxu0  ;;  %v11537_v45 = vor.u32 %v22016_v41, %v22014_v62  ;;  %v10083_v26 = vadd.f32 %v21954_v37, %v21853_v0 }
 0x58a   : > { %v11523_v32 = vsel %vm21849_vm7, %v11518_v14, %v11522_v33  ;;  %v11527_v17 = vor.u32 %v11526_v24, %v11522_v33  ;;  %v10538_v6 = vadd.f32 %v17246_v38, %v10067_v30  ;;  %v10567_v13 = vadd.f32 %v22029_v61, %v10535_v59 }
 0x58b   : > { %v10411_v34 = vpop.f32.mrf.mxu0  ;;  %11679 = vst [vmem:[#allocation7 + $0x2c] sm:$0xf] %v11523_v32  ;;  %v10075_v14 = vadd.f32 %v21958_v36, %v21857_v7  ;;  %v10601_v42 = vmax.f32 %v10569_v21, 0.0 }
 0x58c   : > { %v11528_v4 = vrot.slane %v11527_v17, 4  ;;  %v10536_v23 = vadd.f32 %v10411_v34, %v10059_v35  ;;  %v10570_v59 = vadd.f32 %v22029_v61, %v10538_v6  ;;  %v10599_v24 = vmax.f32 %v10567_v13, 0.0  ;;  %v22052_v35 = vpop.f32.mrf.mxu1 }
 0x58d   : > { %v17249_v60 = vpop.f32.mrf.mxu0  ;;  %v10096_v13 = vadd.f32 %v21966_v22, %v21859_v54  ;;  %v10099_v54 = vadd.f32 %v21980_v58, %v21867_v50  ;;  %v10112_v22 = vadd.f32 %v21988_v9, %v21879_v16  ;;  %v10115_v16 = vadd.f32 %v22004_v57, %v21897_v39 }
 0x58e   : > { %v10541_v8 = vadd.f32 %v17249_v60, %v10080_v2  ;;  %v11533_v52 = vsel %vm21849_vm7, %v11528_v4, %v22014_v62  ;;  %v10568_v34 = vadd.f32 %v22029_v61, %v10536_v23  ;;  %v10602_v60 = vmax.f32 %v10570_v59, 0.0  ;;  %v22058_v23 = vpop.f32.mrf.mxu1 }
 0x58f   : > { %v10424_v11 = vpop.f32.mrf.mxu0  ;;  %11680 = vst [vmem:[#allocation7 + $0x30] sm:$0xf] %v11533_v52 }
 0x590   : > { %v10573_v53 = vadd.f32 %v22029_v61, %v10541_v8  ;;  %v10539_v48 = vadd.f32 %v10424_v11, %v10072_v25  ;;  %v10600_v11 = vmax.f32 %v10568_v34, 0.0  ;;  %v22062_v52 = vpop.f32.mrf.mxu1 }
 0x591   : > { %v17250_v38 = vpop.f32.mrf.mxu0 }
 0x592   : > { %v10605_v33 = vmax.f32 %v10573_v53, 0.0  ;;  %v10571_v0 = vadd.f32 %v22029_v61, %v10539_v48  ;;  %v10542_v37 = vadd.f32 %v17250_v38, %v10083_v26  ;;  %v18635_v17 = vld [vmem:[#allocation7 + $0x28] sm:$0xff]   ;;  %v10088_v48 = vadd.f32 %v21972_v46, %v21861_v31  ;;  %v22071_v46 = vpop.f32.mrf.mxu1 }
 0x593   : > { %v10427_v30 = vpop.f32.mrf.mxu0  ;;  %17300 = vmatmul.mubr.bf16.gmra.mxu1 %v18635_v17  ;;  %v10104_v31 = vadd.f32 %v21996_v63, %v21890_v15 }
 0x594   : > { %v10801_v7 = vmax.f32 %v10601_v42, %v10605_v33  ;;  %v10603_v36 = vmax.f32 %v10571_v0, 0.0  ;;  %v10574_v2 = vadd.f32 %v22029_v61, %v10542_v37  ;;  %v10540_v21 = vadd.f32 %v10427_v30, %v10075_v14 }
 0x595   : > { %v17253_v32 = vpop.f32.mrf.mxu0  ;;  %v10091_v30 = vadd.f32 %v21984_v20, %v21874_v43 }
 0x596   : > { %10805 = vst [vmem:[#allocation5 + $0x110] sm:$0xff] %v10801_v7  ;;  %v10799_v25 = vmax.f32 %v10599_v24, %v10603_v36  ;;  %v10606_v6 = vmax.f32 %v10574_v2, 0.0  ;;  %v10572_v8 = vadd.f32 %v22029_v61, %v10540_v21  ;;  %v10545_v14 = vadd.f32 %v17253_v32, %v10096_v13  ;;  %v17218_v32 = vpop.f32.mrf.mxu1 }
 0x597   : > { %v10440_v4 = vpop.f32.mrf.mxu0 }
 0x598   : > { %10803 = vst [vmem:[#allocation5 + $0x100] sm:$0xff] %v10799_v25  ;;  %v10802_v26 = vmax.f32 %v10602_v60, %v10606_v6  ;;  %v10604_v53 = vmax.f32 %v10572_v8, 0.0  ;;  %v10543_v59 = vadd.f32 %v10440_v4, %v10088_v48  ;;  %v10577_v0 = vadd.f32 %v22029_v61, %v10545_v14 }
 0x599   : > { %v17254_v42 = vpop.f32.mrf.mxu0  ;;  %v10107_v25 = vadd.f32 %v22012_v40, %v21906_v5 }
 0x59a   : > { %10806 = vst [vmem:[#allocation5 + $0x118] sm:$0xff] %v10802_v26  ;;  %v10800_v38 = vmax.f32 %v10600_v11, %v10604_v53  ;;  %v10546_v24 = vadd.f32 %v17254_v42, %v10099_v54  ;;  %v10575_v7 = vadd.f32 %v22029_v61, %v10543_v59  ;;  %v10609_v21 = vmax.f32 %v10577_v0, 0.0 }
 0x59b   : > { %v10443_v33 = vpop.f32.mrf.mxu0  ;;  %v10128_v54 = vadd.f32 %v22024_v12, %v21908_v49 }
 0x59c   : > { %10804 = vst [vmem:[#allocation5 + $0x108] sm:$0xff] %v10800_v38  ;;  %v10544_v15 = vadd.f32 %v10443_v33, %v10091_v30  ;;  %v10578_v17 = vadd.f32 %v22029_v61, %v10546_v24  ;;  %v10607_v8 = vmax.f32 %v10575_v7, 0.0  ;;  %v10138_v38 = vpop.f32.mrf.mxu1  ;;  %v11201_v24 = vrot.slane %v21821_v18, 1 }
 0x59d   : > { %v17257_v37 = vpop.f32.mrf.mxu0 }
 0x59e   : > { %v10549_v34 = vadd.f32 %v17257_v37, %v10112_v22  ;;  %v10576_v48 = vadd.f32 %v22029_v61, %v10544_v15  ;;  %v10610_v40 = vmax.f32 %v10578_v17, 0.0  ;;  %v17221_v37 = vpop.f32.mrf.mxu1  ;;  %v22705_v15 = vrot.slane %v21823_v1, 1 }
 0x59f   : > { %v10456_v50 = vpop.f32.mrf.mxu0 }
 0x5a0   : > { %v10581_v58 = vadd.f32 %v22029_v61, %v10549_v34  ;;  %v10547_v9 = vadd.f32 %v10456_v50, %v10104_v31  ;;  %v10120_v34 = vadd.f32 %v22041_v55, %v21915_v51  ;;  %v10608_v30 = vmax.f32 %v10576_v48, 0.0 }
 0x5a1   : > { %v10889_v36 = vld [vmem:[#allocation5 + $0x110] ss:$2 sm:$0xff]  ;;  %v10937_v2 = vld [vmem:[#allocation5 + $0x111] ss:$2 sm:$0xff]  ;;  %v17258_v63 = vpop.f32.mrf.mxu0  ;;  %v11202_v51 = vsel %vm11171_vm4, %v22705_v15, %v11201_v24 }
 0x5a2   : > { %v10613_v60 = vmax.f32 %v10581_v58, 0.0  ;;  %v10579_v43 = vadd.f32 %v22029_v61, %v10547_v9  ;;  %v10550_v20 = vadd.f32 %v17258_v63, %v10115_v16  ;;  %v22083_v6 = vmax.f32 %v10889_v36, %v10937_v2 }
 0x5a3   : > { %v10887_v39 = vld [vmem:[#allocation5 + $0x100] ss:$2 sm:$0xff]  ;;  %v10935_v57 = vld [vmem:[#allocation5 + $0x101] ss:$2 sm:$0xff]  ;;  %v10459_v13 = vpop.f32.mrf.mxu0  ;;  %v10131_v36 = vadd.f32 %v22052_v35, %v21929_v3  ;;  %v10144_v2 = vadd.f32 %v22062_v52, %v21942_v29  ;;  %v10123_v63 = vadd.f32 %v22058_v23, %v21935_v19  ;;  %v10136_v29 = vadd.f32 %v22071_v46, %v21948_v44 }
 0x5a4   : > { %v22085_v4 = vmax.f32 %v10887_v39, %v10935_v57  ;;  %v10817_v11 = vmax.f32 %v10609_v21, %v10613_v60  ;;  %v10611_v26 = vmax.f32 %v10579_v43, 0.0  ;;  %v10582_v53 = vadd.f32 %v22029_v61, %v10550_v20  ;;  %v10151_v21 = vpop.f32.mrf.mxu1 }
 0x5a5   : > { %v10548_v14 = vadd.f32 %v10459_v13, %v10107_v25  ;;  %v17261_v42 = vpop.f32.mrf.mxu0  ;;  %v10147_v57 = vadd.f32 %v17218_v32, %v21956_v56  ;;  %v10139_v13 = vadd.f32 %v10138_v38, %v21960_v47 }
 0x5a6   : > { %v14946_v5 = vpack.c.bf16 %v22083_v6, %v22085_v4  ;;  %10821 = vst [vmem:[#allocation5 + $0x130] sm:$0xff] %v10817_v11  ;;  %v10815_v59 = vmax.f32 %v10607_v8, %v10611_v26  ;;  %v10614_v33 = vmax.f32 %v10582_v53, 0.0  ;;  %v10553_v50 = vadd.f32 %v17261_v42, %v10128_v54  ;;  %v17222_v19 = vpop.f32.mrf.mxu1 }
 0x5a7   : > { %v10580_v22 = vadd.f32 %v22029_v61, %v10548_v14  ;;  %v10472_v0 = vpop.f32.mrf.mxu0  ;;  %v11203_v58 = vrot.slane %v22085_v4, 1 }
 0x5a8   : > { %15069 = vst [vmem:[#allocation6 + $0x40] sm:$0xff] %v14946_v5   ;;  %10819 = vst [vmem:[#allocation5 + $0x120] sm:$0xff] %v10815_v59  ;;  %v10818_v31 = vmax.f32 %v10610_v40, %v10614_v33  ;;  %v10551_v12 = vadd.f32 %v10472_v0, %v10120_v34  ;;  %v10585_v17 = vadd.f32 %v22029_v61, %v10553_v50  ;;  %v10154_v59 = vpop.f32.mrf.mxu1 }
 0x5a9   : > { %v10612_v7 = vmax.f32 %v10580_v22, 0.0  ;;  %v17262_v16 = vpop.f32.mrf.mxu0  ;;  %v11204_v55 = vsel %vm11171_vm4, %v11201_v24, %v11203_v58  ;;  %v10160_v5 = vadd.f32 %v17221_v37, %v21964_v28 }
 0x5aa   : > { %10822 = vst [vmem:[#allocation5 + $0x138] sm:$0xff] %v10818_v31  ;;  %v18118_v3 = vpack.i.bf16 %v11204_v55, %v11202_v51  ;;  %v10554_v35 = vadd.f32 %v17262_v16, %v10131_v36  ;;  %v10583_v43 = vadd.f32 %v22029_v61, %v10551_v12  ;;  %v10617_v26 = vmax.f32 %v10585_v17, 0.0  ;;  %v17225_v28 = vpop.f32.mrf.mxu1 }
 0x5ab   : > { %v10816_v49 = vmax.f32 %v10608_v30, %v10612_v7  ;;  %v10475_v9 = vpop.f32.mrf.mxu0  ;;  %v10152_v31 = vadd.f32 %v10151_v21, %v21970_v27  ;;  %v11205_v51 = vrot.slane %v22083_v6, 1 }
 0x5ac   : > { %v10552_v20 = vadd.f32 %v10475_v9, %v10123_v63  ;;  %18119 = vrot.lane.b32.xlu1 %v18118_v3, %s18805_s28  ;;  %v10586_v53 = vadd.f32 %v22029_v61, %v10554_v35  ;;  %v10615_v56 = vmax.f32 %v10583_v43, 0.0  ;;  %v10167_v55 = vpop.f32.mrf.mxu1 }
 0x5ad   : > { %10820 = vst [vmem:[#allocation5 + $0x128] sm:$0xff] %v10816_v49  ;;  %v17265_v60 = vpop.f32.mrf.mxu0 }
 0x5ae   : > { %v10557_v52 = vadd.f32 %v17265_v60, %v10144_v2  ;;  %v10584_v32 = vadd.f32 %v22029_v61, %v10552_v20  ;;  %v10618_v37 = vmax.f32 %v10586_v53, 0.0 }
 0x5af   : > { %v10488_v25 = vpop.f32.mrf.mxu0  ;;  %v18636_v39 = vld [vmem:[#allocation6 + $0x40] sm:$0xff]  }
 0x5b0   : > { %v10589_v23 = vadd.f32 %v22029_v61, %v10557_v52  ;;  %v10555_v8 = vadd.f32 %v10488_v25, %v10136_v29  ;;  %17376 = vmatmul.mubr.bf16.gmra.mxu0 %v18636_v39  ;;  %v10616_v36 = vmax.f32 %v10584_v32, 0.0  ;;  %v22706_v29 = vld [vmem:[#allocation14_spill] sm:$0xff]  ;;  %v22707_v52 = vld [vmem:[#allocation16_spill] sm:$0xff]  ;;  %v11206_v39 = vsel %vm11171_vm4, %v11203_v58, %v11205_v51 }
 0x5b1   : > { %v10893_v11 = vld [vmem:[#allocation5 + $0x130] ss:$2 sm:$0xff]  ;;  %v17266_v44 = vpop.f32.mrf.mxu0  ;;  %v10941_v46 = vld [vmem:[#allocation5 + $0x131] ss:$2 sm:$0xff]  ;;  %v10163_v35 = vadd.f32 %v17222_v19, %v22706_v29  ;;  %v10176_v43 = vadd.f32 %v17225_v28, %v22707_v52  ;;  %v22711_v28 = vld [vmem:[#allocation19_spill] sm:$0xff] }
 0x5b2   : > { %v10621_v48 = vmax.f32 %v10589_v23, 0.0  ;;  %v10587_v14 = vadd.f32 %v22029_v61, %v10555_v8  ;;  %v10558_v42 = vadd.f32 %v17266_v44, %v10147_v57  ;;  %v22124_v24 = vmax.f32 %v10893_v11, %v10941_v46  ;;  %v17226_v23 = vpop.f32.mrf.mxu1  ;;  %v22708_v8 = vld [vmem:[#allocation17_spill] sm:$0xff]  ;;  %v22709_v44 = vld [vmem:[#allocation15_spill] sm:$0xff] }
 0x5b3   : > { %v10491_v40 = vpop.f32.mrf.mxu0  ;;  %v10155_v46 = vadd.f32 %v10154_v59, %v22709_v44  ;;  %v18660_v44 = vld [vmem:[%s22658_s5 + $0x28] sm:$0xff]  }
 0x5b4   : > { %v10891_v33 = vld [vmem:[#allocation5 + $0x120] ss:$2 sm:$0xff]  ;;  %v10939_v47 = vld [vmem:[#allocation5 + $0x121] ss:$2 sm:$0xff]  ;;  %v10833_v38 = vmax.f32 %v10617_v26, %v10621_v48  ;;  %v10619_v54 = vmax.f32 %v10587_v14, 0.0  ;;  %v10590_v22 = vadd.f32 %v22029_v61, %v10558_v42  ;;  %v10556_v0 = vadd.f32 %v10491_v40, %v10139_v13 }
 0x5b5   : > { %v22126_v34 = vmax.f32 %v10891_v33, %v10939_v47  ;;  %v17269_v30 = vpop.f32.mrf.mxu0  ;;  %v10168_v13 = vadd.f32 %v10167_v55, %v22708_v8  ;;  %v22710_v14 = vld [vmem:[#allocation18_spill] sm:$0xff]  ;;  %v11209_v52 = vrot.slane %v22124_v24, 1 }
 0x5b6   : > { %10837 = vst [vmem:[#allocation5 + $0x150] sm:$0xff] %v10833_v38  ;;  %v10831_v7 = vmax.f32 %v10615_v56, %v10619_v54  ;;  %v10622_v50 = vmax.f32 %v10590_v22, 0.0  ;;  %v10588_v16 = vadd.f32 %v22029_v61, %v10556_v0  ;;  %v10561_v49 = vadd.f32 %v17269_v30, %v10160_v5  ;;  %v10170_v54 = vpop.f32.mrf.mxu1  ;;  %v18658_v30 = vld [vmem:[%s22658_s5 + $0x38] sm:$0xff]  }
 0x5b7   : > { %v10504_v12 = vpop.f32.mrf.mxu0  ;;  %v14951_v9 = vpack.c.bf16 %v22124_v24, %v22126_v34  ;;  %v11207_v3 = vrot.slane %v22126_v34, 1  ;;  %v10179_v42 = vadd.f32 %v17226_v23, %v22710_v14  ;;  %17311 = vmatprep.subr.bf16.mxu1 %v18658_v30 }
 0x5b8   : > { %10835 = vst [vmem:[#allocation5 + $0x140] sm:$0xff] %v10831_v7  ;;  %v10834_v27 = vmax.f32 %v10618_v37, %v10622_v50  ;;  %v10620_v2 = vmax.f32 %v10588_v16, 0.0  ;;  %v10559_v21 = vadd.f32 %v10504_v12, %v10152_v31  ;;  %v10593_v17 = vadd.f32 %v22029_v61, %v10561_v49  ;;  %17312 = vmatpush3.bf16.msra.mxu1 %v18658_v30 }
 0x5b9   : > { %v17270_v15 = vpop.f32.mrf.mxu0  ;;  %15070 = vst [vmem:[#allocation6 + $0x48] sm:$0xff] %v14951_v9   ;;  %v11208_v57 = vsel %vm11171_vm4, %v11205_v51, %v11207_v3  ;;  %v10171_v37 = vadd.f32 %v10170_v54, %v22711_v28  ;;  %v11210_v8 = vsel %vm11171_vm4, %v11207_v3, %v11209_v52  ;;  %v18662_v3 = vld [vmem:[%s22658_s5 + $0x20] sm:$0xff]  }
 0x5ba   : > { %10838 = vst [vmem:[#allocation5 + $0x158] sm:$0xff] %v10834_v27  ;;  %v10832_v63 = vmax.f32 %v10616_v36, %v10620_v2  ;;  %v10591_v20 = vadd.f32 %v22029_v61, %v10559_v21  ;;  %v10562_v11 = vadd.f32 %v17270_v15, %v10163_v35  ;;  %v18123_v19 = vpack.i.bf16 %v11208_v57, %v11206_v39 }
 0x5bb   : > { %v10507_v60 = vpop.f32.mrf.mxu0  ;;  %v10625_v53 = vmax.f32 %v10593_v17, 0.0 }
 0x5bc   : > { %10836 = vst [vmem:[#allocation5 + $0x148] sm:$0xff] %v10832_v63  ;;  %v10623_v5 = vmax.f32 %v10591_v20, 0.0  ;;  %18124 = vrot.lane.b32.xlu0 %v18123_v19, %s18805_s28  ;;  %v10560_v47 = vadd.f32 %v10507_v60, %v10155_v46  ;;  %v10594_v22 = vadd.f32 %v22029_v61, %v10562_v11  ;;  %v18646_v19 = vld [vmem:[#allocation6 + $0x10] sm:$0xff]  }
 0x5bd   : > { %v17273_v25 = vpop.f32.mrf.mxu0 }
 0x5be   : > { %v10565_v26 = vadd.f32 %v17273_v25, %v10176_v43  ;;  %v10592_v2 = vadd.f32 %v22029_v61, %v10560_v47  ;;  %v10626_v51 = vmax.f32 %v10594_v22, 0.0  ;;  %v18659_v25 = vld [vmem:[%s22658_s5 + $0x30] sm:$0xff]  }
 0x5bf   : > { %v10520_v48 = vpop.f32.mrf.mxu0  ;;  %17313 = vmatprep.subr.bf16.mxu1 %v18659_v25 }
 0x5c0   : > { %v10597_v56 = vadd.f32 %v22029_v61, %v10565_v26  ;;  %v10563_v58 = vadd.f32 %v10520_v48, %v10168_v13  ;;  %v18639_v32 = vld [vmem:[#allocation6 + $0x48] sm:$0xff]   ;;  %v10624_v43 = vmax.f32 %v10592_v2, 0.0  ;;  %17314 = vmatpush3.bf16.msra.mxu1 %v18659_v25 }
 0x5c1   : > { %v10897_v40 = vld [vmem:[#allocation5 + $0x150] ss:$2 sm:$0xff]  ;;  %v10945_v33 = vld [vmem:[#allocation5 + $0x151] ss:$2 sm:$0xff]  ;;  %v17274_v38 = vpop.f32.mrf.mxu0  ;;  %17379 = vmatprep.mubr.bf16.mxu0 %v18639_v32  ;;  %17315 = vmatprep.subr.bf16.mxu1 %v18660_v44 }
 0x5c2   : > { %v10629_v0 = vmax.f32 %v10597_v56, 0.0  ;;  %v10595_v59 = vadd.f32 %v22029_v61, %v10563_v58  ;;  %v10566_v31 = vadd.f32 %v17274_v38, %v10179_v42  ;;  %v10971_v7 = vmax.f32 %v10897_v40, %v10945_v33  ;;  %v18663_v56 = vld [vmem:[%s22658_s5 + $0x18] sm:$0xff]   ;;  %v22186_v58 = vld [vmem:[#allocation6 + $0x60] sm:$0x1]  ;;  %v18648_v40 = vld [vmem:[#allocation6 + $0x18] sm:$0xff]  }
 0x5c3   : > { %v10895_v50 = vld [vmem:[#allocation5 + $0x140] ss:$2 sm:$0xff]  ;;  %v10943_v16 = vld [vmem:[#allocation5 + $0x141] ss:$2 sm:$0xff]  ;;  %v10523_v49 = vpop.f32.mrf.mxu0  ;;  %v11143_v54 = vunpack.c.l.bf16 %v22186_v58 }
 0x5c4   : > { %v10970_v12 = vmax.f32 %v10895_v50, %v10943_v16  ;;  %v10849_v9 = vmax.f32 %v10625_v53, %v10629_v0  ;;  %v10627_v36 = vmax.f32 %v10595_v59, 0.0  ;;  %v10598_v27 = vadd.f32 %v22029_v61, %v10566_v31  ;;  %17316 = vmatpush3.bf16.msra.mxu1 %v18660_v44  ;;  %v18649_v33 = vld [vmem:[#allocation6 + $0x20] sm:$0xff]   ;;  %v18664_v59 = vld [vmem:[%s22658_s5 + $0x10] sm:$0xff]  }
 0x5c5   : > { %v10564_v21 = vadd.f32 %v10523_v49, %v10171_v37  ;;  %17317 = vmatprep.subr.bf16.mxu1 %v18662_v3  ;;  %v11219_v28 = vrot.slane %v11143_v54, 1  ;;  %v18650_v37 = vld [vmem:[#allocation6 + $0x28] sm:$0xff]   ;;  %v18666_v16 = vld [vmem:[%s22658_s5 + $0x8] sm:$0xff]   ;;  %v18669_v49 = vld [vmem:[%s22658_s5] sm:$0xff]  }
 0x5c6   : > { %v22156_v15 = vpack.c.bf16 %v10971_v7, %v10970_v12  ;;  %10853 = vst [vmem:[#allocation5 + $0x170] sm:$0xff] %v10849_v9  ;;  %v10847_v55 = vmax.f32 %v10623_v5, %v10627_v36  ;;  %v10630_v63 = vmax.f32 %v10598_v27, 0.0  ;;  %v18651_v7 = vld [vmem:[#allocation6 + $0x30] sm:$0xff]   ;;  %v18652_v9 = vld [vmem:[#allocation6 + $0x38] sm:$0xff]   ;;  %v18653_v36 = vld [vmem:[#allocation6 + $0x40] sm:$0xff]  }
 0x5c7   : > { %v10596_v17 = vadd.f32 %v22029_v61, %v10564_v21  ;;  %v22219_v12 = vld [vmem:[%s22658_s5 + $0xf8] sm:$0xff]   ;;  %v18654_v27 = vld [vmem:[#allocation6 + $0x48] sm:$0xff]  }
 0x5c8   : > { %15071 = vst [vmem:[#allocation6 + $0x50] sm:$0xff] %v22156_v15   ;;  %10851 = vst [vmem:[#allocation5 + $0x160] sm:$0xff] %v10847_v55  ;;  %v10850_v60 = vmax.f32 %v10626_v51, %v10630_v63  ;;  %v15005_v29 = vunpack.c.l.bf16 %v22156_v15  ;;  %v15006_v35 = vunpack.c.h.bf16 %v22156_v15  ;;  %17318 = vmatpush3.bf16.msra.mxu1 %v18662_v3  ;;  %v22712_v51 = vld [vmem:[#allocation13_spill] sm:$0xff] }
 0x5c9   : > { %v10628_v20 = vmax.f32 %v10596_v17, 0.0  ;;  %17319 = vmatprep.subr.bf16.mxu1 %v18663_v56 }
 0x5ca   : > { %10854 = vst [vmem:[#allocation5 + $0x178] sm:$0xff] %v10850_v60  ;;  %v11211_v61 = vrot.slane %v15005_v29, 1  ;;  %v11213_v39 = vrot.slane %v15006_v35, 1 }
 0x5cb   : > { %v10848_v57 = vmax.f32 %v10624_v43, %v10628_v20 }
 0x5cc   : > { %v11214_v23 = vsel %vm11171_vm4, %v11211_v61, %v11213_v39  ;;  %v11212_v13 = vsel %vm11171_vm4, %v11209_v52, %v11211_v61  ;;  %17320 = vmatpush3.bf16.msra.mxu1 %v18663_v56 }
 0x5cd   : > { %10852 = vst [vmem:[#allocation5 + $0x168] sm:$0xff] %v10848_v57  ;;  %11261 = vrot.lane.b32.xlu0 %v11214_v23, %s18805_s28  ;;  %v18128_v11 = vpack.i.bf16 %v11212_v13, %v11210_v8  ;;  %17321 = vmatprep.subr.bf16.mxu1 %v18664_v59 }
 0x5cf   : > { %v18644_v26 = vld [vmem:[#allocation6 + $0x50] sm:$0xff]   ;;  %18129 = vrot.lane.b32.xlu1 %v18128_v11, %s18805_s28 }
 0x5d0   : > { %17380 = vmatmul.mubr.bf16.gmra.mxu0 %v18644_v26  ;;  %17322 = vmatpush3.bf16.msra.mxu1 %v18664_v59  ;;  %v18655_v2 = vld [vmem:[#allocation6 + $0x50] sm:$0xff]  }
 0x5d1   : > { %v10901_v46 = vld [vmem:[#allocation5 + $0x170] ss:$2 sm:$0xff]  ;;  %v10949_v53 = vld [vmem:[#allocation5 + $0x171] ss:$2 sm:$0xff]  ;;  %17435 = vmatprep.mubr.bf16.mxu0 %v18646_v19  ;;  %17323 = vmatprep.subr.bf16.mxu1 %v18666_v16 }
 0x5d2   : > { %v10973_v42 = vmax.f32 %v10901_v46, %v10949_v53 }
 0x5d4   : > { %v10899_v48 = vld [vmem:[#allocation5 + $0x160] ss:$2 sm:$0xff]  ;;  %v10947_v14 = vld [vmem:[#allocation5 + $0x161] ss:$2 sm:$0xff]  ;;  %17324 = vmatpush3.bf16.msra.mxu1 %v18666_v16 }
 0x5d5   : > { %v10972_v5 = vmax.f32 %v10899_v48, %v10947_v14  ;;  %17325 = vmatprep.subr.bf16.mxu1 %v18669_v49 }
 0x5d7   : > { %v22188_v32 = vpack.c.bf16 %v10973_v42, %v10972_v5 }
 0x5d8   : > { %17436 = vmatmul.mubr.bf16.vlgmr.msra.gmra.mxu0 %v18648_v40  ;;  %17326 = vmatpush3.bf16.msra.mxu1 %v18669_v49 }
 0x5d9   : > { %15072 = vst [vmem:[#allocation6 + $0x58] sm:$0xff] %v22188_v32   ;;  %v15009_v47 = vunpack.c.l.bf16 %v22188_v32  ;;  %v15010_v38 = vunpack.c.h.bf16 %v22188_v32  ;;  %17439 = vmatprep.mubr.bf16.mxu0 %v18649_v33  ;;  %17383 = vmatprep.subr.bf16.mxu1 %v22219_v12 }
 0x5db   : > { %v11215_v22 = vrot.slane %v15009_v47, 1  ;;  %v11217_v0 = vrot.slane %v15010_v38, 1 }
 0x5dd   : > { %v11216_v31 = vsel %vm11171_vm4, %v11213_v39, %v11215_v22  ;;  %v11218_v30 = vsel %vm11171_vm4, %v11215_v22, %v11217_v0  ;;  %v11220_v50 = vsel %vm11171_vm4, %v11217_v0, %v11219_v28  ;;  %v11538_v39 = vrot.slane %v11537_v45, 4 }
 0x5de   : > { %11263 = vrot.lane.b32.xlu1 %v11216_v31, %s18805_s28  ;;  %11265 = vrot.lane.b32.xlu0 %v11218_v30, %s18805_s28 }
 0x5e0   : > { %17440 = vmatmul.mubr.bf16.gmra.mxu0 %v18650_v37  ;;  %v18656_v21 = vld [vmem:[#allocation6 + $0x58] sm:$0xff]  }
 0x5e1   : > { %17443 = vmatprep.mubr.bf16.mxu0 %v18651_v7 }
 0x5e2   : > { %11267 = vrot.lane.b32.xlu1 %v11220_v50, %s18805_s28  ;;  %11269 = vrot.lane.b32.xlu0 %v11219_v28, %s18805_s28  ;;  %s323_s28 = sand.u32 1, %s18793_s10  }
 0x5e3   : > { %s324_s26 = scalar_lea.vmem [#allocation10], %s323_s28  ;;  %s13658_s21 = scalar_lea.sflag [#allocation11], %s323_s28 }
 0x5e4   : > { %s13670_s27 = sshll.u32 %s324_s26, 4  ;;  %s13671_s27 = int_to_ptr.vmem [resolvable:$true] %s13670_s27 }
 0x5e5   : > { %s18741_s23 = scalar_lea.vmem %s13671_s27, 16  ;;  %p18748_p0 = scmp.lt.s32.totalorder %s13671_s27, %s18746_s25 }
 0x5e6   : > { %p18742_p11 = scmp.ne.s32.totalorder %s13671_s27, %s18741_s23  ;;  %p18749_p1 = scmp.lt.s32.totalorder %s18747_s13, %s18741_s23 }
 0x5e8   : > { %17444 = vmatmul.mubr.bf16.gmra.mxu0 %v18652_v9  ;;  %p18743_p12 = pnand %p18742_p11, %p18897_p5  ;;  %p18750_p2 = por %p18749_p1, %p18748_p0 }
 0x5e9   : > { %17447 = vmatprep.mubr.bf16.mxu0 %v18653_v36 }
 0x5ea   : > { %p18744_p13 = pneg %p18743_p12 }
 0x5ec   : > { %p18751_p3 = pnand %p18750_p2, %p18744_p13 }
 0x5f0   : > { %17448 = vmatmul.mubr.bf16.gmra.mxu0 %v18654_v27 }
 0x5f1   : > { %17451 = vmatprep.mubr.bf16.mxu0 %v18655_v2 }
 0x5f8   : > { %17452 = vmatmul.mubr.bf16.gmra.mxu0 %v18656_v21 }
 0x5f9   : > { %17507 = vmatprep.mubr.msk.bf16.mxu0 %vm18804_vm0, %v22712_v51 }
 0x61e   : > { %v18120_v55 = vpop.permute.xlu1 %18119 }
 0x61f   : > { %v18122_v63 = vunpack.i.h.bf16 %v18120_v55  ;;  %v18121_v17 = vunpack.i.l.bf16 %v18120_v55 }
 0x621   : > { %v11311_v60 = vsel %vm6701_vm2, %v21821_v18, %v18122_v63  ;;  %v11310_v52 = vsel %vm6701_vm2, %v21823_v1, %v18121_v17 }
 0x622   : > { %v14633_v43 = vpack.c.bf16 %v11311_v60, %v11311_v60  ;;  %v14632_v20 = vpack.c.bf16 %v11310_v52, %v11310_v52 }
 0x624   : > { %v11540_v25 = vshll.u32 %v14632_v20, 16  ;;  %v11544_v61 = vshrl.u32 %v14632_v20, 16  ;;  %v11550_v57 = vshll.u32 %v14633_v43, 16  ;;  %v11554_v19 = vshrl.u32 %v14633_v43, 16 }
 0x626   : > { %v11542_v23 = vrot.slane %v11540_v25, 5  ;;  %v11546_v8 = vrot.slane %v11544_v61, 4  ;;  %v11552_v18 = vrot.slane %v11550_v57, 5  ;;  %v11556_v44 = vrot.slane %v11554_v19, 4 }
 0x628   : > { %v11543_v13 = vsel %vm21849_vm7, %v11538_v39, %v11542_v23  ;;  %v11547_v11 = vor.u32 %v11546_v8, %v11542_v23  ;;  %v11557_v48 = vor.u32 %v11556_v44, %v11552_v18 }
 0x629   : > { %11681 = vst [vmem:[#allocation7 + $0x34] sm:$0xf] %v11543_v13 }
 0x62a   : > { %v11548_v26 = vrot.slane %v11547_v11, 4  ;;  %v11558_v40 = vrot.slane %v11557_v48, 4 }
 0x62c   : > { %v11553_v1 = vsel %vm21849_vm7, %v11548_v26, %v11552_v18 }
 0x62d   : > { %11682 = vst [vmem:[#allocation7 + $0x38] sm:$0xf] %v11553_v1 }
 0x62e   : > { %v18125_v46 = vpop.permute.xlu0 %18124 }
 0x62f   : > { %v18127_v53 = vunpack.i.h.bf16 %v18125_v46  ;;  %v18126_v62 = vunpack.i.l.bf16 %v18125_v46 }
 0x630   : > { %v18657_v41 = vld [vmem:[#allocation7 + $0x30] sm:$0xff]  }
 0x631   : > { %v11313_v45 = vsel %vm6701_vm2, %v22083_v6, %v18127_v53  ;;  %v11312_v3 = vsel %vm6701_vm2, %v22085_v4, %v18126_v62  ;;  %17303 = vmatprep.mubr.bf16.mxu1 %v18657_v41 }
 0x632   : > { %v14635_v14 = vpack.c.bf16 %v11313_v45, %v11313_v45  ;;  %v14634_v42 = vpack.c.bf16 %v11312_v3, %v11312_v3 }
 0x634   : > { %v11560_v5 = vshll.u32 %v14634_v42, 16  ;;  %v11564_v56 = vshrl.u32 %v14634_v42, 16  ;;  %v11570_v33 = vshll.u32 %v14635_v14, 16  ;;  %v11574_v59 = vshrl.u32 %v14635_v14, 16 }
 0x636   : > { %v11562_v22 = vrot.slane %v11560_v5, 5  ;;  %v11566_v0 = vrot.slane %v11564_v56, 4  ;;  %v11572_v6 = vrot.slane %v11570_v33, 5  ;;  %v11576_v37 = vrot.slane %v11574_v59, 4 }
 0x638   : > { %v11563_v31 = vsel %vm21849_vm7, %v11558_v40, %v11562_v22  ;;  %v11567_v30 = vor.u32 %v11566_v0, %v11562_v22  ;;  %v11577_v36 = vor.u32 %v11576_v37, %v11572_v6 }
 0x639   : > { %11683 = vst [vmem:[#allocation7 + $0x3c] sm:$0xf] %v11563_v31 }
 0x63a   : > { %v11568_v28 = vrot.slane %v11567_v30, 4  ;;  %v11578_v17 = vrot.slane %v11577_v36, 4 }
 0x63c   : > { %v11573_v7 = vsel %vm21849_vm7, %v11568_v28, %v11572_v6 }
 0x63d   : > { %11684 = vst [vmem:[#allocation7 + $0x40] sm:$0xf] %v11573_v7 }
 0x63f   : > { %v11262_v4 = vpop.permute.xlu0 %11261 }
 0x640   : > { %v11316_v50 = vsel %vm6701_vm2, %v15005_v29, %v11262_v4  ;;  %v18661_v51 = vld [vmem:[#allocation7 + $0x38] sm:$0xff]  }
 0x641   : > { %v18130_v16 = vpop.permute.xlu1 %18129  ;;  %v14638_v27 = vpack.c.bf16 %v11316_v50, %v11316_v50  ;;  %17304 = vmatmul.mubr.bf16.gmra.mxu1 %v18661_v51  ;;  %v18668_v50 = vld [vmem:[#allocation6] sm:$0xff]  }
 0x642   : > { %v18132_v49 = vunpack.i.h.bf16 %v18130_v16  ;;  %v18131_v9 = vunpack.i.l.bf16 %v18130_v16 }
 0x643   : > { %v11600_v29 = vshll.u32 %v14638_v27, 16  ;;  %v11604_v25 = vshrl.u32 %v14638_v27, 16 }
 0x644   : > { %v11315_v2 = vsel %vm6701_vm2, %v22124_v24, %v18132_v49  ;;  %v11314_v21 = vsel %vm6701_vm2, %v22126_v34, %v18131_v9 }
 0x645   : > { %v14637_v55 = vpack.c.bf16 %v11315_v2, %v11315_v2  ;;  %v14636_v63 = vpack.c.bf16 %v11314_v21, %v11314_v21  ;;  %v11602_v13 = vrot.slane %v11600_v29, 5  ;;  %v11606_v11 = vrot.slane %v11604_v25, 4  ;;  %v18677_v29 = vld [vmem:[%s22658_s5 + $0xe0] sm:$0xff]   ;;  %v18683_v25 = vld [vmem:[%s22658_s5 + $0xd0] sm:$0xff]  }
 0x647   : > { %v11590_v60 = vshll.u32 %v14637_v55, 16  ;;  %v11594_v52 = vshrl.u32 %v14637_v55, 16  ;;  %v11580_v43 = vshll.u32 %v14636_v63, 16  ;;  %v11584_v20 = vshrl.u32 %v14636_v63, 16  ;;  %v18670_v55 = vld [vmem:[#allocation6 + $0x8] sm:$0xff]  }
 0x648   : > { %v11607_v53 = vor.u32 %v11606_v11, %v11602_v13  ;;  %v18673_v63 = vld [vmem:[%s22658_s5 + $0xf0] sm:$0xff]   ;;  %v18688_v11 = vld [vmem:[#allocation7 + $0x10] sm:$0xff]  }
 0x649   : > { %v11592_v61 = vrot.slane %v11590_v60, 5  ;;  %v11596_v39 = vrot.slane %v11594_v52, 4  ;;  %v11582_v57 = vrot.slane %v11580_v43, 5  ;;  %v11586_v23 = vrot.slane %v11584_v20, 4  ;;  %v18672_v60 = vld [vmem:[#allocation6 + $0x10] sm:$0xff]   ;;  %v18676_v52 = vld [vmem:[%s22658_s5 + $0xe8] sm:$0xff]  }
 0x64a   : > { %v11608_v33 = vrot.slane %v11607_v53, 4  ;;  %v18674_v43 = vld [vmem:[#allocation6 + $0x18] sm:$0xff]   ;;  %v18678_v20 = vld [vmem:[#allocation6 + $0x28] sm:$0xff]   ;;  %v18698_v53 = vld [vmem:[%s22658_s5 + $0x158] sm:$0xff]  }
 0x64b   : > { %v11597_v8 = vor.u32 %v11596_v39, %v11592_v61  ;;  %v11583_v24 = vsel %vm21849_vm7, %v11578_v17, %v11582_v57  ;;  %v11587_v34 = vor.u32 %v11586_v23, %v11582_v57  ;;  %v18684_v39 = vld [vmem:[%s22658_s5 + $0xc8] sm:$0xff]   ;;  %v18681_v57 = vld [vmem:[#allocation6 + $0x38] sm:$0xff]  }
 0x64c   : > { %11685 = vst [vmem:[#allocation7 + $0x44] sm:$0xf] %v11583_v24  ;;  %v18687_v23 = vld [vmem:[%s22658_s5 + $0xc0] sm:$0xff]   ;;  %v18689_v24 = vld [vmem:[%s22658_s5 + $0x178] sm:$0xff]  }
 0x64d   : > { %v11598_v18 = vrot.slane %v11597_v8, 4  ;;  %v11588_v26 = vrot.slane %v11587_v34, 4  ;;  %v18682_v8 = vld [vmem:[#allocation6 + $0x40] sm:$0xff]   ;;  %v18685_v34 = vld [vmem:[#allocation6 + $0x48] sm:$0xff]  }
 0x64f   : > { %v11603_v19 = vsel %vm21849_vm7, %v11598_v18, %v11602_v13  ;;  %v11593_v1 = vsel %vm21849_vm7, %v11588_v26, %v11592_v61  ;;  %v18679_v61 = vld [vmem:[#allocation6 + $0x30] sm:$0xff]   ;;  %v18691_v18 = vld [vmem:[%s22658_s5 + $0x170] sm:$0xff]   ;;  %v18690_v26 = vld [vmem:[#allocation7 + $0x18] sm:$0xff]  }
 0x650   : > { %11687 = vst [vmem:[#allocation7 + $0x4c] sm:$0xf] %v11603_v19  ;;  %v11264_v44 = vpop.permute.xlu1 %11263  ;;  %v11266_v46 = vpop.permute.xlu0 %11265  ;;  %11686 = vst [vmem:[#allocation7 + $0x48] sm:$0xf] %v11593_v1  ;;  %v18686_v13 = vld [vmem:[#allocation7 + $0x8] sm:$0xff]   ;;  %v18694_v19 = vld [vmem:[%s22658_s5 + $0x168] sm:$0xff]  }
 0x651   : > { %v11317_v62 = vsel %vm6701_vm2, %v15006_v35, %v11264_v44  ;;  %v11318_v41 = vsel %vm6701_vm2, %v15009_v47, %v11266_v46  ;;  %v18692_v1 = vld [vmem:[#allocation7 + $0x20] sm:$0xff]   ;;  %v18695_v44 = vld [vmem:[%s22658_s5 + $0x160] sm:$0xff]   ;;  %v18693_v46 = vld [vmem:[#allocation7 + $0x28] sm:$0xff]  }
 0x652   : > { %v14639_v45 = vpack.c.bf16 %v11317_v62, %v11317_v62  ;;  %v14640_v3 = vpack.c.bf16 %v11318_v41, %v11318_v41  ;;  %v18696_v62 = vld [vmem:[#allocation7 + $0x30] sm:$0xff]   ;;  %v18701_v41 = vld [vmem:[%s22658_s5 + $0x150] sm:$0xff]  }
 0x653   : > { %v18665_v48 = vld [vmem:[#allocation7 + $0x40] sm:$0xff]  }
 0x654   : > { %v11610_v14 = vshll.u32 %v14639_v45, 16  ;;  %v11614_v42 = vshrl.u32 %v14639_v45, 16  ;;  %v11620_v5 = vshll.u32 %v14640_v3, 16  ;;  %v11624_v56 = vshrl.u32 %v14640_v3, 16  ;;  %v11268_v40 = vpop.permute.xlu1 %11267  ;;  %17307 = vmatprep.mubr.bf16.mxu1 %v18665_v48  ;;  %v11270_v15 = vpop.permute.xlu0 %11269  ;;  %v18697_v45 = vld [vmem:[#allocation7 + $0x38] sm:$0xff]   ;;  %v18699_v48 = vld [vmem:[#allocation7 + $0x40] sm:$0xff]  }
 0x655   : > { %v11319_v22 = vsel %vm6701_vm2, %v15010_v38, %v11268_v40  ;;  %v11320_v30 = vsel %vm6701_vm2, %v11143_v54, %v11270_v15  ;;  %v18702_v3 = vld [vmem:[%s22658_s5 + $0x148] sm:$0xff]   ;;  %v18709_v15 = vld [vmem:[#allocation7 + $0x30] sm:$0xff]  }
 0x656   : > { %v11612_v35 = vrot.slane %v11610_v14, 5  ;;  %v11616_v0 = vrot.slane %v11614_v42, 4  ;;  %v11622_v59 = vrot.slane %v11620_v5, 5  ;;  %v11626_v31 = vrot.slane %v11624_v56, 4  ;;  %v18705_v14 = vld [vmem:[%s22658_s5 + $0x140] sm:$0xff]  }
 0x657   : > { %v14641_v47 = vpack.c.bf16 %v11319_v22, %v11319_v22  ;;  %v14642_v4 = vpack.c.bf16 %v11320_v30, %v11320_v30  ;;  %v18667_v32 = vld [vmem:[#allocation7 + $0x48] sm:$0xff]   ;;  %v18704_v56 = vld [vmem:[#allocation7 + $0x10] sm:$0xff]   ;;  %v18706_v40 = vld [vmem:[#allocation7 + $0x18] sm:$0xff]   ;;  %v22322_v30 = vpop.f32.mrf.mxu1 }
 0x658   : > { %v11613_v6 = vsel %vm21849_vm7, %v11608_v33, %v11612_v35  ;;  %v11617_v28 = vor.u32 %v11616_v0, %v11612_v35  ;;  %v11627_v37 = vor.u32 %v11626_v31, %v11622_v59  ;;  %17308 = vmatmul.mubr.bf16.gmra.mxu1 %v18667_v32  ;;  %v18700_v42 = vld [vmem:[#allocation7 + $0x48] sm:$0xff]   ;;  %v18707_v33 = vld [vmem:[#allocation7 + $0x20] sm:$0xff]   ;;  %v18710_v35 = vld [vmem:[#allocation7 + $0x38] sm:$0xff]  }
 0x659   : > { %11688 = vst [vmem:[#allocation7 + $0x50] sm:$0xf] %v11613_v6  ;;  %v11630_v38 = vshll.u32 %v14641_v47, 16  ;;  %v11634_v7 = vshrl.u32 %v14641_v47, 16  ;;  %v11640_v9 = vshll.u32 %v14642_v4, 16  ;;  %17327 = vmatprep.mubr.bf16.mxu1 %v18668_v50  ;;  %v18708_v22 = vld [vmem:[#allocation7 + $0x28] sm:$0xff]   ;;  %v22324_v6 = vpop.f32.mrf.mxu1 }
 0x65a   : > { %v11618_v16 = vrot.slane %v11617_v28, 4  ;;  %v11628_v49 = vrot.slane %v11627_v37, 4  ;;  %v18711_v0 = vld [vmem:[#allocation7 + $0x40] sm:$0xff]   ;;  %v18715_v50 = vld [vmem:[%s22660_s7 + $0x38] sm:$0xff]  }
 0x65b   : > { %v11632_v36 = vrot.slane %v11630_v38, 5  ;;  %v11636_v27 = vrot.slane %v11634_v7, 4  ;;  %v11642_v21 = vrot.slane %v11640_v9, 5  ;;  %v22326_v28 = vpop.f32.mrf.mxu1  ;;  %17492 = vmatpush3.bf16.msra.mxu0 %v18715_v50  ;;  %v22345_v9 = vld [vmem:[#allocation2 + $0x340] sm:$0xff] }
 0x65c   : > { %v11623_v58 = vsel %vm21849_vm7, %v11618_v16, %v11622_v59  ;;  %v18712_v59 = vld [vmem:[#allocation7 + $0x48] sm:$0xff]   ;;  %v22341_v16 = vpop.f32.mrf.mxu0  ;;  %22713 = vst [vmem:[#allocation20_spill] sm:$0xff] %v22345_v9  ;;  %17493 = vmatprep.subr.bf16.mxu0 %v22345_v9 }
 0x65d   : > { %11689 = vst [vmem:[#allocation7 + $0x54] sm:$0xf] %v11623_v58  ;;  %v11633_v54 = vsel %vm21849_vm7, %v11628_v49, %v11632_v36  ;;  %v11637_v2 = vor.u32 %v11636_v27, %v11632_v36  ;;  %v22328_v37 = vpop.f32.mrf.mxu1  ;;  %v18716_v36 = vld [vmem:[%s22660_s7 + $0x30] sm:$0xff]  }
 0x65e   : > { %11690 = vst [vmem:[#allocation7 + $0x58] sm:$0xf] %v11633_v54  ;;  %v22351_v27 = vpop.f32.mrf.mxu0  ;;  %v18717_v54 = vld [vmem:[%s22660_s7 + $0x28] sm:$0xff]  }
 0x65f   : > { %v11638_v51 = vrot.slane %v11637_v2, 4  ;;  %v22330_v4 = vpop.f32.mrf.mxu1  ;;  %17494 = vmatpush3.bf16.msra.mxu0 %v18716_v36 }
 0x660   : > { %17328 = vmatmul.mubr.bf16.vlgmr.msra.gmra.mxu1 %v18670_v55  ;;  %17495 = vmatprep.subr.bf16.mxu0 %v22345_v9  ;;  %v22359_v2 = vpop.f32.mrf.mxu0 }
 0x661   : > { %v11643_v17 = vsel %vm21849_vm7, %v11638_v51, %v11642_v21  ;;  %17331 = vmatprep.mubr.bf16.mxu1 %v18672_v60  ;;  %17384 = vmatpush3.bf16.msra.mxu1 %v22219_v12  ;;  %v18680_v12 = vld [vmem:[%s22658_s5 + $0xd8] sm:$0xff]   ;;  %v22332_v32 = vpop.f32.mrf.mxu1  ;;  %v18718_v51 = vld [vmem:[%s22660_s7 + $0x20] sm:$0xff]  }
 0x662   : > { %11691 = vst [vmem:[#allocation7 + $0x5c] sm:$0xf] %v11643_v17  ;;  %17385 = vmatprep.subr.bf16.mxu1 %v18673_v63  ;;  %v22367_v55 = vpop.f32.mrf.mxu0  ;;  %v18719_v60 = vld [vmem:[%s22660_s7 + $0x18] sm:$0xff]  }
 0x663   : > { %v22334_v38 = vpop.f32.mrf.mxu1  ;;  %17496 = vmatpush3.bf16.msra.mxu0 %v18717_v54 }
 0x664   : > { %v18703_v5 = vld [vmem:[#allocation7 + $0x50] sm:$0xff]   ;;  %17497 = vmatprep.subr.bf16.mxu0 %v22345_v9 }
 0x665   : > { %17386 = vmatpush3.bf16.msra.mxu1 %v18673_v63  ;;  %v18713_v31 = vld [vmem:[#allocation7 + $0x50] sm:$0xff]   ;;  %v22336_v7 = vpop.f32.mrf.mxu1 }
 0x666   : > { %17387 = vmatprep.subr.bf16.mxu1 %v18676_v52 }
 0x667   : > { %v22343_v49 = vpop.f32.mrf.mxu1  ;;  %17498 = vmatpush3.bf16.msra.mxu0 %v18718_v51 }
 0x668   : > { %17332 = vmatmul.mubr.bf16.gmra.mxu1 %v18674_v43  ;;  %17499 = vmatprep.subr.bf16.mxu0 %v22345_v9 }
 0x669   : > { %17335 = vmatprep.mubr.bf16.mxu1 %v18675_v10  ;;  %17388 = vmatpush3.bf16.msra.mxu1 %v18676_v52  ;;  %v18714_v47 = vld [vmem:[#allocation7 + $0x58] sm:$0xff]   ;;  %v22353_v58 = vpop.f32.mrf.mxu1  ;;  %v22373_v52 = vpop.f32.mrf.mxu0 }
 0x66a   : > { %17389 = vmatprep.subr.bf16.mxu1 %v18677_v29 }
 0x66b   : > { %v22361_v21 = vpop.f32.mrf.mxu1  ;;  %17500 = vmatpush3.bf16.msra.mxu0 %v18719_v60  ;;  %v22379_v10 = vpop.f32.mrf.mxu0 }
 0x66c   : > { %17501 = vmatprep.subr.bf16.mxu0 %v22345_v9 }
 0x66d   : > { %17390 = vmatpush3.bf16.msra.mxu1 %v18677_v29  ;;  %v11941_v63 = vpop.f32.mrf.mxu1  ;;  %v18720_v29 = vld [vmem:[%s22660_s7 + $0x10] sm:$0xff]  }
 0x66e   : > { %17391 = vmatprep.subr.bf16.mxu1 %v18680_v12 }
 0x66f   : > { %17502 = vmatpush3.bf16.msra.mxu0 %v18720_v29 }
 0x670   : > { %17336 = vmatmul.mubr.bf16.gmra.mxu1 %v18678_v20  ;;  %17503 = vmatprep.subr.bf16.mxu0 %v22345_v9  ;;  %v18721_v20 = vld [vmem:[%s22660_s7 + $0x8] sm:$0xff]  }
 0x671   : > { %17339 = vmatprep.mubr.bf16.mxu1 %v18679_v61  ;;  %17392 = vmatpush3.bf16.msra.mxu1 %v18680_v12 }
 0x672   : > { %17393 = vmatprep.subr.bf16.mxu1 %v18683_v25 }
 0x673   : > { %17504 = vmatpush3.bf16.msra.mxu0 %v18721_v20 }
 0x674   : > { %17505 = vmatprep.subr.bf16.mxu0 %v22345_v9 }
 0x675   : > { %17394 = vmatpush3.bf16.msra.mxu1 %v18683_v25  ;;  %v22385_v25 = vpop.f32.mrf.mxu0 }
 0x676   : > { %17395 = vmatprep.subr.bf16.mxu1 %v18684_v39 }
 0x678   : > { %17340 = vmatmul.mubr.bf16.gmra.mxu1 %v18681_v57  ;;  %v22391_v57 = vpop.f32.mrf.mxu0 }
 0x679   : > { %17343 = vmatprep.mubr.bf16.mxu1 %v18682_v8  ;;  %17396 = vmatpush3.bf16.msra.mxu1 %v18684_v39  ;;  %v18722_v39 = vld [vmem:[%s22660_s7] sm:$0xff]  }
 0x67a   : > { %17397 = vmatprep.subr.bf16.mxu1 %v18687_v23  ;;  %17506 = vmatpush3.bf16.msra.mxu0 %v18722_v39 }
 0x67d   : > { %17398 = vmatpush3.bf16.msra.mxu1 %v18687_v23 }
 0x67e   : > { %17455 = vmatprep.subr.bf16.mxu1 %v18689_v24 }
 0x680   : > { %17344 = vmatmul.mubr.bf16.gmra.mxu1 %v18685_v34 }
 0x681   : > { %17399 = vmatprep.mubr.bf16.mxu1 %v18686_v13 }
 0x688   : > { %17400 = vmatmul.mubr.bf16.vlgmr.msra.gmra.mxu1 %v18688_v11 }
 0x689   : > { %17403 = vmatprep.mubr.bf16.mxu1 %v18690_v26  ;;  %17456 = vmatpush3.bf16.msra.mxu1 %v18689_v24  ;;  %v22393_v24 = vpop.f32.mrf.mxu0 }
 0x68a   : > { %17457 = vmatprep.subr.bf16.mxu1 %v18691_v18 }
 0x68b   : > { %v22395_v11 = vpop.f32.mrf.mxu0 }
 0x68d   : > { %17458 = vmatpush3.bf16.msra.mxu1 %v18691_v18 }
 0x68e   : > { %17459 = vmatprep.subr.bf16.mxu1 %v18694_v19 }
 0x690   : > { %17404 = vmatmul.mubr.bf16.gmra.mxu1 %v18692_v1 }
 0x691   : > { %17407 = vmatprep.mubr.bf16.mxu1 %v18693_v46  ;;  %17460 = vmatpush3.bf16.msra.mxu1 %v18694_v19  ;;  %v22399_v19 = vpop.f32.mrf.mxu0 }
 0x692   : > { %17461 = vmatprep.subr.bf16.mxu1 %v18695_v44 }
 0x693   : > { %v22405_v46 = vpop.f32.mrf.mxu0 }
 0x695   : > { %17462 = vmatpush3.bf16.msra.mxu1 %v18695_v44 }
 0x696   : > { %17463 = vmatprep.subr.bf16.mxu1 %v18698_v53 }
 0x698   : > { %17408 = vmatmul.mubr.bf16.gmra.mxu1 %v18696_v62  ;;  %v22409_v62 = vpop.f32.mrf.mxu0 }
 0x699   : > { %17411 = vmatprep.mubr.bf16.mxu1 %v18697_v45  ;;  %17464 = vmatpush3.bf16.msra.mxu1 %v18698_v53  ;;  %22714 = vst [vmem:[#allocation21_spill] sm:$0xff] %v22409_v62 }
 0x69a   : > { %17465 = vmatprep.subr.bf16.mxu1 %v18701_v41 }
 0x69d   : > { %17466 = vmatpush3.bf16.msra.mxu1 %v18701_v41 }
 0x69e   : > { %17467 = vmatprep.subr.bf16.mxu1 %v18702_v3 }
 0x6a0   : > { %17412 = vmatmul.mubr.bf16.gmra.mxu1 %v18699_v48 }
 0x6a1   : > { %17415 = vmatprep.mubr.bf16.mxu1 %v18700_v42  ;;  %17468 = vmatpush3.bf16.msra.mxu1 %v18702_v3  ;;  %v22415_v3 = vpop.f32.mrf.mxu0 }
 0x6a2   : > { %17469 = vmatprep.subr.bf16.mxu1 %v18705_v14  ;;  %22715 = vst [vmem:[#allocation22_spill] sm:$0xff] %v22415_v3 }
 0x6a3   : > { %v22421_v42 = vpop.f32.mrf.mxu0 }
 0x6a4   : > { %22716 = vst [vmem:[#allocation23_spill] sm:$0xff] %v22421_v42 }
 0x6a5   : > { %17470 = vmatpush3.bf16.msra.mxu1 %v18705_v14 }
 0x6a8   : > { %17416 = vmatmul.mubr.bf16.gmra.mxu1 %v18703_v5 }
 0x6a9   : > { %17471 = vmatprep.mubr.bf16.mxu1 %v18704_v56 }
 0x6b0   : > { %17472 = vmatmul.mubr.bf16.vlgmr.msra.gmra.mxu1 %v18706_v40  ;;  %v22427_v40 = vpop.f32.mrf.mxu0 }
 0x6b1   : > { %17475 = vmatprep.mubr.bf16.mxu1 %v18707_v33  ;;  %22717 = vst [vmem:[#allocation24_spill] sm:$0xff] %v22427_v40 }
 0x6b8   : > { %17476 = vmatmul.mubr.bf16.gmra.mxu1 %v18708_v22 }
 0x6b9   : > { %17479 = vmatprep.mubr.bf16.mxu1 %v18709_v15  ;;  %v22431_v15 = vpop.f32.mrf.mxu0 }
 0x6ba   : > { %22718 = vst [vmem:[#allocation14_spill] sm:$0xff] %v22431_v15 }
 0x6c0   : > { %17480 = vmatmul.mubr.bf16.gmra.mxu1 %v18710_v35 }
 0x6c1   : > { %17483 = vmatprep.mubr.bf16.mxu1 %v18711_v0 }
 0x6c8   : > { %17484 = vmatmul.mubr.bf16.gmra.mxu1 %v18712_v59 }
 0x6c9   : > { %17487 = vmatprep.mubr.bf16.mxu1 %v18713_v31 }
 0x6d0   : > { %17488 = vmatmul.mubr.bf16.gmra.mxu1 %v18714_v47  ;;  %v22437_v47 = vpop.f32.mrf.mxu0 }
 0x6d1   : > { %22720 = vst [vmem:[#allocation17_spill] sm:$0xff] %v22437_v47 }
 0x6d2   : > { %v22443_v60 = vpop.f32.mrf.mxu0 }
 0x6d3   : > { %22723 = vst [vmem:[#allocation19_spill] sm:$0xff] %v22443_v60 }
 0x701   : > { %v17305_v17 = vpop.f32.mrf.mxu1 }
 0x703   : > { %v11954_v43 = vpop.f32.mrf.mxu1 }
 0x705   : > { %v17306_v12 = vpop.f32.mrf.mxu1 }
 0x707   : > { %v11957_v61 = vpop.f32.mrf.mxu1 }
 0x718   : > { %v17309_v23 = vpop.f32.mrf.mxu1 }
 0x71a   : > { %v11970_v8 = vpop.f32.mrf.mxu1 }
 0x71c   : > { %v17310_v34 = vpop.f32.mrf.mxu1 }
 0x71e   : > { %v11973_v13 = vpop.f32.mrf.mxu1 }
 0x720   : > { %v17329_v18 = vpop.f32.mrf.mxu1 }
 0x721   : > { %v12136_v42 = vadd.f32 %v17329_v18, %v22322_v30 }
 0x722   : > { %v22397_v26 = vpop.f32.mrf.mxu1 }
 0x723   : > { %v12128_v3 = vadd.f32 %v22397_v26, %v22324_v6 }
 0x724   : > { %v22401_v1 = vpop.f32.mrf.mxu1 }
 0x725   : > { %v12463_v18 = vadd.f32 %v22351_v27, %v12128_v3 }
 0x726   : > { %v22403_v44 = vpop.f32.mrf.mxu1 }
 0x728   : > { %v22407_v53 = vpop.f32.mrf.mxu1 }
 0x729   : > { %v12152_v6 = vadd.f32 %v22407_v53, %v22330_v4 }
 0x72a   : > { %v22411_v41 = vpop.f32.mrf.mxu1 }
 0x72b   : > { %v12469_v4 = vadd.f32 %v22373_v52, %v12152_v6 }
 0x72c   : > { %v22413_v45 = vpop.f32.mrf.mxu1 }
 0x72d   : > { %v12155_v3 = vadd.f32 %v22413_v45, %v22334_v38 }
 0x72e   : > { %v22417_v48 = vpop.f32.mrf.mxu1 }
 0x730   : > { %v22419_v14 = vpop.f32.mrf.mxu1 }
 0x732   : > { %v22423_v5 = vpop.f32.mrf.mxu1 }
 0x734   : > { %v22425_v56 = vpop.f32.mrf.mxu1 }
 0x736   : > { %v12162_v33 = vpop.f32.mrf.mxu1 }
 0x737   : > { %v22429_v22 = vadd.f32 %v12162_v33, %v11941_v63 }
 0x738   : > { %v17341_v35 = vpop.f32.mrf.mxu1 }
 0x739   : > { %v22433_v0 = vadd.f32 %v17341_v35, %v17305_v17  ;;  %v22449_v17 = vpop.f32.mrf.mxu0 }
 0x73a   : > { %v12175_v59 = vpop.f32.mrf.mxu1  ;;  %22726 = vst [vmem:[#allocation26_spill] sm:$0xff] %v22449_v17 }
 0x73b   : > { %v22435_v31 = vadd.f32 %v12175_v59, %v11954_v43 }
 0x73c   : > { %v17342_v50 = vpop.f32.mrf.mxu1 }
 0x73d   : > { %22719 = vst [vmem:[#allocation16_spill] sm:$0xff] %v22435_v31  ;;  %v22439_v36 = vadd.f32 %v17342_v50, %v17306_v12  ;;  %v17437_v12 = vpop.f32.mrf.mxu0 }
 0x73e   : > { %v12178_v54 = vpop.f32.mrf.mxu1 }
 0x73f   : > { %22721 = vst [vmem:[#allocation15_spill] sm:$0xff] %v22439_v36  ;;  %v22441_v51 = vadd.f32 %v12178_v54, %v11957_v61  ;;  %v12938_v54 = vpop.f32.mrf.mxu0 }
 0x740   : > { %v17345_v63 = vpop.f32.mrf.mxu1 }
 0x741   : > { %22722 = vst [vmem:[#allocation18_spill] sm:$0xff] %v22441_v51  ;;  %v22445_v29 = vadd.f32 %v17345_v63, %v17309_v23  ;;  %v17438_v47 = vpop.f32.mrf.mxu0 }
 0x742   : > { %v12191_v20 = vpop.f32.mrf.mxu1 }
 0x743   : > { %22724 = vst [vmem:[#allocation13_spill] sm:$0xff] %v22445_v29  ;;  %v22447_v39 = vadd.f32 %v12191_v20, %v11970_v8  ;;  %v12941_v15 = vpop.f32.mrf.mxu0 }
 0x744   : > { %v17346_v43 = vpop.f32.mrf.mxu1 }
 0x745   : > { %22725 = vst [vmem:[#allocation25_spill] sm:$0xff] %v22447_v39  ;;  %v22451_v33 = vadd.f32 %v17346_v43, %v17310_v34  ;;  %v17441_v17 = vpop.f32.mrf.mxu0 }
 0x746   : > { %v12194_v35 = vpop.f32.mrf.mxu1 }
 0x747   : > { %22727 = vst [vmem:[#allocation27_spill] sm:$0xff] %v22451_v33  ;;  %v22453_v59 = vadd.f32 %v12194_v35, %v11973_v13  ;;  %v22461_v13 = vpop.f32.mrf.mxu0 }
 0x748   : > { %v17401_v50 = vpop.f32.mrf.mxu1 }
 0x749   : > { %22728 = vst [vmem:[#allocation28_spill] sm:$0xff] %v22453_v59  ;;  %v22467_v59 = vpop.f32.mrf.mxu0 }
 0x74a   : > { %v12661_v61 = vpop.f32.mrf.mxu1 }
 0x74b   : > { %v22473_v40 = vpop.f32.mrf.mxu0 }
 0x74c   : > { %v17402_v9 = vpop.f32.mrf.mxu1 }
 0x74d   : > { %v22482_v31 = vpop.f32.mrf.mxu0 }
 0x74e   : > { %v12664_v60 = vpop.f32.mrf.mxu1 }
 0x750   : > { %v17405_v23 = vpop.f32.mrf.mxu1 }
 0x752   : > { %v12677_v63 = vpop.f32.mrf.mxu1 }
 0x754   : > { %v17406_v8 = vpop.f32.mrf.mxu1 }
 0x756   : > { %v22455_v20 = vpop.f32.mrf.mxu1 }
 0x758   : > { %v22457_v39 = vpop.f32.mrf.mxu1 }
 0x75a   : > { %v22459_v34 = vpop.f32.mrf.mxu1 }
 0x75c   : > { %v22463_v43 = vpop.f32.mrf.mxu1 }
 0x75e   : > { %v22465_v35 = vpop.f32.mrf.mxu1 }
 0x75f   : > { %22729 = vst [vmem:[#allocation29_spill] sm:$0xff] %v22465_v35 }
 0x760   : > { %v22469_v33 = vpop.f32.mrf.mxu1 }
 0x761   : > { %22730 = vst [vmem:[#allocation30_spill] sm:$0xff] %v22469_v33  ;;  %v12139_v33 = vadd.f32 %v22401_v1, %v22326_v28 }
 0x762   : > { %v22471_v29 = vpop.f32.mrf.mxu1 }
 0x763   : > { %22731 = vst [vmem:[#allocation31_spill] sm:$0xff] %v22471_v29  ;;  %v12465_v29 = vadd.f32 %v22341_v16, %v12136_v42  ;;  %v12466_v28 = vadd.f32 %v22359_v2, %v12139_v33  ;;  %v12144_v16 = vadd.f32 %v22411_v41, %v22332_v32  ;;  %v22514_v2 = vld [vmem:[%s22659_s6] ss:$0 sm:$0xff] }
 0x764   : > { %v22475_v51 = vpop.f32.mrf.mxu1 }
 0x765   : > { %22732 = vst [vmem:[#allocation32_spill] sm:$0xff] %v22475_v51  ;;  %v12131_v51 = vadd.f32 %v22403_v44, %v22328_v37  ;;  %v12742_v30 = vadd.f32 %v17401_v50, %v12465_v29  ;;  %v12743_v42 = vadd.f32 %v17402_v9, %v12466_v28  ;;  %v12147_v9 = vadd.f32 %v22417_v48, %v22336_v7 }
 0x766   : > { %v22478_v36 = vpop.f32.mrf.mxu1  ;;  %v12168_v50 = vadd.f32 %v22419_v14, %v22343_v49 }
 0x767   : > { %22733 = vst [vmem:[#allocation33_spill] sm:$0xff] %v22478_v36  ;;  %v22494_v36 = vpop.f32.mrf.mxu0  ;;  %v12464_v37 = vadd.f32 %v22367_v55, %v12131_v51  ;;  %v13019_v44 = vadd.f32 %v17437_v12, %v12742_v30  ;;  %v12746_v55 = vadd.f32 %v17405_v23, %v12469_v4  ;;  %v12467_v51 = vadd.f32 %v22379_v10, %v12144_v16 }
 0x768   : > { %v22484_v35 = vpop.f32.mrf.mxu1  ;;  %v13020_v52 = vadd.f32 %v17438_v47, %v12743_v42  ;;  %v12160_v10 = vadd.f32 %v22423_v5, %v22353_v58  ;;  %v12468_v30 = vadd.f32 %v22391_v57, %v12147_v9 }
 0x769   : > { %22734 = vst [vmem:[#allocation34_spill] sm:$0xff] %v22484_v35  ;;  %v12740_v35 = vadd.f32 %v12661_v61, %v12463_v18  ;;  %v22506_v27 = vpop.f32.mrf.mxu0  ;;  %v12741_v32 = vadd.f32 %v12664_v60, %v12464_v37  ;;  %v12744_v61 = vadd.f32 %v12677_v63, %v12467_v51  ;;  %v12470_v60 = vadd.f32 %v22385_v25, %v12155_v3 }
 0x76a   : > { %v22489_v62 = vpop.f32.mrf.mxu1  ;;  %v13023_v18 = vadd.f32 %v17441_v17, %v12746_v55  ;;  %v12171_v25 = vadd.f32 %v22425_v56, %v22361_v21  ;;  %v12745_v5 = vadd.f32 %v22455_v20, %v12468_v30  ;;  %v12471_v37 = vadd.f32 %v22395_v11, %v12160_v10  ;;  %v22738_v10 = vld [vmem:[#allocation16_spill] sm:$0xff] }
 0x76b   : > { %v13017_v29 = vadd.f32 %v12938_v54, %v12740_v35  ;;  %v22520_v12 = vpop.f32.mrf.mxu0  ;;  %v13018_v48 = vadd.f32 %v12941_v15, %v12741_v32  ;;  %v12747_v23 = vadd.f32 %v17406_v8, %v12470_v60  ;;  %v12473_v15 = vadd.f32 %v22393_v24, %v12168_v50  ;;  %v22735_v50 = vld [vmem:[#allocation21_spill] sm:$0xff] }
 0x76c   : > { %v22498_v26 = vpop.f32.mrf.mxu1  ;;  %v13021_v58 = vadd.f32 %v22461_v13, %v12744_v61  ;;  %v12748_v20 = vadd.f32 %v22459_v34, %v12471_v37  ;;  %v13022_v9 = vadd.f32 %v22473_v40, %v12745_v5  ;;  %v12472_v55 = vadd.f32 %v22405_v46, %v22429_v22  ;;  %v22743_v37 = vld [vmem:[#allocation32_spill] sm:$0xff] }
 0x76d   : > { %v22530_v63 = vpop.f32.mrf.mxu0  ;;  %v12750_v42 = vadd.f32 %v22457_v39, %v12473_v15  ;;  %v13024_v3 = vadd.f32 %v22467_v59, %v12747_v23  ;;  %v12477_v61 = vadd.f32 %v22735_v50, %v22433_v0  ;;  %v22739_v23 = vld [vmem:[#allocation22_spill] sm:$0xff]  ;;  %v22741_v15 = vld [vmem:[#allocation15_spill] sm:$0xff] }
 0x76e   : > { %v22503_v1 = vpop.f32.mrf.mxu1  ;;  %v13025_v40 = vadd.f32 %v22494_v36, %v12748_v20  ;;  %v12475_v30 = vadd.f32 %v22739_v23, %v22738_v10  ;;  %v22752_v10 = vld [vmem:[#allocation27_spill] sm:$0xff] }
 0x76f   : > { %v12986_v13 = vpop.f32.mrf.mxu0  ;;  %v22753_v23 = vld [vmem:[#allocation19_spill] sm:$0xff] }
 0x770   : > { %v17473_v53 = vpop.f32.mrf.mxu1 }
 0x771   : > { %v13296_v41 = vadd.f32 %v17473_v53, %v13019_v44  ;;  %v12474_v53 = vadd.f32 %v22399_v19, %v12171_v25 }
 0x772   : > { %v13215_v33 = vpop.f32.mrf.mxu1 }
 0x773   : > { %v13323_v38 = vadd.f32 %v22514_v2, %v13296_v41  ;;  %v13294_v45 = vadd.f32 %v13215_v33, %v13017_v29  ;;  %v13445_v41 = vlaneseq  ;;  %v12751_v59 = vadd.f32 %v22463_v43, %v12474_v53 }
 0x774   : > { %v17474_v54 = vpop.f32.mrf.mxu1  ;;  %v13027_v33 = vadd.f32 %v22482_v31, %v12750_v42 }
 0x775   : > { %v13321_v35 = vadd.f32 %v22514_v2, %v13294_v45  ;;  %v13297_v7 = vadd.f32 %v17474_v54, %v13020_v52  ;;  %v13343_v6 = vmax.f32 %v13323_v38, 0.0  ;;  %v17450_v52 = vpop.f32.mrf.mxu0  ;;  %v22554_v43 = vshrl.u32 %v13445_v41, 7  ;;  %v22736_v54 = vld [vmem:[#allocation29_spill] sm:$0xff] }
 0x776   : > { %v13218_v47 = vpop.f32.mrf.mxu1  ;;  %v12749_v46 = vadd.f32 %v22736_v54, %v12472_v55 }
 0x777   : > { %v13341_v28 = vmax.f32 %v13321_v35, 0.0  ;;  %v13324_v49 = vadd.f32 %v22514_v2, %v13297_v7  ;;  %v13295_v14 = vadd.f32 %v13218_v47, %v13018_v48  ;;  %v22737_v7 = vld [vmem:[#allocation30_spill] sm:$0xff]  ;;  %v13455_v55 = vand.u32 7, %v22554_v43 }
 0x778   : > { %v17477_v16 = vpop.f32.mrf.mxu1  ;;  %v12754_v48 = vadd.f32 %v22737_v7, %v12477_v61  ;;  %v22750_v61 = vld [vmem:[#allocation25_spill] sm:$0xff] }
 0x779   : > { %v13385_v57 = vmax.f32 %v13341_v28, %v13343_v6  ;;  %v13322_v17 = vadd.f32 %v22514_v2, %v13295_v14  ;;  %v13300_v8 = vadd.f32 %v17477_v16, %v13023_v18  ;;  %v13344_v21 = vmax.f32 %v13324_v49, 0.0  ;;  %v12989_v49 = vpop.f32.mrf.mxu0  ;;  %v22740_v14 = vld [vmem:[#allocation31_spill] sm:$0xff] }
 0x77a   : > { %v13231_v44 = vpop.f32.mrf.mxu1  ;;  %v13028_v18 = vadd.f32 %v22506_v27, %v12751_v59  ;;  %v12752_v25 = vadd.f32 %v22740_v14, %v12475_v30  ;;  %v22742_v16 = vld [vmem:[#allocation23_spill] sm:$0xff]  ;;  %v13026_v27 = vadd.f32 %v22520_v12, %v12749_v46  ;;  %v12482_v30 = vadd.f32 %v22753_v23, %v22752_v10 }
 0x77b   : > { %13387 = vst [vmem:[#allocation9] sm:$0xff] %v13385_v57  ;;  %v13342_v56 = vmax.f32 %v13322_v17, 0.0  ;;  %v13327_v24 = vadd.f32 %v22514_v2, %v13300_v8  ;;  %v13298_v4 = vadd.f32 %v13231_v44, %v13021_v58  ;;  %v12478_v58 = vadd.f32 %v22742_v16, %v22741_v15  ;;  %v22758_v15 = vld [vmem:[#allocation28_spill] sm:$0xff]  ;;  %v22759_v16 = vld [vmem:[#allocation26_spill] sm:$0xff] }
 0x77c   : > { %v17478_v32 = vpop.f32.mrf.mxu1  ;;  %v13447_v57 = vadd.s32 8, %v22554_v43  ;;  %v13029_v12 = vadd.f32 %v12986_v13, %v12752_v25  ;;  %vm22586_vm8 = vcmp.lt.s32.totalorder %v13455_v55, 5  ;;  %v13448_v55 = vadd.s32 16, %v22554_v43 }
 0x77d   : > { %v13386_v29 = vmax.f32 %v13342_v56, %v13344_v21  ;;  %v13325_v39 = vadd.f32 %v22514_v2, %v13298_v4  ;;  %v13301_v11 = vadd.f32 %v17478_v32, %v13024_v3  ;;  %v13347_v34 = vmax.f32 %v13327_v24, 0.0  ;;  %v22744_v3 = vld [vmem:[#allocation18_spill] sm:$0xff]  ;;  %v22745_v21 = vld [vmem:[#allocation24_spill] sm:$0xff] }
 0x77e   : > { %v13234_v51 = vpop.f32.mrf.mxu1  ;;  %v12755_v44 = vadd.f32 %v22743_v37, %v12478_v58  ;;  %v12476_v56 = vadd.f32 %v22745_v21, %v22744_v3  ;;  %v13031_v4 = vadd.f32 %v22530_v63, %v12754_v48  ;;  %v12480_v58 = vadd.f32 %v22759_v16, %v22758_v15 }
 0x77f   : > { %13388 = vst [vmem:[#allocation9 + $0x8] sm:$0xff] %v13386_v29  ;;  %v13345_v38 = vmax.f32 %v13325_v39, 0.0  ;;  %v13328_v19 = vadd.f32 %v22514_v2, %v13301_v11  ;;  %v13299_v45 = vadd.f32 %v13234_v51, %v13022_v9  ;;  %v17453_v29 = vpop.f32.mrf.mxu0  ;;  %v22746_v39 = vld [vmem:[#allocation13_spill] sm:$0xff]  ;;  %v22747_v11 = vld [vmem:[#allocation14_spill] sm:$0xff]  ;;  %v13462_v51 = vand.u32 7, %v13447_v57 }
 0x780   : > { %v17481_v60 = vpop.f32.mrf.mxu1  ;;  %v12481_v9 = vadd.f32 %v22747_v11, %v22746_v39  ;;  %v13032_v46 = vadd.f32 %v17450_v52, %v12755_v44  ;;  %v13450_v23 = vadd.s32 32, %v22554_v43 }
 0x781   : > { %v13393_v22 = vmax.f32 %v13345_v38, %v13347_v34  ;;  %v13326_v31 = vadd.f32 %v22514_v2, %v13299_v45  ;;  %v13304_v35 = vadd.f32 %v17481_v60, %v13027_v33  ;;  %v13348_v0 = vmax.f32 %v13328_v19, 0.0  ;;  %v22748_v33 = vld [vmem:[#allocation33_spill] sm:$0xff]  ;;  %v22749_v45 = vld [vmem:[#allocation34_spill] sm:$0xff]  ;;  %v13002_v7 = vpop.f32.mrf.mxu0 }
 0x782   : > { %v13247_v47 = vpop.f32.mrf.mxu1  ;;  %v12753_v34 = vadd.f32 %v22748_v33, %v12476_v56  ;;  %v12758_v50 = vadd.f32 %v22749_v45, %v12481_v9  ;;  %v22751_v60 = vld [vmem:[#allocation17_spill] sm:$0xff]  ;;  %vm22590_vm9 = vcmp.lt.s32.totalorder %v13462_v51, 5  ;;  %v13449_v51 = vadd.s32 24, %v22554_v43 }
 0x783   : > { %13395 = vst [vmem:[#allocation9 + $0x10] sm:$0xff] %v13393_v22  ;;  %v13346_v6 = vmax.f32 %v13326_v31, 0.0  ;;  %v13331_v36 = vadd.f32 %v22514_v2, %v13304_v35  ;;  %v13302_v28 = vadd.f32 %v13247_v47, %v13025_v40  ;;  %v12479_v40 = vadd.f32 %v22751_v60, %v22750_v61  ;;  %v17454_v21 = vpop.f32.mrf.mxu0  ;;  %vm14477_vm10 = vmpackc.low %vm22590_vm9, %vm22586_vm8 }
 0x784   : > { %v17482_v5 = vpop.f32.mrf.mxu1 }
 0x785   : > { %v13394_v17 = vmax.f32 %v13346_v6, %v13348_v0  ;;  %v13329_v8 = vadd.f32 %v22514_v2, %v13302_v28  ;;  %v13305_v42 = vadd.f32 %v17482_v5, %v13028_v18  ;;  %v13351_v20 = vmax.f32 %v13331_v36, 0.0 }
 0x786   : > { %v13250_v24 = vpop.f32.mrf.mxu1  ;;  %v12756_v48 = vadd.f32 %v22489_v62, %v12479_v40  ;;  %v13030_v28 = vadd.f32 %v12989_v49, %v12753_v34  ;;  %v13421_v14 = vld [vmem:[#allocation9] ss:$2 sm:$0xff]  ;;  %v13431_v25 = vld [vmem:[#allocation9 + $0x1] ss:$2 sm:$0xff]  ;;  %v12759_v62 = vadd.f32 %v22498_v26, %v12482_v30  ;;  %v12757_v26 = vadd.f32 %v22503_v1, %v12480_v58 }
 0x787   : > { %13396 = vst [vmem:[#allocation9 + $0x18] sm:$0xff] %v13394_v17  ;;  %v13349_v53 = vmax.f32 %v13329_v8, 0.0  ;;  %v13332_v32 = vadd.f32 %v22514_v2, %v13305_v42  ;;  %v13303_v41 = vadd.f32 %v13250_v24, %v13026_v27  ;;  %v13035_v17 = vadd.f32 %v17453_v29, %v12758_v50 }
 0x788   : > { %v17485_v59 = vpop.f32.mrf.mxu1  ;;  %v13033_v56 = vadd.f32 %v13002_v7, %v12756_v48  ;;  %v13440_v24 = vmax.f32 %v13421_v14, %v13431_v25  ;;  %v13036_v29 = vadd.f32 %v17454_v21, %v12759_v62 }
 0x789   : > { %v13401_v38 = vmax.f32 %v13349_v53, %v13351_v20  ;;  %v13330_v63 = vadd.f32 %v22514_v2, %v13303_v41  ;;  %v13308_v19 = vadd.f32 %v17485_v59, %v13031_v4  ;;  %v13352_v22 = vmax.f32 %v13332_v32, 0.0 }
 0x78a   : > { %v13263_v54 = vpop.f32.mrf.mxu1 }
 0x78b   : > { %13403 = vst [vmem:[#allocation9 + $0x20] sm:$0xff] %v13401_v38  ;;  %v13350_v31 = vmax.f32 %v13330_v63, 0.0  ;;  %v13335_v13 = vadd.f32 %v22514_v2, %v13308_v19  ;;  %v13306_v35 = vadd.f32 %v13263_v54, %v13029_v12  ;;  %v13005_v12 = vpop.f32.mrf.mxu0  ;;  %v22760_v19 = vld [vmem:[#allocation20_spill] sm:$0xff] }
 0x78c   : > { %v17486_v47 = vpop.f32.mrf.mxu1  ;;  %v13034_v63 = vadd.f32 %v13005_v12, %v12757_v26 }
 0x78d   : > { %v13402_v52 = vmax.f32 %v13350_v31, %v13352_v22  ;;  %v13333_v6 = vadd.f32 %v22514_v2, %v13306_v35  ;;  %v13309_v36 = vadd.f32 %v17486_v47, %v13032_v46  ;;  %v13355_v5 = vmax.f32 %v13335_v13, 0.0 }
 0x78e   : > { %v13266_v57 = vpop.f32.mrf.mxu1  ;;  %v13423_v8 = vld [vmem:[#allocation9 + $0x10] ss:$2 sm:$0xff]  ;;  %v13433_v42 = vld [vmem:[#allocation9 + $0x11] ss:$2 sm:$0xff]  ;;  %v13469_v22 = vand.u32 7, %v13448_v55  ;;  %v13476_v31 = vand.u32 7, %v13449_v51 }
 0x78f   : > { %13404 = vst [vmem:[#allocation9 + $0x28] sm:$0xff] %v13402_v52  ;;  %v13353_v27 = vmax.f32 %v13333_v6, 0.0  ;;  %v13336_v37 = vadd.f32 %v22514_v2, %v13309_v36  ;;  %v13307_v44 = vadd.f32 %v13266_v57, %v13030_v28  ;;  %v13441_v3 = vmax.f32 %v13423_v8, %v13433_v42 }
 0x790   : > { %v17489_v49 = vpop.f32.mrf.mxu1  ;;  %vm13513_vm11 = vcmp.lt.s32.totalorder %v13469_v22, 5  ;;  %vm13514_vm12 = vcmp.lt.s32.totalorder %v13476_v31, 5 }
 0x791   : > { %v13409_v4 = vmax.f32 %v13353_v27, %v13355_v5  ;;  %v13334_v20 = vadd.f32 %v22514_v2, %v13307_v44  ;;  %v13312_v53 = vadd.f32 %v17489_v49, %v13035_v17  ;;  %v14478_v41 = vpack.c.bf16 %v13441_v3, %v13440_v24  ;;  %vm14480_vm13 = vmpackc.low %vm13514_vm12, %vm13513_vm11 }
 0x792   : > { %v13279_v32 = vpop.f32.mrf.mxu1  ;;  %v13356_v39 = vmax.f32 %v13336_v37, 0.0 }
 0x793   : > { %13411 = vst [vmem:[#allocation9 + $0x30] sm:$0xff] %v13409_v4  ;;  %v13354_v11 = vmax.f32 %v13334_v20, 0.0  ;;  %v13339_v9 = vadd.f32 %v22514_v2, %v13312_v53  ;;  %v13310_v59 = vadd.f32 %v13279_v32, %v13033_v56  ;;  %17508 = vmatmul.mubr.msk.bf16.vlgmr.msra.gmra.mxu0 %vm14477_vm10, %v14478_v41  ;;  %v13654_v20 = vld [vmem:[%s22661_s8] sm:$0x1] }
 0x794   : > { %v17490_v1 = vpop.f32.mrf.mxu1  ;;  %17511 = vmatprep.mubr.msk.bf16.mxu0 %vm18804_vm0, %v22760_v19 }
 0x795   : > { %v13410_v33 = vmax.f32 %v13354_v11, %v13356_v39  ;;  %v13337_v34 = vadd.f32 %v22514_v2, %v13310_v59  ;;  %v13313_v38 = vadd.f32 %v17490_v1, %v13036_v29  ;;  %v13359_v50 = vmax.f32 %v13339_v9, 0.0 }
 0x796   : > { %v13282_v45 = vpop.f32.mrf.mxu1  ;;  %v13425_v7 = vld [vmem:[#allocation9 + $0x20] ss:$2 sm:$0xff]  ;;  %v13435_v48 = vld [vmem:[#allocation9 + $0x21] ss:$2 sm:$0xff] }
 0x797   : > { %13412 = vst [vmem:[#allocation9 + $0x38] sm:$0xff] %v13410_v33  ;;  %v13357_v61 = vmax.f32 %v13337_v34, 0.0  ;;  %v13340_v60 = vadd.f32 %v22514_v2, %v13313_v38  ;;  %v13311_v40 = vadd.f32 %v13282_v45, %v13034_v63  ;;  %v13442_v18 = vmax.f32 %v13425_v7, %v13435_v48 }
 0x799   : > { %v13417_v54 = vmax.f32 %v13357_v61, %v13359_v50  ;;  %v13338_v46 = vadd.f32 %v22514_v2, %v13311_v40  ;;  %v13360_v13 = vmax.f32 %v13340_v60, 0.0  ;;  %v13483_v2 = vand.u32 7, %v13450_v23 }
 0x79b   : > { %13419 = vst [vmem:[#allocation9 + $0x40] sm:$0xff] %v13417_v54  ;;  %v13358_v35 = vmax.f32 %v13338_v46, 0.0  ;;  %vm13515_vm14 = vcmp.lt.s32.totalorder %v13483_v2, 5 }
 0x79c   : > { %vm14483_vm15 = vmpackc.low %vm13515_vm14, %vm13515_vm14 }
 0x79d   : > { %v13418_v10 = vmax.f32 %v13358_v35, %v13360_v13 }
 0x79e   : > { %v13427_v30 = vld [vmem:[#allocation9 + $0x30] ss:$2 sm:$0xff]  ;;  %v13437_v47 = vld [vmem:[#allocation9 + $0x31] ss:$2 sm:$0xff] }
 0x79f   : > { %13420 = vst [vmem:[#allocation9 + $0x48] sm:$0xff] %v13418_v10  ;;  %v13443_v0 = vmax.f32 %v13427_v30, %v13437_v47 }
 0x7a1   : > { %v14481_v52 = vpack.c.bf16 %v13443_v0, %v13442_v18 }
 0x7a3   : > { %17512 = vmatmul.mubr.msk.bf16.gmra.mxu0 %vm14480_vm13, %v14481_v52 }
 0x7a4   : > { %17515 = vmatprep.mubr.msk.bf16.mxu0 %vm18804_vm0, %v22760_v19 }
 0x7a6   : > { %v13429_v6 = vld [vmem:[#allocation9 + $0x40] ss:$2 sm:$0xff]  ;;  %v13439_v36 = vld [vmem:[#allocation9 + $0x41] ss:$2 sm:$0xff] }
 0x7a7   : > { %v13444_v28 = vmax.f32 %v13429_v6, %v13439_v36 }
 0x7a9   : > { %v14484_v14 = vpack.c.bf16 %v13444_v28, %v13444_v28 }
 0x7ab   : > { %17516 = vmatmul.mubr.msk.bf16.gmra.mxu0 %vm14483_vm15, %v14484_v14 }
 0x853   : > { %v13622_v43 = vpop.f32.mrf.mxu0 }
 0x855   : > { %v17509_v25 = vpop.f32.mrf.mxu0 }
 0x857   : > { %v13625_v62 = vpop.f32.mrf.mxu0 }
 0x858   : > { %v13644_v5 = vadd.f32 %v13625_v62, %v13622_v43 }
 0x859   : > { %v17510_v15 = vpop.f32.mrf.mxu0 }
 0x863   : > { %v13630_v16 = vpop.f32.mrf.mxu0 }
 0x864   : > { %v13645_v17 = vadd.f32 %v13644_v5, %v13630_v16 }
 0x865   : > { %v17513_v58 = vpop.f32.mrf.mxu0 }
 0x867   : > { %v13633_v57 = vpop.f32.mrf.mxu0 }
 0x868   : > { %v13646_v42 = vadd.f32 %v13645_v17, %v13633_v57 }
 0x869   : > { %v17514_v8 = vpop.f32.mrf.mxu0 }
 0x86b   : > { %v13638_v27 = vpop.f32.mrf.mxu0 }
 0x86c   : > { %v13647_v37 = vadd.f32 %v13646_v42, %v13638_v27 }
 0x86d   : > { %v17517_v44 = vpop.f32.mrf.mxu0 }
 0x86e   : > { %v13648_v3 = vrot.slane %v13647_v37, 4 }
 0x86f   : > { %v13641_v21 = vpop.f32.mrf.mxu0 }
 0x870   : > { %v13649_v49 = vadd.f32 %v13648_v3, %v13647_v37 }
 0x871   : > { %v17518_v56 = vpop.f32.mrf.mxu0 }
 0x872   : > { %v13650_v24 = vrot.slane %v13649_v49, 2 }
 0x874   : > { %v13651_v26 = vadd.f32 %v13650_v24, %v13649_v49 }
 0x876   : > { %v13652_v4 = vrot.slane %v13651_v26, 1 }
 0x878   : > { %v13653_v53 = vadd.f32 %v13652_v4, %v13651_v26 }
 0x87a   : > { %v13655_v32 = vadd.f32 %v13654_v20, %v13653_v53 }
 0x87c   : > { %13656 = vst [vmem:[%s324_s26] sm:$0x1] %v13655_v32 }
 0x87d   : > { %18754 = shalt.err (!%p18751_p3)
}
 0x87e   : > { %s18755_s29 = scalar_lea.hbm %s13668_s17, 16  ;;  %s18759_s26 = scalar_lea.hbm %s22662_s9, 32 }
 0x87f   : > { %p18756_p4 = scmp.ne.s32.totalorder %s13668_s17, %s18755_s29  ;;  %p18760_p9 = scmp.lt.s32.totalorder %s13668_s17, %s22662_s9 }
 0x880   : > { %p18761_p10 = scmp.lt.s32.totalorder %s18759_s26, %s18755_s29 }
 0x881   : > { %p18757_p7 = pnand %p18756_p4, %p18897_p5 }
 0x882   : > { %p18762_p11 = por %p18761_p10, %p18760_p9 }
 0x883   : > { %p18758_p8 = pneg %p18757_p7 }
 0x885   : > { %p18763_p12 = pnand %p18762_p11, %p18758_p8 }
 0x887   : > { %18766 = shalt.err (!%p18763_p12)
}
 0x888   : > { %17519 = dma.vmem_to_hbm [thread:$0]  (%p18897_p5), %s13671_s27, 16, %s13668_s17, %s13658_s21  }
 0x889 PF: > { %p17525_p13 = scmp.ge.s32.totalorder %s18801_s12, 2  ;;  %s13682_s23 = sand.u32 1, %s18789_s30  }
 0x88a   : > { %s13683_s24 = scalar_lea.sflag [#allocation11], %s13682_s23 }
 0x88b   : > { %p17522_p0 = pnand %p17525_p13, %p18901_p6 }
 0x88d   : > { %p17523_p1 = pneg %p17522_p0 }
 0x88f   : > { %18784 = dma.done.wait (%p17523_p1), %s13683_s24, 16  }
 0x890   : > { %18786 = vsyncadd (%p17523_p1), %s13683_s24, 4294967280  ;;  %p19_p2 = scmp.ge.s32.totalorder %s18884_s15, 4   ;;  %s22761_s30 = smov %s18793_s10 }
 0x891   : > { %s22762_s10 = smov %s18797_s11  ;;  %s22763_s11 = smov %s18895_s18 }
 0x892   : > { %s22764_s12 = smov %s18884_s15  ;;  %21 = sbr.rel (!%p19_p2) target bundleno = 3 (0x3), region = 147 }
 0x897   :  { %13687 = vsyncpa [#allocation11], 1 }
 0x898   :  { %13689 = vsyncpa [#allocation11 + $0x1], 1 }

</bundles_post_ra>
